<compile_context>
chip_gen: v6e
topology: v6e:2x2x1
jax: 0.10.0
libtpu: 0.0.40
codegen_flags: <defaults>
</compile_context>

<pallas_src>
import jax
import jax.numpy as jnp
from jax import lax
from jax.experimental import pallas as pl
from jax.experimental.pallas import tpu as pltpu


# ---------------------------- Pallas kernels ----------------------------

def _matmul_bias_kernel(x_ref, w_ref, b_ref, o_ref):
    # bf16 x bf16 -> f32 on the MXU; bias add in f32 on the VPU; store in
    # o_ref.dtype (bf16 for conv layers).
    acc = jnp.dot(x_ref[...], w_ref[...], preferred_element_type=jnp.float32)
    o_ref[...] = (acc + b_ref[...]).astype(o_ref.dtype)


def _pick_tm(M):
    """At most 2 M-blocks.

    Full-M when small (single grid step); otherwise two balanced, 8-row-aligned
    blocks: one per TensorCore on v7x megacore, two cheap (~0.35 us) serial
    steps on single-TC v5e/v6e.  For this net the largest case is conv1 with
    M = B*47*47 = 4418 -> tm = 2216, ~4.5 MB total VMEM with double buffering,
    well under every generation's scoped-VMEM default.
    """
    if M <= 2048:
        return M
    return (((M + 1) // 2) + 7) // 8 * 8


def matmul_bias(x, w, b, out_dtype=jnp.bfloat16):
    """(M, K) bf16 @ (K, N) bf16 + (1, N) f32 -> (M, N) out_dtype.

    Weights/bias blocks are resident (index_map -> (0, 0)); M is tiled over a
    1-D 'parallel' grid; the ragged final block is handled by Pallas masked
    writes (no host-side pad/slice copies).
    """
    M, K = x.shape
    N = w.shape[1]
    tm = _pick_tm(M)
    return pl.pallas_call(
        _matmul_bias_kernel,
        out_shape=jax.ShapeDtypeStruct((M, N), out_dtype),
        grid=(pl.cdiv(M, tm),),
        in_specs=[
            pl.BlockSpec((tm, K), lambda i: (i, 0)),
            pl.BlockSpec((K, N), lambda i: (0, 0)),
            pl.BlockSpec((1, N), lambda i: (0, 0)),
        ],
        out_specs=pl.BlockSpec((tm, N), lambda i: (i, 0)),
        compiler_params=pltpu.CompilerParams(
            dimension_semantics=("parallel",)),
    )(x, w, b)


def _mlp_kernel(x_ref, w1_ref, b1_ref, w2_ref, b2_ref, w3_ref, b3_ref, o_ref):
    def lrelu(v):  # nn.LeakyReLU default negative_slope = 0.01
        return jnp.where(v >= 0.0, v, 0.01 * v)

    h = jnp.dot(x_ref[...], w1_ref[...],
                preferred_element_type=jnp.float32) + b1_ref[...]
    h = lrelu(h)
    # Dropout(p=0.5): identity in eval mode
    h = jnp.dot(h.astype(jnp.bfloat16), w2_ref[...],
                preferred_element_type=jnp.float32) + b2_ref[...]
    h = lrelu(h)
    # Dropout(p=0.3): identity in eval mode
    o_ref[...] = (jnp.dot(h.astype(jnp.bfloat16), w3_ref[...],
                          preferred_element_type=jnp.float32)
                  + b3_ref[...]).astype(o_ref.dtype)


def classifier(x, fc_params):
    """Fused Linear->LeakyReLU->Linear->LeakyReLU->Linear.  x: (M, 384) bf16."""
    (w1, b1), (w2, b2), (w3, b3) = fc_params
    M, K = x.shape
    N = w3.shape[1]
    tm = _pick_tm(M)
    args = (x, w1, b1, w2, b2, w3, b3)
    in_specs = [pl.BlockSpec((tm, K), lambda i: (i, 0))]
    in_specs += [pl.BlockSpec(a.shape, lambda i: (0, 0)) for a in args[1:]]
    return pl.pallas_call(
        _mlp_kernel,
        out_shape=jax.ShapeDtypeStruct((M, N), jnp.float32),
        grid=(pl.cdiv(M, tm),),
        in_specs=in_specs,
        out_specs=pl.BlockSpec((tm, N), lambda i: (i, 0)),
        compiler_params=pltpu.CompilerParams(
            dimension_semantics=("parallel",)),
    )(*args)


# ------------------------------ glue (JAX) -------------------------------

def _im2col_nhwc(x, k, stride, pad):
    """x: (B, H, W, C) bf16 -> patches (B*OH*OW, k*k*C) bf16, order (ki, kj, c).

    Channels-last concat of strided slices, built directly in bf16 so the only
    extra HBM traffic is the bf16 slab itself (no f32 intermediate, no cast
    pass); XLA fuses the pad + slices + concat into a single slab-producing
    fusion.
    """
    B, H, W, C = x.shape
    xp = jnp.pad(x, ((0, 0), (pad, pad), (pad, pad), (0, 0)))
    Hp, Wp = H + 2 * pad, W + 2 * pad
    OH = (Hp - k) // stride + 1
    OW = (Wp - k) // stride + 1
    cols = []
    for ki in range(k):
        for kj in range(k):
            cols.append(xp[:,
                           ki:ki + stride * (OH - 1) + 1:stride,
                           kj:kj + stride * (OW - 1) + 1:stride,
                           :])
    patches = jnp.concatenate(cols, axis=-1)           # (B, OH, OW, k*k*C)
    return patches.reshape(B * OH * OW, k * k * C), OH, OW


def conv2d_nhwc(x, wmat, b, k, stride, pad):
    """x: (B, H, W, C) bf16, wmat: (k*k*C, OC) bf16, b: (1, OC) f32
    -> (B, OH, OW, OC) bf16."""
    B = x.shape[0]
    patches, OH, OW = _im2col_nhwc(x, k, stride, pad)
    out = matmul_bias(patches, wmat, b, out_dtype=jnp.bfloat16)
    return out.reshape(B, OH, OW, -1)


def maxpool2d_nhwc(x, k, s):
    # Kept in XLA per perf review: reduce_window avoids the k^2 HBM slab
    # duplication and fuses with the surrounding reshapes.  Init value is
    # dtype-matched (bf16) to avoid an implicit f32 upcast.
    return lax.reduce_window(x, jnp.array(-jnp.inf, dtype=x.dtype), lax.max,
                             window_dimensions=(1, k, k, 1),
                             window_strides=(1, s, s, 1),
                             padding="VALID")


# ------------------------- parameters & forward ---------------------------

def init_params(key):
    def layer(k, fan_in, w_shape, b_shape):
        kw, kb = jax.random.split(k)
        bound = 1.0 / (fan_in ** 0.5)
        w = jax.random.uniform(kw, w_shape, jnp.float32, -bound, bound)
        b = jax.random.uniform(kb, b_shape, jnp.float32, -bound, bound)
        return w, b

    keys = jax.random.split(key, 6)
    conv1 = layer(keys[0], 3 * 10 * 10, (96, 3, 10, 10), (96,))
    conv2 = layer(keys[1], 96 * 5 * 5, (256, 96, 5, 5), (256,))
    conv3 = layer(keys[2], 256 * 3 * 3, (384, 256, 3, 3), (384,))
    fc1 = layer(keys[3], 384, (384, 256), (256,))      # stored as (in, out)
    fc2 = layer(keys[4], 256, (256, 128), (128,))
    fc3 = layer(keys[5], 128, (128, 2), (2,))
    return conv1, conv2, conv3, fc1, fc2, fc3


def prepare_params(raw):
    """One-time layout + dtype transforms (done once at init, never per forward):
      * conv weights (OC, C, KH, KW) -> (KH*KW*C, OC) matching the (ki, kj, c)
        NHWC patch ordering;
      * conv1 OC zero-padded 96 -> 128 (lane-dense stores); conv2 gets matching
        zero input-channel rows so the padding is a no-op;
      * all matmul weights stored in bf16, all biases stored as (1, N) f32.
    """
    (c1w, c1b), (c2w, c2b), (c3w, c3b), fc1, fc2, fc3 = raw

    def to_mat(w):
        OC, C, KH, KW = w.shape
        return w.transpose(2, 3, 1, 0).reshape(KH * KW * C, OC)

    def prep(wmat, b):
        return wmat.astype(jnp.bfloat16), b.reshape(1, -1).astype(jnp.float32)

    w1 = jnp.pad(to_mat(c1w), ((0, 0), (0, 128 - 96)))          # (300, 128)
    b1 = jnp.pad(c1b, (0, 128 - 96))                            # (128,)

    w2 = c2w.transpose(2, 3, 1, 0)                              # (5,5,96,256)
    w2 = jnp.pad(w2, ((0, 0), (0, 0), (0, 128 - 96), (0, 0)))
    w2 = w2.reshape(5 * 5 * 128, 256)                           # (3200, 256)

    w3 = to_mat(c3w)                                            # (2304, 384)

    return (prep(w1, b1), prep(w2, c2b), prep(w3, c3b),
            prep(*fc1), prep(*fc2), prep(*fc3))


def neuronal_network_forward(x_nchw, params):
    (w1, b1), (w2, b2), (w3, b3), fc1, fc2, fc3 = params
    # NHWC + bf16 end-to-end: one transpose/cast at the boundary, none between
    # layers.  (No nonlinearity between conv and pool, matching the reference.)
    x = jnp.transpose(x_nchw, (0, 2, 3, 1)).astype(jnp.bfloat16)  # (B,192,192,3)
    x = conv2d_nhwc(x, w1, b1, k=10, stride=4, pad=1)   # (B, 47, 47, 128) bf16
    x = maxpool2d_nhwc(x, 5, 3)                         # (B, 15, 15, 128)
    x = conv2d_nhwc(x, w2, b2, k=5, stride=2, pad=1)    # (B, 7, 7, 256)
    x = maxpool2d_nhwc(x, 3, 2)                         # (B, 3, 3, 256)
    x = conv2d_nhwc(x, w3, b3, k=3, stride=2, pad=1)    # (B, 2, 2, 384)
    x = maxpool2d_nhwc(x, 2, 1)                         # (B, 1, 1, 384)
    x = x.reshape(-1, 384)                              # == x.view(-1, 384)
    return classifier(x, (fc1, fc2, fc3))               # (B, 2) f32 logits


if __name__ == "__main__":
    key = jax.random.PRNGKey(0)
    pkey, xkey = jax.random.split(key)
    params = prepare_params(init_params(pkey))
    # (2, 3, 192, 192) is the smallest input for which the feature extractor
    # produces a 1x1 spatial map, as required by x.view(-1, 384).
    x = jax.random.normal(xkey, (2, 3, 192, 192), jnp.float32)
    out = jax.jit(neuronal_network_forward)(x, params)
    out = jax.block_until_ready(out)
    assert out.shape == (2, 2) and out.dtype == jnp.float32
    print("KERNEL_OK")
</pallas_src>

<mosaic_0001>
module attributes {stable_mosaic.version = 11 : i64} {
  func.func @_matmul_bias_kernel(%arg0: i32, %arg1: memref<2216x300xbf16, #tpu.memory_space<vmem>>, %arg2: memref<300x128xbf16, #tpu.memory_space<vmem>>, %arg3: memref<1x128xf32, #tpu.memory_space<vmem>>, %arg4: memref<2216x128xbf16, #tpu.memory_space<vmem>>) attributes {dimension_semantics = [#tpu.dimension_semantics<parallel>], iteration_bounds = array<i64: 2>, scalar_prefetch = 0 : i64, scratch_operands = 0 : i64, tpu.core_type = #tpu.core_type<tc>, window_params = [{transform_indices = @transform_0, window_bounds = array<i64: 2216, 300>}, {pipeline_mode = #tpu.pipeline_mode<synchronous>, transform_indices = @transform_1, window_bounds = array<i64: 300, 128>}, {pipeline_mode = #tpu.pipeline_mode<synchronous>, transform_indices = @transform_2, window_bounds = array<i64: 1, 128>}, {transform_indices = @transform_3, window_bounds = array<i64: 2216, 128>}]} {
    %c0 = arith.constant 0 : index
    %c0_0 = arith.constant 0 : index
    %0 = vector.load %arg1[%c0, %c0_0] : memref<2216x300xbf16, #tpu.memory_space<vmem>>, vector<2216x300xbf16>
    %c0_1 = arith.constant 0 : index
    %c0_2 = arith.constant 0 : index
    %1 = vector.load %arg2[%c0_1, %c0_2] : memref<300x128xbf16, #tpu.memory_space<vmem>>, vector<300x128xbf16>
    %cst = arith.constant dense<0.000000e+00> : vector<2216x128xf32>
    %2 = tpu.matmul %0, %1, %cst {dimension_numbers = #tpu.dot_dimension_numbers<[1], [0], [0], [1], [0, 0, 1, 1], [], []>} : vector<2216x300xbf16>, vector<300x128xbf16>, vector<2216x128xf32> -> vector<2216x128xf32>
    %c0_3 = arith.constant 0 : index
    %c0_4 = arith.constant 0 : index
    %3 = vector.load %arg3[%c0_3, %c0_4] : memref<1x128xf32, #tpu.memory_space<vmem>>, vector<1x128xf32>
    %4 = vector.broadcast %3 : vector<1x128xf32> to vector<2216x128xf32>
    %5 = arith.addf %2, %4 : vector<2216x128xf32>
    %6 = arith.truncf %5 : vector<2216x128xf32> to vector<2216x128xbf16>
    %c0_5 = arith.constant 0 : index
    %c0_6 = arith.constant 0 : index
    %7 = vector.load %arg4[%c0_5, %c0_6] : memref<2216x128xbf16, #tpu.memory_space<vmem>>, vector<2216x128xbf16>
    tpu.vector_store %arg4[%c0_5, %c0_6], %6 {strides = array<i32>} : memref<2216x128xbf16, #tpu.memory_space<vmem>>, vector<2216x128xbf16>,
    return
  }
  func.func @transform_0(%arg0: i32) -> (i32, i32) {
    %c0_i32 = arith.constant 0 : i32
    %c0_i32_0 = arith.constant 0 : i32
    return %arg0, %c0_i32 : i32, i32
  }
  func.func @transform_1(%arg0: i32) -> (i32, i32) {
    %c0_i32 = arith.constant 0 : i32
    %c0_i32_0 = arith.constant 0 : i32
    %c0_i32_1 = arith.constant 0 : i32
    return %c0_i32, %c0_i32_0 : i32, i32
  }
  func.func @transform_2(%arg0: i32) -> (i32, i32) {
    %c0_i32 = arith.constant 0 : i32
    %c0_i32_0 = arith.constant 0 : i32
    %c0_i32_1 = arith.constant 0 : i32
    return %c0_i32, %c0_i32_0 : i32, i32
  }
  func.func @transform_3(%arg0: i32) -> (i32, i32) {
    %c0_i32 = arith.constant 0 : i32
    %c0_i32_0 = arith.constant 0 : i32
    return %arg0, %c0_i32 : i32, i32
  }
}

module attributes {stable_mosaic.version = 11 : i64} {
  func.func @_matmul_bias_kernel(%arg0: i32, %arg1: memref<98x3200xbf16, #tpu.memory_space<vmem>>, %arg2: memref<3200x256xbf16, #tpu.memory_space<vmem>>, %arg3: memref<1x256xf32, #tpu.memory_space<vmem>>, %arg4: memref<98x256xbf16, #tpu.memory_space<vmem>>) attributes {dimension_semantics = [#tpu.dimension_semantics<parallel>], iteration_bounds = array<i64: 1>, scalar_prefetch = 0 : i64, scratch_operands = 0 : i64, tpu.core_type = #tpu.core_type<tc>, window_params = [{transform_indices = @transform_0, window_bounds = array<i64: 98, 3200>}, {pipeline_mode = #tpu.pipeline_mode<synchronous>, transform_indices = @transform_1, window_bounds = array<i64: 3200, 256>}, {pipeline_mode = #tpu.pipeline_mode<synchronous>, transform_indices = @transform_2, window_bounds = array<i64: 1, 256>}, {transform_indices = @transform_3, window_bounds = array<i64: 98, 256>}]} {
    %c0 = arith.constant 0 : index
    %c0_0 = arith.constant 0 : index
    %0 = vector.load %arg1[%c0, %c0_0] : memref<98x3200xbf16, #tpu.memory_space<vmem>>, vector<98x3200xbf16>
    %c0_1 = arith.constant 0 : index
    %c0_2 = arith.constant 0 : index
    %1 = vector.load %arg2[%c0_1, %c0_2] : memref<3200x256xbf16, #tpu.memory_space<vmem>>, vector<3200x256xbf16>
    %cst = arith.constant dense<0.000000e+00> : vector<98x256xf32>
    %2 = tpu.matmul %0, %1, %cst {dimension_numbers = #tpu.dot_dimension_numbers<[1], [0], [0], [1], [0, 0, 1, 1], [], []>} : vector<98x3200xbf16>, vector<3200x256xbf16>, vector<98x256xf32> -> vector<98x256xf32>
    %c0_3 = arith.constant 0 : index
    %c0_4 = arith.constant 0 : index
    %3 = vector.load %arg3[%c0_3, %c0_4] : memref<1x256xf32, #tpu.memory_space<vmem>>, vector<1x256xf32>
    %4 = vector.broadcast %3 : vector<1x256xf32> to vector<98x256xf32>
    %5 = arith.addf %2, %4 : vector<98x256xf32>
    %6 = arith.truncf %5 : vector<98x256xf32> to vector<98x256xbf16>
    %c0_5 = arith.constant 0 : index
    %c0_6 = arith.constant 0 : index
    %7 = vector.load %arg4[%c0_5, %c0_6] : memref<98x256xbf16, #tpu.memory_space<vmem>>, vector<98x256xbf16>
    tpu.vector_store %arg4[%c0_5, %c0_6], %6 {strides = array<i32>} : memref<98x256xbf16, #tpu.memory_space<vmem>>, vector<98x256xbf16>,
    return
  }
  func.func @transform_0(%arg0: i32) -> (i32, i32) {
    %c0_i32 = arith.constant 0 : i32
    %c0_i32_0 = arith.constant 0 : i32
    return %arg0, %c0_i32 : i32, i32
  }
  func.func @transform_1(%arg0: i32) -> (i32, i32) {
    %c0_i32 = arith.constant 0 : i32
    %c0_i32_0 = arith.constant 0 : i32
    %c0_i32_1 = arith.constant 0 : i32
    return %c0_i32, %c0_i32_0 : i32, i32
  }
  func.func @transform_2(%arg0: i32) -> (i32, i32) {
    %c0_i32 = arith.constant 0 : i32
    %c0_i32_0 = arith.constant 0 : i32
    %c0_i32_1 = arith.constant 0 : i32
    return %c0_i32, %c0_i32_0 : i32, i32
  }
  func.func @transform_3(%arg0: i32) -> (i32, i32) {
    %c0_i32 = arith.constant 0 : i32
    %c0_i32_0 = arith.constant 0 : i32
    return %arg0, %c0_i32 : i32, i32
  }
}

module attributes {stable_mosaic.version = 11 : i64} {
  func.func @_matmul_bias_kernel(%arg0: i32, %arg1: memref<8x2304xbf16, #tpu.memory_space<vmem>>, %arg2: memref<2304x384xbf16, #tpu.memory_space<vmem>>, %arg3: memref<1x384xf32, #tpu.memory_space<vmem>>, %arg4: memref<8x384xbf16, #tpu.memory_space<vmem>>) attributes {dimension_semantics = [#tpu.dimension_semantics<parallel>], iteration_bounds = array<i64: 1>, scalar_prefetch = 0 : i64, scratch_operands = 0 : i64, tpu.core_type = #tpu.core_type<tc>, window_params = [{transform_indices = @transform_0, window_bounds = array<i64: 8, 2304>}, {pipeline_mode = #tpu.pipeline_mode<synchronous>, transform_indices = @transform_1, window_bounds = array<i64: 2304, 384>}, {pipeline_mode = #tpu.pipeline_mode<synchronous>, transform_indices = @transform_2, window_bounds = array<i64: 1, 384>}, {transform_indices = @transform_3, window_bounds = array<i64: 8, 384>}]} {
    %c0 = arith.constant 0 : index
    %c0_0 = arith.constant 0 : index
    %0 = vector.load %arg1[%c0, %c0_0] : memref<8x2304xbf16, #tpu.memory_space<vmem>>, vector<8x2304xbf16>
    %c0_1 = arith.constant 0 : index
    %c0_2 = arith.constant 0 : index
    %1 = vector.load %arg2[%c0_1, %c0_2] : memref<2304x384xbf16, #tpu.memory_space<vmem>>, vector<2304x384xbf16>
    %cst = arith.constant dense<0.000000e+00> : vector<8x384xf32>
    %2 = tpu.matmul %0, %1, %cst {dimension_numbers = #tpu.dot_dimension_numbers<[1], [0], [0], [1], [0, 0, 1, 1], [], []>} : vector<8x2304xbf16>, vector<2304x384xbf16>, vector<8x384xf32> -> vector<8x384xf32>
    %c0_3 = arith.constant 0 : index
    %c0_4 = arith.constant 0 : index
    %3 = vector.load %arg3[%c0_3, %c0_4] : memref<1x384xf32, #tpu.memory_space<vmem>>, vector<1x384xf32>
    %4 = vector.broadcast %3 : vector<1x384xf32> to vector<8x384xf32>
    %5 = arith.addf %2, %4 : vector<8x384xf32>
    %6 = arith.truncf %5 : vector<8x384xf32> to vector<8x384xbf16>
    %c0_5 = arith.constant 0 : index
    %c0_6 = arith.constant 0 : index
    %7 = vector.load %arg4[%c0_5, %c0_6] : memref<8x384xbf16, #tpu.memory_space<vmem>>, vector<8x384xbf16>
    tpu.vector_store %arg4[%c0_5, %c0_6], %6 {strides = array<i32>} : memref<8x384xbf16, #tpu.memory_space<vmem>>, vector<8x384xbf16>,
    return
  }
  func.func @transform_0(%arg0: i32) -> (i32, i32) {
    %c0_i32 = arith.constant 0 : i32
    %c0_i32_0 = arith.constant 0 : i32
    return %arg0, %c0_i32 : i32, i32
  }
  func.func @transform_1(%arg0: i32) -> (i32, i32) {
    %c0_i32 = arith.constant 0 : i32
    %c0_i32_0 = arith.constant 0 : i32
    %c0_i32_1 = arith.constant 0 : i32
    return %c0_i32, %c0_i32_0 : i32, i32
  }
  func.func @transform_2(%arg0: i32) -> (i32, i32) {
    %c0_i32 = arith.constant 0 : i32
    %c0_i32_0 = arith.constant 0 : i32
    %c0_i32_1 = arith.constant 0 : i32
    return %c0_i32, %c0_i32_0 : i32, i32
  }
  func.func @transform_3(%arg0: i32) -> (i32, i32) {
    %c0_i32 = arith.constant 0 : i32
    %c0_i32_0 = arith.constant 0 : i32
    return %arg0, %c0_i32 : i32, i32
  }
}

module attributes {stable_mosaic.version = 11 : i64} {
  func.func @_mlp_kernel(%arg0: i32, %arg1: memref<2x384xbf16, #tpu.memory_space<vmem>>, %arg2: memref<384x256xbf16, #tpu.memory_space<vmem>>, %arg3: memref<1x256xf32, #tpu.memory_space<vmem>>, %arg4: memref<256x128xbf16, #tpu.memory_space<vmem>>, %arg5: memref<1x128xf32, #tpu.memory_space<vmem>>, %arg6: memref<128x2xbf16, #tpu.memory_space<vmem>>, %arg7: memref<1x2xf32, #tpu.memory_space<vmem>>, %arg8: memref<2x2xf32, #tpu.memory_space<vmem>>) attributes {dimension_semantics = [#tpu.dimension_semantics<parallel>], iteration_bounds = array<i64: 1>, scalar_prefetch = 0 : i64, scratch_operands = 0 : i64, tpu.core_type = #tpu.core_type<tc>, window_params = [{transform_indices = @transform_0, window_bounds = array<i64: 2, 384>}, {pipeline_mode = #tpu.pipeline_mode<synchronous>, transform_indices = @transform_1, window_bounds = array<i64: 384, 256>}, {pipeline_mode = #tpu.pipeline_mode<synchronous>, transform_indices = @transform_2, window_bounds = array<i64: 1, 256>}, {pipeline_mode = #tpu.pipeline_mode<synchronous>, transform_indices = @transform_3, window_bounds = array<i64: 256, 128>}, {pipeline_mode = #tpu.pipeline_mode<synchronous>, transform_indices = @transform_4, window_bounds = array<i64: 1, 128>}, {pipeline_mode = #tpu.pipeline_mode<synchronous>, transform_indices = @transform_5, window_bounds = array<i64: 128, 2>}, {pipeline_mode = #tpu.pipeline_mode<synchronous>, transform_indices = @transform_6, window_bounds = array<i64: 1, 2>}, {transform_indices = @transform_7, window_bounds = array<i64: 2, 2>}]} {
    %c0 = arith.constant 0 : index
    %c0_0 = arith.constant 0 : index
    %0 = vector.load %arg1[%c0, %c0_0] : memref<2x384xbf16, #tpu.memory_space<vmem>>, vector<2x384xbf16>
    %c0_1 = arith.constant 0 : index
    %c0_2 = arith.constant 0 : index
    %1 = vector.load %arg2[%c0_1, %c0_2] : memref<384x256xbf16, #tpu.memory_space<vmem>>, vector<384x256xbf16>
    %cst = arith.constant dense<0.000000e+00> : vector<2x256xf32>
    %2 = tpu.matmul %0, %1, %cst {dimension_numbers = #tpu.dot_dimension_numbers<[1], [0], [0], [1], [0, 0, 1, 1], [], []>} : vector<2x384xbf16>, vector<384x256xbf16>, vector<2x256xf32> -> vector<2x256xf32>
    %c0_3 = arith.constant 0 : index
    %c0_4 = arith.constant 0 : index
    %3 = vector.load %arg3[%c0_3, %c0_4] : memref<1x256xf32, #tpu.memory_space<vmem>>, vector<1x256xf32>
    %4 = vector.broadcast %3 : vector<1x256xf32> to vector<2x256xf32>
    %5 = arith.addf %2, %4 : vector<2x256xf32>
    %cst_5 = arith.constant 0.000000e+00 : f32
    %6 = vector.broadcast %cst_5 : f32 to vector<2x256xf32>
    %7 = arith.cmpf oge, %5, %6 : vector<2x256xf32>
    %cst_6 = arith.constant 0.00999999977 : f32
    %8 = vector.broadcast %cst_6 : f32 to vector<2x256xf32>
    %9 = arith.mulf %8, %5 : vector<2x256xf32>
    %10 = arith.select %7, %5, %9 : vector<2x256xi1>, vector<2x256xf32>
    %11 = arith.truncf %10 : vector<2x256xf32> to vector<2x256xbf16>
    %c0_7 = arith.constant 0 : index
    %c0_8 = arith.constant 0 : index
    %12 = vector.load %arg4[%c0_7, %c0_8] : memref<256x128xbf16, #tpu.memory_space<vmem>>, vector<256x128xbf16>
    %cst_9 = arith.constant dense<0.000000e+00> : vector<2x128xf32>
    %13 = tpu.matmul %11, %12, %cst_9 {dimension_numbers = #tpu.dot_dimension_numbers<[1], [0], [0], [1], [0, 0, 1, 1], [], []>} : vector<2x256xbf16>, vector<256x128xbf16>, vector<2x128xf32> -> vector<2x128xf32>
    %c0_10 = arith.constant 0 : index
    %c0_11 = arith.constant 0 : index
    %14 = vector.load %arg5[%c0_10, %c0_11] : memref<1x128xf32, #tpu.memory_space<vmem>>, vector<1x128xf32>
    %15 = vector.broadcast %14 : vector<1x128xf32> to vector<2x128xf32>
    %16 = arith.addf %13, %15 : vector<2x128xf32>
    %cst_12 = arith.constant 0.000000e+00 : f32
    %17 = vector.broadcast %cst_12 : f32 to vector<2x128xf32>
    %18 = arith.cmpf oge, %16, %17 : vector<2x128xf32>
    %cst_13 = arith.constant 0.00999999977 : f32
    %19 = vector.broadcast %cst_13 : f32 to vector<2x128xf32>
    %20 = arith.mulf %19, %16 : vector<2x128xf32>
    %21 = arith.select %18, %16, %20 : vector<2x128xi1>, vector<2x128xf32>
    %22 = arith.truncf %21 : vector<2x128xf32> to vector<2x128xbf16>
    %c0_14 = arith.constant 0 : index
    %c0_15 = arith.constant 0 : index
    %23 = vector.load %arg6[%c0_14, %c0_15] : memref<128x2xbf16, #tpu.memory_space<vmem>>, vector<128x2xbf16>
    %cst_16 = arith.constant dense<0.000000e+00> : vector<2x2xf32>
    %24 = tpu.matmul %22, %23, %cst_16 {dimension_numbers = #tpu.dot_dimension_numbers<[1], [0], [0], [1], [0, 0, 1, 1], [], []>} : vector<2x128xbf16>, vector<128x2xbf16>, vector<2x2xf32> -> vector<2x2xf32>
    %c0_17 = arith.constant 0 : index
    %c0_18 = arith.constant 0 : index
    %25 = vector.load %arg7[%c0_17, %c0_18] : memref<1x2xf32, #tpu.memory_space<vmem>>, vector<1x2xf32>
    %26 = vector.broadcast %25 : vector<1x2xf32> to vector<2x2xf32>
    %27 = arith.addf %24, %26 : vector<2x2xf32>
    %c0_19 = arith.constant 0 : index
    %c0_20 = arith.constant 0 : index
    %28 = vector.load %arg8[%c0_19, %c0_20] : memref<2x2xf32, #tpu.memory_space<vmem>>, vector<2x2xf32>
    tpu.vector_store %arg8[%c0_19, %c0_20], %27 {strides = array<i32>} : memref<2x2xf32, #tpu.memory_space<vmem>>, vector<2x2xf32>,
    return
  }
  func.func @transform_0(%arg0: i32) -> (i32, i32) {
    %c0_i32 = arith.constant 0 : i32
    %c0_i32_0 = arith.constant 0 : i32
    return %arg0, %c0_i32 : i32, i32
  }
  func.func @transform_1(%arg0: i32) -> (i32, i32) {
    %c0_i32 = arith.constant 0 : i32
    %c0_i32_0 = arith.constant 0 : i32
    %c0_i32_1 = arith.constant 0 : i32
    return %c0_i32, %c0_i32_0 : i32, i32
  }
  func.func @transform_2(%arg0: i32) -> (i32, i32) {
    %c0_i32 = arith.constant 0 : i32
    %c0_i32_0 = arith.constant 0 : i32
    %c0_i32_1 = arith.constant 0 : i32
    return %c0_i32, %c0_i32_0 : i32, i32
  }
  func.func @transform_3(%arg0: i32) -> (i32, i32) {
    %c0_i32 = arith.constant 0 : i32
    %c0_i32_0 = arith.constant 0 : i32
    %c0_i32_1 = arith.constant 0 : i32
    return %c0_i32, %c0_i32_0 : i32, i32
  }
  func.func @transform_4(%arg0: i32) -> (i32, i32) {
    %c0_i32 = arith.constant 0 : i32
    %c0_i32_0 = arith.constant 0 : i32
    %c0_i32_1 = arith.constant 0 : i32
    return %c0_i32, %c0_i32_0 : i32, i32
  }
  func.func @transform_5(%arg0: i32) -> (i32, i32) {
    %c0_i32 = arith.constant 0 : i32
    %c0_i32_0 = arith.constant 0 : i32
    %c0_i32_1 = arith.constant 0 : i32
    return %c0_i32, %c0_i32_0 : i32, i32
  }
  func.func @transform_6(%arg0: i32) -> (i32, i32) {
    %c0_i32 = arith.constant 0 : i32
    %c0_i32_0 = arith.constant 0 : i32
    %c0_i32_1 = arith.constant 0 : i32
    return %c0_i32, %c0_i32_0 : i32, i32
  }
  func.func @transform_7(%arg0: i32) -> (i32, i32) {
    %c0_i32 = arith.constant 0 : i32
    %c0_i32_0 = arith.constant 0 : i32
    return %arg0, %c0_i32 : i32, i32
  }
}

</mosaic_0001>

<bundles_post_ra>
// kernel: neuronal_network_forward.4
= control target key start
LH: loop header
LB: loop body
LE: loop exit
PB: predicated region body
PF: predicated region fallthrough
CT: control target
= control target key end

     0   :  { %s11024_s12 = smov 0   ;;  %s11026_s13 = smov 0   ;;  %s13442_s0 = inlined_call_operand.vmem [shape: bf16[4418,300], index: 0, kind: input, shape index: {}]   ;;  %s13443_s1 = inlined_call_operand.vmem [shape: bf16[300,128], index: 1, kind: input, shape index: {}]   ;;  %s13444_s2 = inlined_call_operand.vmem [shape: f32[1,128], index: 2, kind: input, shape index: {}]   ;;  %s13445_s3 = inlined_call_operand.vmem [shape: bf16[4418,128], index: 3, kind: output, shape index: {}]  }
   0x1   :  { %s11028_s14 = smov 0  }
   0x2 LB: > { %s11037_s15 = sadd.s32 4294967295, %s10967_s14   ;;  %s11039_s16 = sadd.s32 1, %s10967_s14   ;;  %s10967_s14 = sphi %s11028_s14, %s13452_s14   ;;  %s10963_s13 = sphi %s11026_s13, %s13451_s13   ;;  %s10959_s12 = sphi %s11024_s12, %s13450_s12  }
   0x3   : > { %s85_s17 = ssub.s32 %s10967_s14, %s11039_s16  ;;  %s88_s18 = sadd.s32 1, %s10963_s13 }
   0x4   : > { %p86_p0 = scmp.eq.s32.totalorder %s85_s17, 0  ;;  %p98_p1 = scmp.ne.s32.totalorder %s10963_s13, %s10959_s12 }
   0x5   : > { %p99_p2 = scmp.eq.s32.totalorder %s11037_s15, 1  ;;  %p7560_p3 = scmp.ge.s32.totalorder %s10967_s14, 1 }
   0x6   : > { %s11047_s19 = scalar_select %p86_p0, %s10963_s13, %s88_s18  }
   0x7   : > { %p11049_p4 = por %p99_p2, %p98_p1  ;;  %p149_p5 = scmp.lt.s32.totalorder %s10967_s14, 3 }
   0x9   : > { %p150_p6 = pnand %p7560_p3, %p149_p5 }
   0xa   : > { %s11065_s25 = smul.u32 (!%p150_p6), 277, %s11037_s15 }
   0xb   : > { %153 = sbr.rel (%p150_p6) target bundleno = 1466 (0x5ba), region = 32 }
   0xc   : > { %p184_p7 = scmp.lt.s32.totalorder (!%p150_p6), %s11065_s25, 552 }
  0x10   : > { %v10334_v0 = vld [vmem:[%s13443_s1 + $0x38] sm:$0xff]   ;;  %v11001_v1 = vmov 0   ;;  %v10335_v2 = vld [vmem:[%s13443_s1 + $0x30] sm:$0xff]   ;;  %v11002_v3 = vmov 0.0   ;;  %vm11003_vm0 = vmmov 0   ;;  %v10336_v4 = vld [vmem:[%s13443_s1 + $0x28] sm:$0xff]  }
  0x11   : > { %3415 = vmatprep.subr.bf16.mxu0 %v11001_v1  ;;  %9679 = vmatprep.subr.bf16.mxu1 %v11002_v3  ;;  %s185_s28 = scalar_select %p184_p7, %s11065_s25, 552  ;;  %v10337_v5 = vld [vmem:[%s13443_s1 + $0x20] sm:$0xff]   ;;  %vm3411_vm1 = vcmask 1045504   ;;  %v10346_v6 = vld [vmem:[%s13443_s1 + $0x90] sm:$0x3f]   ;;  %v10338_v7 = vld [vmem:[%s13443_s1 + $0x18] sm:$0xff]  }
  0x12   : > { %3416 = vmatpush1.bf16.msra.mxu0 %v10334_v0  ;;  %9685 = vmatprep.mubr.msk.bf16.mxu1 %vm11003_vm0, %v11002_v3  ;;  %v3413_v8 = vsel %vm3411_vm1, %v10346_v6, 0  ;;  %v10348_v9 = vld [vmem:[%s13443_s1 + $0x88] sm:$0xff]   ;;  %v10339_v10 = vld [vmem:[%s13443_s1 + $0x10] sm:$0xff]   ;;  %v10350_v11 = vld [vmem:[%s13443_s1 + $0x80] sm:$0xff]   ;;  %vm2993_vm2 = vcmask 359424   ;;  %s7097_s14 = ssub.s32 (%p11049_p4), 553, %s11065_s25 }
  0x13   : > { %3417 = vmatprep.subr.bf16.mxu0 %v11001_v1  ;;  %s10242_s6 = smul.u32 12, %s185_s28  ;;  %9680 = vmatpush3.bf16.msra.mxu1 %v3413_v8  ;;  %v10340_v12 = vld [vmem:[%s13443_s1 + $0x8] sm:$0xff]   ;;  %v10341_v15 = vld [vmem:[%s13443_s1] sm:$0xff]   ;;  %v10342_v16 = vld [vmem:[%s13443_s1 + $0x78] sm:$0xff]   ;;  %s175_s28 = sand.u32 1, %s10959_s12  }
  0x14   : > { %9681 = vmatprep.subr.bf16.mxu1 %v11002_v3  ;;  %v10343_v18 = vld [vmem:[%s13443_s1 + $0x70] sm:$0xff]   ;;  %v10344_v19 = vld [vmem:[%s13443_s1 + $0x68] sm:$0xff]   ;;  %v10345_v21 = vld [vmem:[%s13443_s1 + $0x60] sm:$0xff]   ;;  %s10241_s29 = smul.u32 1108, %s175_s28  ;;  %p7098_p8 = scmp.lt.s32.totalorder (%p11049_p4), %s7097_s14, 277 }
  0x15   : > { %s11091_s17 = scalar_lea.vmem %s13442_s0, %s10242_s6  ;;  %v10347_v22 = vld [vmem:[%s13443_s1 + $0x58] sm:$0xff]   ;;  %v10349_v24 = vld [vmem:[%s13443_s1 + $0x50] sm:$0xff]   ;;  %v10351_v25 = vld [vmem:[%s13443_s1 + $0x48] sm:$0xff]   ;;  %s8707_s18 = smul.u32 (%p11049_p4), 1108, %s11037_s15 }
  0x16   : > { %3418 = vmatpush1.bf16.msra.mxu0 %v10335_v2  ;;  %v10356_v13 = vld [vmem:[%s11091_s17 + $0x4] ss:$12 sps:$4 sm:$0xff]   ;;  %v10352_v14 = vld [vmem:[%s11091_s17 + $0x8] ss:$12 sps:$4 sm:$0xff]   ;;  %v10357_v17 = vld [vmem:[%s11091_s17 + $0x20] ss:$12 sps:$4 sm:$0xff]  }
  0x17   : > { %3419 = vmatprep.subr.bf16.mxu0 %v11001_v1  ;;  %9682 = vmatpush3.bf16.msra.mxu1 %v10348_v9  ;;  %v10361_v20 = vld [vmem:[%s11091_s17 + $0x38] ss:$12 sps:$4 sm:$0xff]   ;;  %v10365_v23 = vld [vmem:[%s11091_s17 + $0x50] ss:$12 sps:$4 sm:$0xff]   ;;  %v10369_v26 = vld [vmem:[%s11091_s17 + $0x68] ss:$12 sps:$4 sm:$0xff]   ;;  %s13250_s23 = scalar_lea.vmem (%p11049_p4), %s13445_s3, %s8707_s18  }
  0x18   : > { %9683 = vmatprep.subr.bf16.mxu1 %v11002_v3  ;;  %3447 = vmatprep.mubr.bf16.mxu0 %v10356_v13  ;;  %v10353_v27 = vld [vmem:[%s13443_s1 + $0x40] sm:$0xff]   ;;  %v10358_v29 = vld [vmem:[%s11091_s17 + $0x1c] ss:$12 sps:$4 sm:$0xff]   ;;  %v10366_v35 = vld [vmem:[%s11091_s17 + $0x4c] ss:$12 sps:$4 sm:$0xff]   ;;  %s11354_s12 = scalar_lea.vmem [#allocation2], %s10241_s29  }
  0x19   : > { %v10354_v28 = vld [vmem:[%s11091_s17] ss:$12 sps:$4 sm:$0xff]   ;;  %v10360_v31 = vld [vmem:[%s11091_s17 + $0x18] ss:$12 sps:$4 sm:$0xff]   ;;  %v10364_v34 = vld [vmem:[%s11091_s17 + $0x30] ss:$12 sps:$4 sm:$0xff]  }
  0x1a   : > { %3420 = vmatpush1.bf16.msra.mxu0 %v10336_v4  ;;  %v10373_v30 = vld [vmem:[%s11091_s17 + $0x80] ss:$12 sps:$4 sm:$0xff]   ;;  %v10377_v33 = vld [vmem:[%s11091_s17 + $0x98] ss:$12 sps:$4 sm:$0xff]   ;;  %v10381_v36 = vld [vmem:[%s11091_s17 + $0xb0] ss:$12 sps:$4 sm:$0xff]  }
  0x1b   : > { %3421 = vmatprep.subr.bf16.mxu0 %v11001_v1  ;;  %9684 = vmatpush3.bf16.msra.mxu1 %v10350_v11  ;;  %v10362_v32 = vld [vmem:[%s11091_s17 + $0x34] ss:$12 sps:$4 sm:$0xff]   ;;  %v10370_v38 = vld [vmem:[%s11091_s17 + $0x64] ss:$12 sps:$4 sm:$0xff]   ;;  %v10374_v41 = vld [vmem:[%s11091_s17 + $0x7c] ss:$12 sps:$4 sm:$0xff]  }
  0x1c   : > { %v10368_v37 = vld [vmem:[%s11091_s17 + $0x48] ss:$12 sps:$4 sm:$0xff]   ;;  %v10372_v40 = vld [vmem:[%s11091_s17 + $0x60] ss:$12 sps:$4 sm:$0xff]   ;;  %v10376_v43 = vld [vmem:[%s11091_s17 + $0x78] ss:$12 sps:$4 sm:$0xff]  }
  0x1d   : > { %v10385_v39 = vld [vmem:[%s11091_s17 + $0xc8] ss:$12 sps:$4 sm:$0xff]   ;;  %v10389_v42 = vld [vmem:[%s11091_s17 + $0xe0] ss:$12 sps:$4 sm:$0xff]   ;;  %v10393_v45 = vld [vmem:[%s11091_s17 + $0xf8] ss:$12 sps:$4 sm:$0xff]  }
  0x1e   : > { %3422 = vmatpush1.bf16.msra.mxu0 %v10337_v5  ;;  %9686 = vmatmul.mubr.msk.bf16.vlgmr.msra.gmra.mxu1 %vm2993_vm2, %v10352_v14  ;;  %v10378_v44 = vld [vmem:[%s11091_s17 + $0x94] ss:$12 sps:$4 sm:$0xff]   ;;  %v10380_v46 = vld [vmem:[%s11091_s17 + $0x90] ss:$12 sps:$4 sm:$0xff]   ;;  %v10382_v47 = vld [vmem:[%s11091_s17 + $0xac] ss:$12 sps:$4 sm:$0xff]  }
  0x1f   : > { %3423 = vmatprep.subr.bf16.mxu0 %v11001_v1  ;;  %9689 = vmatprep.mubr.msk.bf16.mxu1 %vm11003_vm0, %v11002_v3  ;;  %v10397_v48 = vld [vmem:[%s11091_s17 + $0x110] ss:$12 sps:$4 sm:$0xff]   ;;  %v10384_v49 = vld [vmem:[%s11091_s17 + $0xa8] ss:$12 sps:$4 sm:$0xff]   ;;  %v10388_v52 = vld [vmem:[%s11091_s17 + $0xc0] ss:$12 sps:$4 sm:$0xff]  }
  0x20   : > { %v10386_v50 = vld [vmem:[%s11091_s17 + $0xc4] ss:$12 sps:$4 sm:$0xff]   ;;  %v10401_v51 = vld [vmem:[%s11091_s17 + $0x128] ss:$12 sps:$4 sm:$0xff]   ;;  %v10405_v54 = vld [vmem:[%s11091_s17 + $0x140] ss:$12 sps:$4 sm:$0xff]  }
  0x21   : > { %v10390_v53 = vld [vmem:[%s11091_s17 + $0xdc] ss:$12 sps:$4 sm:$0xff]   ;;  %v10392_v55 = vld [vmem:[%s11091_s17 + $0xd8] ss:$12 sps:$4 sm:$0xff]   ;;  %v10394_v56 = vld [vmem:[%s11091_s17 + $0xf4] ss:$12 sps:$4 sm:$0xff]  }
  0x22   : > { %3424 = vmatpush1.bf16.msra.mxu0 %v10338_v7  ;;  %v10409_v57 = vld [vmem:[%s11091_s17 + $0x158] ss:$12 sps:$4 sm:$0xff]   ;;  %v10396_v58 = vld [vmem:[%s11091_s17 + $0xf0] ss:$12 sps:$4 sm:$0xff]   ;;  %v10400_v61 = vld [vmem:[%s11091_s17 + $0x108] ss:$12 sps:$4 sm:$0xff]  }
  0x23   : > { %3425 = vmatprep.subr.bf16.mxu0 %v11001_v1  ;;  %v10398_v59 = vld [vmem:[%s11091_s17 + $0x10c] ss:$12 sps:$4 sm:$0xff]   ;;  %v10413_v60 = vld [vmem:[%s11091_s17 + $0x170] ss:$12 sps:$4 sm:$0xff]   ;;  %v10417_v63 = vld [vmem:[%s11091_s17 + $0x188] ss:$12 sps:$4 sm:$0xff]  }
  0x24   : > { %v10402_v62 = vld [vmem:[%s11091_s17 + $0x124] ss:$12 sps:$4 sm:$0xff]   ;;  %v10404_v0 = vld [vmem:[%s11091_s17 + $0x120] ss:$12 sps:$4 sm:$0xff]   ;;  %v10422_v14 = vld [vmem:[%s11091_s17 + $0x19c] ss:$12 sps:$4 sm:$0xff]  }
  0x25   : > { %v10421_v2 = vld [vmem:[%s11091_s17 + $0x1a0] ss:$12 sps:$4 sm:$0xff]   ;;  %v10408_v4 = vld [vmem:[%s11091_s17 + $0x138] ss:$12 sps:$4 sm:$0xff]   ;;  %v10412_v7 = vld [vmem:[%s11091_s17 + $0x150] ss:$12 sps:$4 sm:$0xff]  }
  0x26   : > { %3426 = vmatpush1.bf16.msra.mxu0 %v10339_v10  ;;  %9690 = vmatmul.mubr.msk.bf16.gmra.mxu1 %vm2993_vm2, %v10357_v17  ;;  %v10410_v5 = vld [vmem:[%s11091_s17 + $0x154] ss:$12 sps:$4 sm:$0xff]   ;;  %v10425_v6 = vld [vmem:[%s11091_s17 + $0x1b8] ss:$12 sps:$4 sm:$0xff]   ;;  %v10429_v9 = vld [vmem:[%s11091_s17 + $0x1d0] ss:$12 sps:$4 sm:$0xff]  }
  0x27   : > { %3427 = vmatprep.subr.bf16.mxu0 %v11001_v1  ;;  %9693 = vmatprep.mubr.msk.bf16.mxu1 %vm11003_vm0, %v11002_v3  ;;  %v10414_v8 = vld [vmem:[%s11091_s17 + $0x16c] ss:$12 sps:$4 sm:$0xff]   ;;  %v10416_v10 = vld [vmem:[%s11091_s17 + $0x168] ss:$12 sps:$4 sm:$0xff]   ;;  %v10418_v11 = vld [vmem:[%s11091_s17 + $0x184] ss:$12 sps:$4 sm:$0xff]  }
  0x28   : > { %v10420_v13 = vld [vmem:[%s11091_s17 + $0x180] ss:$12 sps:$4 sm:$0xff]  }
  0x29   : > { %v10426_v17 = vld [vmem:[%s11091_s17 + $0x1b4] ss:$12 sps:$4 sm:$0xff]  }
  0x2a   : > { %3428 = vmatpush1.bf16.msra.mxu0 %v10340_v12  ;;  %v10433_v12 = vld [vmem:[%s11091_s17 + $0x1e8] ss:$12 sps:$4 sm:$0xff]  }
  0x2b   : > { %3429 = vmatprep.subr.bf16.mxu0 %v11001_v1 }
  0x2e   : > { %3430 = vmatpush1.bf16.msra.mxu0 %v10341_v15  ;;  %9694 = vmatmul.mubr.msk.bf16.gmra.mxu1 %vm2993_vm2, %v10361_v20  ;;  %v10437_v15 = vld [vmem:[%s11091_s17 + $0x200] ss:$12 sps:$4 sm:$0xff]  }
  0x2f   : > { %3431 = vmatprep.subr.bf16.mxu0 %v11001_v1  ;;  %9697 = vmatprep.mubr.msk.bf16.mxu1 %vm11003_vm0, %v11002_v3  ;;  %v10430_v20 = vld [vmem:[%s11091_s17 + $0x1cc] ss:$12 sps:$4 sm:$0xff]  }
  0x32   : > { %3432 = vmatpush2.bf16.msra.mxu0 %v10342_v16  ;;  %v10424_v16 = vld [vmem:[%s11091_s17 + $0x198] ss:$12 sps:$4 sm:$0xff]  }
  0x33   : > { %3433 = vmatprep.subr.bf16.mxu0 %v11001_v1 }
  0x36   : > { %3434 = vmatpush2.bf16.msra.mxu0 %v10343_v18  ;;  %9698 = vmatmul.mubr.msk.bf16.gmra.mxu1 %vm2993_vm2, %v10365_v23  ;;  %v10441_v18 = vld [vmem:[%s11091_s17 + $0x218] ss:$12 sps:$4 sm:$0xff]  }
  0x37   : > { %3435 = vmatprep.subr.bf16.mxu0 %v11001_v1  ;;  %9701 = vmatprep.mubr.msk.bf16.mxu1 %vm11003_vm0, %v11002_v3  ;;  %v10434_v23 = vld [vmem:[%s11091_s17 + $0x1e4] ss:$12 sps:$4 sm:$0xff]  }
  0x3a   : > { %3436 = vmatpush2.bf16.msra.mxu0 %v10344_v19  ;;  %v10428_v19 = vld [vmem:[%s11091_s17 + $0x1b0] ss:$12 sps:$4 sm:$0xff]  }
  0x3b   : > { %3437 = vmatprep.subr.bf16.mxu0 %v11001_v1 }
  0x3e   : > { %3438 = vmatpush2.bf16.msra.mxu0 %v10345_v21  ;;  %9702 = vmatmul.mubr.msk.bf16.gmra.mxu1 %vm2993_vm2, %v10369_v26  ;;  %v10445_v21 = vld [vmem:[%s11091_s17 + $0x230] ss:$12 sps:$4 sm:$0xff]   ;;  %v10436_v26 = vld [vmem:[%s11091_s17 + $0x1e0] ss:$12 sps:$4 sm:$0xff]  }
  0x3f   : > { %3439 = vmatprep.subr.bf16.mxu0 %v11001_v1  ;;  %9705 = vmatprep.mubr.msk.bf16.mxu1 %vm11003_vm0, %v11002_v3 }
  0x42   : > { %3440 = vmatpush2.bf16.msra.mxu0 %v10347_v22  ;;  %v10432_v22 = vld [vmem:[%s11091_s17 + $0x1c8] ss:$12 sps:$4 sm:$0xff]  }
  0x43   : > { %3441 = vmatprep.subr.bf16.mxu0 %v11001_v1 }
  0x46   : > { %3442 = vmatpush2.bf16.msra.mxu0 %v10349_v24  ;;  %9706 = vmatmul.mubr.msk.bf16.gmra.mxu1 %vm2993_vm2, %v10373_v30  ;;  %v10449_v24 = vld [vmem:[%s11091_s17 + $0x248] ss:$12 sps:$4 sm:$0xff]   ;;  %v10453_v30 = vld [vmem:[%s11091_s17 + $0x260] ss:$12 sps:$4 sm:$0xff]  }
  0x47   : > { %3443 = vmatprep.subr.bf16.mxu0 %v11001_v1  ;;  %9709 = vmatprep.mubr.msk.bf16.mxu1 %vm11003_vm0, %v11002_v3 }
  0x4a   : > { %3444 = vmatpush2.bf16.msra.mxu0 %v10351_v25 }
  0x4b   : > { %3445 = vmatprep.subr.bf16.mxu0 %v11001_v1  ;;  %v10406_v1 = vld [vmem:[%s11091_s17 + $0x13c] ss:$12 sps:$4 sm:$0xff]  }
  0x4e   : > { %3446 = vmatpush2.bf16.msra.mxu0 %v10353_v27  ;;  %9710 = vmatmul.mubr.msk.bf16.gmra.mxu1 %vm2993_vm2, %v10377_v33  ;;  %v10438_v27 = vld [vmem:[%s11091_s17 + $0x1fc] ss:$12 sps:$4 sm:$0xff]   ;;  %v10440_v33 = vld [vmem:[%s11091_s17 + $0x1f8] ss:$12 sps:$4 sm:$0xff]  }
  0x4f   : > { %9713 = vmatprep.mubr.msk.bf16.mxu1 %vm11003_vm0, %v11002_v3 }
  0x51   : > { %3448 = vmatmul.mubr.bf16.vlgmr.msra.gmra.mxu0 %v10354_v28 }
  0x52   : > { %3455 = vmatprep.mubr.bf16.mxu0 %v10358_v29 }
  0x56   : > { %9714 = vmatmul.mubr.msk.bf16.gmra.mxu1 %vm2993_vm2, %v10381_v36 }
  0x57   : > { %9717 = vmatprep.mubr.msk.bf16.mxu1 %vm11003_vm0, %v11002_v3 }
  0x59   : > { %3456 = vmatmul.mubr.bf16.gmra.mxu0 %v10360_v31 }
  0x5a   : > { %3463 = vmatprep.mubr.bf16.mxu0 %v10362_v32 }
  0x5e   : > { %9718 = vmatmul.mubr.msk.bf16.gmra.mxu1 %vm2993_vm2, %v10385_v39 }
  0x5f   : > { %9721 = vmatprep.mubr.msk.bf16.mxu1 %vm11003_vm0, %v11002_v3 }
  0x61   : > { %3464 = vmatmul.mubr.bf16.gmra.mxu0 %v10364_v34  ;;  %v10442_v34 = vld [vmem:[%s11091_s17 + $0x214] ss:$12 sps:$4 sm:$0xff]  }
  0x62   : > { %3471 = vmatprep.mubr.bf16.mxu0 %v10366_v35 }
  0x66   : > { %9722 = vmatmul.mubr.msk.bf16.gmra.mxu1 %vm2993_vm2, %v10389_v42 }
  0x67   : > { %9725 = vmatprep.mubr.msk.bf16.mxu1 %vm11003_vm0, %v11002_v3 }
  0x69   : > { %3472 = vmatmul.mubr.bf16.gmra.mxu0 %v10368_v37  ;;  %v10457_v37 = vld [vmem:[%s11091_s17 + $0x278] ss:$12 sps:$4 sm:$0xff]  }
  0x6a   : > { %3479 = vmatprep.mubr.bf16.mxu0 %v10370_v38 }
  0x6e   : > { %9726 = vmatmul.mubr.msk.bf16.gmra.mxu1 %vm2993_vm2, %v10393_v45 }
  0x6f   : > { %9729 = vmatprep.mubr.msk.bf16.mxu1 %vm11003_vm0, %v11002_v3 }
  0x71   : > { %3480 = vmatmul.mubr.bf16.gmra.mxu0 %v10372_v40  ;;  %v10444_v40 = vld [vmem:[%s11091_s17 + $0x210] ss:$12 sps:$4 sm:$0xff]  }
  0x72   : > { %3487 = vmatprep.mubr.bf16.mxu0 %v10374_v41  ;;  %v10446_v41 = vld [vmem:[%s11091_s17 + $0x22c] ss:$12 sps:$4 sm:$0xff]  }
  0x76   : > { %9730 = vmatmul.mubr.msk.bf16.gmra.mxu1 %vm2993_vm2, %v10397_v48  ;;  %v10448_v48 = vld [vmem:[%s11091_s17 + $0x228] ss:$12 sps:$4 sm:$0xff]  }
  0x77   : > { %9733 = vmatprep.mubr.msk.bf16.mxu1 %vm11003_vm0, %v11002_v3 }
  0x79   : > { %3488 = vmatmul.mubr.bf16.gmra.mxu0 %v10376_v43 }
  0x7a   : > { %3495 = vmatprep.mubr.bf16.mxu0 %v10378_v44  ;;  %v10461_v44 = vld [vmem:[%s11091_s17 + $0x290] ss:$12 sps:$4 sm:$0xff]  }
  0x7e   : > { %9734 = vmatmul.mubr.msk.bf16.gmra.mxu1 %vm2993_vm2, %v10401_v51  ;;  %v10465_v51 = vld [vmem:[%s11091_s17 + $0x2a8] ss:$12 sps:$4 sm:$0xff]  }
  0x7f   : > { %9737 = vmatprep.mubr.msk.bf16.mxu1 %vm11003_vm0, %v11002_v3 }
  0x81   : > { %3496 = vmatmul.mubr.bf16.gmra.mxu0 %v10380_v46 }
  0x82   : > { %3503 = vmatprep.mubr.bf16.mxu0 %v10382_v47 }
  0x86   : > { %9738 = vmatmul.mubr.msk.bf16.gmra.mxu1 %vm2993_vm2, %v10405_v54 }
  0x87   : > { %9741 = vmatprep.mubr.msk.bf16.mxu1 %vm11003_vm0, %v11002_v3 }
  0x89   : > { %3504 = vmatmul.mubr.bf16.gmra.mxu0 %v10384_v49  ;;  %v10450_v49 = vld [vmem:[%s11091_s17 + $0x244] ss:$12 sps:$4 sm:$0xff]  }
  0x8a   : > { %3511 = vmatprep.mubr.bf16.mxu0 %v10386_v50 }
  0x8e   : > { %9742 = vmatmul.mubr.msk.bf16.gmra.mxu1 %vm2993_vm2, %v10409_v57 }
  0x8f   : > { %9745 = vmatprep.mubr.msk.bf16.mxu1 %vm11003_vm0, %v11002_v3 }
  0x91   : > { %3512 = vmatmul.mubr.bf16.gmra.mxu0 %v10388_v52 }
  0x92   : > { %3519 = vmatprep.mubr.bf16.mxu0 %v10390_v53 }
  0x96   : > { %9746 = vmatmul.mubr.msk.bf16.gmra.mxu1 %vm2993_vm2, %v10413_v60  ;;  %v11332_v60 = vld [vmem:[%s13444_s2] ss:$0 sm:$0xff] }
  0x97   : > { %9749 = vmatprep.mubr.msk.bf16.mxu1 %vm11003_vm0, %v11002_v3 }
  0x99   : > { %3520 = vmatmul.mubr.bf16.gmra.mxu0 %v10392_v55  ;;  %v10452_v55 = vld [vmem:[%s11091_s17 + $0x240] ss:$12 sps:$4 sm:$0xff]  }
  0x9a   : > { %3527 = vmatprep.mubr.bf16.mxu0 %v10394_v56  ;;  %v10454_v56 = vld [vmem:[%s11091_s17 + $0x25c] ss:$12 sps:$4 sm:$0xff]  }
  0x9e   : > { %9750 = vmatmul.mubr.msk.bf16.gmra.mxu1 %vm2993_vm2, %v10417_v63 }
  0x9f   : > { %9753 = vmatprep.mubr.msk.bf16.mxu1 %vm11003_vm0, %v11002_v3 }
  0xa1   : > { %3528 = vmatmul.mubr.bf16.gmra.mxu0 %v10396_v58  ;;  %v10469_v58 = vld [vmem:[%s11091_s17 + $0x2c0] ss:$12 sps:$4 sm:$0xff]  }
  0xa2   : > { %3535 = vmatprep.mubr.bf16.mxu0 %v10398_v59 }
  0xa6   : > { %9754 = vmatmul.mubr.msk.bf16.gmra.mxu1 %vm2993_vm2, %v10421_v2 }
  0xa7   : > { %9757 = vmatprep.mubr.msk.bf16.mxu1 %vm11003_vm0, %v11002_v3 }
  0xa9   : > { %3536 = vmatmul.mubr.bf16.gmra.mxu0 %v10400_v61 }
  0xaa   : > { %3543 = vmatprep.mubr.bf16.mxu0 %v10402_v62 }
  0xae   : > { %9758 = vmatmul.mubr.msk.bf16.gmra.mxu1 %vm2993_vm2, %v10425_v6  ;;  %v10458_v6 = vld [vmem:[%s11091_s17 + $0x274] ss:$12 sps:$4 sm:$0xff]  }
  0xaf   : > { %9761 = vmatprep.mubr.msk.bf16.mxu1 %vm11003_vm0, %v11002_v3 }
  0xb1   : > { %3544 = vmatmul.mubr.bf16.gmra.mxu0 %v10404_v0 }
  0xb2   : > { %3551 = vmatprep.mubr.bf16.mxu0 %v10406_v1 }
  0xb6   : > { %9762 = vmatmul.mubr.msk.bf16.gmra.mxu1 %vm2993_vm2, %v10429_v9 }
  0xb7   : > { %9765 = vmatprep.mubr.msk.bf16.mxu1 %vm11003_vm0, %v11002_v3 }
  0xb9   : > { %3552 = vmatmul.mubr.bf16.gmra.mxu0 %v10408_v4  ;;  %v10456_v4 = vld [vmem:[%s11091_s17 + $0x258] ss:$12 sps:$4 sm:$0xff]  }
  0xba   : > { %3559 = vmatprep.mubr.bf16.mxu0 %v10410_v5 }
  0xbe   : > { %9766 = vmatmul.mubr.msk.bf16.gmra.mxu1 %vm2993_vm2, %v10433_v12 }
  0xbf   : > { %9769 = vmatprep.mubr.msk.bf16.mxu1 %vm11003_vm0, %v11002_v3 }
  0xc1   : > { %3560 = vmatmul.mubr.bf16.gmra.mxu0 %v10412_v7 }
  0xc2   : > { %3567 = vmatprep.mubr.bf16.mxu0 %v10414_v8  ;;  %v10473_v8 = vld [vmem:[%s11091_s17 + $0x2d8] ss:$12 sps:$4 sm:$0xff]  }
  0xc6   : > { %9770 = vmatmul.mubr.msk.bf16.gmra.mxu1 %vm2993_vm2, %v10437_v15 }
  0xc7   : > { %9773 = vmatprep.mubr.msk.bf16.mxu1 %vm11003_vm0, %v11002_v3 }
  0xc9   : > { %3568 = vmatmul.mubr.bf16.gmra.mxu0 %v10416_v10 }
  0xca   : > { %3575 = vmatprep.mubr.bf16.mxu0 %v10418_v11 }
  0xce   : > { %9774 = vmatmul.mubr.msk.bf16.gmra.mxu1 %vm2993_vm2, %v10441_v18 }
  0xcf   : > { %9777 = vmatprep.mubr.msk.bf16.mxu1 %vm11003_vm0, %v11002_v3 }
  0xd1   : > { %3576 = vmatmul.mubr.bf16.gmra.mxu0 %v10420_v13 }
  0xd2   : > { %3583 = vmatprep.mubr.bf16.mxu0 %v10422_v14 }
  0xd6   : > { %9778 = vmatmul.mubr.msk.bf16.gmra.mxu1 %vm2993_vm2, %v10445_v21 }
  0xd7   : > { %9781 = vmatprep.mubr.msk.bf16.mxu1 %vm11003_vm0, %v11002_v3 }
  0xd9   : > { %3584 = vmatmul.mubr.bf16.gmra.mxu0 %v10424_v16 }
  0xda   : > { %3591 = vmatprep.mubr.bf16.mxu0 %v10426_v17 }
  0xde   : > { %v11279_v25 = vpop.f32.mrf.mxu1  ;;  %9782 = vmatmul.mubr.msk.bf16.gmra.mxu1 %vm2993_vm2, %v10449_v24  ;;  %v10477_v24 = vld [vmem:[%s11091_s17 + $0x2f0] ss:$12 sps:$4 sm:$0xff]  }
  0xdf   : > { %9785 = vmatprep.mubr.msk.bf16.mxu1 %vm11003_vm0, %v11002_v3 }
  0xe0   : > { %v9687_v28 = vpop.f32.mrf.mxu1 }
  0xe1   : > { %3592 = vmatmul.mubr.bf16.gmra.mxu0 %v10428_v19 }
  0xe2   : > { %3599 = vmatprep.mubr.bf16.mxu0 %v10430_v20  ;;  %v11286_v29 = vpop.f32.mrf.mxu1  ;;  %v10460_v20 = vld [vmem:[%s11091_s17 + $0x270] ss:$12 sps:$4 sm:$0xff]  }
  0xe4   : > { %v9688_v31 = vpop.f32.mrf.mxu1 }
  0xe6   : > { %v11289_v32 = vpop.f32.mrf.mxu1  ;;  %9786 = vmatmul.mubr.msk.bf16.gmra.mxu1 %vm2993_vm2, %v10453_v30 }
  0xe7   : > { %9789 = vmatprep.mubr.msk.bf16.mxu1 %vm11003_vm0, %v11002_v3 }
  0xe8   : > { %v9691_v35 = vpop.f32.mrf.mxu1 }
  0xe9   : > { %3600 = vmatmul.mubr.bf16.gmra.mxu0 %v10432_v22  ;;  %v10462_v22 = vld [vmem:[%s11091_s17 + $0x28c] ss:$12 sps:$4 sm:$0xff]  }
  0xea   : > { %3607 = vmatprep.mubr.bf16.mxu0 %v10434_v23  ;;  %v11296_v36 = vpop.f32.mrf.mxu1 }
  0xec   : > { %v9692_v38 = vpop.f32.mrf.mxu1 }
  0xed   : > { %v10468_v38 = vld [vmem:[%s11091_s17 + $0x2a4] ss:$12 sps:$4 sm:$0xff]  }
  0xee   : > { %v11299_v39 = vpop.f32.mrf.mxu1  ;;  %9790 = vmatmul.mubr.msk.bf16.gmra.mxu1 %vm2993_vm2, %v10457_v37 }
  0xef   : > { %9793 = vmatprep.mubr.msk.bf16.mxu1 %vm11003_vm0, %v11002_v3 }
  0xf0   : > { %v9695_v42 = vpop.f32.mrf.mxu1 }
  0xf1   : > { %3608 = vmatmul.mubr.bf16.gmra.mxu0 %v10436_v26 }
  0xf2   : > { %3615 = vmatprep.mubr.bf16.mxu0 %v10438_v27  ;;  %v11306_v43 = vpop.f32.mrf.mxu1 }
  0xf4   : > { %v9696_v45 = vpop.f32.mrf.mxu1 }
  0xf6   : > { %v11309_v46 = vpop.f32.mrf.mxu1  ;;  %9794 = vmatmul.mubr.msk.bf16.gmra.mxu1 %vm2993_vm2, %v10461_v44 }
  0xf7   : > { %9797 = vmatprep.mubr.msk.bf16.mxu1 %vm11003_vm0, %v11002_v3 }
  0xf8   : > { %v9699_v47 = vpop.f32.mrf.mxu1 }
  0xf9   : > { %3616 = vmatmul.mubr.bf16.gmra.mxu0 %v10440_v33 }
  0xfa   : > { %3623 = vmatprep.mubr.bf16.mxu0 %v10442_v34  ;;  %v11316_v50 = vpop.f32.mrf.mxu1 }
  0xfc   : > { %v9700_v52 = vpop.f32.mrf.mxu1 }
  0xfe   : > { %v11319_v53 = vpop.f32.mrf.mxu1  ;;  %9798 = vmatmul.mubr.msk.bf16.gmra.mxu1 %vm2993_vm2, %v10465_v51 }
  0xff   : > { %9801 = vmatprep.mubr.msk.bf16.mxu1 %vm11003_vm0, %v11002_v3 }
 0x100   : > { %v9703_v54 = vpop.f32.mrf.mxu1 }
 0x101   : > { %3624 = vmatmul.mubr.bf16.gmra.mxu0 %v10444_v40 }
 0x102   : > { %3631 = vmatprep.mubr.bf16.mxu0 %v10446_v41  ;;  %v11326_v57 = vpop.f32.mrf.mxu1  ;;  %v10481_v41 = vld [vmem:[%s11091_s17 + $0x308] ss:$12 sps:$4 sm:$0xff]  }
 0x104   : > { %v9704_v59 = vpop.f32.mrf.mxu1 }
 0x106   : > { %v11335_v62 = vpop.f32.mrf.mxu1  ;;  %9802 = vmatmul.mubr.msk.bf16.gmra.mxu1 %vm2993_vm2, %v10469_v58  ;;  %v10472_v58 = vld [vmem:[%s11091_s17 + $0x2bc] ss:$12 sps:$4 sm:$0xff]  }
 0x107   : > { %9805 = vmatprep.mubr.msk.bf16.mxu1 %vm11003_vm0, %v11002_v3 }
 0x108   : > { %v9707_v1 = vpop.f32.mrf.mxu1 }
 0x109   : > { %3632 = vmatmul.mubr.bf16.gmra.mxu0 %v10448_v48 }
 0x10a   : > { %3639 = vmatprep.mubr.bf16.mxu0 %v10450_v49  ;;  %v11344_v7 = vpop.f32.mrf.mxu1 }
 0x10c   : > { %v9708_v12 = vpop.f32.mrf.mxu1 }
 0x10d   : > { %v10476_v12 = vld [vmem:[%s11091_s17 + $0x2d4] ss:$12 sps:$4 sm:$0xff]  }
 0x10e   : > { %v11349_v15 = vpop.f32.mrf.mxu1  ;;  %9806 = vmatmul.mubr.msk.bf16.gmra.mxu1 %vm2993_vm2, %v10473_v8 }
 0x10f   : > { %9809 = vmatprep.mubr.msk.bf16.mxu1 %vm11003_vm0, %v11002_v3 }
 0x110   : > { %v9711_v18 = vpop.f32.mrf.mxu1 }
 0x111   : > { %v3449_v61 = vpop.f32.mrf.mxu0  ;;  %3640 = vmatmul.mubr.bf16.gmra.mxu0 %v10452_v55  ;;  %v10466_v55 = vld [vmem:[%s11091_s17 + $0x2a0] ss:$12 sps:$4 sm:$0xff]  }
 0x112   : > { %3647 = vmatprep.mubr.bf16.mxu0 %v10454_v56  ;;  %v3450_v0 = vadd.f32 %v11332_v60, %v3449_v61  ;;  %v11361_v23 = vpop.f32.mrf.mxu1  ;;  %v10485_v61 = vld [vmem:[%s11091_s17 + $0x320] ss:$12 sps:$4 sm:$0xff]  }
 0x113   : > { %v3451_v63 = vpop.f32.mrf.mxu0 }
 0x114   : > { %v4594_v10 = vadd.f32 %v11279_v25, %v3450_v0  ;;  %v9712_v28 = vpop.f32.mrf.mxu1 }
 0x115   : > { %v3452_v2 = vpop.f32.mrf.mxu0  ;;  %v10480_v28 = vld [vmem:[%s11091_s17 + $0x2ec] ss:$12 sps:$4 sm:$0xff]  }
 0x116   : > { %v3453_v5 = vadd.f32 %v11332_v60, %v3452_v2  ;;  %v11366_v31 = vpop.f32.mrf.mxu1  ;;  %9810 = vmatmul.mubr.msk.bf16.gmra.mxu1 %vm2993_vm2, %v10477_v24 }
 0x117   : > { %v3454_v9 = vpop.f32.mrf.mxu0  ;;  %9813 = vmatprep.mubr.msk.bf16.mxu1 %vm11003_vm0, %v11002_v3 }
 0x118   : > { %v4597_v11 = vadd.f32 %v11286_v29, %v3453_v5  ;;  %v9715_v34 = vpop.f32.mrf.mxu1 }
 0x119   : > { %v3457_v13 = vpop.f32.mrf.mxu0  ;;  %3648 = vmatmul.mubr.bf16.gmra.mxu0 %v10456_v4 }
 0x11a   : > { %v8713_v14 = vpack.c.bf16 %v4597_v11, %v4594_v10  ;;  %3655 = vmatprep.mubr.bf16.mxu0 %v10458_v6  ;;  %v3458_v17 = vadd.f32 %v11332_v60, %v3457_v13  ;;  %v11376_v40 = vpop.f32.mrf.mxu1  ;;  %v10470_v10 = vld [vmem:[%s11091_s17 + $0x2b8] ss:$12 sps:$4 sm:$0xff]  }
 0x11b   : > { %v3459_v16 = vpop.f32.mrf.mxu0 }
 0x11c   : > { %8714 = vst [vmem:[%s11354_s12] sm:$0xff] %v8713_v14   ;;  %v4602_v26 = vadd.f32 %v11289_v32, %v3458_v17  ;;  %v9716_v47 = vpop.f32.mrf.mxu1  ;;  %v10489_v14 = vld [vmem:[%s11091_s17 + $0x338] ss:$12 sps:$4 sm:$0xff]  }
 0x11d   : > { %v3460_v19 = vpop.f32.mrf.mxu0  ;;  %v10484_v47 = vld [vmem:[%s11091_s17 + $0x304] ss:$12 sps:$4 sm:$0xff]  }
 0x11e   : > { %v3461_v21 = vadd.f32 %v11332_v60, %v3460_v19  ;;  %v11381_v51 = vpop.f32.mrf.mxu1  ;;  %9814 = vmatmul.mubr.msk.bf16.gmra.mxu1 %vm2993_vm2, %v10481_v41 }
 0x11f   : > { %v3462_v25 = vpop.f32.mrf.mxu0  ;;  %9817 = vmatprep.mubr.msk.bf16.mxu1 %vm11003_vm0, %v11002_v3 }
 0x120   : > { %v4605_v27 = vadd.f32 %v11296_v36, %v3461_v21  ;;  %v10464_v36 = vld [vmem:[%s11091_s17 + $0x288] ss:$12 sps:$4 sm:$0xff]   ;;  %v9719_v54 = vpop.f32.mrf.mxu1 }
 0x121   : > { %v3465_v29 = vpop.f32.mrf.mxu0  ;;  %3656 = vmatmul.mubr.bf16.gmra.mxu0 %v10460_v20 }
 0x122   : > { %v8718_v30 = vpack.c.bf16 %v4605_v27, %v4602_v26  ;;  %3663 = vmatprep.mubr.bf16.mxu0 %v10462_v22  ;;  %v3466_v32 = vadd.f32 %v11332_v60, %v3465_v29  ;;  %v11391_v59 = vpop.f32.mrf.mxu1  ;;  %v10474_v26 = vld [vmem:[%s11091_s17 + $0x2d0] ss:$12 sps:$4 sm:$0xff]  }
 0x123   : > { %v3467_v33 = vpop.f32.mrf.mxu0 }
 0x124   : > { %9400 = vst [vmem:[%s11354_s12 + $0x8] sm:$0xff] %v8718_v30   ;;  %v4610_v44 = vadd.f32 %v11299_v39, %v3466_v32  ;;  %v9720_v2 = vpop.f32.mrf.mxu1  ;;  %v10493_v30 = vld [vmem:[%s11091_s17 + $0x350] ss:$12 sps:$4 sm:$0xff]  }
 0x125   : > { %v3468_v35 = vpop.f32.mrf.mxu0  ;;  %v10488_v2 = vld [vmem:[%s11091_s17 + $0x31c] ss:$12 sps:$4 sm:$0xff]  }
 0x126   : > { %v3469_v37 = vadd.f32 %v11332_v60, %v3468_v35  ;;  %v11396_v6 = vpop.f32.mrf.mxu1  ;;  %9818 = vmatmul.mubr.msk.bf16.gmra.mxu1 %vm2993_vm2, %v10485_v61 }
 0x127   : > { %v3470_v42 = vpop.f32.mrf.mxu0  ;;  %9821 = vmatprep.mubr.msk.bf16.mxu1 %vm11003_vm0, %v11002_v3 }
 0x128   : > { %v4613_v45 = vadd.f32 %v11306_v43, %v3469_v37  ;;  %v9723_v9 = vpop.f32.mrf.mxu1 }
 0x129   : > { %v3473_v48 = vpop.f32.mrf.mxu0  ;;  %3664 = vmatmul.mubr.bf16.gmra.mxu0 %v10464_v36 }
 0x12a   : > { %v8723_v49 = vpack.c.bf16 %v4613_v45, %v4610_v44  ;;  %3671 = vmatprep.mubr.bf16.mxu0 %v10468_v38  ;;  %v3474_v39 = vadd.f32 %v11332_v60, %v3473_v48  ;;  %v11406_v13 = vpop.f32.mrf.mxu1  ;;  %v10478_v44 = vld [vmem:[%s11091_s17 + $0x2e8] ss:$12 sps:$4 sm:$0xff]  }
 0x12b   : > { %v3475_v52 = vpop.f32.mrf.mxu0 }
 0x12c   : > { %9401 = vst [vmem:[%s11354_s12 + $0x10] sm:$0xff] %v8723_v49   ;;  %v4618_v0 = vadd.f32 %v11309_v46, %v3474_v39  ;;  %v9724_v19 = vpop.f32.mrf.mxu1  ;;  %v10497_v49 = vld [vmem:[%s11091_s17 + $0x368] ss:$12 sps:$4 sm:$0xff]  }
 0x12d   : > { %v3476_v43 = vpop.f32.mrf.mxu0  ;;  %v10492_v19 = vld [vmem:[%s11091_s17 + $0x334] ss:$12 sps:$4 sm:$0xff]  }
 0x12e   : > { %v3477_v56 = vadd.f32 %v11332_v60, %v3476_v43  ;;  %v11411_v22 = vpop.f32.mrf.mxu1  ;;  %9822 = vmatmul.mubr.msk.bf16.gmra.mxu1 %vm2993_vm2, %v10489_v14 }
 0x12f   : > { %v3478_v63 = vpop.f32.mrf.mxu0  ;;  %9825 = vmatprep.mubr.msk.bf16.mxu1 %vm11003_vm0, %v11002_v3 }
 0x130   : > { %v4621_v1 = vadd.f32 %v11316_v50, %v3477_v56  ;;  %v9727_v25 = vpop.f32.mrf.mxu1 }
 0x131   : > { %v3481_v4 = vpop.f32.mrf.mxu0  ;;  %3672 = vmatmul.mubr.bf16.gmra.mxu0 %v10466_v55 }
 0x132   : > { %v8728_v5 = vpack.c.bf16 %v4621_v1, %v4618_v0  ;;  %3679 = vmatprep.mubr.bf16.mxu0 %v10472_v58  ;;  %v3482_v46 = vadd.f32 %v11332_v60, %v3481_v4  ;;  %v11421_v29 = vpop.f32.mrf.mxu1  ;;  %v10482_v0 = vld [vmem:[%s11091_s17 + $0x300] ss:$12 sps:$4 sm:$0xff]  }
 0x133   : > { %v3483_v8 = vpop.f32.mrf.mxu0 }
 0x134   : > { %9402 = vst [vmem:[%s11354_s12 + $0x18] sm:$0xff] %v8728_v5   ;;  %v4626_v17 = vadd.f32 %v11319_v53, %v3482_v46  ;;  %v9728_v35 = vpop.f32.mrf.mxu1  ;;  %v10501_v5 = vld [vmem:[%s11091_s17 + $0x380] ss:$12 sps:$4 sm:$0xff]  }
 0x135   : > { %v3484_v50 = vpop.f32.mrf.mxu0  ;;  %v10496_v35 = vld [vmem:[%s11091_s17 + $0x34c] ss:$12 sps:$4 sm:$0xff]  }
 0x136   : > { %v3485_v11 = vadd.f32 %v11332_v60, %v3484_v50  ;;  %v11426_v38 = vpop.f32.mrf.mxu1  ;;  %9826 = vmatmul.mubr.msk.bf16.gmra.mxu1 %vm2993_vm2, %v10493_v30 }
 0x137   : > { %v3486_v16 = vpop.f32.mrf.mxu0  ;;  %9829 = vmatprep.mubr.msk.bf16.mxu1 %vm11003_vm0, %v11002_v3 }
 0x138   : > { %v4629_v18 = vadd.f32 %v11326_v57, %v3485_v11  ;;  %v9731_v42 = vpop.f32.mrf.mxu1 }
 0x139   : > { %v3489_v20 = vpop.f32.mrf.mxu0  ;;  %3680 = vmatmul.mubr.bf16.gmra.mxu0 %v10470_v10 }
 0x13a   : > { %v8733_v21 = vpack.c.bf16 %v4629_v18, %v4626_v17  ;;  %3687 = vmatprep.mubr.bf16.mxu0 %v10476_v12  ;;  %v3490_v53 = vadd.f32 %v11332_v60, %v3489_v20  ;;  %v11436_v48 = vpop.f32.mrf.mxu1  ;;  %v10486_v17 = vld [vmem:[%s11091_s17 + $0x318] ss:$12 sps:$4 sm:$0xff]  }
 0x13b   : > { %v3491_v24 = vpop.f32.mrf.mxu0 }
 0x13c   : > { %9403 = vst [vmem:[%s11354_s12 + $0x20] sm:$0xff] %v8733_v21   ;;  %v4634_v32 = vadd.f32 %v11335_v62, %v3490_v53  ;;  %v9732_v43 = vpop.f32.mrf.mxu1  ;;  %v10505_v21 = vld [vmem:[%s11091_s17 + $0x398] ss:$12 sps:$4 sm:$0xff]  }
 0x13d   : > { %v3492_v57 = vpop.f32.mrf.mxu0  ;;  %v10500_v43 = vld [vmem:[%s11091_s17 + $0x364] ss:$12 sps:$4 sm:$0xff]  }
 0x13e   : > { %v3493_v27 = vadd.f32 %v11332_v60, %v3492_v57  ;;  %v11441_v58 = vpop.f32.mrf.mxu1  ;;  %9830 = vmatmul.mubr.msk.bf16.gmra.mxu1 %vm2993_vm2, %v10497_v49 }
 0x13f   : > { %v3494_v33 = vpop.f32.mrf.mxu0  ;;  %9833 = vmatprep.mubr.msk.bf16.mxu1 %vm11003_vm0, %v11002_v3 }
 0x140   : > { %v4637_v34 = vadd.f32 %v11344_v7, %v3493_v27  ;;  %v9735_v63 = vpop.f32.mrf.mxu1 }
 0x141   : > { %v3497_v36 = vpop.f32.mrf.mxu0  ;;  %3688 = vmatmul.mubr.bf16.gmra.mxu0 %v10474_v26 }
 0x142   : > { %v8738_v37 = vpack.c.bf16 %v4637_v34, %v4634_v32  ;;  %3695 = vmatprep.mubr.bf16.mxu0 %v10480_v28  ;;  %v3498_v62 = vadd.f32 %v11332_v60, %v3497_v36  ;;  %v11451_v4 = vpop.f32.mrf.mxu1  ;;  %v10490_v32 = vld [vmem:[%s11091_s17 + $0x330] ss:$12 sps:$4 sm:$0xff]  }
 0x143   : > { %v3499_v41 = vpop.f32.mrf.mxu0 }
 0x144   : > { %9404 = vst [vmem:[%s11354_s12 + $0x28] sm:$0xff] %v8738_v37   ;;  %v4642_v39 = vadd.f32 %v11349_v15, %v3498_v62  ;;  %v9736_v50 = vpop.f32.mrf.mxu1  ;;  %v10509_v37 = vld [vmem:[%s11091_s17 + $0x3b0] ss:$12 sps:$4 sm:$0xff]  }
 0x145   : > { %v3500_v7 = vpop.f32.mrf.mxu0  ;;  %v10504_v50 = vld [vmem:[%s11091_s17 + $0x37c] ss:$12 sps:$4 sm:$0xff]  }
 0x146   : > { %v3501_v45 = vadd.f32 %v11332_v60, %v3500_v7  ;;  %v11456_v12 = vpop.f32.mrf.mxu1  ;;  %9834 = vmatmul.mubr.msk.bf16.gmra.mxu1 %vm2993_vm2, %v10501_v5 }
 0x147   : > { %v3502_v52 = vpop.f32.mrf.mxu0  ;;  %9837 = vmatprep.mubr.msk.bf16.mxu1 %vm11003_vm0, %v11002_v3 }
 0x148   : > { %v4645_v54 = vadd.f32 %v11361_v23, %v3501_v45  ;;  %v9739_v16 = vpop.f32.mrf.mxu1 }
 0x149   : > { %v3505_v55 = vpop.f32.mrf.mxu0  ;;  %3696 = vmatmul.mubr.bf16.gmra.mxu0 %v10478_v44 }
 0x14a   : > { %v8743_v56 = vpack.c.bf16 %v4645_v54, %v4642_v39  ;;  %3703 = vmatprep.mubr.bf16.mxu0 %v10484_v47  ;;  %v3506_v15 = vadd.f32 %v11332_v60, %v3505_v55  ;;  %v11466_v20 = vpop.f32.mrf.mxu1  ;;  %v10494_v39 = vld [vmem:[%s11091_s17 + $0x348] ss:$12 sps:$4 sm:$0xff]  }
 0x14b   : > { %v3507_v61 = vpop.f32.mrf.mxu0 }
 0x14c   : > { %9405 = vst [vmem:[%s11354_s12 + $0x30] sm:$0xff] %v8743_v56   ;;  %v4650_v46 = vadd.f32 %v11366_v31, %v3506_v15  ;;  %v9740_v57 = vpop.f32.mrf.mxu1  ;;  %v10513_v56 = vld [vmem:[%s11091_s17 + $0x3c8] ss:$12 sps:$4 sm:$0xff]  }
 0x14d   : > { %v3508_v23 = vpop.f32.mrf.mxu0  ;;  %v10508_v57 = vld [vmem:[%s11091_s17 + $0x394] ss:$12 sps:$4 sm:$0xff]  }
 0x14e   : > { %v3509_v1 = vadd.f32 %v11332_v60, %v3508_v23  ;;  %v11471_v28 = vpop.f32.mrf.mxu1  ;;  %9838 = vmatmul.mubr.msk.bf16.gmra.mxu1 %vm2993_vm2, %v10505_v21 }
 0x14f   : > { %v3510_v8 = vpop.f32.mrf.mxu0  ;;  %9841 = vmatprep.mubr.msk.bf16.mxu1 %vm11003_vm0, %v11002_v3 }
 0x150   : > { %v4653_v9 = vadd.f32 %v11376_v40, %v3509_v1  ;;  %v9743_v33 = vpop.f32.mrf.mxu1 }
 0x151   : > { %v3513_v10 = vpop.f32.mrf.mxu0  ;;  %3704 = vmatmul.mubr.bf16.gmra.mxu0 %v10482_v0 }
 0x152   : > { %v8748_v11 = vpack.c.bf16 %v4653_v9, %v4650_v46  ;;  %3711 = vmatprep.mubr.bf16.mxu0 %v10488_v2  ;;  %v3514_v31 = vadd.f32 %v11332_v60, %v3513_v10  ;;  %v11481_v36 = vpop.f32.mrf.mxu1  ;;  %v10498_v46 = vld [vmem:[%s11091_s17 + $0x360] ss:$12 sps:$4 sm:$0xff]  }
 0x153   : > { %v3515_v14 = vpop.f32.mrf.mxu0 }
 0x154   : > { %9406 = vst [vmem:[%s11354_s12 + $0x38] sm:$0xff] %v8748_v11   ;;  %v4658_v53 = vadd.f32 %v11381_v51, %v3514_v31  ;;  %v9744_v7 = vpop.f32.mrf.mxu1  ;;  %v10517_v11 = vld [vmem:[%s11091_s17 + $0x3e0] ss:$12 sps:$4 sm:$0xff]  }
 0x155   : > { %v3516_v40 = vpop.f32.mrf.mxu0  ;;  %v10512_v7 = vld [vmem:[%s11091_s17 + $0x3ac] ss:$12 sps:$4 sm:$0xff]  }
 0x156   : > { %v3517_v18 = vadd.f32 %v11332_v60, %v3516_v40  ;;  %v11486_v47 = vpop.f32.mrf.mxu1  ;;  %9842 = vmatmul.mubr.msk.bf16.gmra.mxu1 %vm2993_vm2, %v10509_v37 }
 0x157   : > { %v3518_v24 = vpop.f32.mrf.mxu0  ;;  %9845 = vmatprep.mubr.msk.bf16.mxu1 %vm11003_vm0, %v11002_v3 }
 0x158   : > { %v4661_v25 = vadd.f32 %v11391_v59, %v3517_v18  ;;  %v9747_v52 = vpop.f32.mrf.mxu1 }
 0x159   : > { %v3521_v26 = vpop.f32.mrf.mxu0  ;;  %3712 = vmatmul.mubr.bf16.gmra.mxu0 %v10486_v17 }
 0x15a   : > { %v8753_v27 = vpack.c.bf16 %v4661_v25, %v4658_v53  ;;  %3719 = vmatprep.mubr.bf16.mxu0 %v10492_v19  ;;  %v3522_v51 = vadd.f32 %v11332_v60, %v3521_v26  ;;  %v11496_v55 = vpop.f32.mrf.mxu1  ;;  %v10502_v53 = vld [vmem:[%s11091_s17 + $0x378] ss:$12 sps:$4 sm:$0xff]  }
 0x15b   : > { %v3523_v30 = vpop.f32.mrf.mxu0 }
 0x15c   : > { %9407 = vst [vmem:[%s11354_s12 + $0x40] sm:$0xff] %v8753_v27   ;;  %v4666_v62 = vadd.f32 %v11396_v6, %v3522_v51  ;;  %v9748_v23 = vpop.f32.mrf.mxu1  ;;  %v10521_v27 = vld [vmem:[%s11091_s17 + $0x3f8] ss:$12 sps:$4 sm:$0xff]  }
 0x15d   : > { %v3524_v59 = vpop.f32.mrf.mxu0  ;;  %v10516_v23 = vld [vmem:[%s11091_s17 + $0x3c4] ss:$12 sps:$4 sm:$0xff]  }
 0x15e   : > { %v3525_v34 = vadd.f32 %v11332_v60, %v3524_v59  ;;  %v11501_v2 = vpop.f32.mrf.mxu1  ;;  %9846 = vmatmul.mubr.msk.bf16.gmra.mxu1 %vm2993_vm2, %v10513_v56 }
 0x15f   : > { %v3526_v41 = vpop.f32.mrf.mxu0  ;;  %9849 = vmatprep.mubr.msk.bf16.mxu1 %vm11003_vm0, %v11002_v3 }
 0x160   : > { %v4669_v42 = vadd.f32 %v11406_v13, %v3525_v34  ;;  %v9751_v8 = vpop.f32.mrf.mxu1 }
 0x161   : > { %v3529_v44 = vpop.f32.mrf.mxu0  ;;  %3720 = vmatmul.mubr.bf16.gmra.mxu0 %v10490_v32 }
 0x162   : > { %v8758_v45 = vpack.c.bf16 %v4669_v42, %v4666_v62  ;;  %3727 = vmatprep.mubr.bf16.mxu0 %v10496_v35  ;;  %v3530_v6 = vadd.f32 %v11332_v60, %v3529_v44  ;;  %v11511_v10 = vpop.f32.mrf.mxu1  ;;  %v10506_v62 = vld [vmem:[%s11091_s17 + $0x390] ss:$12 sps:$4 sm:$0xff]  }
 0x163   : > { %v3531_v49 = vpop.f32.mrf.mxu0 }
 0x164   : > { %9408 = vst [vmem:[%s11354_s12 + $0x48] sm:$0xff] %v8758_v45   ;;  %v4674_v15 = vadd.f32 %v11411_v22, %v3530_v6  ;;  %v9752_v40 = vpop.f32.mrf.mxu1  ;;  %v10525_v45 = vld [vmem:[%s11091_s17 + $0x410] ss:$12 sps:$4 sm:$0xff]  }
 0x165   : > { %v3532_v13 = vpop.f32.mrf.mxu0  ;;  %v10520_v40 = vld [vmem:[%s11091_s17 + $0x3dc] ss:$12 sps:$4 sm:$0xff]  }
 0x166   : > { %v3533_v54 = vadd.f32 %v11332_v60, %v3532_v13  ;;  %v11516_v19 = vpop.f32.mrf.mxu1  ;;  %9850 = vmatmul.mubr.msk.bf16.gmra.mxu1 %vm2993_vm2, %v10517_v11 }
 0x167   : > { %v3534_v61 = vpop.f32.mrf.mxu0  ;;  %9853 = vmatprep.mubr.msk.bf16.mxu1 %vm11003_vm0, %v11002_v3 }
 0x168   : > { %v4677_v63 = vadd.f32 %v11421_v29, %v3533_v54  ;;  %v9755_v24 = vpop.f32.mrf.mxu1 }
 0x169   : > { %v3537_v0 = vpop.f32.mrf.mxu0  ;;  %3728 = vmatmul.mubr.bf16.gmra.mxu0 %v10494_v39 }
 0x16a   : > { %v8763_v1 = vpack.c.bf16 %v4677_v63, %v4674_v15  ;;  %3735 = vmatprep.mubr.bf16.mxu0 %v10500_v43  ;;  %v3538_v22 = vadd.f32 %v11332_v60, %v3537_v0  ;;  %v11526_v26 = vpop.f32.mrf.mxu1  ;;  %v10510_v15 = vld [vmem:[%s11091_s17 + $0x3a8] ss:$12 sps:$4 sm:$0xff]  }
 0x16b   : > { %v3539_v5 = vpop.f32.mrf.mxu0 }
 0x16c   : > { %9409 = vst [vmem:[%s11354_s12 + $0x50] sm:$0xff] %v8763_v1   ;;  %v4682_v31 = vadd.f32 %v11426_v38, %v3538_v22  ;;  %v9756_v59 = vpop.f32.mrf.mxu1  ;;  %v10529_v1 = vld [vmem:[%s11091_s17 + $0x428] ss:$12 sps:$4 sm:$0xff]  }
 0x16d   : > { %v3540_v29 = vpop.f32.mrf.mxu0  ;;  %v10524_v59 = vld [vmem:[%s11091_s17 + $0x3f4] ss:$12 sps:$4 sm:$0xff]  }
 0x16e   : > { %v3541_v9 = vadd.f32 %v11332_v60, %v3540_v29  ;;  %v11531_v35 = vpop.f32.mrf.mxu1  ;;  %9854 = vmatmul.mubr.msk.bf16.gmra.mxu1 %vm2993_vm2, %v10521_v27 }
 0x16f   : > { %v3542_v14 = vpop.f32.mrf.mxu0  ;;  %9857 = vmatprep.mubr.msk.bf16.mxu1 %vm11003_vm0, %v11002_v3 }
 0x170   : > { %v4685_v16 = vadd.f32 %v11436_v48, %v3541_v9  ;;  %v9759_v41 = vpop.f32.mrf.mxu1 }
 0x171   : > { %v3545_v17 = vpop.f32.mrf.mxu0  ;;  %3736 = vmatmul.mubr.bf16.gmra.mxu0 %v10498_v46 }
 0x172   : > { %v8768_v18 = vpack.c.bf16 %v4685_v16, %v4682_v31  ;;  %3743 = vmatprep.mubr.bf16.mxu0 %v10504_v50  ;;  %v3546_v38 = vadd.f32 %v11332_v60, %v3545_v17  ;;  %v11541_v44 = vpop.f32.mrf.mxu1  ;;  %v10514_v31 = vld [vmem:[%s11091_s17 + $0x3c0] ss:$12 sps:$4 sm:$0xff]  }
 0x173   : > { %v3547_v21 = vpop.f32.mrf.mxu0 }
 0x174   : > { %9410 = vst [vmem:[%s11354_s12 + $0x58] sm:$0xff] %v8768_v18   ;;  %v4690_v51 = vadd.f32 %v11441_v58, %v3546_v38  ;;  %v9760_v13 = vpop.f32.mrf.mxu1  ;;  %v10533_v18 = vld [vmem:[%s11091_s17 + $0x440] ss:$12 sps:$4 sm:$0xff]  }
 0x175   : > { %v3548_v48 = vpop.f32.mrf.mxu0  ;;  %v10528_v13 = vld [vmem:[%s11091_s17 + $0x40c] ss:$12 sps:$4 sm:$0xff]  }
 0x176   : > { %v3549_v25 = vadd.f32 %v11332_v60, %v3548_v48  ;;  %v11546_v43 = vpop.f32.mrf.mxu1  ;;  %9858 = vmatmul.mubr.msk.bf16.gmra.mxu1 %vm2993_vm2, %v10525_v45 }
 0x177   : > { %v3550_v30 = vpop.f32.mrf.mxu0  ;;  %9861 = vmatprep.mubr.msk.bf16.mxu1 %vm11003_vm0, %v11002_v3 }
 0x178   : > { %v4693_v33 = vadd.f32 %v11451_v4, %v3549_v25  ;;  %v9763_v61 = vpop.f32.mrf.mxu1 }
 0x179   : > { %v3553_v32 = vpop.f32.mrf.mxu0  ;;  %3744 = vmatmul.mubr.bf16.gmra.mxu0 %v10502_v53 }
 0x17a   : > { %v8773_v34 = vpack.c.bf16 %v4693_v33, %v4690_v51  ;;  %3751 = vmatprep.mubr.bf16.mxu0 %v10508_v57  ;;  %v3554_v58 = vadd.f32 %v11332_v60, %v3553_v32  ;;  %v11556_v0 = vpop.f32.mrf.mxu1  ;;  %v10518_v51 = vld [vmem:[%s11091_s17 + $0x3d8] ss:$12 sps:$4 sm:$0xff]  }
 0x17b   : > { %v3555_v37 = vpop.f32.mrf.mxu0 }
 0x17c   : > { %9411 = vst [vmem:[%s11354_s12 + $0x60] sm:$0xff] %v8773_v34   ;;  %v4698_v6 = vadd.f32 %v11456_v12, %v3554_v58  ;;  %v9764_v29 = vpop.f32.mrf.mxu1  ;;  %v10537_v34 = vld [vmem:[%s11091_s17 + $0x458] ss:$12 sps:$4 sm:$0xff]  }
 0x17d   : > { %v3556_v4 = vpop.f32.mrf.mxu0  ;;  %v10532_v29 = vld [vmem:[%s11091_s17 + $0x424] ss:$12 sps:$4 sm:$0xff]  }
 0x17e   : > { %v3557_v42 = vadd.f32 %v11332_v60, %v3556_v4  ;;  %v11561_v50 = vpop.f32.mrf.mxu1  ;;  %9862 = vmatmul.mubr.msk.bf16.gmra.mxu1 %vm2993_vm2, %v10529_v1 }
 0x17f   : > { %v3558_v49 = vpop.f32.mrf.mxu0  ;;  %9865 = vmatprep.mubr.msk.bf16.mxu1 %vm11003_vm0, %v11002_v3 }
 0x180   : > { %v4701_v52 = vadd.f32 %v11466_v20, %v3557_v42  ;;  %v9767_v14 = vpop.f32.mrf.mxu1 }
 0x181   : > { %v3561_v39 = vpop.f32.mrf.mxu0  ;;  %3752 = vmatmul.mubr.bf16.gmra.mxu0 %v10506_v62 }
 0x182   : > { %v8778_v54 = vpack.c.bf16 %v4701_v52, %v4698_v6  ;;  %3759 = vmatprep.mubr.bf16.mxu0 %v10512_v7  ;;  %v3562_v12 = vadd.f32 %v11332_v60, %v3561_v39  ;;  %v11571_v17 = vpop.f32.mrf.mxu1  ;;  %v10522_v6 = vld [vmem:[%s11091_s17 + $0x3f0] ss:$12 sps:$4 sm:$0xff]  }
 0x183   : > { %v3563_v56 = vpop.f32.mrf.mxu0 }
 0x184   : > { %9412 = vst [vmem:[%s11354_s12 + $0x68] sm:$0xff] %v8778_v54   ;;  %v4706_v22 = vadd.f32 %v11471_v28, %v3562_v12  ;;  %v9768_v48 = vpop.f32.mrf.mxu1  ;;  %v10541_v54 = vld [vmem:[%s11091_s17 + $0x470] ss:$12 sps:$4 sm:$0xff]  }
 0x185   : > { %v3564_v20 = vpop.f32.mrf.mxu0  ;;  %v10536_v48 = vld [vmem:[%s11091_s17 + $0x43c] ss:$12 sps:$4 sm:$0xff]  }
 0x186   : > { %v3565_v63 = vadd.f32 %v11332_v60, %v3564_v20  ;;  %v11576_v57 = vpop.f32.mrf.mxu1  ;;  %9866 = vmatmul.mubr.msk.bf16.gmra.mxu1 %vm2993_vm2, %v10533_v18 }
 0x187   : > { %v3566_v5 = vpop.f32.mrf.mxu0  ;;  %9869 = vmatprep.mubr.msk.bf16.mxu1 %vm11003_vm0, %v11002_v3 }
 0x188   : > { %v4709_v8 = vadd.f32 %v11481_v36, %v3565_v63  ;;  %v9771_v30 = vpop.f32.mrf.mxu1 }
 0x189   : > { %v3569_v46 = vpop.f32.mrf.mxu0  ;;  %3760 = vmatmul.mubr.bf16.gmra.mxu0 %v10510_v15 }
 0x18a   : > { %v8783_v9 = vpack.c.bf16 %v4709_v8, %v4706_v22  ;;  %3767 = vmatprep.mubr.bf16.mxu0 %v10516_v23  ;;  %v3570_v28 = vadd.f32 %v11332_v60, %v3569_v46  ;;  %v11586_v32 = vpop.f32.mrf.mxu1  ;;  %v10526_v22 = vld [vmem:[%s11091_s17 + $0x408] ss:$12 sps:$4 sm:$0xff]  }
 0x18b   : > { %v3571_v11 = vpop.f32.mrf.mxu0 }
 0x18c   : > { %9413 = vst [vmem:[%s11354_s12 + $0x70] sm:$0xff] %v8783_v9   ;;  %v4714_v38 = vadd.f32 %v11486_v47, %v3570_v28  ;;  %v9772_v4 = vpop.f32.mrf.mxu1  ;;  %v10545_v9 = vld [vmem:[%s11091_s17 + $0x488] ss:$12 sps:$4 sm:$0xff]  }
 0x18d   : > { %v3572_v36 = vpop.f32.mrf.mxu0  ;;  %v10540_v4 = vld [vmem:[%s11091_s17 + $0x454] ss:$12 sps:$4 sm:$0xff]  }
 0x18e   : > { %v3573_v16 = vadd.f32 %v11332_v60, %v3572_v36  ;;  %v11591_v7 = vpop.f32.mrf.mxu1  ;;  %9870 = vmatmul.mubr.msk.bf16.gmra.mxu1 %vm2993_vm2, %v10537_v34 }
 0x18f   : > { %v3574_v21 = vpop.f32.mrf.mxu0  ;;  %9873 = vmatprep.mubr.msk.bf16.mxu1 %vm11003_vm0, %v11002_v3 }
 0x190   : > { %v4717_v24 = vadd.f32 %v11496_v55, %v3573_v16  ;;  %v9775_v49 = vpop.f32.mrf.mxu1 }
 0x191   : > { %v3577_v53 = vpop.f32.mrf.mxu0  ;;  %3768 = vmatmul.mubr.bf16.gmra.mxu0 %v10514_v31 }
 0x192   : > { %v8788_v25 = vpack.c.bf16 %v4717_v24, %v4714_v38  ;;  %3775 = vmatprep.mubr.bf16.mxu0 %v10520_v40  ;;  %v3578_v47 = vadd.f32 %v11332_v60, %v3577_v53  ;;  %v11601_v39 = vpop.f32.mrf.mxu1  ;;  %v10530_v38 = vld [vmem:[%s11091_s17 + $0x420] ss:$12 sps:$4 sm:$0xff]  }
 0x193   : > { %v3579_v27 = vpop.f32.mrf.mxu0 }
 0x194   : > { %9414 = vst [vmem:[%s11354_s12 + $0x78] sm:$0xff] %v8788_v25   ;;  %v4722_v58 = vadd.f32 %v11501_v2, %v3578_v47  ;;  %v9776_v20 = vpop.f32.mrf.mxu1  ;;  %v10549_v25 = vld [vmem:[%s11091_s17 + $0x4a0] ss:$12 sps:$4 sm:$0xff]  }
 0x195   : > { %v3580_v55 = vpop.f32.mrf.mxu0  ;;  %v10544_v20 = vld [vmem:[%s11091_s17 + $0x46c] ss:$12 sps:$4 sm:$0xff]  }
 0x196   : > { %v3581_v33 = vadd.f32 %v11332_v60, %v3580_v55  ;;  %v11606_v23 = vpop.f32.mrf.mxu1  ;;  %9874 = vmatmul.mubr.msk.bf16.gmra.mxu1 %vm2993_vm2, %v10541_v54 }
 0x197   : > { %v3582_v37 = vpop.f32.mrf.mxu0  ;;  %9877 = vmatprep.mubr.msk.bf16.mxu1 %vm11003_vm0, %v11002_v3 }
 0x198   : > { %v4725_v41 = vadd.f32 %v11511_v10, %v3581_v33  ;;  %v9779_v5 = vpop.f32.mrf.mxu1 }
 0x199   : > { %v3585_v62 = vpop.f32.mrf.mxu0  ;;  %3776 = vmatmul.mubr.bf16.gmra.mxu0 %v10518_v51 }
 0x19a   : > { %v8793_v42 = vpack.c.bf16 %v4725_v41, %v4722_v58  ;;  %3783 = vmatprep.mubr.bf16.mxu0 %v10524_v59  ;;  %v3586_v2 = vadd.f32 %v11332_v60, %v3585_v62  ;;  %v11616_v46 = vpop.f32.mrf.mxu1  ;;  %v10534_v58 = vld [vmem:[%s11091_s17 + $0x438] ss:$12 sps:$4 sm:$0xff]  }
 0x19b   : > { %v3587_v45 = vpop.f32.mrf.mxu0 }
 0x19c   : > { %9415 = vst [vmem:[%s11354_s12 + $0x80] sm:$0xff] %v8793_v42   ;;  %v4730_v12 = vadd.f32 %v11516_v19, %v3586_v2  ;;  %v9780_v36 = vpop.f32.mrf.mxu1  ;;  %v10553_v42 = vld [vmem:[%s11091_s17 + $0x4b8] ss:$12 sps:$4 sm:$0xff]  }
 0x19d   : > { %v3588_v10 = vpop.f32.mrf.mxu0  ;;  %v10548_v36 = vld [vmem:[%s11091_s17 + $0x484] ss:$12 sps:$4 sm:$0xff]  }
 0x19e   : > { %v3589_v52 = vadd.f32 %v11332_v60, %v3588_v10  ;;  %v11621_v40 = vpop.f32.mrf.mxu1  ;;  %9878 = vmatmul.mubr.msk.bf16.gmra.mxu1 %vm2993_vm2, %v10545_v9 }
 0x19f   : > { %v3590_v56 = vpop.f32.mrf.mxu0  ;;  %9881 = vmatprep.mubr.msk.bf16.mxu1 %vm11003_vm0, %v11002_v3 }
 0x1a0   : > { %v4733_v61 = vadd.f32 %v11526_v26, %v3589_v52  ;;  %v9783_v21 = vpop.f32.mrf.mxu1 }
 0x1a1   : > { %v3593_v15 = vpop.f32.mrf.mxu0  ;;  %3784 = vmatmul.mubr.bf16.gmra.mxu0 %v10522_v6 }
 0x1a2   : > { %v8798_v63 = vpack.c.bf16 %v4733_v61, %v4730_v12  ;;  %3791 = vmatprep.mubr.bf16.mxu0 %v10528_v13  ;;  %v3594_v19 = vadd.f32 %v11332_v60, %v3593_v15  ;;  %v11631_v53 = vpop.f32.mrf.mxu1  ;;  %v10538_v12 = vld [vmem:[%s11091_s17 + $0x450] ss:$12 sps:$4 sm:$0xff]  }
 0x1a3   : > { %v3595_v1 = vpop.f32.mrf.mxu0 }
 0x1a4   : > { %9416 = vst [vmem:[%s11354_s12 + $0x88] sm:$0xff] %v8798_v63   ;;  %v4738_v28 = vadd.f32 %v11531_v35, %v3594_v19  ;;  %v9784_v55 = vpop.f32.mrf.mxu1  ;;  %v10557_v63 = vld [vmem:[%s11091_s17 + $0x4d0] ss:$12 sps:$4 sm:$0xff]  }
 0x1a5   : > { %v3596_v26 = vpop.f32.mrf.mxu0  ;;  %v10552_v55 = vld [vmem:[%s11091_s17 + $0x49c] ss:$12 sps:$4 sm:$0xff]  }
 0x1a6   : > { %v3597_v8 = vadd.f32 %v11332_v60, %v3596_v26  ;;  %v11636_v59 = vpop.f32.mrf.mxu1  ;;  %9882 = vmatmul.mubr.msk.bf16.gmra.mxu1 %vm2993_vm2, %v10549_v25 }
 0x1a7   : > { %v3598_v11 = vpop.f32.mrf.mxu0  ;;  %9885 = vmatprep.mubr.msk.bf16.mxu1 %vm11003_vm0, %v11002_v3 }
 0x1a8   : > { %v4741_v14 = vadd.f32 %v11541_v44, %v3597_v8  ;;  %v9787_v37 = vpop.f32.mrf.mxu1 }
 0x1a9   : > { %v3601_v31 = vpop.f32.mrf.mxu0  ;;  %3792 = vmatmul.mubr.bf16.gmra.mxu0 %v10526_v22 }
 0x1aa   : > { %v8803_v16 = vpack.c.bf16 %v4741_v14, %v4738_v28  ;;  %3799 = vmatprep.mubr.bf16.mxu0 %v10532_v29  ;;  %v3602_v35 = vadd.f32 %v11332_v60, %v3601_v31  ;;  %v11646_v62 = vpop.f32.mrf.mxu1  ;;  %v10542_v28 = vld [vmem:[%s11091_s17 + $0x468] ss:$12 sps:$4 sm:$0xff]  }
 0x1ab   : > { %v3603_v18 = vpop.f32.mrf.mxu0 }
 0x1ac   : > { %9417 = vst [vmem:[%s11354_s12 + $0x90] sm:$0xff] %v8803_v16   ;;  %v4746_v47 = vadd.f32 %v11546_v43, %v3602_v35  ;;  %v9788_v10 = vpop.f32.mrf.mxu1  ;;  %v10561_v16 = vld [vmem:[%s11091_s17 + $0x4e8] ss:$12 sps:$4 sm:$0xff]  }
 0x1ad   : > { %v3604_v44 = vpop.f32.mrf.mxu0  ;;  %v10556_v10 = vld [vmem:[%s11091_s17 + $0x4b4] ss:$12 sps:$4 sm:$0xff]  }
 0x1ae   : > { %v3605_v24 = vadd.f32 %v11332_v60, %v3604_v44  ;;  %v11651_v13 = vpop.f32.mrf.mxu1  ;;  %9886 = vmatmul.mubr.msk.bf16.gmra.mxu1 %vm2993_vm2, %v10553_v42 }
 0x1af   : > { %v3606_v27 = vpop.f32.mrf.mxu0  ;;  %9889 = vmatprep.mubr.msk.bf16.mxu1 %vm11003_vm0, %v11002_v3 }
 0x1b0   : > { %v4749_v30 = vadd.f32 %v11556_v0, %v3605_v24  ;;  %v9791_v56 = vpop.f32.mrf.mxu1 }
 0x1b1   : > { %v3609_v51 = vpop.f32.mrf.mxu0  ;;  %3800 = vmatmul.mubr.bf16.gmra.mxu0 %v10530_v38 }
 0x1b2   : > { %v8808_v33 = vpack.c.bf16 %v4749_v30, %v4746_v47  ;;  %3807 = vmatprep.mubr.bf16.mxu0 %v10536_v48  ;;  %v3610_v43 = vadd.f32 %v11332_v60, %v3609_v51  ;;  %v11661_v15 = vpop.f32.mrf.mxu1  ;;  %v10546_v47 = vld [vmem:[%s11091_s17 + $0x480] ss:$12 sps:$4 sm:$0xff]  }
 0x1b3   : > { %v3611_v34 = vpop.f32.mrf.mxu0 }
 0x1b4   : > { %9418 = vst [vmem:[%s11354_s12 + $0x98] sm:$0xff] %v8808_v33   ;;  %v4754_v2 = vadd.f32 %v11561_v50, %v3610_v43  ;;  %v9792_v26 = vpop.f32.mrf.mxu1  ;;  %v10565_v33 = vld [vmem:[%s11091_s17 + $0x500] ss:$12 sps:$4 sm:$0xff]  }
 0x1b5   : > { %v3612_v0 = vpop.f32.mrf.mxu0  ;;  %v10560_v26 = vld [vmem:[%s11091_s17 + $0x4cc] ss:$12 sps:$4 sm:$0xff]  }
 0x1b6   : > { %v3613_v41 = vadd.f32 %v11332_v60, %v3612_v0  ;;  %v11666_v29 = vpop.f32.mrf.mxu1  ;;  %9890 = vmatmul.mubr.msk.bf16.gmra.mxu1 %vm2993_vm2, %v10557_v63 }
 0x1b7   : > { %v3614_v45 = vpop.f32.mrf.mxu0  ;;  %9893 = vmatprep.mubr.msk.bf16.mxu1 %vm11003_vm0, %v11002_v3 }
 0x1b8   : > { %v4757_v49 = vadd.f32 %v11571_v17, %v3613_v41  ;;  %v9795_v11 = vpop.f32.mrf.mxu1 }
 0x1b9   : > { %v3617_v6 = vpop.f32.mrf.mxu0  ;;  %3808 = vmatmul.mubr.bf16.gmra.mxu0 %v10534_v58 }
 0x1ba   : > { %v8813_v52 = vpack.c.bf16 %v4757_v49, %v4754_v2  ;;  %3815 = vmatprep.mubr.bf16.mxu0 %v10540_v4  ;;  %v3618_v50 = vadd.f32 %v11332_v60, %v3617_v6  ;;  %v11676_v31 = vpop.f32.mrf.mxu1  ;;  %v10550_v2 = vld [vmem:[%s11091_s17 + $0x498] ss:$12 sps:$4 sm:$0xff]  }
 0x1bb   : > { %v3619_v54 = vpop.f32.mrf.mxu0 }
 0x1bc   : > { %9419 = vst [vmem:[%s11354_s12 + $0xa0] sm:$0xff] %v8813_v52   ;;  %v4762_v19 = vadd.f32 %v11576_v57, %v3618_v50  ;;  %v9796_v44 = vpop.f32.mrf.mxu1  ;;  %v10569_v52 = vld [vmem:[%s11091_s17 + $0x518] ss:$12 sps:$4 sm:$0xff]  }
 0x1bd   : > { %v3620_v17 = vpop.f32.mrf.mxu0  ;;  %v10564_v44 = vld [vmem:[%s11091_s17 + $0x4e4] ss:$12 sps:$4 sm:$0xff]  }
 0x1be   : > { %v3621_v61 = vadd.f32 %v11332_v60, %v3620_v17  ;;  %v11681_v48 = vpop.f32.mrf.mxu1  ;;  %9894 = vmatmul.mubr.msk.bf16.gmra.mxu1 %vm2993_vm2, %v10561_v16 }
 0x1bf   : > { %v3622_v1 = vpop.f32.mrf.mxu0  ;;  %9897 = vmatprep.mubr.msk.bf16.mxu1 %vm11003_vm0, %v11002_v3 }
 0x1c0   : > { %v4765_v5 = vadd.f32 %v11586_v32, %v3621_v61  ;;  %v9799_v27 = vpop.f32.mrf.mxu1 }
 0x1c1   : > { %v3625_v22 = vpop.f32.mrf.mxu0  ;;  %3816 = vmatmul.mubr.bf16.gmra.mxu0 %v10538_v12 }
 0x1c2   : > { %v8818_v8 = vpack.c.bf16 %v4765_v5, %v4762_v19  ;;  %3823 = vmatprep.mubr.bf16.mxu0 %v10544_v20  ;;  %v3626_v57 = vadd.f32 %v11332_v60, %v3625_v22  ;;  %v11691_v51 = vpop.f32.mrf.mxu1  ;;  %v10554_v19 = vld [vmem:[%s11091_s17 + $0x4b0] ss:$12 sps:$4 sm:$0xff]  }
 0x1c3   : > { %v3627_v9 = vpop.f32.mrf.mxu0 }
 0x1c4   : > { %9420 = vst [vmem:[%s11354_s12 + $0xa8] sm:$0xff] %v8818_v8   ;;  %v4770_v35 = vadd.f32 %v11591_v7, %v3626_v57  ;;  %v9800_v0 = vpop.f32.mrf.mxu1  ;;  %v10573_v8 = vld [vmem:[%s11091_s17 + $0x530] ss:$12 sps:$4 sm:$0xff]  }
 0x1c5   : > { %v3628_v32 = vpop.f32.mrf.mxu0  ;;  %v10568_v0 = vld [vmem:[%s11091_s17 + $0x4fc] ss:$12 sps:$4 sm:$0xff]  }
 0x1c6   : > { %v3629_v14 = vadd.f32 %v11332_v60, %v3628_v32  ;;  %v11696_v4 = vpop.f32.mrf.mxu1  ;;  %9898 = vmatmul.mubr.msk.bf16.gmra.mxu1 %vm2993_vm2, %v10565_v33 }
 0x1c7   : > { %v3630_v18 = vpop.f32.mrf.mxu0  ;;  %9901 = vmatprep.mubr.msk.bf16.mxu1 %vm11003_vm0, %v11002_v3 }
 0x1c8   : > { %v4773_v21 = vadd.f32 %v11601_v39, %v3629_v14  ;;  %v9803_v42 = vpop.f32.mrf.mxu1 }
 0x1c9   : > { %v3633_v38 = vpop.f32.mrf.mxu0  ;;  %3824 = vmatmul.mubr.bf16.gmra.mxu0 %v10542_v28 }
 0x1ca   : > { %v8823_v24 = vpack.c.bf16 %v4773_v21, %v4770_v35  ;;  %3831 = vmatprep.mubr.bf16.mxu0 %v10548_v36  ;;  %v3634_v7 = vadd.f32 %v11332_v60, %v3633_v38  ;;  %v11711_v6 = vpop.f32.mrf.mxu1  ;;  %v10558_v35 = vld [vmem:[%s11091_s17 + $0x4c8] ss:$12 sps:$4 sm:$0xff]  }
 0x1cb   : > { %v3635_v25 = vpop.f32.mrf.mxu0 }
 0x1cc   : > { %9421 = vst [vmem:[%s11354_s12 + $0xb0] sm:$0xff] %v8823_v24   ;;  %v4778_v43 = vadd.f32 %v11606_v23, %v3634_v7  ;;  %v11705_v23 = vld [vmem:[%s13444_s2] ss:$0 sm:$0xff]  ;;  %v9804_v17 = vpop.f32.mrf.mxu1  ;;  %v10577_v24 = vld [vmem:[%s11091_s17 + $0x548] ss:$12 sps:$4 sm:$0xff]  }
 0x1cd   : > { %v3636_v39 = vpop.f32.mrf.mxu0  ;;  %v10572_v17 = vld [vmem:[%s11091_s17 + $0x514] ss:$12 sps:$4 sm:$0xff]  }
 0x1ce   : > { %v3637_v30 = vadd.f32 %v11332_v60, %v3636_v39  ;;  %v11716_v20 = vpop.f32.mrf.mxu1  ;;  %9902 = vmatmul.mubr.msk.bf16.gmra.mxu1 %vm2993_vm2, %v10569_v52 }
 0x1cf   : > { %v3638_v34 = vpop.f32.mrf.mxu0  ;;  %9905 = vmatprep.mubr.msk.bf16.mxu1 %vm11003_vm0, %v11002_v3 }
 0x1d0   : > { %v4781_v37 = vadd.f32 %v11616_v46, %v3637_v30  ;;  %v9807_v1 = vpop.f32.mrf.mxu1 }
 0x1d1   : > { %v3641_v58 = vpop.f32.mrf.mxu0  ;;  %3832 = vmatmul.mubr.bf16.gmra.mxu0 %v10546_v47 }
 0x1d2   : > { %v8828_v41 = vpack.c.bf16 %v4781_v37, %v4778_v43  ;;  %3839 = vmatprep.mubr.bf16.mxu0 %v10552_v55  ;;  %v3642_v46 = vadd.f32 %v11705_v23, %v3641_v58  ;;  %v11726_v22 = vpop.f32.mrf.mxu1  ;;  %v10562_v43 = vld [vmem:[%s11091_s17 + $0x4e0] ss:$12 sps:$4 sm:$0xff]  }
 0x1d3   : > { %v3643_v60 = vpop.f32.mrf.mxu0 }
 0x1d4   : > { %9422 = vst [vmem:[%s11354_s12 + $0xb8] sm:$0xff] %v8828_v41   ;;  %v4786_v50 = vadd.f32 %v11621_v40, %v3642_v46  ;;  %v9808_v32 = vpop.f32.mrf.mxu1  ;;  %v10581_v41 = vld [vmem:[%s11091_s17 + $0x560] ss:$12 sps:$4 sm:$0xff]  }
 0x1d5   : > { %v3644_v45 = vpop.f32.mrf.mxu0  ;;  %v10576_v32 = vld [vmem:[%s11091_s17 + $0x52c] ss:$12 sps:$4 sm:$0xff]  }
 0x1d6   : > { %v3645_v49 = vadd.f32 %v11705_v23, %v3644_v45  ;;  %v11731_v36 = vpop.f32.mrf.mxu1  ;;  %9906 = vmatmul.mubr.msk.bf16.gmra.mxu1 %vm2993_vm2, %v10573_v8 }
 0x1d7   : > { %v3646_v54 = vpop.f32.mrf.mxu0  ;;  %9909 = vmatprep.mubr.msk.bf16.mxu1 %vm11003_vm0, %v11002_v3 }
 0x1d8   : > { %v4789_v56 = vadd.f32 %v11631_v53, %v3645_v49  ;;  %v9811_v18 = vpop.f32.mrf.mxu1 }
 0x1d9   : > { %v3649_v12 = vpop.f32.mrf.mxu0  ;;  %3840 = vmatmul.mubr.bf16.gmra.mxu0 %v10550_v2 }
 0x1da   : > { %v8833_v61 = vpack.c.bf16 %v4789_v56, %v4786_v50  ;;  %3847 = vmatprep.mubr.bf16.mxu0 %v10556_v10  ;;  %v3650_v40 = vadd.f32 %v11705_v23, %v3649_v12  ;;  %v11741_v38 = vpop.f32.mrf.mxu1  ;;  %v10566_v50 = vld [vmem:[%s11091_s17 + $0x4f8] ss:$12 sps:$4 sm:$0xff]  }
 0x1db   : > { %v3651_v63 = vpop.f32.mrf.mxu0 }
 0x1dc   : > { %9423 = vst [vmem:[%s11354_s12 + $0xc0] sm:$0xff] %v8833_v61   ;;  %v4794_v57 = vadd.f32 %v11636_v59, %v3650_v40  ;;  %v9812_v39 = vpop.f32.mrf.mxu1  ;;  %v10585_v61 = vld [vmem:[%s11091_s17 + $0x578] ss:$12 sps:$4 sm:$0xff]  }
 0x1dd   : > { %v3652_v53 = vpop.f32.mrf.mxu0  ;;  %v10580_v39 = vld [vmem:[%s11091_s17 + $0x544] ss:$12 sps:$4 sm:$0xff]  }
 0x1de   : > { %v3653_v5 = vadd.f32 %v11705_v23, %v3652_v53  ;;  %v11746_v55 = vpop.f32.mrf.mxu1  ;;  %9910 = vmatmul.mubr.msk.bf16.gmra.mxu1 %vm2993_vm2, %v10577_v24 }
 0x1df   : > { %v3654_v9 = vpop.f32.mrf.mxu0  ;;  %9913 = vmatprep.mubr.msk.bf16.mxu1 %vm11003_vm0, %v11002_v3 }
 0x1e0   : > { %v4797_v11 = vadd.f32 %v11646_v62, %v3653_v5  ;;  %v9815_v34 = vpop.f32.mrf.mxu1 }
 0x1e1   : > { %v3657_v28 = vpop.f32.mrf.mxu0  ;;  %3848 = vmatmul.mubr.bf16.gmra.mxu0 %v10554_v19 }
 0x1e2   : > { %v8838_v14 = vpack.c.bf16 %v4797_v11, %v4794_v57  ;;  %3855 = vmatprep.mubr.bf16.mxu0 %v10560_v26  ;;  %v3658_v59 = vadd.f32 %v11705_v23, %v3657_v28  ;;  %v11756_v58 = vpop.f32.mrf.mxu1  ;;  %v10570_v57 = vld [vmem:[%s11091_s17 + $0x510] ss:$12 sps:$4 sm:$0xff]  }
 0x1e3   : > { %v3659_v16 = vpop.f32.mrf.mxu0 }
 0x1e4   : > { %9424 = vst [vmem:[%s11354_s12 + $0xc8] sm:$0xff] %v8838_v14   ;;  %v4802_v7 = vadd.f32 %v11651_v13, %v3658_v59  ;;  %v9816_v45 = vpop.f32.mrf.mxu1  ;;  %v10589_v14 = vld [vmem:[%s11091_s17 + $0x590] ss:$12 sps:$4 sm:$0xff]  }
 0x1e5   : > { %v3660_v62 = vpop.f32.mrf.mxu0  ;;  %v10584_v45 = vld [vmem:[%s11091_s17 + $0x55c] ss:$12 sps:$4 sm:$0xff]  }
 0x1e6   : > { %v3661_v21 = vadd.f32 %v11705_v23, %v3660_v62  ;;  %v11761_v10 = vpop.f32.mrf.mxu1  ;;  %9914 = vmatmul.mubr.msk.bf16.gmra.mxu1 %vm2993_vm2, %v10581_v41 }
 0x1e7   : > { %v3662_v25 = vpop.f32.mrf.mxu0  ;;  %9917 = vmatprep.mubr.msk.bf16.mxu1 %vm11003_vm0, %v11002_v3 }
 0x1e8   : > { %v4805_v27 = vadd.f32 %v11661_v15, %v3661_v21  ;;  %v9819_v54 = vpop.f32.mrf.mxu1 }
 0x1e9   : > { %v3665_v47 = vpop.f32.mrf.mxu0  ;;  %3856 = vmatmul.mubr.bf16.gmra.mxu0 %v10558_v35 }
 0x1ea   : > { %v8843_v30 = vpack.c.bf16 %v4805_v27, %v4802_v7  ;;  %3863 = vmatprep.mubr.bf16.mxu0 %v10564_v44  ;;  %v3666_v13 = vadd.f32 %v11705_v23, %v3665_v47  ;;  %v11771_v12 = vpop.f32.mrf.mxu1  ;;  %v10574_v7 = vld [vmem:[%s11091_s17 + $0x528] ss:$12 sps:$4 sm:$0xff]  }
 0x1eb   : > { %v3667_v33 = vpop.f32.mrf.mxu0 }
 0x1ec   : > { %9425 = vst [vmem:[%s11354_s12 + $0xd0] sm:$0xff] %v8843_v30   ;;  %v4810_v46 = vadd.f32 %v11666_v29, %v3666_v13  ;;  %v9820_v53 = vpop.f32.mrf.mxu1  ;;  %v10593_v30 = vld [vmem:[%s11091_s17 + $0x5a8] ss:$12 sps:$4 sm:$0xff]  }
 0x1ed   : > { %v3668_v15 = vpop.f32.mrf.mxu0  ;;  %v10588_v53 = vld [vmem:[%s11091_s17 + $0x574] ss:$12 sps:$4 sm:$0xff]  }
 0x1ee   : > { %v3669_v37 = vadd.f32 %v11705_v23, %v3668_v15  ;;  %v11776_v26 = vpop.f32.mrf.mxu1  ;;  %9918 = vmatmul.mubr.msk.bf16.gmra.mxu1 %vm2993_vm2, %v10585_v61 }
 0x1ef   : > { %v3670_v60 = vpop.f32.mrf.mxu0  ;;  %9921 = vmatprep.mubr.msk.bf16.mxu1 %vm11003_vm0, %v11002_v3 }
 0x1f0   : > { %v4813_v42 = vadd.f32 %v11676_v31, %v3669_v37  ;;  %v9823_v9 = vpop.f32.mrf.mxu1 }
 0x1f1   : > { %v3673_v2 = vpop.f32.mrf.mxu0  ;;  %3864 = vmatmul.mubr.bf16.gmra.mxu0 %v10562_v43 }
 0x1f2   : > { %v8848_v49 = vpack.c.bf16 %v4813_v42, %v4810_v46  ;;  %3871 = vmatprep.mubr.bf16.mxu0 %v10568_v0  ;;  %v3674_v29 = vadd.f32 %v11705_v23, %v3673_v2  ;;  %v11786_v28 = vpop.f32.mrf.mxu1  ;;  %v10578_v46 = vld [vmem:[%s11091_s17 + $0x540] ss:$12 sps:$4 sm:$0xff]  }
 0x1f3   : > { %v3675_v52 = vpop.f32.mrf.mxu0 }
 0x1f4   : > { %9426 = vst [vmem:[%s11354_s12 + $0xd8] sm:$0xff] %v8848_v49   ;;  %v4818_v40 = vadd.f32 %v11681_v48, %v3674_v29  ;;  %v9824_v62 = vpop.f32.mrf.mxu1  ;;  %v10597_v49 = vld [vmem:[%s11091_s17 + $0x5c0] ss:$12 sps:$4 sm:$0xff]  }
 0x1f5   : > { %v3676_v31 = vpop.f32.mrf.mxu0  ;;  %v10592_v62 = vld [vmem:[%s11091_s17 + $0x58c] ss:$12 sps:$4 sm:$0xff]  }
 0x1f6   : > { %v3677_v56 = vadd.f32 %v11705_v23, %v3676_v31  ;;  %v11791_v44 = vpop.f32.mrf.mxu1  ;;  %9922 = vmatmul.mubr.msk.bf16.gmra.mxu1 %vm2993_vm2, %v10589_v14 }
 0x1f7   : > { %v3678_v63 = vpop.f32.mrf.mxu0  ;;  %9925 = vmatprep.mubr.msk.bf16.mxu1 %vm11003_vm0, %v11002_v3 }
 0x1f8   : > { %v4821_v1 = vadd.f32 %v11691_v51, %v3677_v56  ;;  %v9827_v25 = vpop.f32.mrf.mxu1 }
 0x1f9   : > { %v3681_v19 = vpop.f32.mrf.mxu0  ;;  %3872 = vmatmul.mubr.bf16.gmra.mxu0 %v10566_v50 }
 0x1fa   : > { %v8853_v5 = vpack.c.bf16 %v4821_v1, %v4818_v40  ;;  %3879 = vmatprep.mubr.bf16.mxu0 %v10572_v17  ;;  %v3682_v48 = vadd.f32 %v11705_v23, %v3681_v19  ;;  %v11801_v47 = vpop.f32.mrf.mxu1  ;;  %v10582_v40 = vld [vmem:[%s11091_s17 + $0x558] ss:$12 sps:$4 sm:$0xff]  }
 0x1fb   : > { %v3683_v8 = vpop.f32.mrf.mxu0 }
 0x1fc   : > { %9427 = vst [vmem:[%s11354_s12 + $0xe0] sm:$0xff] %v8853_v5   ;;  %v4826_v59 = vadd.f32 %v11696_v4, %v3682_v48  ;;  %v9828_v15 = vpop.f32.mrf.mxu1  ;;  %v10601_v5 = vld [vmem:[%s11091_s17 + $0x5d8] ss:$12 sps:$4 sm:$0xff]  }
 0x1fd   : > { %v3684_v51 = vpop.f32.mrf.mxu0  ;;  %v10596_v15 = vld [vmem:[%s11091_s17 + $0x5a4] ss:$12 sps:$4 sm:$0xff]  }
 0x1fe   : > { %v3685_v11 = vadd.f32 %v11705_v23, %v3684_v51  ;;  %v11806_v0 = vpop.f32.mrf.mxu1  ;;  %9926 = vmatmul.mubr.msk.bf16.gmra.mxu1 %vm2993_vm2, %v10593_v30 }
 0x1ff   : > { %v3686_v16 = vpop.f32.mrf.mxu0  ;;  %9929 = vmatprep.mubr.msk.bf16.mxu1 %vm11003_vm0, %v11002_v3 }
 0x200   : > { %v4829_v18 = vadd.f32 %v11711_v6, %v3685_v11  ;;  %v9831_v60 = vpop.f32.mrf.mxu1 }
 0x201   : > { %v3689_v35 = vpop.f32.mrf.mxu0  ;;  %3880 = vmatmul.mubr.bf16.gmra.mxu0 %v10570_v57 }
 0x202   : > { %v8858_v21 = vpack.c.bf16 %v4829_v18, %v4826_v59  ;;  %3887 = vmatprep.mubr.bf16.mxu0 %v10576_v32  ;;  %v3690_v4 = vadd.f32 %v11705_v23, %v3689_v35  ;;  %v11816_v2 = vpop.f32.mrf.mxu1  ;;  %v10586_v59 = vld [vmem:[%s11091_s17 + $0x570] ss:$12 sps:$4 sm:$0xff]  }
 0x203   : > { %v3691_v24 = vpop.f32.mrf.mxu0 }
 0x204   : > { %9428 = vst [vmem:[%s11354_s12 + $0xe8] sm:$0xff] %v8858_v21   ;;  %v4834_v13 = vadd.f32 %v11716_v20, %v3690_v4  ;;  %v9832_v31 = vpop.f32.mrf.mxu1  ;;  %v10605_v21 = vld [vmem:[%s11091_s17 + $0x5f0] ss:$12 sps:$4 sm:$0xff]  }
 0x205   : > { %v3692_v6 = vpop.f32.mrf.mxu0  ;;  %v10600_v31 = vld [vmem:[%s11091_s17 + $0x5bc] ss:$12 sps:$4 sm:$0xff]  }
 0x206   : > { %v3693_v27 = vadd.f32 %v11705_v23, %v3692_v6  ;;  %v11821_v17 = vpop.f32.mrf.mxu1  ;;  %9930 = vmatmul.mubr.msk.bf16.gmra.mxu1 %vm2993_vm2, %v10597_v49 }
 0x207   : > { %v3694_v33 = vpop.f32.mrf.mxu0  ;;  %9933 = vmatprep.mubr.msk.bf16.mxu1 %vm11003_vm0, %v11002_v3 }
 0x208   : > { %v4837_v34 = vadd.f32 %v11726_v22, %v3693_v27  ;;  %v9835_v63 = vpop.f32.mrf.mxu1 }
 0x209   : > { %v3697_v43 = vpop.f32.mrf.mxu0  ;;  %3888 = vmatmul.mubr.bf16.gmra.mxu0 %v10574_v7 }
 0x20a   : > { %v8863_v37 = vpack.c.bf16 %v4837_v34, %v4834_v13  ;;  %3895 = vmatprep.mubr.bf16.mxu0 %v10580_v39  ;;  %v3698_v20 = vadd.f32 %v11705_v23, %v3697_v43  ;;  %v11831_v19 = vpop.f32.mrf.mxu1  ;;  %v10590_v13 = vld [vmem:[%s11091_s17 + $0x588] ss:$12 sps:$4 sm:$0xff]  }
 0x20b   : > { %v3699_v41 = vpop.f32.mrf.mxu0 }
 0x20c   : > { %9429 = vst [vmem:[%s11354_s12 + $0xf0] sm:$0xff] %v8863_v37   ;;  %v4842_v29 = vadd.f32 %v11731_v36, %v3698_v20  ;;  %v9836_v51 = vpop.f32.mrf.mxu1  ;;  %v10609_v37 = vld [vmem:[%s11091_s17 + $0x608] ss:$12 sps:$4 sm:$0xff]  }
 0x20d   : > { %v3700_v22 = vpop.f32.mrf.mxu0  ;;  %v10604_v51 = vld [vmem:[%s11091_s17 + $0x5d4] ss:$12 sps:$4 sm:$0xff]  }
 0x20e   : > { %v3701_v42 = vadd.f32 %v11705_v23, %v3700_v22  ;;  %v11836_v32 = vpop.f32.mrf.mxu1  ;;  %9934 = vmatmul.mubr.msk.bf16.gmra.mxu1 %vm2993_vm2, %v10601_v5 }
 0x20f   : > { %v3702_v52 = vpop.f32.mrf.mxu0  ;;  %9937 = vmatprep.mubr.msk.bf16.mxu1 %vm11003_vm0, %v11002_v3 }
 0x210   : > { %v4845_v54 = vadd.f32 %v11741_v38, %v3701_v42  ;;  %v9839_v16 = vpop.f32.mrf.mxu1 }
 0x211   : > { %v3705_v50 = vpop.f32.mrf.mxu0  ;;  %3896 = vmatmul.mubr.bf16.gmra.mxu0 %v10578_v46 }
 0x212   : > { %v8868_v56 = vpack.c.bf16 %v4845_v54, %v4842_v29  ;;  %3903 = vmatprep.mubr.bf16.mxu0 %v10584_v45  ;;  %v3706_v36 = vadd.f32 %v11705_v23, %v3705_v50  ;;  %v11846_v35 = vpop.f32.mrf.mxu1  ;;  %v10594_v29 = vld [vmem:[%s11091_s17 + $0x5a0] ss:$12 sps:$4 sm:$0xff]  }
 0x213   : > { %v3707_v61 = vpop.f32.mrf.mxu0 }
 0x214   : > { %9430 = vst [vmem:[%s11354_s12 + $0xf8] sm:$0xff] %v8868_v56   ;;  %v4850_v48 = vadd.f32 %v11746_v55, %v3706_v36  ;;  %v9840_v6 = vpop.f32.mrf.mxu1  ;;  %v10613_v56 = vld [vmem:[%s11091_s17 + $0x620] ss:$12 sps:$4 sm:$0xff]  }
 0x215   : > { %v3708_v38 = vpop.f32.mrf.mxu0  ;;  %v10608_v6 = vld [vmem:[%s11091_s17 + $0x5ec] ss:$12 sps:$4 sm:$0xff]  }
 0x216   : > { %v3709_v1 = vadd.f32 %v11705_v23, %v3708_v38  ;;  %v11851_v39 = vpop.f32.mrf.mxu1  ;;  %9938 = vmatmul.mubr.msk.bf16.gmra.mxu1 %vm2993_vm2, %v10605_v21 }
 0x217   : > { %v3710_v8 = vpop.f32.mrf.mxu0  ;;  %9941 = vmatprep.mubr.msk.bf16.mxu1 %vm11003_vm0, %v11002_v3 }
 0x218   : > { %v4853_v9 = vadd.f32 %v11756_v58, %v3709_v1  ;;  %v9843_v33 = vpop.f32.mrf.mxu1 }
 0x219   : > { %v3713_v57 = vpop.f32.mrf.mxu0  ;;  %3904 = vmatmul.mubr.bf16.gmra.mxu0 %v10582_v40 }
 0x21a   : > { %v8873_v11 = vpack.c.bf16 %v4853_v9, %v4850_v48  ;;  %3911 = vmatprep.mubr.bf16.mxu0 %v10588_v53  ;;  %v3714_v55 = vadd.f32 %v11705_v23, %v3713_v57  ;;  %v11861_v43 = vpop.f32.mrf.mxu1  ;;  %v10598_v48 = vld [vmem:[%s11091_s17 + $0x5b8] ss:$12 sps:$4 sm:$0xff]  }
 0x21b   : > { %v3715_v14 = vpop.f32.mrf.mxu0 }
 0x21c   : > { %9431 = vst [vmem:[%s11354_s12 + $0x100] sm:$0xff] %v8873_v11   ;;  %v4858_v4 = vadd.f32 %v11761_v10, %v3714_v55  ;;  %v9844_v22 = vpop.f32.mrf.mxu1  ;;  %v10617_v11 = vld [vmem:[%s11091_s17 + $0x638] ss:$12 sps:$4 sm:$0xff]  }
 0x21d   : > { %v3716_v58 = vpop.f32.mrf.mxu0  ;;  %v10612_v22 = vld [vmem:[%s11091_s17 + $0x604] ss:$12 sps:$4 sm:$0xff]  }
 0x21e   : > { %v3717_v18 = vadd.f32 %v11705_v23, %v3716_v58  ;;  %v11866_v45 = vpop.f32.mrf.mxu1  ;;  %9942 = vmatmul.mubr.msk.bf16.gmra.mxu1 %vm2993_vm2, %v10609_v37 }
 0x21f   : > { %v3718_v24 = vpop.f32.mrf.mxu0  ;;  %9945 = vmatprep.mubr.msk.bf16.mxu1 %vm11003_vm0, %v11002_v3 }
 0x220   : > { %v4861_v25 = vadd.f32 %v11771_v12, %v3717_v18  ;;  %v9847_v52 = vpop.f32.mrf.mxu1 }
 0x221   : > { %v3721_v7 = vpop.f32.mrf.mxu0  ;;  %3912 = vmatmul.mubr.bf16.gmra.mxu0 %v10586_v59 }
 0x222   : > { %v8878_v27 = vpack.c.bf16 %v4861_v25, %v4858_v4  ;;  %3919 = vmatprep.mubr.bf16.mxu0 %v10592_v62  ;;  %v3722_v10 = vadd.f32 %v11705_v23, %v3721_v7  ;;  %v11876_v50 = vpop.f32.mrf.mxu1  ;;  %v10602_v4 = vld [vmem:[%s11091_s17 + $0x5d0] ss:$12 sps:$4 sm:$0xff]  }
 0x223   : > { %v3723_v30 = vpop.f32.mrf.mxu0 }
 0x224   : > { %9432 = vst [vmem:[%s11354_s12 + $0x108] sm:$0xff] %v8878_v27   ;;  %v4866_v20 = vadd.f32 %v11776_v26, %v3722_v10  ;;  %v9848_v38 = vpop.f32.mrf.mxu1  ;;  %v10621_v27 = vld [vmem:[%s11091_s17 + $0x650] ss:$12 sps:$4 sm:$0xff]  }
 0x225   : > { %v3724_v12 = vpop.f32.mrf.mxu0  ;;  %v10616_v38 = vld [vmem:[%s11091_s17 + $0x61c] ss:$12 sps:$4 sm:$0xff]  }
 0x226   : > { %v3725_v34 = vadd.f32 %v11705_v23, %v3724_v12  ;;  %v11881_v53 = vpop.f32.mrf.mxu1  ;;  %9946 = vmatmul.mubr.msk.bf16.gmra.mxu1 %vm2993_vm2, %v10613_v56 }
 0x227   : > { %v3726_v41 = vpop.f32.mrf.mxu0  ;;  %9949 = vmatprep.mubr.msk.bf16.mxu1 %vm11003_vm0, %v11002_v3 }
 0x228   : > { %v4869_v60 = vadd.f32 %v11786_v28, %v3725_v34  ;;  %v9851_v8 = vpop.f32.mrf.mxu1 }
 0x229   : > { %v3729_v46 = vpop.f32.mrf.mxu0  ;;  %3920 = vmatmul.mubr.bf16.gmra.mxu0 %v10590_v13 }
 0x22a   : > { %v8883_v42 = vpack.c.bf16 %v4869_v60, %v4866_v20  ;;  %3927 = vmatprep.mubr.bf16.mxu0 %v10596_v15  ;;  %v3730_v26 = vadd.f32 %v11705_v23, %v3729_v46  ;;  %v11891_v57 = vpop.f32.mrf.mxu1  ;;  %v10606_v20 = vld [vmem:[%s11091_s17 + $0x5e8] ss:$12 sps:$4 sm:$0xff]  }
 0x22b   : > { %v3731_v49 = vpop.f32.mrf.mxu0 }
 0x22c   : > { %9433 = vst [vmem:[%s11354_s12 + $0x110] sm:$0xff] %v8883_v42   ;;  %v4874_v36 = vadd.f32 %v11791_v44, %v3730_v26  ;;  %v9852_v58 = vpop.f32.mrf.mxu1  ;;  %v10625_v42 = vld [vmem:[%s11091_s17 + $0x668] ss:$12 sps:$4 sm:$0xff]  }
 0x22d   : > { %v3732_v28 = vpop.f32.mrf.mxu0  ;;  %v10620_v58 = vld [vmem:[%s11091_s17 + $0x634] ss:$12 sps:$4 sm:$0xff]  }
 0x22e   : > { %v3733_v54 = vadd.f32 %v11705_v23, %v3732_v28  ;;  %v11896_v62 = vpop.f32.mrf.mxu1  ;;  %9950 = vmatmul.mubr.msk.bf16.gmra.mxu1 %vm2993_vm2, %v10617_v11 }
 0x22f   : > { %v3734_v61 = vpop.f32.mrf.mxu0  ;;  %9953 = vmatprep.mubr.msk.bf16.mxu1 %vm11003_vm0, %v11002_v3 }
 0x230   : > { %v4877_v63 = vadd.f32 %v11801_v47, %v3733_v54  ;;  %v9855_v24 = vpop.f32.mrf.mxu1 }
 0x231   : > { %v3737_v40 = vpop.f32.mrf.mxu0  ;;  %3928 = vmatmul.mubr.bf16.gmra.mxu0 %v10594_v29 }
 0x232   : > { %v8888_v1 = vpack.c.bf16 %v4877_v63, %v4874_v36  ;;  %3935 = vmatprep.mubr.bf16.mxu0 %v10600_v31  ;;  %v3738_v44 = vadd.f32 %v11705_v23, %v3737_v40  ;;  %v11906_v7 = vpop.f32.mrf.mxu1  ;;  %v10610_v36 = vld [vmem:[%s11091_s17 + $0x600] ss:$12 sps:$4 sm:$0xff]  }
 0x233   : > { %v3739_v5 = vpop.f32.mrf.mxu0 }
 0x234   : > { %9434 = vst [vmem:[%s11354_s12 + $0x118] sm:$0xff] %v8888_v1   ;;  %v4882_v55 = vadd.f32 %v11806_v0, %v3738_v44  ;;  %v9856_v12 = vpop.f32.mrf.mxu1  ;;  %v10629_v1 = vld [vmem:[%s11091_s17 + $0x680] ss:$12 sps:$4 sm:$0xff]  }
 0x235   : > { %v3740_v47 = vpop.f32.mrf.mxu0  ;;  %v10624_v12 = vld [vmem:[%s11091_s17 + $0x64c] ss:$12 sps:$4 sm:$0xff]  }
 0x236   : > { %v3741_v9 = vadd.f32 %v11705_v23, %v3740_v47  ;;  %v11911_v15 = vpop.f32.mrf.mxu1  ;;  %9954 = vmatmul.mubr.msk.bf16.gmra.mxu1 %vm2993_vm2, %v10621_v27 }
 0x237   : > { %v3742_v14 = vpop.f32.mrf.mxu0  ;;  %9957 = vmatprep.mubr.msk.bf16.mxu1 %vm11003_vm0, %v11002_v3 }
 0x238   : > { %v4885_v16 = vadd.f32 %v11816_v2, %v3741_v9  ;;  %v9859_v41 = vpop.f32.mrf.mxu1 }
 0x239   : > { %v3745_v59 = vpop.f32.mrf.mxu0  ;;  %3936 = vmatmul.mubr.bf16.gmra.mxu0 %v10598_v48 }
 0x23a   : > { %v8893_v18 = vpack.c.bf16 %v4885_v16, %v4882_v55  ;;  %3943 = vmatprep.mubr.bf16.mxu0 %v10604_v51  ;;  %v3746_v0 = vadd.f32 %v11705_v23, %v3745_v59  ;;  %v11921_v46 = vpop.f32.mrf.mxu1  ;;  %v10614_v55 = vld [vmem:[%s11091_s17 + $0x618] ss:$12 sps:$4 sm:$0xff]  }
 0x23b   : > { %v3747_v21 = vpop.f32.mrf.mxu0 }
 0x23c   : > { %9435 = vst [vmem:[%s11354_s12 + $0x120] sm:$0xff] %v8893_v18   ;;  %v4890_v10 = vadd.f32 %v11821_v17, %v3746_v0  ;;  %v9860_v28 = vpop.f32.mrf.mxu1  ;;  %v10633_v18 = vld [vmem:[%s11091_s17 + $0x698] ss:$12 sps:$4 sm:$0xff]  }
 0x23d   : > { %v3748_v2 = vpop.f32.mrf.mxu0  ;;  %v10628_v28 = vld [vmem:[%s11091_s17 + $0x664] ss:$12 sps:$4 sm:$0xff]  }
 0x23e   : > { %v3749_v25 = vadd.f32 %v11705_v23, %v3748_v2  ;;  %v11926_v31 = vpop.f32.mrf.mxu1  ;;  %9958 = vmatmul.mubr.msk.bf16.gmra.mxu1 %vm2993_vm2, %v10625_v42 }
 0x23f   : > { %v3750_v30 = vpop.f32.mrf.mxu0  ;;  %9961 = vmatprep.mubr.msk.bf16.mxu1 %vm11003_vm0, %v11002_v3 }
 0x240   : > { %v4893_v33 = vadd.f32 %v11831_v19, %v3749_v25  ;;  %v9863_v61 = vpop.f32.mrf.mxu1 }
 0x241   : > { %v3753_v13 = vpop.f32.mrf.mxu0  ;;  %3944 = vmatmul.mubr.bf16.gmra.mxu0 %v10602_v4 }
 0x242   : > { %v8898_v34 = vpack.c.bf16 %v4893_v33, %v4890_v10  ;;  %3951 = vmatprep.mubr.bf16.mxu0 %v10608_v6  ;;  %v3754_v17 = vadd.f32 %v11705_v23, %v3753_v13  ;;  %v11936_v40 = vpop.f32.mrf.mxu1  ;;  %v10618_v10 = vld [vmem:[%s11091_s17 + $0x630] ss:$12 sps:$4 sm:$0xff]  }
 0x243   : > { %v3755_v37 = vpop.f32.mrf.mxu0 }
 0x244   : > { %9436 = vst [vmem:[%s11354_s12 + $0x128] sm:$0xff] %v8898_v34   ;;  %v4898_v26 = vadd.f32 %v11836_v32, %v3754_v17  ;;  %v9864_v47 = vpop.f32.mrf.mxu1  ;;  %v10637_v34 = vld [vmem:[%s11091_s17 + $0x6b0] ss:$12 sps:$4 sm:$0xff]  }
 0x245   : > { %v3756_v19 = vpop.f32.mrf.mxu0  ;;  %v10632_v47 = vld [vmem:[%s11091_s17 + $0x67c] ss:$12 sps:$4 sm:$0xff]  }
 0x246   : > { %v3757_v60 = vadd.f32 %v11705_v23, %v3756_v19  ;;  %v11941_v51 = vpop.f32.mrf.mxu1  ;;  %9962 = vmatmul.mubr.msk.bf16.gmra.mxu1 %vm2993_vm2, %v10629_v1 }
 0x247   : > { %v3758_v49 = vpop.f32.mrf.mxu0  ;;  %9965 = vmatprep.mubr.msk.bf16.mxu1 %vm11003_vm0, %v11002_v3 }
 0x248   : > { %v4901_v52 = vadd.f32 %v11846_v35, %v3757_v60  ;;  %v9867_v14 = vpop.f32.mrf.mxu1 }
 0x249   : > { %v3761_v29 = vpop.f32.mrf.mxu0  ;;  %3952 = vmatmul.mubr.bf16.gmra.mxu0 %v10606_v20 }
 0x24a   : > { %v8903_v54 = vpack.c.bf16 %v4901_v52, %v4898_v26  ;;  %3959 = vmatprep.mubr.bf16.mxu0 %v10612_v22  ;;  %v3762_v32 = vadd.f32 %v11705_v23, %v3761_v29  ;;  %v11951_v59 = vpop.f32.mrf.mxu1  ;;  %v10622_v26 = vld [vmem:[%s11091_s17 + $0x648] ss:$12 sps:$4 sm:$0xff]  }
 0x24b   : > { %v3763_v56 = vpop.f32.mrf.mxu0 }
 0x24c   : > { %9437 = vst [vmem:[%s11354_s12 + $0x130] sm:$0xff] %v8903_v54   ;;  %v4906_v44 = vadd.f32 %v11851_v39, %v3762_v32  ;;  %v9868_v2 = vpop.f32.mrf.mxu1  ;;  %v10641_v54 = vld [vmem:[%s11091_s17 + $0x6c8] ss:$12 sps:$4 sm:$0xff]  }
 0x24d   : > { %v3764_v35 = vpop.f32.mrf.mxu0  ;;  %v10636_v2 = vld [vmem:[%s11091_s17 + $0x694] ss:$12 sps:$4 sm:$0xff]  }
 0x24e   : > { %v3765_v63 = vadd.f32 %v11705_v23, %v3764_v35  ;;  %v11956_v6 = vpop.f32.mrf.mxu1  ;;  %9966 = vmatmul.mubr.msk.bf16.gmra.mxu1 %vm2993_vm2, %v10633_v18 }
 0x24f   : > { %v3766_v5 = vpop.f32.mrf.mxu0  ;;  %9969 = vmatprep.mubr.msk.bf16.mxu1 %vm11003_vm0, %v11002_v3 }
 0x250   : > { %v4909_v8 = vadd.f32 %v11861_v43, %v3765_v63  ;;  %v9871_v30 = vpop.f32.mrf.mxu1 }
 0x251   : > { %v3769_v48 = vpop.f32.mrf.mxu0  ;;  %3960 = vmatmul.mubr.bf16.gmra.mxu0 %v10610_v36 }
 0x252   : > { %v8908_v9 = vpack.c.bf16 %v4909_v8, %v4906_v44  ;;  %3967 = vmatprep.mubr.bf16.mxu0 %v10616_v38  ;;  %v3770_v39 = vadd.f32 %v11705_v23, %v3769_v48  ;;  %v11966_v13 = vpop.f32.mrf.mxu1  ;;  %v10626_v44 = vld [vmem:[%s11091_s17 + $0x660] ss:$12 sps:$4 sm:$0xff]  }
 0x253   : > { %v3771_v11 = vpop.f32.mrf.mxu0 }
 0x254   : > { %9438 = vst [vmem:[%s11354_s12 + $0x138] sm:$0xff] %v8908_v9   ;;  %v4914_v0 = vadd.f32 %v11866_v45, %v3770_v39  ;;  %v9872_v19 = vpop.f32.mrf.mxu1  ;;  %v10645_v9 = vld [vmem:[%s11091_s17 + $0x6e0] ss:$12 sps:$4 sm:$0xff]  }
 0x255   : > { %v3772_v43 = vpop.f32.mrf.mxu0  ;;  %v10640_v19 = vld [vmem:[%s11091_s17 + $0x6ac] ss:$12 sps:$4 sm:$0xff]  }
 0x256   : > { %v3773_v16 = vadd.f32 %v11705_v23, %v3772_v43  ;;  %v11971_v22 = vpop.f32.mrf.mxu1  ;;  %9970 = vmatmul.mubr.msk.bf16.gmra.mxu1 %vm2993_vm2, %v10637_v34 }
 0x257   : > { %v3774_v21 = vpop.f32.mrf.mxu0  ;;  %9973 = vmatprep.mubr.msk.bf16.mxu1 %vm11003_vm0, %v11002_v3 }
 0x258   : > { %v4917_v24 = vadd.f32 %v11876_v50, %v3773_v16  ;;  %v9875_v49 = vpop.f32.mrf.mxu1 }
 0x259   : > { %v3777_v4 = vpop.f32.mrf.mxu0  ;;  %3968 = vmatmul.mubr.bf16.gmra.mxu0 %v10614_v55 }
 0x25a   : > { %v8913_v25 = vpack.c.bf16 %v4917_v24, %v4914_v0  ;;  %3975 = vmatprep.mubr.bf16.mxu0 %v10620_v58  ;;  %v3778_v45 = vadd.f32 %v11705_v23, %v3777_v4  ;;  %v11981_v29 = vpop.f32.mrf.mxu1  ;;  %v10630_v0 = vld [vmem:[%s11091_s17 + $0x678] ss:$12 sps:$4 sm:$0xff]  }
 0x25b   : > { %v3779_v27 = vpop.f32.mrf.mxu0 }
 0x25c   : > { %9439 = vst [vmem:[%s11354_s12 + $0x140] sm:$0xff] %v8913_v25   ;;  %v4922_v17 = vadd.f32 %v11881_v53, %v3778_v45  ;;  %v9876_v35 = vpop.f32.mrf.mxu1  ;;  %v10649_v25 = vld [vmem:[%s11091_s17 + $0x6f8] ss:$12 sps:$4 sm:$0xff]  }
 0x25d   : > { %v3780_v50 = vpop.f32.mrf.mxu0  ;;  %v10644_v35 = vld [vmem:[%s11091_s17 + $0x6c4] ss:$12 sps:$4 sm:$0xff]  }
 0x25e   : > { %v3781_v33 = vadd.f32 %v11705_v23, %v3780_v50  ;;  %v11986_v38 = vpop.f32.mrf.mxu1  ;;  %9974 = vmatmul.mubr.msk.bf16.gmra.mxu1 %vm2993_vm2, %v10641_v54 }
 0x25f   : > { %v3782_v37 = vpop.f32.mrf.mxu0  ;;  %9977 = vmatprep.mubr.msk.bf16.mxu1 %vm11003_vm0, %v11002_v3 }
 0x260   : > { %v4925_v41 = vadd.f32 %v11891_v57, %v3781_v33  ;;  %v9879_v5 = vpop.f32.mrf.mxu1 }
 0x261   : > { %v3785_v20 = vpop.f32.mrf.mxu0  ;;  %3976 = vmatmul.mubr.bf16.gmra.mxu0 %v10618_v10 }
 0x262   : > { %v8918_v60 = vpack.c.bf16 %v4925_v41, %v4922_v17  ;;  %3983 = vmatprep.mubr.bf16.mxu0 %v10624_v12  ;;  %v3786_v53 = vadd.f32 %v11705_v23, %v3785_v20  ;;  %v11996_v48 = vpop.f32.mrf.mxu1  ;;  %v10634_v17 = vld [vmem:[%s11091_s17 + $0x690] ss:$12 sps:$4 sm:$0xff]  }
 0x263   : > { %v3787_v42 = vpop.f32.mrf.mxu0 }
 0x264   : > { %9440 = vst [vmem:[%s11354_s12 + $0x148] sm:$0xff] %v8918_v60   ;;  %v4930_v32 = vadd.f32 %v11896_v62, %v3786_v53  ;;  %v9880_v43 = vpop.f32.mrf.mxu1  ;;  %v10653_v60 = vld [vmem:[%s11091_s17 + $0x710] ss:$12 sps:$4 sm:$0xff]  }
 0x265   : > { %v3788_v57 = vpop.f32.mrf.mxu0  ;;  %v10648_v43 = vld [vmem:[%s11091_s17 + $0x6dc] ss:$12 sps:$4 sm:$0xff]  }
 0x266   : > { %v3789_v52 = vadd.f32 %v11705_v23, %v3788_v57  ;;  %v12001_v58 = vpop.f32.mrf.mxu1  ;;  %9978 = vmatmul.mubr.msk.bf16.gmra.mxu1 %vm2993_vm2, %v10645_v9 }
 0x267   : > { %v3790_v56 = vpop.f32.mrf.mxu0  ;;  %9981 = vmatprep.mubr.msk.bf16.mxu1 %vm11003_vm0, %v11002_v3 }
 0x268   : > { %v4933_v61 = vadd.f32 %v11906_v7, %v3789_v52  ;;  %v9883_v21 = vpop.f32.mrf.mxu1 }
 0x269   : > { %v3793_v36 = vpop.f32.mrf.mxu0  ;;  %3984 = vmatmul.mubr.bf16.gmra.mxu0 %v10622_v26 }
 0x26a   : > { %v8923_v63 = vpack.c.bf16 %v4933_v61, %v4930_v32  ;;  %3991 = vmatprep.mubr.bf16.mxu0 %v10628_v28  ;;  %v3794_v62 = vadd.f32 %v11705_v23, %v3793_v36  ;;  %v12011_v4 = vpop.f32.mrf.mxu1  ;;  %v10638_v32 = vld [vmem:[%s11091_s17 + $0x6a8] ss:$12 sps:$4 sm:$0xff]  }
 0x26b   : > { %v3795_v1 = vpop.f32.mrf.mxu0 }
 0x26c   : > { %9441 = vst [vmem:[%s11354_s12 + $0x150] sm:$0xff] %v8923_v63   ;;  %v4938_v39 = vadd.f32 %v11911_v15, %v3794_v62  ;;  %v9884_v50 = vpop.f32.mrf.mxu1  ;;  %v10657_v63 = vld [vmem:[%s11091_s17 + $0x728] ss:$12 sps:$4 sm:$0xff]  }
 0x26d   : > { %v3796_v7 = vpop.f32.mrf.mxu0  ;;  %v10652_v50 = vld [vmem:[%s11091_s17 + $0x6f4] ss:$12 sps:$4 sm:$0xff]  }
 0x26e   : > { %v3797_v8 = vadd.f32 %v11705_v23, %v3796_v7  ;;  %v12016_v12 = vpop.f32.mrf.mxu1  ;;  %9982 = vmatmul.mubr.msk.bf16.gmra.mxu1 %vm2993_vm2, %v10649_v25 }
 0x26f   : > { %v3798_v11 = vpop.f32.mrf.mxu0  ;;  %9985 = vmatprep.mubr.msk.bf16.mxu1 %vm11003_vm0, %v11002_v3 }
 0x270   : > { %v4941_v14 = vadd.f32 %v11921_v46, %v3797_v8  ;;  %v9887_v37 = vpop.f32.mrf.mxu1 }
 0x271   : > { %v3801_v55 = vpop.f32.mrf.mxu0  ;;  %3992 = vmatmul.mubr.bf16.gmra.mxu0 %v10626_v44 }
 0x272   : > { %v8928_v16 = vpack.c.bf16 %v4941_v14, %v4938_v39  ;;  %3999 = vmatprep.mubr.bf16.mxu0 %v10632_v47  ;;  %v3802_v15 = vadd.f32 %v11705_v23, %v3801_v55  ;;  %v12026_v20 = vpop.f32.mrf.mxu1  ;;  %v10642_v39 = vld [vmem:[%s11091_s17 + $0x6c0] ss:$12 sps:$4 sm:$0xff]  }
 0x273   : > { %v3803_v18 = vpop.f32.mrf.mxu0 }
 0x274   : > { %9442 = vst [vmem:[%s11354_s12 + $0x158] sm:$0xff] %v8928_v16   ;;  %v4946_v45 = vadd.f32 %v11926_v31, %v3802_v15  ;;  %v9888_v57 = vpop.f32.mrf.mxu1  ;;  %v10661_v16 = vld [vmem:[%s11091_s17 + $0x740] ss:$12 sps:$4 sm:$0xff]  }
 0x275   : > { %v3804_v46 = vpop.f32.mrf.mxu0  ;;  %v10656_v57 = vld [vmem:[%s11091_s17 + $0x70c] ss:$12 sps:$4 sm:$0xff]  }
 0x276   : > { %v3805_v24 = vadd.f32 %v11705_v23, %v3804_v46  ;;  %v12031_v28 = vpop.f32.mrf.mxu1  ;;  %9986 = vmatmul.mubr.msk.bf16.gmra.mxu1 %vm2993_vm2, %v10653_v60 }
 0x277   : > { %v3806_v27 = vpop.f32.mrf.mxu0  ;;  %9989 = vmatprep.mubr.msk.bf16.mxu1 %vm11003_vm0, %v11002_v3 }
 0x278   : > { %v4949_v30 = vadd.f32 %v11936_v40, %v3805_v24  ;;  %v9891_v56 = vpop.f32.mrf.mxu1 }
 0x279   : > { %v3809_v10 = vpop.f32.mrf.mxu0  ;;  %4000 = vmatmul.mubr.bf16.gmra.mxu0 %v10630_v0 }
 0x27a   : > { %v8933_v33 = vpack.c.bf16 %v4949_v30, %v4946_v45  ;;  %4007 = vmatprep.mubr.bf16.mxu0 %v10636_v2  ;;  %v3810_v31 = vadd.f32 %v11705_v23, %v3809_v10  ;;  %v12041_v36 = vpop.f32.mrf.mxu1  ;;  %v10646_v45 = vld [vmem:[%s11091_s17 + $0x6d8] ss:$12 sps:$4 sm:$0xff]  }
 0x27b   : > { %v3811_v34 = vpop.f32.mrf.mxu0 }
 0x27c   : > { %9443 = vst [vmem:[%s11354_s12 + $0x160] sm:$0xff] %v8933_v33   ;;  %v4954_v53 = vadd.f32 %v11941_v51, %v3810_v31  ;;  %v9892_v7 = vpop.f32.mrf.mxu1  ;;  %v10665_v33 = vld [vmem:[%s11091_s17 + $0x758] ss:$12 sps:$4 sm:$0xff]  }
 0x27d   : > { %v3812_v40 = vpop.f32.mrf.mxu0  ;;  %v10660_v7 = vld [vmem:[%s11091_s17 + $0x724] ss:$12 sps:$4 sm:$0xff]  }
 0x27e   : > { %v3813_v41 = vadd.f32 %v11705_v23, %v3812_v40  ;;  %v12046_v47 = vpop.f32.mrf.mxu1  ;;  %9990 = vmatmul.mubr.msk.bf16.gmra.mxu1 %vm2993_vm2, %v10657_v63 }
 0x27f   : > { %v3814_v42 = vpop.f32.mrf.mxu0  ;;  %9993 = vmatprep.mubr.msk.bf16.mxu1 %vm11003_vm0, %v11002_v3 }
 0x280   : > { %v4957_v49 = vadd.f32 %v11951_v59, %v3813_v41  ;;  %v9895_v11 = vpop.f32.mrf.mxu1 }
 0x281   : > { %v3817_v26 = vpop.f32.mrf.mxu0  ;;  %4008 = vmatmul.mubr.bf16.gmra.mxu0 %v10634_v17 }
 0x282   : > { %v8938_v52 = vpack.c.bf16 %v4957_v49, %v4954_v53  ;;  %4015 = vmatprep.mubr.bf16.mxu0 %v10640_v19  ;;  %v3818_v51 = vadd.f32 %v11705_v23, %v3817_v26  ;;  %v12056_v55 = vpop.f32.mrf.mxu1  ;;  %v10650_v53 = vld [vmem:[%s11091_s17 + $0x6f0] ss:$12 sps:$4 sm:$0xff]  }
 0x283   : > { %v3819_v54 = vpop.f32.mrf.mxu0 }
 0x284   : > { %9444 = vst [vmem:[%s11354_s12 + $0x168] sm:$0xff] %v8938_v52   ;;  %v4962_v62 = vadd.f32 %v11956_v6, %v3818_v51  ;;  %v9896_v46 = vpop.f32.mrf.mxu1  ;;  %v10669_v52 = vld [vmem:[%s11091_s17 + $0x770] ss:$12 sps:$4 sm:$0xff]  }
 0x285   : > { %v3820_v59 = vpop.f32.mrf.mxu0  ;;  %v10664_v46 = vld [vmem:[%s11091_s17 + $0x73c] ss:$12 sps:$4 sm:$0xff]  }
 0x286   : > { %v3821_v61 = vadd.f32 %v11705_v23, %v3820_v59  ;;  %v12061_v2 = vpop.f32.mrf.mxu1  ;;  %9994 = vmatmul.mubr.msk.bf16.gmra.mxu1 %vm2993_vm2, %v10661_v16 }
 0x287   : > { %v3822_v1 = vpop.f32.mrf.mxu0  ;;  %9997 = vmatprep.mubr.msk.bf16.mxu1 %vm11003_vm0, %v11002_v3 }
 0x288   : > { %v4965_v5 = vadd.f32 %v11966_v13, %v3821_v61  ;;  %v9899_v27 = vpop.f32.mrf.mxu1 }
 0x289   : > { %v3825_v44 = vpop.f32.mrf.mxu0  ;;  %4016 = vmatmul.mubr.bf16.gmra.mxu0 %v10638_v32 }
 0x28a   : > { %v8943_v8 = vpack.c.bf16 %v4965_v5, %v4962_v62  ;;  %4023 = vmatprep.mubr.bf16.mxu0 %v10644_v35  ;;  %v3826_v6 = vadd.f32 %v11705_v23, %v3825_v44  ;;  %v12071_v10 = vpop.f32.mrf.mxu1  ;;  %v10654_v62 = vld [vmem:[%s11091_s17 + $0x708] ss:$12 sps:$4 sm:$0xff]  }
 0x28b   : > { %v3827_v9 = vpop.f32.mrf.mxu0 }
 0x28c   : > { %9445 = vst [vmem:[%s11354_s12 + $0x170] sm:$0xff] %v8943_v8   ;;  %v4970_v15 = vadd.f32 %v11971_v22, %v3826_v6  ;;  %v9900_v40 = vpop.f32.mrf.mxu1  ;;  %v10673_v8 = vld [vmem:[%s11091_s17 + $0x788] ss:$12 sps:$4 sm:$0xff]  }
 0x28d   : > { %v3828_v13 = vpop.f32.mrf.mxu0  ;;  %v10668_v40 = vld [vmem:[%s11091_s17 + $0x754] ss:$12 sps:$4 sm:$0xff]  }
 0x28e   : > { %v3829_v14 = vadd.f32 %v11705_v23, %v3828_v13  ;;  %v12076_v19 = vpop.f32.mrf.mxu1  ;;  %9998 = vmatmul.mubr.msk.bf16.gmra.mxu1 %vm2993_vm2, %v10665_v33 }
 0x28f   : > { %v3830_v18 = vpop.f32.mrf.mxu0  ;;  %10001 = vmatprep.mubr.msk.bf16.mxu1 %vm11003_vm0, %v11002_v3 }
 0x290   : > { %v4973_v21 = vadd.f32 %v11981_v29, %v3829_v14  ;;  %v9903_v60 = vpop.f32.mrf.mxu1 }
 0x291   : > { %v3833_v0 = vpop.f32.mrf.mxu0  ;;  %4024 = vmatmul.mubr.bf16.gmra.mxu0 %v10642_v39 }
 0x292   : > { %v8948_v24 = vpack.c.bf16 %v4973_v21, %v4970_v15  ;;  %4031 = vmatprep.mubr.bf16.mxu0 %v10648_v43  ;;  %v3834_v22 = vadd.f32 %v11705_v23, %v3833_v0  ;;  %v12091_v26 = vpop.f32.mrf.mxu1  ;;  %v10658_v15 = vld [vmem:[%s11091_s17 + $0x720] ss:$12 sps:$4 sm:$0xff]  }
 0x293   : > { %v3835_v25 = vpop.f32.mrf.mxu0 }
 0x294   : > { %9446 = vst [vmem:[%s11354_s12 + $0x178] sm:$0xff] %v8948_v24   ;;  %v4978_v31 = vadd.f32 %v11986_v38, %v3834_v22  ;;  %v12085_v38 = vld [vmem:[%s13444_s2] ss:$0 sm:$0xff]  ;;  %v9904_v59 = vpop.f32.mrf.mxu1 }
 0x295   : > { %v3836_v29 = vpop.f32.mrf.mxu0  ;;  %v10677_v24 = vld [vmem:[%s11091_s17 + $0x7a0] ss:$12 sps:$4 sm:$0xff]  }
 0x296   : > { %v3837_v30 = vadd.f32 %v11705_v23, %v3836_v29  ;;  %v12096_v35 = vpop.f32.mrf.mxu1  ;;  %10002 = vmatmul.mubr.msk.bf16.gmra.mxu1 %vm2993_vm2, %v10669_v52  ;;  %v10672_v59 = vld [vmem:[%s11091_s17 + $0x76c] ss:$12 sps:$4 sm:$0xff]  }
 0x297   : > { %v3838_v34 = vpop.f32.mrf.mxu0  ;;  %10005 = vmatprep.mubr.msk.bf16.mxu1 %vm11003_vm0, %v11002_v3 }
 0x298   : > { %v4981_v37 = vadd.f32 %v11996_v48, %v3837_v30  ;;  %v9907_v1 = vpop.f32.mrf.mxu1 }
 0x299   : > { %v3841_v17 = vpop.f32.mrf.mxu0  ;;  %4032 = vmatmul.mubr.bf16.gmra.mxu0 %v10646_v45 }
 0x29a   : > { %v8953_v41 = vpack.c.bf16 %v4981_v37, %v4978_v31  ;;  %4039 = vmatprep.mubr.bf16.mxu0 %v10652_v50  ;;  %v3842_v48 = vadd.f32 %v12085_v38, %v3841_v17  ;;  %v12106_v44 = vpop.f32.mrf.mxu1  ;;  %v10662_v31 = vld [vmem:[%s11091_s17 + $0x738] ss:$12 sps:$4 sm:$0xff]  }
 0x29b   : > { %v3843_v23 = vpop.f32.mrf.mxu0 }
 0x29c   : > { %9447 = vst [vmem:[%s11354_s12 + $0x180] sm:$0xff] %v8953_v41   ;;  %v4986_v51 = vadd.f32 %v12001_v58, %v3842_v48  ;;  %v9908_v13 = vpop.f32.mrf.mxu1  ;;  %v10681_v41 = vld [vmem:[%s11091_s17 + $0x7b8] ss:$12 sps:$4 sm:$0xff]  }
 0x29d   : > { %v3844_v42 = vpop.f32.mrf.mxu0  ;;  %v10676_v13 = vld [vmem:[%s11091_s17 + $0x784] ss:$12 sps:$4 sm:$0xff]  }
 0x29e   : > { %v3845_v49 = vadd.f32 %v12085_v38, %v3844_v42  ;;  %v12111_v43 = vpop.f32.mrf.mxu1  ;;  %10006 = vmatmul.mubr.msk.bf16.gmra.mxu1 %vm2993_vm2, %v10673_v8 }
 0x29f   : > { %v3846_v54 = vpop.f32.mrf.mxu0  ;;  %10009 = vmatprep.mubr.msk.bf16.mxu1 %vm11003_vm0, %v11002_v3 }
 0x2a0   : > { %v4989_v56 = vadd.f32 %v12011_v4, %v3845_v49  ;;  %v9911_v18 = vpop.f32.mrf.mxu1 }
 0x2a1   : > { %v3849_v32 = vpop.f32.mrf.mxu0  ;;  %4040 = vmatmul.mubr.bf16.gmra.mxu0 %v10650_v53 }
 0x2a2   : > { %v8958_v61 = vpack.c.bf16 %v4989_v56, %v4986_v51  ;;  %4047 = vmatprep.mubr.bf16.mxu0 %v10656_v57  ;;  %v3850_v58 = vadd.f32 %v12085_v38, %v3849_v32  ;;  %v12121_v0 = vpop.f32.mrf.mxu1  ;;  %v10666_v51 = vld [vmem:[%s11091_s17 + $0x750] ss:$12 sps:$4 sm:$0xff]  }
 0x2a3   : > { %v3851_v63 = vpop.f32.mrf.mxu0 }
 0x2a4   : > { %9448 = vst [vmem:[%s11354_s12 + $0x188] sm:$0xff] %v8958_v61   ;;  %v4994_v6 = vadd.f32 %v12016_v12, %v3850_v58  ;;  %v9912_v29 = vpop.f32.mrf.mxu1  ;;  %v10685_v61 = vld [vmem:[%s11091_s17 + $0x7d0] ss:$12 sps:$4 sm:$0xff]  }
 0x2a5   : > { %v3852_v4 = vpop.f32.mrf.mxu0  ;;  %v10680_v29 = vld [vmem:[%s11091_s17 + $0x79c] ss:$12 sps:$4 sm:$0xff]  }
 0x2a6   : > { %v3853_v5 = vadd.f32 %v12085_v38, %v3852_v4  ;;  %v12126_v50 = vpop.f32.mrf.mxu1  ;;  %10010 = vmatmul.mubr.msk.bf16.gmra.mxu1 %vm2993_vm2, %v10677_v24 }
 0x2a7   : > { %v3854_v9 = vpop.f32.mrf.mxu0  ;;  %10013 = vmatprep.mubr.msk.bf16.mxu1 %vm11003_vm0, %v11002_v3 }
 0x2a8   : > { %v4997_v11 = vadd.f32 %v12026_v20, %v3853_v5  ;;  %v9915_v34 = vpop.f32.mrf.mxu1 }
 0x2a9   : > { %v3857_v39 = vpop.f32.mrf.mxu0  ;;  %4048 = vmatmul.mubr.bf16.gmra.mxu0 %v10654_v62 }
 0x2aa   : > { %v8963_v14 = vpack.c.bf16 %v4997_v11, %v4994_v6  ;;  %4055 = vmatprep.mubr.bf16.mxu0 %v10660_v7  ;;  %v3858_v12 = vadd.f32 %v12085_v38, %v3857_v39  ;;  %v12136_v17 = vpop.f32.mrf.mxu1  ;;  %v10670_v6 = vld [vmem:[%s11091_s17 + $0x768] ss:$12 sps:$4 sm:$0xff]  }
 0x2ab   : > { %v3859_v16 = vpop.f32.mrf.mxu0 }
 0x2ac   : > { %9449 = vst [vmem:[%s11354_s12 + $0x190] sm:$0xff] %v8963_v14   ;;  %v5002_v22 = vadd.f32 %v12031_v28, %v3858_v12  ;;  %v9916_v42 = vpop.f32.mrf.mxu1  ;;  %v10689_v14 = vld [vmem:[%s11091_s17 + $0x7e8] ss:$12 sps:$4 sm:$0xff]  }
 0x2ad   : > { %v3860_v20 = vpop.f32.mrf.mxu0  ;;  %v10684_v42 = vld [vmem:[%s11091_s17 + $0x7b4] ss:$12 sps:$4 sm:$0xff]  }
 0x2ae   : > { %v3861_v21 = vadd.f32 %v12085_v38, %v3860_v20  ;;  %v12141_v57 = vpop.f32.mrf.mxu1  ;;  %10014 = vmatmul.mubr.msk.bf16.gmra.mxu1 %vm2993_vm2, %v10681_v41 }
 0x2af   : > { %v3862_v25 = vpop.f32.mrf.mxu0  ;;  %10017 = vmatprep.mubr.msk.bf16.mxu1 %vm11003_vm0, %v11002_v3 }
 0x2b0   : > { %v5005_v27 = vadd.f32 %v12041_v36, %v3861_v21  ;;  %v9919_v54 = vpop.f32.mrf.mxu1 }
 0x2b1   : > { %v3865_v45 = vpop.f32.mrf.mxu0  ;;  %4056 = vmatmul.mubr.bf16.gmra.mxu0 %v10658_v15 }
 0x2b2   : > { %v8968_v30 = vpack.c.bf16 %v5005_v27, %v5002_v22  ;;  %4063 = vmatprep.mubr.bf16.mxu0 %v10664_v46  ;;  %v3866_v28 = vadd.f32 %v12085_v38, %v3865_v45  ;;  %v12151_v32 = vpop.f32.mrf.mxu1  ;;  %v10674_v22 = vld [vmem:[%s11091_s17 + $0x780] ss:$12 sps:$4 sm:$0xff]  }
 0x2b3   : > { %v3867_v33 = vpop.f32.mrf.mxu0 }
 0x2b4   : > { %9450 = vst [vmem:[%s11354_s12 + $0x198] sm:$0xff] %v8968_v30   ;;  %v5010_v48 = vadd.f32 %v12046_v47, %v3866_v28  ;;  %v9920_v4 = vpop.f32.mrf.mxu1  ;;  %v10693_v30 = vld [vmem:[%s11091_s17 + $0x800] ss:$12 sps:$4 sm:$0xff]  }
 0x2b5   : > { %v3868_v36 = vpop.f32.mrf.mxu0  ;;  %v10688_v4 = vld [vmem:[%s11091_s17 + $0x7cc] ss:$12 sps:$4 sm:$0xff]  }
 0x2b6   : > { %v3869_v37 = vadd.f32 %v12085_v38, %v3868_v36  ;;  %v12156_v7 = vpop.f32.mrf.mxu1  ;;  %10018 = vmatmul.mubr.msk.bf16.gmra.mxu1 %vm2993_vm2, %v10685_v61 }
 0x2b7   : > { %v3870_v23 = vpop.f32.mrf.mxu0  ;;  %10021 = vmatprep.mubr.msk.bf16.mxu1 %vm11003_vm0, %v11002_v3 }
 0x2b8   : > { %v5013_v60 = vadd.f32 %v12056_v55, %v3869_v37  ;;  %v9923_v9 = vpop.f32.mrf.mxu1 }
 0x2b9   : > { %v3873_v53 = vpop.f32.mrf.mxu0  ;;  %4064 = vmatmul.mubr.bf16.gmra.mxu0 %v10662_v31 }
 0x2ba   : > { %v8973_v49 = vpack.c.bf16 %v5013_v60, %v5010_v48  ;;  %4071 = vmatprep.mubr.bf16.mxu0 %v10668_v40  ;;  %v3874_v47 = vadd.f32 %v12085_v38, %v3873_v53  ;;  %v12166_v39 = vpop.f32.mrf.mxu1  ;;  %v10678_v48 = vld [vmem:[%s11091_s17 + $0x798] ss:$12 sps:$4 sm:$0xff]  }
 0x2bb   : > { %v3875_v52 = vpop.f32.mrf.mxu0 }
 0x2bc   : > { %9451 = vst [vmem:[%s11354_s12 + $0x1a0] sm:$0xff] %v8973_v49   ;;  %v5018_v58 = vadd.f32 %v12061_v2, %v3874_v47  ;;  %v9924_v20 = vpop.f32.mrf.mxu1  ;;  %v10697_v49 = vld [vmem:[%s11091_s17 + $0x818] ss:$12 sps:$4 sm:$0xff]  }
 0x2bd   : > { %v3876_v55 = vpop.f32.mrf.mxu0  ;;  %v10692_v20 = vld [vmem:[%s11091_s17 + $0x7e4] ss:$12 sps:$4 sm:$0xff]  }
 0x2be   : > { %v3877_v56 = vadd.f32 %v12085_v38, %v3876_v55  ;;  %v12171_v46 = vpop.f32.mrf.mxu1  ;;  %10022 = vmatmul.mubr.msk.bf16.gmra.mxu1 %vm2993_vm2, %v10689_v14 }
 0x2bf   : > { %v3878_v63 = vpop.f32.mrf.mxu0  ;;  %10025 = vmatprep.mubr.msk.bf16.mxu1 %vm11003_vm0, %v11002_v3 }
 0x2c0   : > { %v5021_v1 = vadd.f32 %v12071_v10, %v3877_v56  ;;  %v9927_v25 = vpop.f32.mrf.mxu1 }
 0x2c1   : > { %v3881_v62 = vpop.f32.mrf.mxu0  ;;  %4072 = vmatmul.mubr.bf16.gmra.mxu0 %v10666_v51 }
 0x2c2   : > { %v8978_v5 = vpack.c.bf16 %v5021_v1, %v5018_v58  ;;  %4079 = vmatprep.mubr.bf16.mxu0 %v10672_v59  ;;  %v3882_v2 = vadd.f32 %v12085_v38, %v3881_v62  ;;  %v12181_v45 = vpop.f32.mrf.mxu1  ;;  %v10682_v58 = vld [vmem:[%s11091_s17 + $0x7b0] ss:$12 sps:$4 sm:$0xff]  }
 0x2c3   : > { %v3883_v8 = vpop.f32.mrf.mxu0 }
 0x2c4   : > { %9452 = vst [vmem:[%s11354_s12 + $0x1a8] sm:$0xff] %v8978_v5   ;;  %v5026_v12 = vadd.f32 %v12076_v19, %v3882_v2  ;;  %v9928_v36 = vpop.f32.mrf.mxu1  ;;  %v10701_v5 = vld [vmem:[%s11091_s17 + $0x830] ss:$12 sps:$4 sm:$0xff]  }
 0x2c5   : > { %v3884_v10 = vpop.f32.mrf.mxu0  ;;  %v10696_v36 = vld [vmem:[%s11091_s17 + $0x7fc] ss:$12 sps:$4 sm:$0xff]  }
 0x2c6   : > { %v3885_v11 = vadd.f32 %v12085_v38, %v3884_v10  ;;  %v12186_v40 = vpop.f32.mrf.mxu1  ;;  %10026 = vmatmul.mubr.msk.bf16.gmra.mxu1 %vm2993_vm2, %v10693_v30 }
 0x2c7   : > { %v3886_v16 = vpop.f32.mrf.mxu0  ;;  %10029 = vmatprep.mubr.msk.bf16.mxu1 %vm11003_vm0, %v11002_v3 }
 0x2c8   : > { %v5029_v18 = vadd.f32 %v12091_v26, %v3885_v11  ;;  %v9931_v23 = vpop.f32.mrf.mxu1 }
 0x2c9   : > { %v3889_v15 = vpop.f32.mrf.mxu0  ;;  %4080 = vmatmul.mubr.bf16.gmra.mxu0 %v10670_v6 }
 0x2ca   : > { %v8983_v21 = vpack.c.bf16 %v5029_v18, %v5026_v12  ;;  %4087 = vmatprep.mubr.bf16.mxu0 %v10676_v13  ;;  %v3890_v19 = vadd.f32 %v12085_v38, %v3889_v15  ;;  %v12196_v53 = vpop.f32.mrf.mxu1  ;;  %v10686_v12 = vld [vmem:[%s11091_s17 + $0x7c8] ss:$12 sps:$4 sm:$0xff]  }
 0x2cb   : > { %v3891_v24 = vpop.f32.mrf.mxu0 }
 0x2cc   : > { %9453 = vst [vmem:[%s11354_s12 + $0x1b0] sm:$0xff] %v8983_v21   ;;  %v5034_v28 = vadd.f32 %v12096_v35, %v3890_v19  ;;  %v9932_v55 = vpop.f32.mrf.mxu1  ;;  %v10705_v21 = vld [vmem:[%s11091_s17 + $0x848] ss:$12 sps:$4 sm:$0xff]  }
 0x2cd   : > { %v3892_v26 = vpop.f32.mrf.mxu0  ;;  %v10700_v55 = vld [vmem:[%s11091_s17 + $0x814] ss:$12 sps:$4 sm:$0xff]  }
 0x2ce   : > { %v3893_v27 = vadd.f32 %v12085_v38, %v3892_v26  ;;  %v12201_v59 = vpop.f32.mrf.mxu1  ;;  %10030 = vmatmul.mubr.msk.bf16.gmra.mxu1 %vm2993_vm2, %v10697_v49 }
 0x2cf   : > { %v3894_v33 = vpop.f32.mrf.mxu0  ;;  %10033 = vmatprep.mubr.msk.bf16.mxu1 %vm11003_vm0, %v11002_v3 }
 0x2d0   : > { %v5037_v34 = vadd.f32 %v12106_v44, %v3893_v27  ;;  %v9935_v63 = vpop.f32.mrf.mxu1 }
 0x2d1   : > { %v3897_v31 = vpop.f32.mrf.mxu0  ;;  %4088 = vmatmul.mubr.bf16.gmra.mxu0 %v10674_v22 }
 0x2d2   : > { %v8988_v37 = vpack.c.bf16 %v5037_v34, %v5034_v28  ;;  %4095 = vmatprep.mubr.bf16.mxu0 %v10680_v29  ;;  %v3898_v35 = vadd.f32 %v12085_v38, %v3897_v31  ;;  %v12211_v62 = vpop.f32.mrf.mxu1  ;;  %v10690_v28 = vld [vmem:[%s11091_s17 + $0x7e0] ss:$12 sps:$4 sm:$0xff]  }
 0x2d3   : > { %v3899_v41 = vpop.f32.mrf.mxu0 }
 0x2d4   : > { %9454 = vst [vmem:[%s11354_s12 + $0x1b8] sm:$0xff] %v8988_v37   ;;  %v5042_v47 = vadd.f32 %v12111_v43, %v3898_v35  ;;  %v9936_v10 = vpop.f32.mrf.mxu1  ;;  %v10709_v37 = vld [vmem:[%s11091_s17 + $0x860] ss:$12 sps:$4 sm:$0xff]  }
 0x2d5   : > { %v3900_v44 = vpop.f32.mrf.mxu0  ;;  %v10704_v10 = vld [vmem:[%s11091_s17 + $0x82c] ss:$12 sps:$4 sm:$0xff]  }
 0x2d6   : > { %v3901_v60 = vadd.f32 %v12085_v38, %v3900_v44  ;;  %v12216_v13 = vpop.f32.mrf.mxu1  ;;  %10034 = vmatmul.mubr.msk.bf16.gmra.mxu1 %vm2993_vm2, %v10701_v5 }
 0x2d7   : > { %v3902_v52 = vpop.f32.mrf.mxu0  ;;  %10037 = vmatprep.mubr.msk.bf16.mxu1 %vm11003_vm0, %v11002_v3 }
 0x2d8   : > { %v5045_v54 = vadd.f32 %v12121_v0, %v3901_v60  ;;  %v9939_v16 = vpop.f32.mrf.mxu1 }
 0x2d9   : > { %v3905_v51 = vpop.f32.mrf.mxu0  ;;  %4096 = vmatmul.mubr.bf16.gmra.mxu0 %v10678_v48 }
 0x2da   : > { %v8993_v56 = vpack.c.bf16 %v5045_v54, %v5042_v47  ;;  %4103 = vmatprep.mubr.bf16.mxu0 %v10684_v42  ;;  %v3906_v43 = vadd.f32 %v12085_v38, %v3905_v51  ;;  %v12226_v15 = vpop.f32.mrf.mxu1  ;;  %v10694_v47 = vld [vmem:[%s11091_s17 + $0x7f8] ss:$12 sps:$4 sm:$0xff]  }
 0x2db   : > { %v3907_v61 = vpop.f32.mrf.mxu0 }
 0x2dc   : > { %9455 = vst [vmem:[%s11354_s12 + $0x1c0] sm:$0xff] %v8993_v56   ;;  %v5050_v2 = vadd.f32 %v12126_v50, %v3906_v43  ;;  %v9940_v26 = vpop.f32.mrf.mxu1  ;;  %v10713_v56 = vld [vmem:[%s11091_s17 + $0x878] ss:$12 sps:$4 sm:$0xff]  }
 0x2dd   : > { %v3908_v0 = vpop.f32.mrf.mxu0  ;;  %v10708_v26 = vld [vmem:[%s11091_s17 + $0x844] ss:$12 sps:$4 sm:$0xff]  }
 0x2de   : > { %v3909_v1 = vadd.f32 %v12085_v38, %v3908_v0  ;;  %v12231_v29 = vpop.f32.mrf.mxu1  ;;  %10038 = vmatmul.mubr.msk.bf16.gmra.mxu1 %vm2993_vm2, %v10705_v21 }
 0x2df   : > { %v3910_v8 = vpop.f32.mrf.mxu0  ;;  %10041 = vmatprep.mubr.msk.bf16.mxu1 %vm11003_vm0, %v11002_v3 }
 0x2e0   : > { %v5053_v9 = vadd.f32 %v12136_v17, %v3909_v1  ;;  %v9943_v33 = vpop.f32.mrf.mxu1 }
 0x2e1   : > { %v3913_v6 = vpop.f32.mrf.mxu0  ;;  %4104 = vmatmul.mubr.bf16.gmra.mxu0 %v10682_v58 }
 0x2e2   : > { %v8998_v11 = vpack.c.bf16 %v5053_v9, %v5050_v2  ;;  %4111 = vmatprep.mubr.bf16.mxu0 %v10688_v4  ;;  %v3914_v50 = vadd.f32 %v12085_v38, %v3913_v6  ;;  %v12241_v31 = vpop.f32.mrf.mxu1  ;;  %v10698_v2 = vld [vmem:[%s11091_s17 + $0x810] ss:$12 sps:$4 sm:$0xff]  }
 0x2e3   : > { %v3915_v14 = vpop.f32.mrf.mxu0 }
 0x2e4   : > { %9456 = vst [vmem:[%s11354_s12 + $0x1c8] sm:$0xff] %v8998_v11   ;;  %v5058_v19 = vadd.f32 %v12141_v57, %v3914_v50  ;;  %v9944_v44 = vpop.f32.mrf.mxu1  ;;  %v10717_v11 = vld [vmem:[%s11091_s17 + $0x890] ss:$12 sps:$4 sm:$0xff]  }
 0x2e5   : > { %v3916_v17 = vpop.f32.mrf.mxu0  ;;  %v10712_v44 = vld [vmem:[%s11091_s17 + $0x85c] ss:$12 sps:$4 sm:$0xff]  }
 0x2e6   : > { %v3917_v18 = vadd.f32 %v12085_v38, %v3916_v17  ;;  %v12246_v42 = vpop.f32.mrf.mxu1  ;;  %10042 = vmatmul.mubr.msk.bf16.gmra.mxu1 %vm2993_vm2, %v10709_v37 }
 0x2e7   : > { %v3918_v24 = vpop.f32.mrf.mxu0  ;;  %10045 = vmatprep.mubr.msk.bf16.mxu1 %vm11003_vm0, %v11002_v3 }
 0x2e8   : > { %v5061_v25 = vadd.f32 %v12151_v32, %v3917_v18  ;;  %v9947_v52 = vpop.f32.mrf.mxu1 }
 0x2e9   : > { %v3921_v22 = vpop.f32.mrf.mxu0  ;;  %4112 = vmatmul.mubr.bf16.gmra.mxu0 %v10686_v12 }
 0x2ea   : > { %v9003_v27 = vpack.c.bf16 %v5061_v25, %v5058_v19  ;;  %4119 = vmatprep.mubr.bf16.mxu0 %v10692_v20  ;;  %v3922_v57 = vadd.f32 %v12085_v38, %v3921_v22  ;;  %v12256_v51 = vpop.f32.mrf.mxu1  ;;  %v10702_v19 = vld [vmem:[%s11091_s17 + $0x828] ss:$12 sps:$4 sm:$0xff]  }
 0x2eb   : > { %v3923_v30 = vpop.f32.mrf.mxu0 }
 0x2ec   : > { %9457 = vst [vmem:[%s11354_s12 + $0x1d0] sm:$0xff] %v9003_v27   ;;  %v5066_v35 = vadd.f32 %v12156_v7, %v3922_v57  ;;  %v9948_v0 = vpop.f32.mrf.mxu1  ;;  %v10721_v27 = vld [vmem:[%s11091_s17 + $0x8a8] ss:$12 sps:$4 sm:$0xff]  }
 0x2ed   : > { %v3924_v32 = vpop.f32.mrf.mxu0  ;;  %v10716_v0 = vld [vmem:[%s11091_s17 + $0x874] ss:$12 sps:$4 sm:$0xff]  }
 0x2ee   : > { %v3925_v34 = vadd.f32 %v12085_v38, %v3924_v32  ;;  %v12261_v4 = vpop.f32.mrf.mxu1  ;;  %10046 = vmatmul.mubr.msk.bf16.gmra.mxu1 %vm2993_vm2, %v10713_v56 }
 0x2ef   : > { %v3926_v41 = vpop.f32.mrf.mxu0  ;;  %10049 = vmatprep.mubr.msk.bf16.mxu1 %vm11003_vm0, %v11002_v3 }
 0x2f0   : > { %v5069_v23 = vadd.f32 %v12166_v39, %v3925_v34  ;;  %v9951_v8 = vpop.f32.mrf.mxu1 }
 0x2f1   : > { %v3929_v48 = vpop.f32.mrf.mxu0  ;;  %4120 = vmatmul.mubr.bf16.gmra.mxu0 %v10690_v28 }
 0x2f2   : > { %v9008_v60 = vpack.c.bf16 %v5069_v23, %v5066_v35  ;;  %4127 = vmatprep.mubr.bf16.mxu0 %v10696_v36  ;;  %v3930_v7 = vadd.f32 %v12085_v38, %v3929_v48  ;;  %v12271_v6 = vpop.f32.mrf.mxu1  ;;  %v10706_v35 = vld [vmem:[%s11091_s17 + $0x840] ss:$12 sps:$4 sm:$0xff]  }
 0x2f3   : > { %v3931_v49 = vpop.f32.mrf.mxu0 }
 0x2f4   : > { %9458 = vst [vmem:[%s11354_s12 + $0x1d8] sm:$0xff] %v9008_v60   ;;  %v5074_v43 = vadd.f32 %v12171_v46, %v3930_v7  ;;  %v9952_v17 = vpop.f32.mrf.mxu1  ;;  %v10725_v60 = vld [vmem:[%s11091_s17 + $0x8c0] ss:$12 sps:$4 sm:$0xff]  }
 0x2f5   : > { %v3932_v39 = vpop.f32.mrf.mxu0  ;;  %v10720_v17 = vld [vmem:[%s11091_s17 + $0x88c] ss:$12 sps:$4 sm:$0xff]  }
 0x2f6   : > { %v3933_v54 = vadd.f32 %v12085_v38, %v3932_v39  ;;  %v12276_v20 = vpop.f32.mrf.mxu1  ;;  %10050 = vmatmul.mubr.msk.bf16.gmra.mxu1 %vm2993_vm2, %v10717_v11 }
 0x2f7   : > { %v3934_v61 = vpop.f32.mrf.mxu0  ;;  %10053 = vmatprep.mubr.msk.bf16.mxu1 %vm11003_vm0, %v11002_v3 }
 0x2f8   : > { %v5077_v63 = vadd.f32 %v12181_v45, %v3933_v54  ;;  %v9955_v24 = vpop.f32.mrf.mxu1 }
 0x2f9   : > { %v3937_v58 = vpop.f32.mrf.mxu0  ;;  %4128 = vmatmul.mubr.bf16.gmra.mxu0 %v10694_v47 }
 0x2fa   : > { %v9013_v1 = vpack.c.bf16 %v5077_v63, %v5074_v43  ;;  %4135 = vmatprep.mubr.bf16.mxu0 %v10700_v55  ;;  %v3938_v46 = vadd.f32 %v12085_v38, %v3937_v58  ;;  %v12286_v22 = vpop.f32.mrf.mxu1  ;;  %v10710_v43 = vld [vmem:[%s11091_s17 + $0x858] ss:$12 sps:$4 sm:$0xff]  }
 0x2fb   : > { %v3939_v5 = vpop.f32.mrf.mxu0 }
 0x2fc   : > { %9459 = vst [vmem:[%s11354_s12 + $0x1e0] sm:$0xff] %v9013_v1   ;;  %v5082_v50 = vadd.f32 %v12186_v40, %v3938_v46  ;;  %v9956_v32 = vpop.f32.mrf.mxu1  ;;  %v10729_v1 = vld [vmem:[%s11091_s17 + $0x8d8] ss:$12 sps:$4 sm:$0xff]  }
 0x2fd   : > { %v3940_v45 = vpop.f32.mrf.mxu0  ;;  %v10724_v32 = vld [vmem:[%s11091_s17 + $0x8a4] ss:$12 sps:$4 sm:$0xff]  }
 0x2fe   : > { %v3941_v9 = vadd.f32 %v12085_v38, %v3940_v45  ;;  %v12291_v36 = vpop.f32.mrf.mxu1  ;;  %10054 = vmatmul.mubr.msk.bf16.gmra.mxu1 %vm2993_vm2, %v10721_v27 }
 0x2ff   : > { %v3942_v14 = vpop.f32.mrf.mxu0  ;;  %10057 = vmatprep.mubr.msk.bf16.mxu1 %vm11003_vm0, %v11002_v3 }
 0x300   : > { %v5085_v16 = vadd.f32 %v12196_v53, %v3941_v9  ;;  %v9959_v41 = vpop.f32.mrf.mxu1 }
 0x301   : > { %v3945_v12 = vpop.f32.mrf.mxu0  ;;  %4136 = vmatmul.mubr.bf16.gmra.mxu0 %v10698_v2 }
 0x302   : > { %v9018_v18 = vpack.c.bf16 %v5085_v16, %v5082_v50  ;;  %4143 = vmatprep.mubr.bf16.mxu0 %v10704_v10  ;;  %v3946_v40 = vadd.f32 %v12085_v38, %v3945_v12  ;;  %v12301_v48 = vpop.f32.mrf.mxu1  ;;  %v10714_v50 = vld [vmem:[%s11091_s17 + $0x870] ss:$12 sps:$4 sm:$0xff]  }
 0x303   : > { %v3947_v21 = vpop.f32.mrf.mxu0 }
 0x304   : > { %9460 = vst [vmem:[%s11354_s12 + $0x1e8] sm:$0xff] %v9018_v18   ;;  %v5090_v57 = vadd.f32 %v12201_v59, %v3946_v40  ;;  %v9960_v39 = vpop.f32.mrf.mxu1  ;;  %v10733_v18 = vld [vmem:[%s11091_s17 + $0x8f0] ss:$12 sps:$4 sm:$0xff]  }
 0x305   : > { %v3948_v53 = vpop.f32.mrf.mxu0  ;;  %v10728_v39 = vld [vmem:[%s11091_s17 + $0x8bc] ss:$12 sps:$4 sm:$0xff]  }
 0x306   : > { %v3949_v25 = vadd.f32 %v12085_v38, %v3948_v53  ;;  %v12306_v55 = vpop.f32.mrf.mxu1  ;;  %10058 = vmatmul.mubr.msk.bf16.gmra.mxu1 %vm2993_vm2, %v10725_v60 }
 0x307   : > { %v3950_v30 = vpop.f32.mrf.mxu0  ;;  %10061 = vmatprep.mubr.msk.bf16.mxu1 %vm11003_vm0, %v11002_v3 }
 0x308   : > { %v5093_v33 = vadd.f32 %v12211_v62, %v3949_v25  ;;  %v9963_v61 = vpop.f32.mrf.mxu1 }
 0x309   : > { %v3953_v28 = vpop.f32.mrf.mxu0  ;;  %4144 = vmatmul.mubr.bf16.gmra.mxu0 %v10702_v19 }
 0x30a   : > { %v9023_v34 = vpack.c.bf16 %v5093_v33, %v5090_v57  ;;  %4151 = vmatprep.mubr.bf16.mxu0 %v10708_v26  ;;  %v3954_v59 = vadd.f32 %v12085_v38, %v3953_v28  ;;  %v12316_v58 = vpop.f32.mrf.mxu1  ;;  %v10718_v57 = vld [vmem:[%s11091_s17 + $0x888] ss:$12 sps:$4 sm:$0xff]  }
 0x30b   : > { %v3955_v37 = vpop.f32.mrf.mxu0 }
 0x30c   : > { %9461 = vst [vmem:[%s11354_s12 + $0x1f0] sm:$0xff] %v9023_v34   ;;  %v5098_v7 = vadd.f32 %v12216_v13, %v3954_v59  ;;  %v9964_v45 = vpop.f32.mrf.mxu1  ;;  %v10737_v34 = vld [vmem:[%s11091_s17 + $0x908] ss:$12 sps:$4 sm:$0xff]  }
 0x30d   : > { %v3956_v62 = vpop.f32.mrf.mxu0  ;;  %v10732_v45 = vld [vmem:[%s11091_s17 + $0x8d4] ss:$12 sps:$4 sm:$0xff]  }
 0x30e   : > { %v3957_v23 = vadd.f32 %v12085_v38, %v3956_v62  ;;  %v12321_v10 = vpop.f32.mrf.mxu1  ;;  %10062 = vmatmul.mubr.msk.bf16.gmra.mxu1 %vm2993_vm2, %v10729_v1 }
 0x30f   : > { %v3958_v49 = vpop.f32.mrf.mxu0  ;;  %10065 = vmatprep.mubr.msk.bf16.mxu1 %vm11003_vm0, %v11002_v3 }
 0x310   : > { %v5101_v52 = vadd.f32 %v12226_v15, %v3957_v23  ;;  %v9967_v14 = vpop.f32.mrf.mxu1 }
 0x311   : > { %v3961_v47 = vpop.f32.mrf.mxu0  ;;  %4152 = vmatmul.mubr.bf16.gmra.mxu0 %v10706_v35 }
 0x312   : > { %v9028_v54 = vpack.c.bf16 %v5101_v52, %v5098_v7  ;;  %4159 = vmatprep.mubr.bf16.mxu0 %v10712_v44  ;;  %v3962_v13 = vadd.f32 %v12085_v38, %v3961_v47  ;;  %v12331_v12 = vpop.f32.mrf.mxu1  ;;  %v10722_v7 = vld [vmem:[%s11091_s17 + $0x8a0] ss:$12 sps:$4 sm:$0xff]  }
 0x313   : > { %v3963_v56 = vpop.f32.mrf.mxu0 }
 0x314   : > { %9462 = vst [vmem:[%s11354_s12 + $0x1f8] sm:$0xff] %v9028_v54   ;;  %v5106_v46 = vadd.f32 %v12231_v29, %v3962_v13  ;;  %v9968_v53 = vpop.f32.mrf.mxu1  ;;  %v10741_v54 = vld [vmem:[%s11091_s17 + $0x920] ss:$12 sps:$4 sm:$0xff]  }
 0x315   : > { %v3964_v15 = vpop.f32.mrf.mxu0  ;;  %v10736_v53 = vld [vmem:[%s11091_s17 + $0x8ec] ss:$12 sps:$4 sm:$0xff]  }
 0x316   : > { %v3965_v63 = vadd.f32 %v12085_v38, %v3964_v15  ;;  %v12336_v26 = vpop.f32.mrf.mxu1  ;;  %10066 = vmatmul.mubr.msk.bf16.gmra.mxu1 %vm2993_vm2, %v10733_v18 }
 0x317   : > { %v3966_v5 = vpop.f32.mrf.mxu0  ;;  %10069 = vmatprep.mubr.msk.bf16.mxu1 %vm11003_vm0, %v11002_v3 }
 0x318   : > { %v5109_v8 = vadd.f32 %v12241_v31, %v3965_v63  ;;  %v9971_v30 = vpop.f32.mrf.mxu1 }
 0x319   : > { %v3969_v2 = vpop.f32.mrf.mxu0  ;;  %4160 = vmatmul.mubr.bf16.gmra.mxu0 %v10710_v43 }
 0x31a   : > { %v9033_v9 = vpack.c.bf16 %v5109_v8, %v5106_v46  ;;  %4167 = vmatprep.mubr.bf16.mxu0 %v10716_v0  ;;  %v3970_v29 = vadd.f32 %v12085_v38, %v3969_v2  ;;  %v12346_v28 = vpop.f32.mrf.mxu1  ;;  %v10726_v46 = vld [vmem:[%s11091_s17 + $0x8b8] ss:$12 sps:$4 sm:$0xff]  }
 0x31b   : > { %v3971_v11 = vpop.f32.mrf.mxu0 }
 0x31c   : > { %9463 = vst [vmem:[%s11354_s12 + $0x200] sm:$0xff] %v9033_v9   ;;  %v5114_v40 = vadd.f32 %v12246_v42, %v3970_v29  ;;  %v9972_v62 = vpop.f32.mrf.mxu1  ;;  %v10745_v9 = vld [vmem:[%s11091_s17 + $0x938] ss:$12 sps:$4 sm:$0xff]  }
 0x31d   : > { %v3972_v31 = vpop.f32.mrf.mxu0  ;;  %v10740_v62 = vld [vmem:[%s11091_s17 + $0x904] ss:$12 sps:$4 sm:$0xff]  }
 0x31e   : > { %v3973_v16 = vadd.f32 %v12085_v38, %v3972_v31  ;;  %v12351_v44 = vpop.f32.mrf.mxu1  ;;  %10070 = vmatmul.mubr.msk.bf16.gmra.mxu1 %vm2993_vm2, %v10737_v34 }
 0x31f   : > { %v3974_v21 = vpop.f32.mrf.mxu0  ;;  %10073 = vmatprep.mubr.msk.bf16.mxu1 %vm11003_vm0, %v11002_v3 }
 0x320   : > { %v5117_v24 = vadd.f32 %v12256_v51, %v3973_v16  ;;  %v9975_v49 = vpop.f32.mrf.mxu1 }
 0x321   : > { %v3977_v19 = vpop.f32.mrf.mxu0  ;;  %4168 = vmatmul.mubr.bf16.gmra.mxu0 %v10714_v50 }
 0x322   : > { %v9038_v25 = vpack.c.bf16 %v5117_v24, %v5114_v40  ;;  %4175 = vmatprep.mubr.bf16.mxu0 %v10720_v17  ;;  %v3978_v42 = vadd.f32 %v12085_v38, %v3977_v19  ;;  %v12361_v47 = vpop.f32.mrf.mxu1  ;;  %v10730_v40 = vld [vmem:[%s11091_s17 + $0x8d0] ss:$12 sps:$4 sm:$0xff]  }
 0x323   : > { %v3979_v27 = vpop.f32.mrf.mxu0 }
 0x324   : > { %9464 = vst [vmem:[%s11354_s12 + $0x208] sm:$0xff] %v9038_v25   ;;  %v5122_v59 = vadd.f32 %v12261_v4, %v3978_v42  ;;  %v9976_v15 = vpop.f32.mrf.mxu1  ;;  %v10749_v25 = vld [vmem:[%s11091_s17 + $0x950] ss:$12 sps:$4 sm:$0xff]  }
 0x325   : > { %v3980_v51 = vpop.f32.mrf.mxu0  ;;  %v10744_v15 = vld [vmem:[%s11091_s17 + $0x91c] ss:$12 sps:$4 sm:$0xff]  }
 0x326   : > { %v3981_v33 = vadd.f32 %v12085_v38, %v3980_v51  ;;  %v12366_v0 = vpop.f32.mrf.mxu1  ;;  %10074 = vmatmul.mubr.msk.bf16.gmra.mxu1 %vm2993_vm2, %v10741_v54 }
 0x327   : > { %v3982_v37 = vpop.f32.mrf.mxu0  ;;  %10077 = vmatprep.mubr.msk.bf16.mxu1 %vm11003_vm0, %v11002_v3 }
 0x328   : > { %v5125_v41 = vadd.f32 %v12271_v6, %v3981_v33  ;;  %v9979_v5 = vpop.f32.mrf.mxu1 }
 0x329   : > { %v3985_v35 = vpop.f32.mrf.mxu0  ;;  %4176 = vmatmul.mubr.bf16.gmra.mxu0 %v10718_v57 }
 0x32a   : > { %v9043_v23 = vpack.c.bf16 %v5125_v41, %v5122_v59  ;;  %4183 = vmatprep.mubr.bf16.mxu0 %v10724_v32  ;;  %v3986_v4 = vadd.f32 %v12085_v38, %v3985_v35  ;;  %v12376_v2 = vpop.f32.mrf.mxu1  ;;  %v10734_v59 = vld [vmem:[%s11091_s17 + $0x8e8] ss:$12 sps:$4 sm:$0xff]  }
 0x32b   : > { %v3987_v60 = vpop.f32.mrf.mxu0 }
 0x32c   : > { %9465 = vst [vmem:[%s11354_s12 + $0x210] sm:$0xff] %v9043_v23   ;;  %v5130_v13 = vadd.f32 %v12276_v20, %v3986_v4  ;;  %v9980_v31 = vpop.f32.mrf.mxu1  ;;  %v10753_v23 = vld [vmem:[%s11091_s17 + $0x968] ss:$12 sps:$4 sm:$0xff]  }
 0x32d   : > { %v3988_v6 = vpop.f32.mrf.mxu0  ;;  %v10748_v31 = vld [vmem:[%s11091_s17 + $0x934] ss:$12 sps:$4 sm:$0xff]  }
 0x32e   : > { %v3989_v52 = vadd.f32 %v12085_v38, %v3988_v6  ;;  %v12381_v17 = vpop.f32.mrf.mxu1  ;;  %10078 = vmatmul.mubr.msk.bf16.gmra.mxu1 %vm2993_vm2, %v10745_v9 }
 0x32f   : > { %v3990_v56 = vpop.f32.mrf.mxu0  ;;  %10081 = vmatprep.mubr.msk.bf16.mxu1 %vm11003_vm0, %v11002_v3 }
 0x330   : > { %v5133_v61 = vadd.f32 %v12286_v22, %v3989_v52  ;;  %v9983_v21 = vpop.f32.mrf.mxu1 }
 0x331   : > { %v3993_v43 = vpop.f32.mrf.mxu0  ;;  %4184 = vmatmul.mubr.bf16.gmra.mxu0 %v10722_v7 }
 0x332   : > { %v9048_v63 = vpack.c.bf16 %v5133_v61, %v5130_v13  ;;  %4191 = vmatprep.mubr.bf16.mxu0 %v10728_v39  ;;  %v3994_v20 = vadd.f32 %v12085_v38, %v3993_v43  ;;  %v12391_v19 = vpop.f32.mrf.mxu1  ;;  %v10738_v13 = vld [vmem:[%s11091_s17 + $0x900] ss:$12 sps:$4 sm:$0xff]  }
 0x333   : > { %v3995_v1 = vpop.f32.mrf.mxu0 }
 0x334   : > { %9466 = vst [vmem:[%s11354_s12 + $0x218] sm:$0xff] %v9048_v63   ;;  %v5138_v29 = vadd.f32 %v12291_v36, %v3994_v20  ;;  %v9984_v51 = vpop.f32.mrf.mxu1  ;;  %v10757_v63 = vld [vmem:[%s11091_s17 + $0x980] ss:$12 sps:$4 sm:$0xff]  }
 0x335   : > { %v3996_v22 = vpop.f32.mrf.mxu0  ;;  %v10752_v51 = vld [vmem:[%s11091_s17 + $0x94c] ss:$12 sps:$4 sm:$0xff]  }
 0x336   : > { %v3997_v8 = vadd.f32 %v12085_v38, %v3996_v22  ;;  %v12396_v32 = vpop.f32.mrf.mxu1  ;;  %10082 = vmatmul.mubr.msk.bf16.gmra.mxu1 %vm2993_vm2, %v10749_v25 }
 0x337   : > { %v3998_v11 = vpop.f32.mrf.mxu0  ;;  %10085 = vmatprep.mubr.msk.bf16.mxu1 %vm11003_vm0, %v11002_v3 }
 0x338   : > { %v5141_v14 = vadd.f32 %v12301_v48, %v3997_v8  ;;  %v9987_v37 = vpop.f32.mrf.mxu1 }
 0x339   : > { %v4001_v50 = vpop.f32.mrf.mxu0  ;;  %4192 = vmatmul.mubr.bf16.gmra.mxu0 %v10726_v46 }
 0x33a   : > { %v9053_v16 = vpack.c.bf16 %v5141_v14, %v5138_v29  ;;  %4199 = vmatprep.mubr.bf16.mxu0 %v10732_v45  ;;  %v4002_v36 = vadd.f32 %v12085_v38, %v4001_v50  ;;  %v12406_v35 = vpop.f32.mrf.mxu1  ;;  %v10742_v29 = vld [vmem:[%s11091_s17 + $0x918] ss:$12 sps:$4 sm:$0xff]  }
 0x33b   : > { %v4003_v18 = vpop.f32.mrf.mxu0 }
 0x33c   : > { %9467 = vst [vmem:[%s11354_s12 + $0x220] sm:$0xff] %v9053_v16   ;;  %v5146_v42 = vadd.f32 %v12306_v55, %v4002_v36  ;;  %v9988_v6 = vpop.f32.mrf.mxu1  ;;  %v10761_v16 = vld [vmem:[%s11091_s17 + $0x998] ss:$12 sps:$4 sm:$0xff]  }
 0x33d   : > { %v4004_v48 = vpop.f32.mrf.mxu0  ;;  %v10756_v6 = vld [vmem:[%s11091_s17 + $0x964] ss:$12 sps:$4 sm:$0xff]  }
 0x33e   : > { %v4005_v24 = vadd.f32 %v12085_v38, %v4004_v48  ;;  %v12411_v39 = vpop.f32.mrf.mxu1  ;;  %10086 = vmatmul.mubr.msk.bf16.gmra.mxu1 %vm2993_vm2, %v10753_v23 }
 0x33f   : > { %v4006_v27 = vpop.f32.mrf.mxu0  ;;  %10089 = vmatprep.mubr.msk.bf16.mxu1 %vm11003_vm0, %v11002_v3 }
 0x340   : > { %v5149_v30 = vadd.f32 %v12316_v58, %v4005_v24  ;;  %v9991_v56 = vpop.f32.mrf.mxu1 }
 0x341   : > { %v4009_v57 = vpop.f32.mrf.mxu0  ;;  %4200 = vmatmul.mubr.bf16.gmra.mxu0 %v10730_v40 }
 0x342   : > { %v9058_v33 = vpack.c.bf16 %v5149_v30, %v5146_v42  ;;  %4207 = vmatprep.mubr.bf16.mxu0 %v10736_v53  ;;  %v4010_v55 = vadd.f32 %v12085_v38, %v4009_v57  ;;  %v12421_v43 = vpop.f32.mrf.mxu1  ;;  %v10746_v42 = vld [vmem:[%s11091_s17 + $0x930] ss:$12 sps:$4 sm:$0xff]  }
 0x343   : > { %v4011_v34 = vpop.f32.mrf.mxu0 }
 0x344   : > { %9468 = vst [vmem:[%s11354_s12 + $0x228] sm:$0xff] %v9058_v33   ;;  %v5154_v4 = vadd.f32 %v12321_v10, %v4010_v55  ;;  %v9992_v22 = vpop.f32.mrf.mxu1  ;;  %v10765_v33 = vld [vmem:[%s11091_s17 + $0x9b0] ss:$12 sps:$4 sm:$0xff]  }
 0x345   : > { %v4012_v58 = vpop.f32.mrf.mxu0  ;;  %v10760_v22 = vld [vmem:[%s11091_s17 + $0x97c] ss:$12 sps:$4 sm:$0xff]  }
 0x346   : > { %v4013_v41 = vadd.f32 %v12085_v38, %v4012_v58  ;;  %v12426_v45 = vpop.f32.mrf.mxu1  ;;  %10090 = vmatmul.mubr.msk.bf16.gmra.mxu1 %vm2993_vm2, %v10757_v63 }
 0x347   : > { %v4014_v60 = vpop.f32.mrf.mxu0  ;;  %10093 = vmatprep.mubr.msk.bf16.mxu1 %vm11003_vm0, %v11002_v3 }
 0x348   : > { %v5157_v49 = vadd.f32 %v12331_v12, %v4013_v41  ;;  %v9995_v11 = vpop.f32.mrf.mxu1 }
 0x349   : > { %v4017_v7 = vpop.f32.mrf.mxu0  ;;  %4208 = vmatmul.mubr.bf16.gmra.mxu0 %v10734_v59 }
 0x34a   : > { %v9063_v52 = vpack.c.bf16 %v5157_v49, %v5154_v4  ;;  %4215 = vmatprep.mubr.bf16.mxu0 %v10740_v62  ;;  %v4018_v10 = vadd.f32 %v12085_v38, %v4017_v7  ;;  %v12436_v50 = vpop.f32.mrf.mxu1  ;;  %v10750_v4 = vld [vmem:[%s11091_s17 + $0x948] ss:$12 sps:$4 sm:$0xff]  }
 0x34b   : > { %v4019_v54 = vpop.f32.mrf.mxu0 }
 0x34c   : > { %9469 = vst [vmem:[%s11354_s12 + $0x230] sm:$0xff] %v9063_v52   ;;  %v5162_v20 = vadd.f32 %v12336_v26, %v4018_v10  ;;  %v9996_v48 = vpop.f32.mrf.mxu1  ;;  %v10769_v52 = vld [vmem:[%s11091_s17 + $0x9c8] ss:$12 sps:$4 sm:$0xff]  }
 0x34d   : > { %v4020_v12 = vpop.f32.mrf.mxu0  ;;  %v10764_v48 = vld [vmem:[%s11091_s17 + $0x994] ss:$12 sps:$4 sm:$0xff]  }
 0x34e   : > { %v4021_v61 = vadd.f32 %v12085_v38, %v4020_v12  ;;  %v12441_v53 = vpop.f32.mrf.mxu1  ;;  %10094 = vmatmul.mubr.msk.bf16.gmra.mxu1 %vm2993_vm2, %v10761_v16 }
 0x34f   : > { %v4022_v1 = vpop.f32.mrf.mxu0  ;;  %10097 = vmatprep.mubr.msk.bf16.mxu1 %vm11003_vm0, %v11002_v3 }
 0x350   : > { %v5165_v5 = vadd.f32 %v12346_v28, %v4021_v61  ;;  %v9999_v27 = vpop.f32.mrf.mxu1 }
 0x351   : > { %v4025_v46 = vpop.f32.mrf.mxu0  ;;  %4216 = vmatmul.mubr.bf16.gmra.mxu0 %v10738_v13 }
 0x352   : > { %v9068_v8 = vpack.c.bf16 %v5165_v5, %v5162_v20  ;;  %4223 = vmatprep.mubr.bf16.mxu0 %v10744_v15  ;;  %v4026_v26 = vadd.f32 %v12085_v38, %v4025_v46  ;;  %v12451_v57 = vpop.f32.mrf.mxu1  ;;  %v10754_v20 = vld [vmem:[%s11091_s17 + $0x960] ss:$12 sps:$4 sm:$0xff]  }
 0x353   : > { %v4027_v9 = vpop.f32.mrf.mxu0 }
 0x354   : > { %9470 = vst [vmem:[%s11354_s12 + $0x238] sm:$0xff] %v9068_v8   ;;  %v5170_v36 = vadd.f32 %v12351_v44, %v4026_v26  ;;  %v10000_v58 = vpop.f32.mrf.mxu1  ;;  %v10773_v8 = vld [vmem:[%s11091_s17 + $0x9e0] ss:$12 sps:$4 sm:$0xff]  }
 0x355   : > { %v4028_v28 = vpop.f32.mrf.mxu0  ;;  %v10768_v58 = vld [vmem:[%s11091_s17 + $0x9ac] ss:$12 sps:$4 sm:$0xff]  }
 0x356   : > { %v4029_v14 = vadd.f32 %v12085_v38, %v4028_v28  ;;  %v12456_v62 = vpop.f32.mrf.mxu1  ;;  %10098 = vmatmul.mubr.msk.bf16.gmra.mxu1 %vm2993_vm2, %v10765_v33 }
 0x357   : > { %v4030_v18 = vpop.f32.mrf.mxu0  ;;  %10101 = vmatprep.mubr.msk.bf16.mxu1 %vm11003_vm0, %v11002_v3 }
 0x358   : > { %v5173_v21 = vadd.f32 %v12361_v47, %v4029_v14  ;;  %v10003_v23 = vpop.f32.mrf.mxu1 }
 0x359   : > { %v4033_v40 = vpop.f32.mrf.mxu0  ;;  %4224 = vmatmul.mubr.bf16.gmra.mxu0 %v10742_v29 }
 0x35a   : > { %v9073_v24 = vpack.c.bf16 %v5173_v21, %v5170_v36  ;;  %4231 = vmatprep.mubr.bf16.mxu0 %v10748_v31  ;;  %v4034_v44 = vadd.f32 %v12085_v38, %v4033_v40  ;;  %v12471_v7 = vpop.f32.mrf.mxu1  ;;  %v10758_v36 = vld [vmem:[%s11091_s17 + $0x978] ss:$12 sps:$4 sm:$0xff]  }
 0x35b   : > { %v4035_v25 = vpop.f32.mrf.mxu0 }
 0x35c   : > { %9471 = vst [vmem:[%s11354_s12 + $0x240] sm:$0xff] %v9073_v24   ;;  %v5178_v55 = vadd.f32 %v12366_v0, %v4034_v44  ;;  %v12465_v0 = vld [vmem:[%s13444_s2] ss:$0 sm:$0xff]  ;;  %v10004_v12 = vpop.f32.mrf.mxu1  ;;  %v10777_v24 = vld [vmem:[%s11091_s17 + $0x9f8] ss:$12 sps:$4 sm:$0xff]  }
 0x35d   : > { %v4036_v47 = vpop.f32.mrf.mxu0  ;;  %v10772_v12 = vld [vmem:[%s11091_s17 + $0x9c4] ss:$12 sps:$4 sm:$0xff]  }
 0x35e   : > { %v4037_v30 = vadd.f32 %v12085_v38, %v4036_v47  ;;  %v12476_v15 = vpop.f32.mrf.mxu1  ;;  %10102 = vmatmul.mubr.msk.bf16.gmra.mxu1 %vm2993_vm2, %v10769_v52 }
 0x35f   : > { %v4038_v34 = vpop.f32.mrf.mxu0  ;;  %10105 = vmatprep.mubr.msk.bf16.mxu1 %vm11003_vm0, %v11002_v3 }
 0x360   : > { %v5181_v37 = vadd.f32 %v12376_v2, %v4037_v30  ;;  %v10007_v1 = vpop.f32.mrf.mxu1 }
 0x361   : > { %v4041_v59 = vpop.f32.mrf.mxu0  ;;  %4232 = vmatmul.mubr.bf16.gmra.mxu0 %v10746_v42 }
 0x362   : > { %v9078_v41 = vpack.c.bf16 %v5181_v37, %v5178_v55  ;;  %4239 = vmatprep.mubr.bf16.mxu0 %v10752_v51  ;;  %v4042_v2 = vadd.f32 %v12465_v0, %v4041_v59  ;;  %v12486_v46 = vpop.f32.mrf.mxu1  ;;  %v10762_v55 = vld [vmem:[%s11091_s17 + $0x990] ss:$12 sps:$4 sm:$0xff]  }
 0x363   : > { %v4043_v38 = vpop.f32.mrf.mxu0 }
 0x364   : > { %9472 = vst [vmem:[%s11354_s12 + $0x248] sm:$0xff] %v9078_v41   ;;  %v5186_v10 = vadd.f32 %v12381_v17, %v4042_v2  ;;  %v10008_v28 = vpop.f32.mrf.mxu1  ;;  %v10781_v41 = vld [vmem:[%s11091_s17 + $0xa10] ss:$12 sps:$4 sm:$0xff]  }
 0x365   : > { %v4044_v60 = vpop.f32.mrf.mxu0  ;;  %v10776_v28 = vld [vmem:[%s11091_s17 + $0x9dc] ss:$12 sps:$4 sm:$0xff]  }
 0x366   : > { %v4045_v49 = vadd.f32 %v12465_v0, %v4044_v60  ;;  %v12491_v31 = vpop.f32.mrf.mxu1  ;;  %10106 = vmatmul.mubr.msk.bf16.gmra.mxu1 %vm2993_vm2, %v10773_v8 }
 0x367   : > { %v4046_v54 = vpop.f32.mrf.mxu0  ;;  %10109 = vmatprep.mubr.msk.bf16.mxu1 %vm11003_vm0, %v11002_v3 }
 0x368   : > { %v5189_v56 = vadd.f32 %v12391_v19, %v4045_v49  ;;  %v10011_v18 = vpop.f32.mrf.mxu1 }
 0x369   : > { %v4049_v13 = vpop.f32.mrf.mxu0  ;;  %4240 = vmatmul.mubr.bf16.gmra.mxu0 %v10750_v4 }
 0x36a   : > { %v9083_v61 = vpack.c.bf16 %v5189_v56, %v5186_v10  ;;  %4247 = vmatprep.mubr.bf16.mxu0 %v10756_v6  ;;  %v4050_v17 = vadd.f32 %v12465_v0, %v4049_v13  ;;  %v12501_v40 = vpop.f32.mrf.mxu1  ;;  %v10766_v10 = vld [vmem:[%s11091_s17 + $0x9a8] ss:$12 sps:$4 sm:$0xff]  }
 0x36b   : > { %v4051_v63 = vpop.f32.mrf.mxu0 }
 0x36c   : > { %9473 = vst [vmem:[%s11354_s12 + $0x250] sm:$0xff] %v9083_v61   ;;  %v5194_v26 = vadd.f32 %v12396_v32, %v4050_v17  ;;  %v10012_v47 = vpop.f32.mrf.mxu1  ;;  %v10785_v61 = vld [vmem:[%s11091_s17 + $0xa28] ss:$12 sps:$4 sm:$0xff]  }
 0x36d   : > { %v4052_v19 = vpop.f32.mrf.mxu0  ;;  %v10780_v47 = vld [vmem:[%s11091_s17 + $0x9f4] ss:$12 sps:$4 sm:$0xff]  }
 0x36e   : > { %v4053_v5 = vadd.f32 %v12465_v0, %v4052_v19  ;;  %v12506_v51 = vpop.f32.mrf.mxu1  ;;  %10110 = vmatmul.mubr.msk.bf16.gmra.mxu1 %vm2993_vm2, %v10777_v24 }
 0x36f   : > { %v4054_v9 = vpop.f32.mrf.mxu0  ;;  %10113 = vmatprep.mubr.msk.bf16.mxu1 %vm11003_vm0, %v11002_v3 }
 0x370   : > { %v5197_v11 = vadd.f32 %v12406_v35, %v4053_v5  ;;  %v10015_v34 = vpop.f32.mrf.mxu1 }
 0x371   : > { %v4057_v29 = vpop.f32.mrf.mxu0  ;;  %4248 = vmatmul.mubr.bf16.gmra.mxu0 %v10754_v20 }
 0x372   : > { %v9088_v14 = vpack.c.bf16 %v5197_v11, %v5194_v26  ;;  %4255 = vmatprep.mubr.bf16.mxu0 %v10760_v22  ;;  %v4058_v32 = vadd.f32 %v12465_v0, %v4057_v29  ;;  %v12516_v59 = vpop.f32.mrf.mxu1  ;;  %v10770_v26 = vld [vmem:[%s11091_s17 + $0x9c0] ss:$12 sps:$4 sm:$0xff]  }
 0x373   : > { %v4059_v16 = vpop.f32.mrf.mxu0 }
 0x374   : > { %9474 = vst [vmem:[%s11354_s12 + $0x258] sm:$0xff] %v9088_v14   ;;  %v5202_v44 = vadd.f32 %v12411_v39, %v4058_v32  ;;  %v10016_v60 = vpop.f32.mrf.mxu1  ;;  %v10789_v14 = vld [vmem:[%s11091_s17 + $0xa40] ss:$12 sps:$4 sm:$0xff]  }
 0x375   : > { %v4060_v35 = vpop.f32.mrf.mxu0  ;;  %v10784_v60 = vld [vmem:[%s11091_s17 + $0xa0c] ss:$12 sps:$4 sm:$0xff]  }
 0x376   : > { %v4061_v21 = vadd.f32 %v12465_v0, %v4060_v35  ;;  %v12521_v6 = vpop.f32.mrf.mxu1  ;;  %10114 = vmatmul.mubr.msk.bf16.gmra.mxu1 %vm2993_vm2, %v10781_v41 }
 0x377   : > { %v4062_v25 = vpop.f32.mrf.mxu0  ;;  %10117 = vmatprep.mubr.msk.bf16.mxu1 %vm11003_vm0, %v11002_v3 }
 0x378   : > { %v5205_v27 = vadd.f32 %v12421_v43, %v4061_v21  ;;  %v10019_v54 = vpop.f32.mrf.mxu1 }
 0x379   : > { %v4065_v42 = vpop.f32.mrf.mxu0  ;;  %4256 = vmatmul.mubr.bf16.gmra.mxu0 %v10758_v36 }
 0x37a   : > { %v9093_v30 = vpack.c.bf16 %v5205_v27, %v5202_v44  ;;  %4263 = vmatprep.mubr.bf16.mxu0 %v10764_v48  ;;  %v4066_v39 = vadd.f32 %v12465_v0, %v4065_v42  ;;  %v12531_v13 = vpop.f32.mrf.mxu1  ;;  %v10774_v44 = vld [vmem:[%s11091_s17 + $0x9d8] ss:$12 sps:$4 sm:$0xff]  }
 0x37b   : > { %v4067_v33 = vpop.f32.mrf.mxu0 }
 0x37c   : > { %9475 = vst [vmem:[%s11354_s12 + $0x260] sm:$0xff] %v9093_v30   ;;  %v5210_v2 = vadd.f32 %v12426_v45, %v4066_v39  ;;  %v10020_v19 = vpop.f32.mrf.mxu1  ;;  %v10793_v30 = vld [vmem:[%s11091_s17 + $0xa58] ss:$12 sps:$4 sm:$0xff]  }
 0x37d   : > { %v4068_v43 = vpop.f32.mrf.mxu0  ;;  %v10788_v19 = vld [vmem:[%s11091_s17 + $0xa24] ss:$12 sps:$4 sm:$0xff]  }
 0x37e   : > { %v4069_v37 = vadd.f32 %v12465_v0, %v4068_v43  ;;  %v12536_v22 = vpop.f32.mrf.mxu1  ;;  %10118 = vmatmul.mubr.msk.bf16.gmra.mxu1 %vm2993_vm2, %v10785_v61 }
 0x37f   : > { %v4070_v38 = vpop.f32.mrf.mxu0  ;;  %10121 = vmatprep.mubr.msk.bf16.mxu1 %vm11003_vm0, %v11002_v3 }
 0x380   : > { %v5213_v23 = vadd.f32 %v12436_v50, %v4069_v37  ;;  %v10023_v9 = vpop.f32.mrf.mxu1 }
 0x381   : > { %v4073_v4 = vpop.f32.mrf.mxu0  ;;  %4264 = vmatmul.mubr.bf16.gmra.mxu0 %v10762_v55 }
 0x382   : > { %v9098_v49 = vpack.c.bf16 %v5213_v23, %v5210_v2  ;;  %4271 = vmatprep.mubr.bf16.mxu0 %v10768_v58  ;;  %v4074_v45 = vadd.f32 %v12465_v0, %v4073_v4  ;;  %v12546_v29 = vpop.f32.mrf.mxu1  ;;  %v10778_v2 = vld [vmem:[%s11091_s17 + $0x9f0] ss:$12 sps:$4 sm:$0xff]  }
 0x383   : > { %v4075_v52 = vpop.f32.mrf.mxu0 }
 0x384   : > { %9476 = vst [vmem:[%s11354_s12 + $0x268] sm:$0xff] %v9098_v49   ;;  %v5218_v17 = vadd.f32 %v12441_v53, %v4074_v45  ;;  %v10024_v35 = vpop.f32.mrf.mxu1  ;;  %v10797_v49 = vld [vmem:[%s11091_s17 + $0xa70] ss:$12 sps:$4 sm:$0xff]  }
 0x385   : > { %v4076_v50 = vpop.f32.mrf.mxu0  ;;  %v10792_v35 = vld [vmem:[%s11091_s17 + $0xa3c] ss:$12 sps:$4 sm:$0xff]  }
 0x386   : > { %v4077_v56 = vadd.f32 %v12465_v0, %v4076_v50  ;;  %v12551_v48 = vpop.f32.mrf.mxu1  ;;  %10122 = vmatmul.mubr.msk.bf16.gmra.mxu1 %vm2993_vm2, %v10789_v14 }
 0x387   : > { %v4078_v63 = vpop.f32.mrf.mxu0  ;;  %10125 = vmatprep.mubr.msk.bf16.mxu1 %vm11003_vm0, %v11002_v3 }
 0x388   : > { %v5221_v1 = vadd.f32 %v12451_v57, %v4077_v56  ;;  %v10027_v25 = vpop.f32.mrf.mxu1 }
 0x389   : > { %v4081_v20 = vpop.f32.mrf.mxu0  ;;  %4272 = vmatmul.mubr.bf16.gmra.mxu0 %v10766_v10 }
 0x38a   : > { %v9103_v5 = vpack.c.bf16 %v5221_v1, %v5218_v17  ;;  %4279 = vmatprep.mubr.bf16.mxu0 %v10772_v12  ;;  %v4082_v53 = vadd.f32 %v12465_v0, %v4081_v20  ;;  %v12561_v42 = vpop.f32.mrf.mxu1  ;;  %v10782_v17 = vld [vmem:[%s11091_s17 + $0xa08] ss:$12 sps:$4 sm:$0xff]  }
 0x38b   : > { %v4083_v8 = vpop.f32.mrf.mxu0 }
 0x38c   : > { %9477 = vst [vmem:[%s11354_s12 + $0x270] sm:$0xff] %v9103_v5   ;;  %v5226_v32 = vadd.f32 %v12456_v62, %v4082_v53  ;;  %v10028_v43 = vpop.f32.mrf.mxu1  ;;  %v10801_v5 = vld [vmem:[%s11091_s17 + $0xa88] ss:$12 sps:$4 sm:$0xff]  }
 0x38d   : > { %v4084_v57 = vpop.f32.mrf.mxu0  ;;  %v10796_v43 = vld [vmem:[%s11091_s17 + $0xa54] ss:$12 sps:$4 sm:$0xff]  }
 0x38e   : > { %v4085_v11 = vadd.f32 %v12465_v0, %v4084_v57  ;;  %v12566_v58 = vpop.f32.mrf.mxu1  ;;  %10126 = vmatmul.mubr.msk.bf16.gmra.mxu1 %vm2993_vm2, %v10793_v30 }
 0x38f   : > { %v4086_v16 = vpop.f32.mrf.mxu0  ;;  %10129 = vmatprep.mubr.msk.bf16.mxu1 %vm11003_vm0, %v11002_v3 }
 0x390   : > { %v5229_v18 = vadd.f32 %v12471_v7, %v4085_v11  ;;  %v10031_v38 = vpop.f32.mrf.mxu1 }
 0x391   : > { %v4089_v36 = vpop.f32.mrf.mxu0  ;;  %4280 = vmatmul.mubr.bf16.gmra.mxu0 %v10770_v26 }
 0x392   : > { %v9108_v21 = vpack.c.bf16 %v5229_v18, %v5226_v32  ;;  %4287 = vmatprep.mubr.bf16.mxu0 %v10776_v28  ;;  %v4090_v62 = vadd.f32 %v12465_v0, %v4089_v36  ;;  %v12576_v4 = vpop.f32.mrf.mxu1  ;;  %v10786_v32 = vld [vmem:[%s11091_s17 + $0xa20] ss:$12 sps:$4 sm:$0xff]  }
 0x393   : > { %v4091_v24 = vpop.f32.mrf.mxu0 }
 0x394   : > { %9478 = vst [vmem:[%s11354_s12 + $0x278] sm:$0xff] %v9108_v21   ;;  %v5234_v39 = vadd.f32 %v12476_v15, %v4090_v62  ;;  %v10032_v50 = vpop.f32.mrf.mxu1  ;;  %v10805_v21 = vld [vmem:[%s11091_s17 + $0xaa0] ss:$12 sps:$4 sm:$0xff]  }
 0x395   : > { %v4092_v7 = vpop.f32.mrf.mxu0  ;;  %v10800_v50 = vld [vmem:[%s11091_s17 + $0xa6c] ss:$12 sps:$4 sm:$0xff]  }
 0x396   : > { %v4093_v27 = vadd.f32 %v12465_v0, %v4092_v7  ;;  %v12581_v12 = vpop.f32.mrf.mxu1  ;;  %10130 = vmatmul.mubr.msk.bf16.gmra.mxu1 %vm2993_vm2, %v10797_v49 }
 0x397   : > { %v4094_v33 = vpop.f32.mrf.mxu0  ;;  %10133 = vmatprep.mubr.msk.bf16.mxu1 %vm11003_vm0, %v11002_v3 }
 0x398   : > { %v5237_v34 = vadd.f32 %v12486_v46, %v4093_v27  ;;  %v10035_v63 = vpop.f32.mrf.mxu1 }
 0x399   : > { %v4097_v55 = vpop.f32.mrf.mxu0  ;;  %4288 = vmatmul.mubr.bf16.gmra.mxu0 %v10774_v44 }
 0x39a   : > { %v9113_v37 = vpack.c.bf16 %v5237_v34, %v5234_v39  ;;  %4295 = vmatprep.mubr.bf16.mxu0 %v10780_v47  ;;  %v4098_v15 = vadd.f32 %v12465_v0, %v4097_v55  ;;  %v12591_v20 = vpop.f32.mrf.mxu1  ;;  %v10790_v39 = vld [vmem:[%s11091_s17 + $0xa38] ss:$12 sps:$4 sm:$0xff]  }
 0x39b   : > { %v4099_v41 = vpop.f32.mrf.mxu0 }
 0x39c   : > { %9479 = vst [vmem:[%s11354_s12 + $0x280] sm:$0xff] %v9113_v37   ;;  %v5242_v45 = vadd.f32 %v12491_v31, %v4098_v15  ;;  %v10036_v57 = vpop.f32.mrf.mxu1  ;;  %v10809_v37 = vld [vmem:[%s11091_s17 + $0xab8] ss:$12 sps:$4 sm:$0xff]  }
 0x39d   : > { %v4100_v46 = vpop.f32.mrf.mxu0  ;;  %v10804_v57 = vld [vmem:[%s11091_s17 + $0xa84] ss:$12 sps:$4 sm:$0xff]  }
 0x39e   : > { %v4101_v23 = vadd.f32 %v12465_v0, %v4100_v46  ;;  %v12596_v28 = vpop.f32.mrf.mxu1  ;;  %10134 = vmatmul.mubr.msk.bf16.gmra.mxu1 %vm2993_vm2, %v10801_v5 }
 0x39f   : > { %v4102_v52 = vpop.f32.mrf.mxu0  ;;  %10137 = vmatprep.mubr.msk.bf16.mxu1 %vm11003_vm0, %v11002_v3 }
 0x3a0   : > { %v5245_v54 = vadd.f32 %v12501_v40, %v4101_v23  ;;  %v10039_v16 = vpop.f32.mrf.mxu1 }
 0x3a1   : > { %v4105_v10 = vpop.f32.mrf.mxu0  ;;  %4296 = vmatmul.mubr.bf16.gmra.mxu0 %v10778_v2 }
 0x3a2   : > { %v9118_v56 = vpack.c.bf16 %v5245_v54, %v5242_v45  ;;  %4303 = vmatprep.mubr.bf16.mxu0 %v10784_v60  ;;  %v4106_v31 = vadd.f32 %v12465_v0, %v4105_v10  ;;  %v12606_v36 = vpop.f32.mrf.mxu1  ;;  %v10794_v45 = vld [vmem:[%s11091_s17 + $0xa50] ss:$12 sps:$4 sm:$0xff]  }
 0x3a3   : > { %v4107_v61 = vpop.f32.mrf.mxu0 }
 0x3a4   : > { %9480 = vst [vmem:[%s11354_s12 + $0x288] sm:$0xff] %v9118_v56   ;;  %v5250_v53 = vadd.f32 %v12506_v51, %v4106_v31  ;;  %v10040_v7 = vpop.f32.mrf.mxu1  ;;  %v10813_v56 = vld [vmem:[%s11091_s17 + $0xad0] ss:$12 sps:$4 sm:$0xff]  }
 0x3a5   : > { %v4108_v40 = vpop.f32.mrf.mxu0  ;;  %v10808_v7 = vld [vmem:[%s11091_s17 + $0xa9c] ss:$12 sps:$4 sm:$0xff]  }
 0x3a6   : > { %v4109_v1 = vadd.f32 %v12465_v0, %v4108_v40  ;;  %v12611_v47 = vpop.f32.mrf.mxu1  ;;  %10138 = vmatmul.mubr.msk.bf16.gmra.mxu1 %vm2993_vm2, %v10805_v21 }
 0x3a7   : > { %v4110_v8 = vpop.f32.mrf.mxu0  ;;  %10141 = vmatprep.mubr.msk.bf16.mxu1 %vm11003_vm0, %v11002_v3 }
 0x3a8   : > { %v5253_v9 = vadd.f32 %v12516_v59, %v4109_v1  ;;  %v10043_v33 = vpop.f32.mrf.mxu1 }
 0x3a9   : > { %v4113_v26 = vpop.f32.mrf.mxu0  ;;  %4304 = vmatmul.mubr.bf16.gmra.mxu0 %v10782_v17 }
 0x3aa   : > { %v9123_v11 = vpack.c.bf16 %v5253_v9, %v5250_v53  ;;  %4311 = vmatprep.mubr.bf16.mxu0 %v10788_v19  ;;  %v4114_v51 = vadd.f32 %v12465_v0, %v4113_v26  ;;  %v12621_v55 = vpop.f32.mrf.mxu1  ;;  %v10798_v53 = vld [vmem:[%s11091_s17 + $0xa68] ss:$12 sps:$4 sm:$0xff]  }
 0x3ab   : > { %v4115_v14 = vpop.f32.mrf.mxu0 }
 0x3ac   : > { %9481 = vst [vmem:[%s11354_s12 + $0x290] sm:$0xff] %v9123_v11   ;;  %v5258_v62 = vadd.f32 %v12521_v6, %v4114_v51  ;;  %v10044_v46 = vpop.f32.mrf.mxu1  ;;  %v10817_v11 = vld [vmem:[%s11091_s17 + $0xae8] ss:$12 sps:$4 sm:$0xff]  }
 0x3ad   : > { %v4116_v59 = vpop.f32.mrf.mxu0  ;;  %v10812_v46 = vld [vmem:[%s11091_s17 + $0xab4] ss:$12 sps:$4 sm:$0xff]  }
 0x3ae   : > { %v4117_v18 = vadd.f32 %v12465_v0, %v4116_v59  ;;  %v12626_v60 = vpop.f32.mrf.mxu1  ;;  %10142 = vmatmul.mubr.msk.bf16.gmra.mxu1 %vm2993_vm2, %v10809_v37 }
 0x3af   : > { %v4118_v24 = vpop.f32.mrf.mxu0  ;;  %10145 = vmatprep.mubr.msk.bf16.mxu1 %vm11003_vm0, %v11002_v3 }
 0x3b0   : > { %v5261_v25 = vadd.f32 %v12531_v13, %v4117_v18  ;;  %v10047_v52 = vpop.f32.mrf.mxu1 }
 0x3b1   : > { %v4121_v44 = vpop.f32.mrf.mxu0  ;;  %4312 = vmatmul.mubr.bf16.gmra.mxu0 %v10786_v32 }
 0x3b2   : > { %v9128_v27 = vpack.c.bf16 %v5261_v25, %v5258_v62  ;;  %4319 = vmatprep.mubr.bf16.mxu0 %v10792_v35  ;;  %v4122_v6 = vadd.f32 %v12465_v0, %v4121_v44  ;;  %v12636_v10 = vpop.f32.mrf.mxu1  ;;  %v10802_v62 = vld [vmem:[%s11091_s17 + $0xa80] ss:$12 sps:$4 sm:$0xff]  }
 0x3b3   : > { %v4123_v30 = vpop.f32.mrf.mxu0 }
 0x3b4   : > { %9482 = vst [vmem:[%s11354_s12 + $0x298] sm:$0xff] %v9128_v27   ;;  %v5266_v15 = vadd.f32 %v12536_v22, %v4122_v6  ;;  %v10048_v40 = vpop.f32.mrf.mxu1  ;;  %v10821_v27 = vld [vmem:[%s11091_s17 + $0xb00] ss:$12 sps:$4 sm:$0xff]  }
 0x3b5   : > { %v4124_v13 = vpop.f32.mrf.mxu0  ;;  %v10816_v40 = vld [vmem:[%s11091_s17 + $0xacc] ss:$12 sps:$4 sm:$0xff]  }
 0x3b6   : > { %v4125_v34 = vadd.f32 %v12465_v0, %v4124_v13  ;;  %v12641_v19 = vpop.f32.mrf.mxu1  ;;  %10146 = vmatmul.mubr.msk.bf16.gmra.mxu1 %vm2993_vm2, %v10813_v56 }
 0x3b7   : > { %v4126_v41 = vpop.f32.mrf.mxu0  ;;  %10149 = vmatprep.mubr.msk.bf16.mxu1 %vm11003_vm0, %v11002_v3 }
 0x3b8   : > { %v5269_v38 = vadd.f32 %v12546_v29, %v4125_v34  ;;  %v10051_v8 = vpop.f32.mrf.mxu1 }
 0x3b9   : > { %v4129_v2 = vpop.f32.mrf.mxu0  ;;  %4320 = vmatmul.mubr.bf16.gmra.mxu0 %v10790_v39 }
 0x3ba   : > { %v9133_v23 = vpack.c.bf16 %v5269_v38, %v5266_v15  ;;  %4327 = vmatprep.mubr.bf16.mxu0 %v10796_v43  ;;  %v4130_v22 = vadd.f32 %v12465_v0, %v4129_v2  ;;  %v12651_v26 = vpop.f32.mrf.mxu1  ;;  %v10806_v15 = vld [vmem:[%s11091_s17 + $0xa98] ss:$12 sps:$4 sm:$0xff]  }
 0x3bb   : > { %v4131_v49 = vpop.f32.mrf.mxu0 }
 0x3bc   : > { %9483 = vst [vmem:[%s11354_s12 + $0x2a0] sm:$0xff] %v9133_v23   ;;  %v5274_v31 = vadd.f32 %v12551_v48, %v4130_v22  ;;  %v10052_v59 = vpop.f32.mrf.mxu1  ;;  %v10825_v23 = vld [vmem:[%s11091_s17 + $0xb18] ss:$12 sps:$4 sm:$0xff]  }
 0x3bd   : > { %v4132_v29 = vpop.f32.mrf.mxu0  ;;  %v10820_v59 = vld [vmem:[%s11091_s17 + $0xae4] ss:$12 sps:$4 sm:$0xff]  }
 0x3be   : > { %v4133_v54 = vadd.f32 %v12465_v0, %v4132_v29  ;;  %v12656_v35 = vpop.f32.mrf.mxu1  ;;  %10150 = vmatmul.mubr.msk.bf16.gmra.mxu1 %vm2993_vm2, %v10817_v11 }
 0x3bf   : > { %v4134_v61 = vpop.f32.mrf.mxu0  ;;  %10153 = vmatprep.mubr.msk.bf16.mxu1 %vm11003_vm0, %v11002_v3 }
 0x3c0   : > { %v5277_v63 = vadd.f32 %v12561_v42, %v4133_v54  ;;  %v10055_v24 = vpop.f32.mrf.mxu1 }
 0x3c1   : > { %v4137_v17 = vpop.f32.mrf.mxu0  ;;  %4328 = vmatmul.mubr.bf16.gmra.mxu0 %v10794_v45 }
 0x3c2   : > { %v9138_v1 = vpack.c.bf16 %v5277_v63, %v5274_v31  ;;  %4335 = vmatprep.mubr.bf16.mxu0 %v10800_v50  ;;  %v4138_v48 = vadd.f32 %v12465_v0, %v4137_v17  ;;  %v12666_v44 = vpop.f32.mrf.mxu1  ;;  %v10810_v31 = vld [vmem:[%s11091_s17 + $0xab0] ss:$12 sps:$4 sm:$0xff]  }
 0x3c3   : > { %v4139_v5 = vpop.f32.mrf.mxu0 }
 0x3c4   : > { %9484 = vst [vmem:[%s11354_s12 + $0x2a8] sm:$0xff] %v9138_v1   ;;  %v5282_v51 = vadd.f32 %v12566_v58, %v4138_v48  ;;  %v10056_v13 = vpop.f32.mrf.mxu1  ;;  %v10829_v1 = vld [vmem:[%s11091_s17 + $0xb30] ss:$12 sps:$4 sm:$0xff]  }
 0x3c5   : > { %v4140_v42 = vpop.f32.mrf.mxu0  ;;  %v10824_v13 = vld [vmem:[%s11091_s17 + $0xafc] ss:$12 sps:$4 sm:$0xff]  }
 0x3c6   : > { %v4141_v9 = vadd.f32 %v12465_v0, %v4140_v42  ;;  %v12671_v43 = vpop.f32.mrf.mxu1  ;;  %10154 = vmatmul.mubr.msk.bf16.gmra.mxu1 %vm2993_vm2, %v10821_v27 }
 0x3c7   : > { %v4142_v14 = vpop.f32.mrf.mxu0  ;;  %10157 = vmatprep.mubr.msk.bf16.mxu1 %vm11003_vm0, %v11002_v3 }
 0x3c8   : > { %v5285_v16 = vadd.f32 %v12576_v4, %v4141_v9  ;;  %v10059_v41 = vpop.f32.mrf.mxu1 }
 0x3c9   : > { %v4145_v32 = vpop.f32.mrf.mxu0  ;;  %4336 = vmatmul.mubr.bf16.gmra.mxu0 %v10798_v53 }
 0x3ca   : > { %v9143_v18 = vpack.c.bf16 %v5285_v16, %v5282_v51  ;;  %4343 = vmatprep.mubr.bf16.mxu0 %v10804_v57  ;;  %v4146_v58 = vadd.f32 %v12465_v0, %v4145_v32  ;;  %v12681_v2 = vpop.f32.mrf.mxu1  ;;  %v10814_v51 = vld [vmem:[%s11091_s17 + $0xac8] ss:$12 sps:$4 sm:$0xff]  }
 0x3cb   : > { %v4147_v21 = vpop.f32.mrf.mxu0 }
 0x3cc   : > { %9485 = vst [vmem:[%s11354_s12 + $0x2b0] sm:$0xff] %v9143_v18   ;;  %v5290_v6 = vadd.f32 %v12581_v12, %v4146_v58  ;;  %v10060_v29 = vpop.f32.mrf.mxu1  ;;  %v10833_v18 = vld [vmem:[%s11091_s17 + $0xb48] ss:$12 sps:$4 sm:$0xff]  }
 0x3cd   : > { %v4148_v4 = vpop.f32.mrf.mxu0  ;;  %v10828_v29 = vld [vmem:[%s11091_s17 + $0xb14] ss:$12 sps:$4 sm:$0xff]  }
 0x3ce   : > { %v4149_v25 = vadd.f32 %v12465_v0, %v4148_v4  ;;  %v12686_v50 = vpop.f32.mrf.mxu1  ;;  %10158 = vmatmul.mubr.msk.bf16.gmra.mxu1 %vm2993_vm2, %v10825_v23 }
 0x3cf   : > { %v4150_v30 = vpop.f32.mrf.mxu0  ;;  %10161 = vmatprep.mubr.msk.bf16.mxu1 %vm11003_vm0, %v11002_v3 }
 0x3d0   : > { %v5293_v33 = vadd.f32 %v12591_v20, %v4149_v25  ;;  %v10063_v61 = vpop.f32.mrf.mxu1 }
 0x3d1   : > { %v4153_v39 = vpop.f32.mrf.mxu0  ;;  %4344 = vmatmul.mubr.bf16.gmra.mxu0 %v10802_v62 }
 0x3d2   : > { %v9148_v34 = vpack.c.bf16 %v5293_v33, %v5290_v6  ;;  %4351 = vmatprep.mubr.bf16.mxu0 %v10808_v7  ;;  %v4154_v12 = vadd.f32 %v12465_v0, %v4153_v39  ;;  %v12696_v17 = vpop.f32.mrf.mxu1  ;;  %v10818_v6 = vld [vmem:[%s11091_s17 + $0xae0] ss:$12 sps:$4 sm:$0xff]  }
 0x3d3   : > { %v4155_v37 = vpop.f32.mrf.mxu0 }
 0x3d4   : > { %9486 = vst [vmem:[%s11354_s12 + $0x2b8] sm:$0xff] %v9148_v34   ;;  %v5298_v22 = vadd.f32 %v12596_v28, %v4154_v12  ;;  %v10064_v42 = vpop.f32.mrf.mxu1  ;;  %v10837_v34 = vld [vmem:[%s11091_s17 + $0xb60] ss:$12 sps:$4 sm:$0xff]  }
 0x3d5   : > { %v4156_v20 = vpop.f32.mrf.mxu0  ;;  %v10832_v42 = vld [vmem:[%s11091_s17 + $0xb2c] ss:$12 sps:$4 sm:$0xff]  }
 0x3d6   : > { %v4157_v38 = vadd.f32 %v12465_v0, %v4156_v20  ;;  %v12701_v57 = vpop.f32.mrf.mxu1  ;;  %10162 = vmatmul.mubr.msk.bf16.gmra.mxu1 %vm2993_vm2, %v10829_v1 }
 0x3d7   : > { %v4158_v49 = vpop.f32.mrf.mxu0  ;;  %10165 = vmatprep.mubr.msk.bf16.mxu1 %vm11003_vm0, %v11002_v3 }
 0x3d8   : > { %v5301_v52 = vadd.f32 %v12606_v36, %v4157_v38  ;;  %v10067_v14 = vpop.f32.mrf.mxu1 }
 0x3d9   : > { %v4161_v45 = vpop.f32.mrf.mxu0  ;;  %4352 = vmatmul.mubr.bf16.gmra.mxu0 %v10806_v15 }
 0x3da   : > { %v9153_v54 = vpack.c.bf16 %v5301_v52, %v5298_v22  ;;  %4359 = vmatprep.mubr.bf16.mxu0 %v10812_v46  ;;  %v4162_v28 = vadd.f32 %v12465_v0, %v4161_v45  ;;  %v12711_v32 = vpop.f32.mrf.mxu1  ;;  %v10822_v22 = vld [vmem:[%s11091_s17 + $0xaf8] ss:$12 sps:$4 sm:$0xff]  }
 0x3db   : > { %v4163_v56 = vpop.f32.mrf.mxu0 }
 0x3dc   : > { %9487 = vst [vmem:[%s11354_s12 + $0x2c0] sm:$0xff] %v9153_v54   ;;  %v5306_v48 = vadd.f32 %v12611_v47, %v4162_v28  ;;  %v10068_v4 = vpop.f32.mrf.mxu1  ;;  %v10841_v54 = vld [vmem:[%s11091_s17 + $0xb78] ss:$12 sps:$4 sm:$0xff]  }
 0x3dd   : > { %v4164_v36 = vpop.f32.mrf.mxu0  ;;  %v10836_v4 = vld [vmem:[%s11091_s17 + $0xb44] ss:$12 sps:$4 sm:$0xff]  }
 0x3de   : > { %v4165_v63 = vadd.f32 %v12465_v0, %v4164_v36  ;;  %v12716_v7 = vpop.f32.mrf.mxu1  ;;  %10166 = vmatmul.mubr.msk.bf16.gmra.mxu1 %vm2993_vm2, %v10833_v18 }
 0x3df   : > { %v4166_v5 = vpop.f32.mrf.mxu0  ;;  %10169 = vmatprep.mubr.msk.bf16.mxu1 %vm11003_vm0, %v11002_v3 }
 0x3e0   : > { %v5309_v8 = vadd.f32 %v12621_v55, %v4165_v63  ;;  %v10071_v30 = vpop.f32.mrf.mxu1 }
 0x3e1   : > { %v4169_v53 = vpop.f32.mrf.mxu0  ;;  %4360 = vmatmul.mubr.bf16.gmra.mxu0 %v10810_v31 }
 0x3e2   : > { %v9158_v9 = vpack.c.bf16 %v5309_v8, %v5306_v48  ;;  %4367 = vmatprep.mubr.bf16.mxu0 %v10816_v40  ;;  %v4170_v47 = vadd.f32 %v12465_v0, %v4169_v53  ;;  %v12726_v39 = vpop.f32.mrf.mxu1  ;;  %v10826_v48 = vld [vmem:[%s11091_s17 + $0xb10] ss:$12 sps:$4 sm:$0xff]  }
 0x3e3   : > { %v4171_v11 = vpop.f32.mrf.mxu0 }
 0x3e4   : > { %9488 = vst [vmem:[%s11354_s12 + $0x2c8] sm:$0xff] %v9158_v9   ;;  %v5314_v58 = vadd.f32 %v12626_v60, %v4170_v47  ;;  %v10072_v20 = vpop.f32.mrf.mxu1  ;;  %v10845_v9 = vld [vmem:[%s11091_s17 + $0xb90] ss:$12 sps:$4 sm:$0xff]  }
 0x3e5   : > { %v4172_v55 = vpop.f32.mrf.mxu0  ;;  %v10840_v20 = vld [vmem:[%s11091_s17 + $0xb5c] ss:$12 sps:$4 sm:$0xff]  }
 0x3e6   : > { %v4173_v16 = vadd.f32 %v12465_v0, %v4172_v55  ;;  %v12731_v46 = vpop.f32.mrf.mxu1  ;;  %10170 = vmatmul.mubr.msk.bf16.gmra.mxu1 %vm2993_vm2, %v10837_v34 }
 0x3e7   : > { %v4174_v21 = vpop.f32.mrf.mxu0  ;;  %10173 = vmatprep.mubr.msk.bf16.mxu1 %vm11003_vm0, %v11002_v3 }
 0x3e8   : > { %v5317_v24 = vadd.f32 %v12636_v10, %v4173_v16  ;;  %v10075_v49 = vpop.f32.mrf.mxu1 }
 0x3e9   : > { %v4177_v62 = vpop.f32.mrf.mxu0  ;;  %4368 = vmatmul.mubr.bf16.gmra.mxu0 %v10814_v51 }
 0x3ea   : > { %v9163_v25 = vpack.c.bf16 %v5317_v24, %v5314_v58  ;;  %4375 = vmatprep.mubr.bf16.mxu0 %v10820_v59  ;;  %v4178_v60 = vadd.f32 %v12465_v0, %v4177_v62  ;;  %v12741_v45 = vpop.f32.mrf.mxu1  ;;  %v10830_v58 = vld [vmem:[%s11091_s17 + $0xb28] ss:$12 sps:$4 sm:$0xff]  }
 0x3eb   : > { %v4179_v27 = vpop.f32.mrf.mxu0 }
 0x3ec   : > { %9489 = vst [vmem:[%s11354_s12 + $0x2d0] sm:$0xff] %v9163_v25   ;;  %v5322_v12 = vadd.f32 %v12641_v19, %v4178_v60  ;;  %v10076_v36 = vpop.f32.mrf.mxu1  ;;  %v10849_v25 = vld [vmem:[%s11091_s17 + $0xba8] ss:$12 sps:$4 sm:$0xff]  }
 0x3ed   : > { %v4180_v10 = vpop.f32.mrf.mxu0  ;;  %v10844_v36 = vld [vmem:[%s11091_s17 + $0xb74] ss:$12 sps:$4 sm:$0xff]  }
 0x3ee   : > { %v4181_v33 = vadd.f32 %v12465_v0, %v4180_v10  ;;  %v12746_v40 = vpop.f32.mrf.mxu1  ;;  %10174 = vmatmul.mubr.msk.bf16.gmra.mxu1 %vm2993_vm2, %v10841_v54 }
 0x3ef   : > { %v4182_v37 = vpop.f32.mrf.mxu0  ;;  %10177 = vmatprep.mubr.msk.bf16.mxu1 %vm11003_vm0, %v11002_v3 }
 0x3f0   : > { %v5325_v41 = vadd.f32 %v12651_v26, %v4181_v33  ;;  %v10079_v5 = vpop.f32.mrf.mxu1 }
 0x3f1   : > { %v4185_v15 = vpop.f32.mrf.mxu0  ;;  %4376 = vmatmul.mubr.bf16.gmra.mxu0 %v10818_v6 }
 0x3f2   : > { %v9168_v38 = vpack.c.bf16 %v5325_v41, %v5322_v12  ;;  %4383 = vmatprep.mubr.bf16.mxu0 %v10824_v13  ;;  %v4186_v19 = vadd.f32 %v12465_v0, %v4185_v15  ;;  %v12756_v53 = vpop.f32.mrf.mxu1  ;;  %v10834_v12 = vld [vmem:[%s11091_s17 + $0xb40] ss:$12 sps:$4 sm:$0xff]  }
 0x3f3   : > { %v4187_v23 = vpop.f32.mrf.mxu0 }
 0x3f4   : > { %9490 = vst [vmem:[%s11354_s12 + $0x2d8] sm:$0xff] %v9168_v38   ;;  %v5330_v28 = vadd.f32 %v12656_v35, %v4186_v19  ;;  %v10080_v55 = vpop.f32.mrf.mxu1  ;;  %v10853_v38 = vld [vmem:[%s11091_s17 + $0xbc0] ss:$12 sps:$4 sm:$0xff]  }
 0x3f5   : > { %v4188_v26 = vpop.f32.mrf.mxu0  ;;  %v10848_v55 = vld [vmem:[%s11091_s17 + $0xb8c] ss:$12 sps:$4 sm:$0xff]  }
 0x3f6   : > { %v4189_v52 = vadd.f32 %v12465_v0, %v4188_v26  ;;  %v12761_v59 = vpop.f32.mrf.mxu1  ;;  %10178 = vmatmul.mubr.msk.bf16.gmra.mxu1 %vm2993_vm2, %v10845_v9 }
 0x3f7   : > { %v4190_v56 = vpop.f32.mrf.mxu0  ;;  %10181 = vmatprep.mubr.msk.bf16.mxu1 %vm11003_vm0, %v11002_v3 }
 0x3f8   : > { %v5333_v61 = vadd.f32 %v12666_v44, %v4189_v52  ;;  %v10083_v21 = vpop.f32.mrf.mxu1 }
 0x3f9   : > { %v4193_v31 = vpop.f32.mrf.mxu0  ;;  %4384 = vmatmul.mubr.bf16.gmra.mxu0 %v10822_v22 }
 0x3fa   : > { %v9173_v63 = vpack.c.bf16 %v5333_v61, %v5330_v28  ;;  %4391 = vmatprep.mubr.bf16.mxu0 %v10828_v29  ;;  %v4194_v35 = vadd.f32 %v12465_v0, %v4193_v31  ;;  %v12771_v62 = vpop.f32.mrf.mxu1  ;;  %v10838_v28 = vld [vmem:[%s11091_s17 + $0xb58] ss:$12 sps:$4 sm:$0xff]  }
 0x3fb   : > { %v4195_v1 = vpop.f32.mrf.mxu0 }
 0x3fc   : > { %9491 = vst [vmem:[%s11354_s12 + $0x2e0] sm:$0xff] %v9173_v63   ;;  %v5338_v47 = vadd.f32 %v12671_v43, %v4194_v35  ;;  %v10084_v10 = vpop.f32.mrf.mxu1  ;;  %v10857_v63 = vld [vmem:[%s11091_s17 + $0xbd8] ss:$12 sps:$4 sm:$0xff]  }
 0x3fd   : > { %v4196_v44 = vpop.f32.mrf.mxu0  ;;  %v10852_v10 = vld [vmem:[%s11091_s17 + $0xba4] ss:$12 sps:$4 sm:$0xff]  }
 0x3fe   : > { %v4197_v8 = vadd.f32 %v12465_v0, %v4196_v44  ;;  %v12776_v13 = vpop.f32.mrf.mxu1  ;;  %10182 = vmatmul.mubr.msk.bf16.gmra.mxu1 %vm2993_vm2, %v10849_v25 }
 0x3ff   : > { %v4198_v11 = vpop.f32.mrf.mxu0  ;;  %10185 = vmatprep.mubr.msk.bf16.mxu1 %vm11003_vm0, %v11002_v3 }
 0x400   : > { %v5341_v14 = vadd.f32 %v12681_v2, %v4197_v8  ;;  %v10087_v37 = vpop.f32.mrf.mxu1 }
 0x401   : > { %v4201_v51 = vpop.f32.mrf.mxu0  ;;  %4392 = vmatmul.mubr.bf16.gmra.mxu0 %v10826_v48 }
 0x402   : > { %v9178_v16 = vpack.c.bf16 %v5341_v14, %v5338_v47  ;;  %4399 = vmatprep.mubr.bf16.mxu0 %v10832_v42  ;;  %v4202_v43 = vadd.f32 %v12465_v0, %v4201_v51  ;;  %v12786_v15 = vpop.f32.mrf.mxu1  ;;  %v10842_v47 = vld [vmem:[%s11091_s17 + $0xb70] ss:$12 sps:$4 sm:$0xff]  }
 0x403   : > { %v4203_v18 = vpop.f32.mrf.mxu0 }
 0x404   : > { %9492 = vst [vmem:[%s11354_s12 + $0x2e8] sm:$0xff] %v9178_v16   ;;  %v5346_v60 = vadd.f32 %v12686_v50, %v4202_v43  ;;  %v10088_v26 = vpop.f32.mrf.mxu1  ;;  %v10861_v16 = vld [vmem:[%s11091_s17 + $0xbf0] ss:$12 sps:$4 sm:$0xff]  }
 0x405   : > { %v4204_v2 = vpop.f32.mrf.mxu0  ;;  %v10856_v26 = vld [vmem:[%s11091_s17 + $0xbbc] ss:$12 sps:$4 sm:$0xff]  }
 0x406   : > { %v4205_v24 = vadd.f32 %v12465_v0, %v4204_v2  ;;  %v12791_v29 = vpop.f32.mrf.mxu1  ;;  %10186 = vmatmul.mubr.msk.bf16.gmra.mxu1 %vm2993_vm2, %v10853_v38 }
 0x407   : > { %v4206_v27 = vpop.f32.mrf.mxu0  ;;  %10189 = vmatprep.mubr.msk.bf16.mxu1 %vm11003_vm0, %v11002_v3 }
 0x408   : > { %v5349_v30 = vadd.f32 %v12696_v17, %v4205_v24  ;;  %v10091_v56 = vpop.f32.mrf.mxu1 }
 0x409   : > { %v4209_v6 = vpop.f32.mrf.mxu0  ;;  %4400 = vmatmul.mubr.bf16.gmra.mxu0 %v10830_v58 }
 0x40a   : > { %v9183_v33 = vpack.c.bf16 %v5349_v30, %v5346_v60  ;;  %4407 = vmatprep.mubr.bf16.mxu0 %v10836_v4  ;;  %v4210_v50 = vadd.f32 %v12465_v0, %v4209_v6  ;;  %v12801_v31 = vpop.f32.mrf.mxu1  ;;  %v10846_v60 = vld [vmem:[%s11091_s17 + $0xb88] ss:$12 sps:$4 sm:$0xff]  }
 0x40b   : > { %v4211_v34 = vpop.f32.mrf.mxu0 }
 0x40c   : > { %9493 = vst [vmem:[%s11354_s12 + $0x2f0] sm:$0xff] %v9183_v33   ;;  %v5354_v19 = vadd.f32 %v12701_v57, %v4210_v50  ;;  %v10092_v44 = vpop.f32.mrf.mxu1  ;;  %v10865_v33 = vld [vmem:[%s11091_s17 + $0xc08] ss:$12 sps:$4 sm:$0xff]  }
 0x40d   : > { %v4212_v17 = vpop.f32.mrf.mxu0  ;;  %v10860_v44 = vld [vmem:[%s11091_s17 + $0xbd4] ss:$12 sps:$4 sm:$0xff]  }
 0x40e   : > { %v4213_v41 = vadd.f32 %v12465_v0, %v4212_v17  ;;  %v12806_v42 = vpop.f32.mrf.mxu1  ;;  %10190 = vmatmul.mubr.msk.bf16.gmra.mxu1 %vm2993_vm2, %v10857_v63 }
 0x40f   : > { %v4214_v23 = vpop.f32.mrf.mxu0  ;;  %10193 = vmatprep.mubr.msk.bf16.mxu1 %vm11003_vm0, %v11002_v3 }
 0x410   : > { %v5357_v49 = vadd.f32 %v12711_v32, %v4213_v41  ;;  %v10095_v11 = vpop.f32.mrf.mxu1 }
 0x411   : > { %v4217_v22 = vpop.f32.mrf.mxu0  ;;  %4408 = vmatmul.mubr.bf16.gmra.mxu0 %v10834_v12 }
 0x412   : > { %v9188_v52 = vpack.c.bf16 %v5357_v49, %v5354_v19  ;;  %4415 = vmatprep.mubr.bf16.mxu0 %v10840_v20  ;;  %v4218_v57 = vadd.f32 %v12465_v0, %v4217_v22  ;;  %v12816_v51 = vpop.f32.mrf.mxu1  ;;  %v10850_v19 = vld [vmem:[%s11091_s17 + $0xba0] ss:$12 sps:$4 sm:$0xff]  }
 0x413   : > { %v4219_v54 = vpop.f32.mrf.mxu0 }
 0x414   : > { %9494 = vst [vmem:[%s11354_s12 + $0x2f8] sm:$0xff] %v9188_v52   ;;  %v5362_v35 = vadd.f32 %v12716_v7, %v4218_v57  ;;  %v10096_v2 = vpop.f32.mrf.mxu1  ;;  %v10869_v52 = vld [vmem:[%s11091_s17 + $0xc20] ss:$12 sps:$4 sm:$0xff]  }
 0x415   : > { %v4220_v32 = vpop.f32.mrf.mxu0  ;;  %v10864_v2 = vld [vmem:[%s11091_s17 + $0xbec] ss:$12 sps:$4 sm:$0xff]  }
 0x416   : > { %v4221_v61 = vadd.f32 %v12465_v0, %v4220_v32  ;;  %v12821_v4 = vpop.f32.mrf.mxu1  ;;  %10194 = vmatmul.mubr.msk.bf16.gmra.mxu1 %vm2993_vm2, %v10861_v16 }
 0x417   : > { %v4222_v1 = vpop.f32.mrf.mxu0  ;;  %10197 = vmatprep.mubr.msk.bf16.mxu1 %vm11003_vm0, %v11002_v3 }
 0x418   : > { %v5365_v5 = vadd.f32 %v12726_v39, %v4221_v61  ;;  %v10099_v27 = vpop.f32.mrf.mxu1 }
 0x419   : > { %v4225_v48 = vpop.f32.mrf.mxu0  ;;  %4416 = vmatmul.mubr.bf16.gmra.mxu0 %v10838_v28 }
 0x41a   : > { %v9193_v8 = vpack.c.bf16 %v5365_v5, %v5362_v35  ;;  %4423 = vmatprep.mubr.bf16.mxu0 %v10844_v36  ;;  %v4226_v7 = vadd.f32 %v12465_v0, %v4225_v48  ;;  %v12831_v6 = vpop.f32.mrf.mxu1  ;;  %v10854_v35 = vld [vmem:[%s11091_s17 + $0xbb8] ss:$12 sps:$4 sm:$0xff]  }
 0x41b   : > { %v4227_v9 = vpop.f32.mrf.mxu0 }
 0x41c   : > { %9495 = vst [vmem:[%s11354_s12 + $0x300] sm:$0xff] %v9193_v8   ;;  %v5370_v43 = vadd.f32 %v12731_v46, %v4226_v7  ;;  %v10100_v17 = vpop.f32.mrf.mxu1  ;;  %v10873_v8 = vld [vmem:[%s11091_s17 + $0xc38] ss:$12 sps:$4 sm:$0xff]  }
 0x41d   : > { %v4228_v39 = vpop.f32.mrf.mxu0  ;;  %v10868_v17 = vld [vmem:[%s11091_s17 + $0xc04] ss:$12 sps:$4 sm:$0xff]  }
 0x41e   : > { %v4229_v14 = vadd.f32 %v12465_v0, %v4228_v39  ;;  %v12836_v20 = vpop.f32.mrf.mxu1  ;;  %10198 = vmatmul.mubr.msk.bf16.gmra.mxu1 %vm2993_vm2, %v10865_v33 }
 0x41f   : > { %v4230_v18 = vpop.f32.mrf.mxu0  ;;  %10201 = vmatprep.mubr.msk.bf16.mxu1 %vm11003_vm0, %v11002_v3 }
 0x420   : > { %v5373_v21 = vadd.f32 %v12741_v45, %v4229_v14  ;;  %v10103_v38 = vpop.f32.mrf.mxu1 }
 0x421   : > { %v4233_v58 = vpop.f32.mrf.mxu0  ;;  %4424 = vmatmul.mubr.bf16.gmra.mxu0 %v10842_v47 }
 0x422   : > { %v9198_v24 = vpack.c.bf16 %v5373_v21, %v5370_v43  ;;  %4431 = vmatprep.mubr.bf16.mxu0 %v10848_v55  ;;  %v4234_v46 = vadd.f32 %v12465_v0, %v4233_v58  ;;  %v12851_v22 = vpop.f32.mrf.mxu1  ;;  %v10858_v43 = vld [vmem:[%s11091_s17 + $0xbd0] ss:$12 sps:$4 sm:$0xff]  }
 0x423   : > { %v4235_v25 = vpop.f32.mrf.mxu0 }
 0x424   : > { %9496 = vst [vmem:[%s11354_s12 + $0x308] sm:$0xff] %v9198_v24   ;;  %v5378_v50 = vadd.f32 %v12746_v40, %v4234_v46  ;;  %v12845_v40 = vld [vmem:[%s13444_s2] ss:$0 sm:$0xff]  ;;  %v10104_v32 = vpop.f32.mrf.mxu1  ;;  %v10877_v24 = vld [vmem:[%s11091_s17 + $0xc50] ss:$12 sps:$4 sm:$0xff]  }
 0x425   : > { %v4236_v45 = vpop.f32.mrf.mxu0  ;;  %v10872_v32 = vld [vmem:[%s11091_s17 + $0xc1c] ss:$12 sps:$4 sm:$0xff]  }
 0x426   : > { %v4237_v30 = vadd.f32 %v12465_v0, %v4236_v45  ;;  %v12856_v36 = vpop.f32.mrf.mxu1  ;;  %10202 = vmatmul.mubr.msk.bf16.gmra.mxu1 %vm2993_vm2, %v10869_v52 }
 0x427   : > { %v4238_v34 = vpop.f32.mrf.mxu0  ;;  %10205 = vmatprep.mubr.msk.bf16.mxu1 %vm11003_vm0, %v11002_v3 }
 0x428   : > { %v5381_v37 = vadd.f32 %v12756_v53, %v4237_v30  ;;  %v10107_v1 = vpop.f32.mrf.mxu1 }
 0x429   : > { %v4241_v12 = vpop.f32.mrf.mxu0  ;;  %4432 = vmatmul.mubr.bf16.gmra.mxu0 %v10846_v60 }
 0x42a   : > { %v9203_v41 = vpack.c.bf16 %v5381_v37, %v5378_v50  ;;  %4439 = vmatprep.mubr.bf16.mxu0 %v10852_v10  ;;  %v4242_v53 = vadd.f32 %v12845_v40, %v4241_v12  ;;  %v12866_v48 = vpop.f32.mrf.mxu1  ;;  %v10862_v50 = vld [vmem:[%s11091_s17 + $0xbe8] ss:$12 sps:$4 sm:$0xff]  }
 0x42b   : > { %v4243_v0 = vpop.f32.mrf.mxu0 }
 0x42c   : > { %9497 = vst [vmem:[%s11354_s12 + $0x310] sm:$0xff] %v9203_v41   ;;  %v5386_v57 = vadd.f32 %v12761_v59, %v4242_v53  ;;  %v10108_v39 = vpop.f32.mrf.mxu1  ;;  %v10881_v41 = vld [vmem:[%s11091_s17 + $0xc68] ss:$12 sps:$4 sm:$0xff]  }
 0x42d   : > { %v4244_v23 = vpop.f32.mrf.mxu0  ;;  %v10876_v39 = vld [vmem:[%s11091_s17 + $0xc34] ss:$12 sps:$4 sm:$0xff]  }
 0x42e   : > { %v4245_v49 = vadd.f32 %v12845_v40, %v4244_v23  ;;  %v12871_v55 = vpop.f32.mrf.mxu1  ;;  %10206 = vmatmul.mubr.msk.bf16.gmra.mxu1 %vm2993_vm2, %v10873_v8 }
 0x42f   : > { %v4246_v54 = vpop.f32.mrf.mxu0  ;;  %10209 = vmatprep.mubr.msk.bf16.mxu1 %vm11003_vm0, %v11002_v3 }
 0x430   : > { %v5389_v56 = vadd.f32 %v12771_v62, %v4245_v49  ;;  %v10111_v18 = vpop.f32.mrf.mxu1 }
 0x431   : > { %v4249_v28 = vpop.f32.mrf.mxu0  ;;  %4440 = vmatmul.mubr.bf16.gmra.mxu0 %v10850_v19 }
 0x432   : > { %v9208_v61 = vpack.c.bf16 %v5389_v56, %v5386_v57  ;;  %4447 = vmatprep.mubr.bf16.mxu0 %v10856_v26  ;;  %v4250_v59 = vadd.f32 %v12845_v40, %v4249_v28  ;;  %v12881_v58 = vpop.f32.mrf.mxu1  ;;  %v10866_v57 = vld [vmem:[%s11091_s17 + $0xc00] ss:$12 sps:$4 sm:$0xff]  }
 0x433   : > { %v4251_v63 = vpop.f32.mrf.mxu0 }
 0x434   : > { %9498 = vst [vmem:[%s11354_s12 + $0x318] sm:$0xff] %v9208_v61   ;;  %v5394_v7 = vadd.f32 %v12776_v13, %v4250_v59  ;;  %v10112_v45 = vpop.f32.mrf.mxu1  ;;  %v10885_v61 = vld [vmem:[%s11091_s17 + $0xc80] ss:$12 sps:$4 sm:$0xff]  }
 0x435   : > { %v4252_v62 = vpop.f32.mrf.mxu0  ;;  %v10880_v45 = vld [vmem:[%s11091_s17 + $0xc4c] ss:$12 sps:$4 sm:$0xff]  }
 0x436   : > { %v4253_v5 = vadd.f32 %v12845_v40, %v4252_v62  ;;  %v12886_v10 = vpop.f32.mrf.mxu1  ;;  %10210 = vmatmul.mubr.msk.bf16.gmra.mxu1 %vm2993_vm2, %v10877_v24 }
 0x437   : > { %v4254_v9 = vpop.f32.mrf.mxu0  ;;  %10213 = vmatprep.mubr.msk.bf16.mxu1 %vm11003_vm0, %v11002_v3 }
 0x438   : > { %v5397_v11 = vadd.f32 %v12786_v15, %v4253_v5  ;;  %v10115_v34 = vpop.f32.mrf.mxu1 }
 0x439   : > { %v4257_v47 = vpop.f32.mrf.mxu0  ;;  %4448 = vmatmul.mubr.bf16.gmra.mxu0 %v10854_v35 }
 0x43a   : > { %v9213_v14 = vpack.c.bf16 %v5397_v11, %v5394_v7  ;;  %4455 = vmatprep.mubr.bf16.mxu0 %v10860_v44  ;;  %v4258_v13 = vadd.f32 %v12845_v40, %v4257_v47  ;;  %v12896_v12 = vpop.f32.mrf.mxu1  ;;  %v10870_v7 = vld [vmem:[%s11091_s17 + $0xc18] ss:$12 sps:$4 sm:$0xff]  }
 0x43b   : > { %v4259_v16 = vpop.f32.mrf.mxu0 }
 0x43c   : > { %9499 = vst [vmem:[%s11354_s12 + $0x320] sm:$0xff] %v9213_v14   ;;  %v5402_v46 = vadd.f32 %v12791_v29, %v4258_v13  ;;  %v10116_v23 = vpop.f32.mrf.mxu1  ;;  %v10889_v14 = vld [vmem:[%s11091_s17 + $0xc98] ss:$12 sps:$4 sm:$0xff]  }
 0x43d   : > { %v4260_v15 = vpop.f32.mrf.mxu0  ;;  %v10884_v23 = vld [vmem:[%s11091_s17 + $0xc64] ss:$12 sps:$4 sm:$0xff]  }
 0x43e   : > { %v4261_v21 = vadd.f32 %v12845_v40, %v4260_v15  ;;  %v12901_v26 = vpop.f32.mrf.mxu1  ;;  %10214 = vmatmul.mubr.msk.bf16.gmra.mxu1 %vm2993_vm2, %v10881_v41 }
 0x43f   : > { %v4262_v25 = vpop.f32.mrf.mxu0  ;;  %10217 = vmatprep.mubr.msk.bf16.mxu1 %vm11003_vm0, %v11002_v3 }
 0x440   : > { %v5405_v27 = vadd.f32 %v12801_v31, %v4261_v21  ;;  %v10119_v54 = vpop.f32.mrf.mxu1 }
 0x441   : > { %v4265_v60 = vpop.f32.mrf.mxu0  ;;  %4456 = vmatmul.mubr.bf16.gmra.mxu0 %v10858_v43 }
 0x442   : > { %v9218_v30 = vpack.c.bf16 %v5405_v27, %v5402_v46  ;;  %4463 = vmatprep.mubr.bf16.mxu0 %v10864_v2  ;;  %v4266_v29 = vadd.f32 %v12845_v40, %v4265_v60  ;;  %v12911_v28 = vpop.f32.mrf.mxu1  ;;  %v10874_v46 = vld [vmem:[%s11091_s17 + $0xc30] ss:$12 sps:$4 sm:$0xff]  }
 0x443   : > { %v4267_v33 = vpop.f32.mrf.mxu0 }
 0x444   : > { %9500 = vst [vmem:[%s11354_s12 + $0x328] sm:$0xff] %v9218_v30   ;;  %v5410_v53 = vadd.f32 %v12806_v42, %v4266_v29  ;;  %v10120_v62 = vpop.f32.mrf.mxu1  ;;  %v10893_v30 = vld [vmem:[%s11091_s17 + $0xcb0] ss:$12 sps:$4 sm:$0xff]  }
 0x445   : > { %v4268_v31 = vpop.f32.mrf.mxu0  ;;  %v10888_v62 = vld [vmem:[%s11091_s17 + $0xc7c] ss:$12 sps:$4 sm:$0xff]  }
 0x446   : > { %v4269_v37 = vadd.f32 %v12845_v40, %v4268_v31  ;;  %v12916_v44 = vpop.f32.mrf.mxu1  ;;  %10218 = vmatmul.mubr.msk.bf16.gmra.mxu1 %vm2993_vm2, %v10885_v61 }
 0x447   : > { %v4270_v0 = vpop.f32.mrf.mxu0  ;;  %10221 = vmatprep.mubr.msk.bf16.mxu1 %vm11003_vm0, %v11002_v3 }
 0x448   : > { %v5413_v38 = vadd.f32 %v12816_v51, %v4269_v37  ;;  %v10123_v9 = vpop.f32.mrf.mxu1 }
 0x449   : > { %v4273_v19 = vpop.f32.mrf.mxu0  ;;  %4464 = vmatmul.mubr.bf16.gmra.mxu0 %v10862_v50 }
 0x44a   : > { %v9223_v49 = vpack.c.bf16 %v5413_v38, %v5410_v53  ;;  %4471 = vmatprep.mubr.bf16.mxu0 %v10868_v17  ;;  %v4274_v42 = vadd.f32 %v12845_v40, %v4273_v19  ;;  %v12926_v47 = vpop.f32.mrf.mxu1  ;;  %v10878_v53 = vld [vmem:[%s11091_s17 + $0xc48] ss:$12 sps:$4 sm:$0xff]  }
 0x44b   : > { %v4275_v52 = vpop.f32.mrf.mxu0 }
 0x44c   : > { %9501 = vst [vmem:[%s11354_s12 + $0x330] sm:$0xff] %v9223_v49   ;;  %v5418_v59 = vadd.f32 %v12821_v4, %v4274_v42  ;;  %v10124_v15 = vpop.f32.mrf.mxu1  ;;  %v10897_v49 = vld [vmem:[%s11091_s17 + $0xcc8] ss:$12 sps:$4 sm:$0xff]  }
 0x44d   : > { %v4276_v51 = vpop.f32.mrf.mxu0  ;;  %v10892_v15 = vld [vmem:[%s11091_s17 + $0xc94] ss:$12 sps:$4 sm:$0xff]  }
 0x44e   : > { %v4277_v56 = vadd.f32 %v12845_v40, %v4276_v51  ;;  %v12931_v2 = vpop.f32.mrf.mxu1  ;;  %10222 = vmatmul.mubr.msk.bf16.gmra.mxu1 %vm2993_vm2, %v10889_v14 }
 0x44f   : > { %v4278_v63 = vpop.f32.mrf.mxu0  ;;  %10225 = vmatprep.mubr.msk.bf16.mxu1 %vm11003_vm0, %v11002_v3 }
 0x450   : > { %v5421_v1 = vadd.f32 %v12831_v6, %v4277_v56  ;;  %v10127_v25 = vpop.f32.mrf.mxu1 }
 0x451   : > { %v4281_v35 = vpop.f32.mrf.mxu0  ;;  %4472 = vmatmul.mubr.bf16.gmra.mxu0 %v10866_v57 }
 0x452   : > { %v9228_v5 = vpack.c.bf16 %v5421_v1, %v5418_v59  ;;  %4479 = vmatprep.mubr.bf16.mxu0 %v10872_v32  ;;  %v4282_v4 = vadd.f32 %v12845_v40, %v4281_v35  ;;  %v12941_v60 = vpop.f32.mrf.mxu1  ;;  %v10882_v59 = vld [vmem:[%s11091_s17 + $0xc60] ss:$12 sps:$4 sm:$0xff]  }
 0x453   : > { %v4283_v8 = vpop.f32.mrf.mxu0 }
 0x454   : > { %9502 = vst [vmem:[%s11354_s12 + $0x338] sm:$0xff] %v9228_v5   ;;  %v5426_v13 = vadd.f32 %v12836_v20, %v4282_v4  ;;  %v10128_v31 = vpop.f32.mrf.mxu1  ;;  %v10901_v5 = vld [vmem:[%s11091_s17 + $0xce0] ss:$12 sps:$4 sm:$0xff]  }
 0x455   : > { %v4284_v6 = vpop.f32.mrf.mxu0 }
 0x456   : > { %v4285_v11 = vadd.f32 %v12845_v40, %v4284_v6  ;;  %v12946_v17 = vpop.f32.mrf.mxu1  ;;  %10226 = vmatmul.mubr.msk.bf16.gmra.mxu1 %vm2993_vm2, %v10893_v30 }
 0x457   : > { %v4286_v16 = vpop.f32.mrf.mxu0  ;;  %10229 = vmatprep.mubr.msk.bf16.mxu1 %vm11003_vm0, %v11002_v3 }
 0x458   : > { %v5429_v18 = vadd.f32 %v12851_v22, %v4285_v11  ;;  %v10131_v0 = vpop.f32.mrf.mxu1 }
 0x459   : > { %v4289_v43 = vpop.f32.mrf.mxu0  ;;  %4480 = vmatmul.mubr.bf16.gmra.mxu0 %v10870_v7 }
 0x45a   : > { %v9233_v21 = vpack.c.bf16 %v5429_v18, %v5426_v13  ;;  %4487 = vmatprep.mubr.bf16.mxu0 %v10876_v39  ;;  %v4290_v20 = vadd.f32 %v12845_v40, %v4289_v43  ;;  %v12956_v19 = vpop.f32.mrf.mxu1  ;;  %v10886_v13 = vld [vmem:[%s11091_s17 + $0xc78] ss:$12 sps:$4 sm:$0xff]  }
 0x45b   : > { %v4291_v24 = vpop.f32.mrf.mxu0 }
 0x45c   : > { %9503 = vst [vmem:[%s11354_s12 + $0x340] sm:$0xff] %v9233_v21   ;;  %v5434_v29 = vadd.f32 %v12856_v36, %v4290_v20  ;;  %v10132_v51 = vpop.f32.mrf.mxu1  ;;  %v10905_v21 = vld [vmem:[%s11091_s17 + $0xcf8] ss:$0 sps:$4 sm:$0xff]  }
 0x45d   : > { %v4292_v22 = vpop.f32.mrf.mxu0 }
 0x45e   : > { %v4293_v27 = vadd.f32 %v12845_v40, %v4292_v22  ;;  %v12961_v32 = vpop.f32.mrf.mxu1  ;;  %10230 = vmatmul.mubr.msk.bf16.gmra.mxu1 %vm2993_vm2, %v10897_v49 }
 0x45f   : > { %v4294_v33 = vpop.f32.mrf.mxu0  ;;  %10233 = vmatprep.mubr.msk.bf16.mxu1 %vm11003_vm0, %v11002_v3 }
 0x460   : > { %v5437_v34 = vadd.f32 %v12866_v48, %v4293_v27  ;;  %v10135_v63 = vpop.f32.mrf.mxu1 }
 0x461   : > { %v4297_v50 = vpop.f32.mrf.mxu0  ;;  %4488 = vmatmul.mubr.bf16.gmra.mxu0 %v10874_v46 }
 0x462   : > { %v9238_v37 = vpack.c.bf16 %v5437_v34, %v5434_v29  ;;  %4495 = vmatprep.mubr.bf16.mxu0 %v10880_v45  ;;  %v4298_v36 = vadd.f32 %v12845_v40, %v4297_v50  ;;  %v12971_v35 = vpop.f32.mrf.mxu1 }
 0x463   : > { %v4299_v41 = vpop.f32.mrf.mxu0 }
 0x464   : > { %9504 = vst [vmem:[%s11354_s12 + $0x348] sm:$0xff] %v9238_v37   ;;  %v5442_v42 = vadd.f32 %v12871_v55, %v4298_v36  ;;  %v10136_v6 = vpop.f32.mrf.mxu1 }
 0x465   : > { %v4300_v48 = vpop.f32.mrf.mxu0 }
 0x466   : > { %v4301_v38 = vadd.f32 %v12845_v40, %v4300_v48  ;;  %v12976_v39 = vpop.f32.mrf.mxu1  ;;  %10234 = vmatmul.mubr.msk.bf16.gmra.mxu1 %vm2993_vm2, %v10901_v5 }
 0x467   : > { %v4302_v52 = vpop.f32.mrf.mxu0  ;;  %10237 = vmatprep.mubr.msk.bf16.mxu1 %vm11003_vm0, %v11002_v3 }
 0x468   : > { %v5445_v54 = vadd.f32 %v12881_v58, %v4301_v38  ;;  %v10139_v16 = vpop.f32.mrf.mxu1 }
 0x469   : > { %v4305_v57 = vpop.f32.mrf.mxu0  ;;  %4496 = vmatmul.mubr.bf16.gmra.mxu0 %v10878_v53 }
 0x46a   : > { %v9243_v56 = vpack.c.bf16 %v5445_v54, %v5442_v42  ;;  %4503 = vmatprep.mubr.bf16.mxu0 %v10884_v23  ;;  %v4306_v55 = vadd.f32 %v12845_v40, %v4305_v57  ;;  %v12986_v43 = vpop.f32.mrf.mxu1  ;;  %v10894_v42 = vld [vmem:[%s11091_s17 + $0xca8] ss:$12 sps:$4 sm:$0xff]  }
 0x46b   : > { %v4307_v61 = vpop.f32.mrf.mxu0 }
 0x46c   : > { %9505 = vst [vmem:[%s11354_s12 + $0x350] sm:$0xff] %v9243_v56   ;;  %v5450_v4 = vadd.f32 %v12886_v10, %v4306_v55  ;;  %v10140_v25 = vpop.f32.mrf.mxu1 }
 0x46d   : > { %v4308_v58 = vpop.f32.mrf.mxu0 }
 0x46e   : > { %v4309_v1 = vadd.f32 %v12845_v40, %v4308_v58  ;;  %v12991_v27 = vpop.f32.mrf.mxu1  ;;  %10238 = vmatmul.mubr.msk.bf16.gmra.mxu1 %vm2993_vm2, %v10905_v21 }
 0x46f   : > { %v4310_v8 = vpop.f32.mrf.mxu0 }
 0x470   : > { %v5453_v9 = vadd.f32 %v12896_v12, %v4309_v1  ;;  %v10143_v33 = vpop.f32.mrf.mxu1  ;;  %v10898_v8 = vld [vmem:[%s11091_s17 + $0xcc0] ss:$12 sps:$4 sm:$0xff]  }
 0x471   : > { %v4313_v7 = vpop.f32.mrf.mxu0  ;;  %4504 = vmatmul.mubr.bf16.gmra.mxu0 %v10882_v59 }
 0x472   : > { %v9248_v11 = vpack.c.bf16 %v5453_v9, %v5450_v4  ;;  %4511 = vmatprep.mubr.bf16.mxu0 %v10888_v62  ;;  %v4314_v10 = vadd.f32 %v12845_v40, %v4313_v7  ;;  %v12999_v31 = vpop.f32.mrf.mxu1  ;;  %v10904_v4 = vld [vmem:[%s11091_s17 + $0xcdc] ss:$12 sps:$4 sm:$0xff]  }
 0x473   : > { %v4315_v14 = vpop.f32.mrf.mxu0 }
 0x474   : > { %9506 = vst [vmem:[%s11354_s12 + $0x358] sm:$0xff] %v9248_v11   ;;  %v5458_v20 = vadd.f32 %v12901_v26, %v4314_v10  ;;  %v10890_v26 = vld [vmem:[%s11091_s17 + $0xc90] ss:$12 sps:$4 sm:$0xff]   ;;  %v10144_v36 = vpop.f32.mrf.mxu1 }
 0x475   : > { %v4316_v12 = vpop.f32.mrf.mxu0 }
 0x476   : > { %v4317_v18 = vadd.f32 %v12845_v40, %v4316_v12  ;;  %v13003_v53 = vpop.f32.mrf.mxu1 }
 0x477   : > { %v4318_v24 = vpop.f32.mrf.mxu0 }
 0x478   : > { %v5461_v3 = vadd.f32 %v12911_v28, %v4317_v18  ;;  %v10896_v28 = vld [vmem:[%s11091_s17 + $0xcac] ss:$12 sps:$4 sm:$0xff]   ;;  %v10147_v49 = vpop.f32.mrf.mxu1 }
 0x479   : > { %v4321_v22 = vpop.f32.mrf.mxu0  ;;  %4512 = vmatmul.mubr.bf16.gmra.mxu0 %v10886_v13  ;;  %v753_v13 = vld [vmem:[%s11091_s17 + $0xcf0] sm:$0xff]  ;;  %v10902_v24 = vld [vmem:[%s11091_s17 + $0xcd8] ss:$12 sps:$4 sm:$0xff]  }
 0x47a   : > { %v9253_v46 = vpack.c.bf16 %v5461_v3, %v5458_v20  ;;  %4519 = vmatprep.mubr.bf16.mxu0 %v10892_v15  ;;  %v4322_v30 = vadd.f32 %v12845_v40, %v4321_v22  ;;  %v7978_v20 = vcombine.high %v753_v13, %v753_v13 }
 0x47b   : > { %v4323_v45 = vpop.f32.mrf.mxu0 }
 0x47c   : > { %9507 = vst [vmem:[%s11354_s12 + $0x360] sm:$0xff] %v9253_v46   ;;  %v5466_v37 = vadd.f32 %v12916_v44, %v4322_v30  ;;  %v10900_v44 = vld [vmem:[%s11091_s17 + $0xcc4] ss:$12 sps:$4 sm:$0xff]  }
 0x47d   : > { %v4324_v29 = vpop.f32.mrf.mxu0 }
 0x47e   : > { %v4325_v34 = vadd.f32 %v12845_v40, %v4324_v29 }
 0x47f   : > { %v4326_v50 = vpop.f32.mrf.mxu0 }
 0x480   : > { %v5469_v41 = vadd.f32 %v12926_v47, %v4325_v34  ;;  %v13010_v47 = vpop.f32.mrf.mxu1  ;;  %v7977_v50 = vcombine.low %v753_v13, %v753_v13 }
 0x481   : > { %v4329_v0 = vpop.f32.mrf.mxu0  ;;  %4520 = vmatmul.mubr.bf16.gmra.mxu0 %v10890_v26 }
 0x482   : > { %v9258_v48 = vpack.c.bf16 %v5469_v41, %v5466_v37  ;;  %4527 = vmatprep.mubr.bf16.mxu0 %v10896_v28  ;;  %v4330_v23 = vadd.f32 %v12845_v40, %v4329_v0  ;;  %v10148_v61 = vpop.f32.mrf.mxu1 }
 0x483   : > { %v4331_v38 = vpop.f32.mrf.mxu0 }
 0x484   : > { %9508 = vst [vmem:[%s11354_s12 + $0x368] sm:$0xff] %v9258_v48   ;;  %v5474_v57 = vadd.f32 %v12931_v2, %v4330_v23  ;;  %v13014_v58 = vpop.f32.mrf.mxu1 }
 0x485   : > { %v4332_v52 = vpop.f32.mrf.mxu0 }
 0x486   : > { %v4333_v54 = vadd.f32 %v12845_v40, %v4332_v52  ;;  %v10151_v62 = vpop.f32.mrf.mxu1 }
 0x487   : > { %v4334_v51 = vpop.f32.mrf.mxu0 }
 0x488   : > { %v5477_v56 = vadd.f32 %v12941_v60, %v4333_v54  ;;  %v13021_v60 = vpop.f32.mrf.mxu1 }
 0x489   : > { %v4337_v55 = vpop.f32.mrf.mxu0  ;;  %4528 = vmatmul.mubr.bf16.gmra.mxu0 %v10894_v42 }
 0x48a   : > { %v9263_v63 = vpack.c.bf16 %v5477_v56, %v5474_v57  ;;  %4535 = vmatprep.mubr.bf16.mxu0 %v10900_v44  ;;  %v4338_v1 = vadd.f32 %v12845_v40, %v4337_v55  ;;  %v10152_v11 = vpop.f32.mrf.mxu1 }
 0x48b   : > { %v4339_v59 = vpop.f32.mrf.mxu0 }
 0x48c   : > { %9509 = vst [vmem:[%s11354_s12 + $0x370] sm:$0xff] %v9263_v63   ;;  %v5482_v6 = vadd.f32 %v12946_v17, %v4338_v1  ;;  %v13025_v16 = vpop.f32.mrf.mxu1 }
 0x48d   : > { %v4340_v5 = vpop.f32.mrf.mxu0 }
 0x48e   : > { %v4341_v2 = vadd.f32 %v12845_v40, %v4340_v5  ;;  %v10155_v15 = vpop.f32.mrf.mxu1 }
 0x48f   : > { %v4342_v9 = vpop.f32.mrf.mxu0 }
 0x490   : > { %v5485_v7 = vadd.f32 %v12956_v19, %v4341_v2  ;;  %v13032_v19 = vpop.f32.mrf.mxu1 }
 0x491   : > { %v4345_v14 = vpop.f32.mrf.mxu0  ;;  %4536 = vmatmul.mubr.bf16.gmra.mxu0 %v10898_v8 }
 0x492   : > { %v9268_v10 = vpack.c.bf16 %v5485_v7, %v5482_v6  ;;  %4543 = vmatprep.mubr.bf16.mxu0 %v10904_v4  ;;  %v4346_v18 = vadd.f32 %v12845_v40, %v4345_v14  ;;  %v10156_v46 = vpop.f32.mrf.mxu1 }
 0x493   : > { %v4347_v12 = vpop.f32.mrf.mxu0 }
 0x494   : > { %9510 = vst [vmem:[%s11354_s12 + $0x378] sm:$0xff] %v9268_v10   ;;  %v5490_v25 = vadd.f32 %v12961_v32, %v4346_v18  ;;  %v13036_v33 = vpop.f32.mrf.mxu1 }
 0x495   : > { %v4348_v21 = vpop.f32.mrf.mxu0 }
 0x496   : > { %v4349_v17 = vadd.f32 %v12845_v40, %v4348_v21  ;;  %v10159_v34 = vpop.f32.mrf.mxu1 }
 0x497   : > { %v4350_v3 = vpop.f32.mrf.mxu0 }
 0x498   : > { %v5493_v22 = vadd.f32 %v12971_v35, %v4349_v17  ;;  %v13041_v32 = vpop.f32.mrf.mxu1 }
 0x499   : > { %v4353_v45 = vpop.f32.mrf.mxu0  ;;  %4544 = vmatmul.mubr.bf16.gmra.mxu0 %v10902_v24 }
 0x49a   : > { %v9273_v30 = vpack.c.bf16 %v5493_v22, %v5490_v25  ;;  %4551 = vmatprep.mubr.bf16.mxu0 %v7978_v20  ;;  %v4354_v26 = vadd.f32 %v12845_v40, %v4353_v45  ;;  %v10160_v0 = vpop.f32.mrf.mxu1 }
 0x49b   : > { %v4355_v29 = vpop.f32.mrf.mxu0 }
 0x49c   : > { %9511 = vst [vmem:[%s11354_s12 + $0x380] sm:$0xff] %v9273_v30   ;;  %v5498_v41 = vadd.f32 %v12976_v39, %v4354_v26  ;;  %v13045_v23 = vpop.f32.mrf.mxu1 }
 0x49d   : > { %v4356_v28 = vpop.f32.mrf.mxu0 }
 0x49e   : > { %v4357_v37 = vadd.f32 %v12845_v40, %v4356_v28  ;;  %v10163_v42 = vpop.f32.mrf.mxu1 }
 0x49f   : > { %v4358_v35 = vpop.f32.mrf.mxu0 }
 0x4a0   : > { %v5501_v36 = vadd.f32 %v12986_v43, %v4357_v37  ;;  %v13050_v51 = vpop.f32.mrf.mxu1 }
 0x4a1   : > { %v4361_v48 = vpop.f32.mrf.mxu0  ;;  %4552 = vmatmul.mubr.bf16.gmra.mxu0 %v7977_v50 }
 0x4a2   : > { %v9278_v38 = vpack.c.bf16 %v5501_v36, %v5498_v41  ;;  %v4362_v52 = vadd.f32 %v12845_v40, %v4361_v48  ;;  %v10164_v56 = vpop.f32.mrf.mxu1 }
 0x4a3   : > { %v4363_v49 = vpop.f32.mrf.mxu0 }
 0x4a4   : > { %9512 = vst [vmem:[%s11354_s12 + $0x388] sm:$0xff] %v9278_v38   ;;  %v5506_v43 = vadd.f32 %v12991_v27, %v4362_v52  ;;  %v13054_v63 = vpop.f32.mrf.mxu1 }
 0x4a5   : > { %v4364_v54 = vpop.f32.mrf.mxu0 }
 0x4a6   : > { %v4365_v44 = vadd.f32 %v12845_v40, %v4364_v54  ;;  %v10167_v62 = vpop.f32.mrf.mxu1 }
 0x4a7   : > { %v4366_v39 = vpop.f32.mrf.mxu0 }
 0x4a8   : > { %v5509_v57 = vadd.f32 %v12999_v31, %v4365_v44  ;;  %v13059_v2 = vpop.f32.mrf.mxu1 }
 0x4a9   : > { %v4369_v61 = vpop.f32.mrf.mxu0 }
 0x4aa   : > { %v9283_v55 = vpack.c.bf16 %v5509_v57, %v5506_v43  ;;  %v4370_v1 = vadd.f32 %v12845_v40, %v4369_v61  ;;  %v10168_v9 = vpop.f32.mrf.mxu1 }
 0x4ab   : > { %v4371_v59 = vpop.f32.mrf.mxu0 }
 0x4ac   : > { %9513 = vst [vmem:[%s11354_s12 + $0x390] sm:$0xff] %v9283_v55   ;;  %v5514_v27 = vadd.f32 %v13003_v53, %v4370_v1  ;;  %v13063_v11 = vpop.f32.mrf.mxu1 }
 0x4ad   : > { %v4372_v5 = vpop.f32.mrf.mxu0 }
 0x4ae   : > { %v4373_v8 = vadd.f32 %v12845_v40, %v4372_v5  ;;  %v10171_v12 = vpop.f32.mrf.mxu1 }
 0x4af   : > { %v4374_v4 = vpop.f32.mrf.mxu0 }
 0x4b0   : > { %v5517_v31 = vadd.f32 %v13010_v47, %v4373_v8  ;;  %v13068_v15 = vpop.f32.mrf.mxu1 }
 0x4b1   : > { %v4377_v6 = vpop.f32.mrf.mxu0 }
 0x4b2   : > { %v9288_v7 = vpack.c.bf16 %v5517_v31, %v5514_v27  ;;  %v4378_v10 = vadd.f32 %v12845_v40, %v4377_v6  ;;  %v10172_v24 = vpop.f32.mrf.mxu1 }
 0x4b3   : > { %v4379_v14 = vpop.f32.mrf.mxu0 }
 0x4b4   : > { %9514 = vst [vmem:[%s11354_s12 + $0x398] sm:$0xff] %v9288_v7   ;;  %v5522_v53 = vadd.f32 %v13014_v58, %v4378_v10  ;;  %v13072_v3 = vpop.f32.mrf.mxu1 }
 0x4b5   : > { %v4380_v13 = vpop.f32.mrf.mxu0 }
 0x4b6   : > { %v4381_v18 = vadd.f32 %v12845_v40, %v4380_v13  ;;  %v10175_v46 = vpop.f32.mrf.mxu1 }
 0x4b7   : > { %v4382_v21 = vpop.f32.mrf.mxu0 }
 0x4b8   : > { %v5525_v47 = vadd.f32 %v13021_v60, %v4381_v18  ;;  %v13077_v29 = vpop.f32.mrf.mxu1 }
 0x4b9   : > { %v4385_v17 = vpop.f32.mrf.mxu0 }
 0x4ba   : > { %v9293_v20 = vpack.c.bf16 %v5525_v47, %v5522_v53  ;;  %v4386_v22 = vadd.f32 %v12845_v40, %v4385_v17  ;;  %v10176_v34 = vpop.f32.mrf.mxu1 }
 0x4bb   : > { %v4387_v25 = vpop.f32.mrf.mxu0 }
 0x4bc   : > { %9515 = vst [vmem:[%s11354_s12 + $0x3a0] sm:$0xff] %v9293_v20   ;;  %v5530_v58 = vadd.f32 %v13025_v16, %v4386_v22  ;;  %v13081_v37 = vpop.f32.mrf.mxu1 }
 0x4bd   : > { %v4388_v45 = vpop.f32.mrf.mxu0 }
 0x4be   : > { %v4389_v30 = vadd.f32 %v12845_v40, %v4388_v45  ;;  %v10179_v36 = vpop.f32.mrf.mxu1 }
 0x4bf   : > { %v4390_v26 = vpop.f32.mrf.mxu0 }
 0x4c0   : > { %v5533_v60 = vadd.f32 %v13032_v19, %v4389_v30  ;;  %v13086_v38 = vpop.f32.mrf.mxu1 }
 0x4c1   : > { %v4393_v28 = vpop.f32.mrf.mxu0 }
 0x4c2   : > { %v9298_v50 = vpack.c.bf16 %v5533_v60, %v5530_v58  ;;  %v4394_v41 = vadd.f32 %v12845_v40, %v4393_v28  ;;  %v10180_v52 = vpop.f32.mrf.mxu1 }
 0x4c3   : > { %v4395_v35 = vpop.f32.mrf.mxu0 }
 0x4c4   : > { %9516 = vst [vmem:[%s11354_s12 + $0x3a8] sm:$0xff] %v9298_v50   ;;  %v5538_v16 = vadd.f32 %v13036_v33, %v4394_v41  ;;  %v13090_v44 = vpop.f32.mrf.mxu1 }
 0x4c5   : > { %v4396_v0 = vpop.f32.mrf.mxu0 }
 0x4c6   : > { %v4397_v48 = vadd.f32 %v12845_v40, %v4396_v0  ;;  %v10183_v57 = vpop.f32.mrf.mxu1 }
 0x4c7   : > { %v4398_v49 = vpop.f32.mrf.mxu0 }
 0x4c8   : > { %v5541_v19 = vadd.f32 %v13041_v32, %v4397_v48  ;;  %v13095_v55 = vpop.f32.mrf.mxu1 }
 0x4c9   : > { %v4401_v42 = vpop.f32.mrf.mxu0 }
 0x4ca   : > { %v9303_v54 = vpack.c.bf16 %v5541_v19, %v5538_v16  ;;  %v4402_v43 = vadd.f32 %v12845_v40, %v4401_v42  ;;  %v10184_v1 = vpop.f32.mrf.mxu1 }
 0x4cb   : > { %v4403_v39 = vpop.f32.mrf.mxu0 }
 0x4cc   : > { %9517 = vst [vmem:[%s11354_s12 + $0x3b0] sm:$0xff] %v9303_v54   ;;  %v5546_v33 = vadd.f32 %v13045_v23, %v4402_v43  ;;  %v13099_v8 = vpop.f32.mrf.mxu1 }
 0x4cd   : > { %v4404_v56 = vpop.f32.mrf.mxu0 }
 0x4ce   : > { %v4405_v61 = vadd.f32 %v12845_v40, %v4404_v56  ;;  %v10187_v31 = vpop.f32.mrf.mxu1 }
 0x4cf   : > { %v4406_v59 = vpop.f32.mrf.mxu0 }
 0x4d0   : > { %v5549_v32 = vadd.f32 %v13050_v51, %v4405_v61  ;;  %v13104_v7 = vpop.f32.mrf.mxu1 }
 0x4d1   : > { %v4409_v62 = vpop.f32.mrf.mxu0 }
 0x4d2   : > { %v9308_v5 = vpack.c.bf16 %v5549_v32, %v5546_v33  ;;  %v4410_v27 = vadd.f32 %v12845_v40, %v4409_v62  ;;  %v10188_v10 = vpop.f32.mrf.mxu1 }
 0x4d3   : > { %v4411_v4 = vpop.f32.mrf.mxu0 }
 0x4d4   : > { %9518 = vst [vmem:[%s11354_s12 + $0x3b8] sm:$0xff] %v9308_v5   ;;  %v5554_v23 = vadd.f32 %v13054_v63, %v4410_v27  ;;  %v13108_v18 = vpop.f32.mrf.mxu1 }
 0x4d5   : > { %v4412_v9 = vpop.f32.mrf.mxu0 }
 0x4d6   : > { %v4413_v6 = vadd.f32 %v12845_v40, %v4412_v9  ;;  %v10191_v47 = vpop.f32.mrf.mxu1 }
 0x4d7   : > { %v4414_v14 = vpop.f32.mrf.mxu0 }
 0x4d8   : > { %v5557_v51 = vadd.f32 %v13059_v2, %v4413_v6  ;;  %v13113_v20 = vpop.f32.mrf.mxu1 }
 0x4d9   : > { %v4417_v12 = vpop.f32.mrf.mxu0 }
 0x4da   : > { %v9313_v13 = vpack.c.bf16 %v5557_v51, %v5554_v23  ;;  %v4418_v53 = vadd.f32 %v12845_v40, %v4417_v12  ;;  %v10192_v22 = vpop.f32.mrf.mxu1 }
 0x4db   : > { %v4419_v21 = vpop.f32.mrf.mxu0 }
 0x4dc   : > { %9519 = vst [vmem:[%s11354_s12 + $0x3c0] sm:$0xff] %v9313_v13   ;;  %v5562_v63 = vadd.f32 %v13063_v11, %v4418_v53  ;;  %v13117_v30 = vpop.f32.mrf.mxu1 }
 0x4dd   : > { %v4420_v24 = vpop.f32.mrf.mxu0 }
 0x4de   : > { %v4421_v17 = vadd.f32 %v12845_v40, %v4420_v24  ;;  %v10195_v60 = vpop.f32.mrf.mxu1 }
 0x4df   : > { %v4422_v25 = vpop.f32.mrf.mxu0 }
 0x4e0   : > { %v5565_v2 = vadd.f32 %v13068_v15, %v4421_v17  ;;  %v13122_v50 = vpop.f32.mrf.mxu1 }
 0x4e1   : > { %v4425_v46 = vpop.f32.mrf.mxu0 }
 0x4e2   : > { %v9318_v45 = vpack.c.bf16 %v5565_v2, %v5562_v63  ;;  %v4426_v58 = vadd.f32 %v12845_v40, %v4425_v46  ;;  %v10196_v41 = vpop.f32.mrf.mxu1 }
 0x4e3   : > { %v4427_v26 = vpop.f32.mrf.mxu0 }
 0x4e4   : > { %9520 = vst [vmem:[%s11354_s12 + $0x3c8] sm:$0xff] %v9318_v45   ;;  %v5570_v11 = vadd.f32 %v13072_v3, %v4426_v58  ;;  %v13126_v48 = vpop.f32.mrf.mxu1 }
 0x4e5   : > { %v4428_v34 = vpop.f32.mrf.mxu0 }
 0x4e6   : > { %v4429_v28 = vadd.f32 %v12845_v40, %v4428_v34  ;;  %v10199_v19 = vpop.f32.mrf.mxu1 }
 0x4e7   : > { %v4430_v35 = vpop.f32.mrf.mxu0 }
 0x4e8   : > { %v5573_v15 = vadd.f32 %v13077_v29, %v4429_v28  ;;  %v13131_v54 = vpop.f32.mrf.mxu1 }
 0x4e9   : > { %v4433_v36 = vpop.f32.mrf.mxu0 }
 0x4ea   : > { %v9323_v0 = vpack.c.bf16 %v5573_v15, %v5570_v11  ;;  %v4434_v16 = vadd.f32 %v12845_v40, %v4433_v36  ;;  %v10200_v43 = vpop.f32.mrf.mxu1 }
 0x4eb   : > { %v4435_v49 = vpop.f32.mrf.mxu0 }
 0x4ec   : > { %9521 = vst [vmem:[%s11354_s12 + $0x3d0] sm:$0xff] %v9323_v0   ;;  %v5578_v3 = vadd.f32 %v13081_v37, %v4434_v16  ;;  %v13135_v61 = vpop.f32.mrf.mxu1 }
 0x4ed   : > { %v4436_v52 = vpop.f32.mrf.mxu0 }
 0x4ee   : > { %v4437_v42 = vadd.f32 %v12845_v40, %v4436_v52  ;;  %v10203_v32 = vpop.f32.mrf.mxu1 }
 0x4ef   : > { %v4438_v39 = vpop.f32.mrf.mxu0 }
 0x4f0   : > { %v5581_v29 = vadd.f32 %v13086_v38, %v4437_v42  ;;  %v13140_v5 = vpop.f32.mrf.mxu1 }
 0x4f1   : > { %v4441_v57 = vpop.f32.mrf.mxu0 }
 0x4f2   : > { %v9328_v56 = vpack.c.bf16 %v5581_v29, %v5578_v3  ;;  %v4442_v33 = vadd.f32 %v12845_v40, %v4441_v57  ;;  %v10204_v27 = vpop.f32.mrf.mxu1 }
 0x4f3   : > { %v4443_v59 = vpop.f32.mrf.mxu0 }
 0x4f4   : > { %9522 = vst [vmem:[%s11354_s12 + $0x3d8] sm:$0xff] %v9328_v56   ;;  %v5586_v37 = vadd.f32 %v13090_v44, %v4442_v33  ;;  %v13144_v6 = vpop.f32.mrf.mxu1 }
 0x4f5   : > { %v4444_v1 = vpop.f32.mrf.mxu0 }
 0x4f6   : > { %v4445_v62 = vadd.f32 %v12845_v40, %v4444_v1  ;;  %v10207_v51 = vpop.f32.mrf.mxu1 }
 0x4f7   : > { %v4446_v4 = vpop.f32.mrf.mxu0 }
 0x4f8   : > { %v5589_v38 = vadd.f32 %v13095_v55, %v4445_v62  ;;  %v13149_v13 = vpop.f32.mrf.mxu1 }
 0x4f9   : > { %v4449_v31 = vpop.f32.mrf.mxu0 }
 0x4fa   : > { %v9333_v9 = vpack.c.bf16 %v5589_v38, %v5586_v37  ;;  %v4450_v23 = vadd.f32 %v12845_v40, %v4449_v31  ;;  %v10208_v53 = vpop.f32.mrf.mxu1 }
 0x4fb   : > { %v4451_v14 = vpop.f32.mrf.mxu0 }
 0x4fc   : > { %9523 = vst [vmem:[%s11354_s12 + $0x3e0] sm:$0xff] %v9333_v9   ;;  %v5594_v44 = vadd.f32 %v13099_v8, %v4450_v23  ;;  %v13153_v17 = vpop.f32.mrf.mxu1 }
 0x4fd   : > { %v4452_v10 = vpop.f32.mrf.mxu0 }
 0x4fe   : > { %v4453_v12 = vadd.f32 %v12845_v40, %v4452_v10  ;;  %v10211_v2 = vpop.f32.mrf.mxu1 }
 0x4ff   : > { %v4454_v21 = vpop.f32.mrf.mxu0 }
 0x500   : > { %v5597_v55 = vadd.f32 %v13104_v7, %v4453_v12  ;;  %v13158_v45 = vpop.f32.mrf.mxu1 }
 0x501   : > { %v4457_v47 = vpop.f32.mrf.mxu0 }
 0x502   : > { %v9338_v24 = vpack.c.bf16 %v5597_v55, %v5594_v44  ;;  %v4458_v63 = vadd.f32 %v12845_v40, %v4457_v47  ;;  %v10212_v58 = vpop.f32.mrf.mxu1  ;;  %v13195_v44 = vld [vmem:[%s13444_s2] ss:$0 sm:$0xff] }
 0x503   : > { %v4459_v25 = vpop.f32.mrf.mxu0 }
 0x504   : > { %9524 = vst [vmem:[%s11354_s12 + $0x3e8] sm:$0xff] %v9338_v24   ;;  %v5602_v8 = vadd.f32 %v13108_v18, %v4458_v63  ;;  %v13162_v28 = vpop.f32.mrf.mxu1 }
 0x505   : > { %v4460_v22 = vpop.f32.mrf.mxu0 }
 0x506   : > { %v4461_v46 = vadd.f32 %v12845_v40, %v4460_v22  ;;  %v10215_v15 = vpop.f32.mrf.mxu1 }
 0x507   : > { %v4462_v26 = vpop.f32.mrf.mxu0 }
 0x508   : > { %v5605_v7 = vadd.f32 %v13113_v20, %v4461_v46  ;;  %v13167_v0 = vpop.f32.mrf.mxu1 }
 0x509   : > { %v4465_v60 = vpop.f32.mrf.mxu0 }
 0x50a   : > { %v9343_v34 = vpack.c.bf16 %v5605_v7, %v5602_v8  ;;  %v4466_v11 = vadd.f32 %v12845_v40, %v4465_v60  ;;  %v10216_v16 = vpop.f32.mrf.mxu1 }
 0x50b   : > { %v4467_v35 = vpop.f32.mrf.mxu0 }
 0x50c   : > { %9525 = vst [vmem:[%s11354_s12 + $0x3f0] sm:$0xff] %v9343_v34   ;;  %v5610_v18 = vadd.f32 %v13117_v30, %v4466_v11  ;;  %v13171_v42 = vpop.f32.mrf.mxu1 }
 0x50d   : > { %v4468_v41 = vpop.f32.mrf.mxu0 }
 0x50e   : > { %v4469_v36 = vadd.f32 %v12845_v40, %v4468_v41  ;;  %v10219_v29 = vpop.f32.mrf.mxu1 }
 0x50f   : > { %v4470_v49 = vpop.f32.mrf.mxu0 }
 0x510   : > { %v5613_v20 = vadd.f32 %v13122_v50, %v4469_v36  ;;  %v13176_v56 = vpop.f32.mrf.mxu1 }
 0x511   : > { %v4473_v19 = vpop.f32.mrf.mxu0 }
 0x512   : > { %v9348_v52 = vpack.c.bf16 %v5613_v20, %v5610_v18  ;;  %v4474_v3 = vadd.f32 %v12845_v40, %v4473_v19  ;;  %v10220_v33 = vpop.f32.mrf.mxu1 }
 0x513   : > { %v4475_v39 = vpop.f32.mrf.mxu0 }
 0x514   : > { %9526 = vst [vmem:[%s11354_s12 + $0x3f8] sm:$0xff] %v9348_v52   ;;  %v5618_v30 = vadd.f32 %v13126_v48, %v4474_v3  ;;  %v13180_v62 = vpop.f32.mrf.mxu1 }
 0x515   : > { %v4476_v43 = vpop.f32.mrf.mxu0 }
 0x516   : > { %v4477_v57 = vadd.f32 %v12845_v40, %v4476_v43  ;;  %v10223_v38 = vpop.f32.mrf.mxu1 }
 0x517   : > { %v4478_v59 = vpop.f32.mrf.mxu0 }
 0x518   : > { %v5621_v50 = vadd.f32 %v13131_v54, %v4477_v57  ;;  %v13185_v9 = vpop.f32.mrf.mxu1 }
 0x519   : > { %v4481_v32 = vpop.f32.mrf.mxu0 }
 0x51a   : > { %v9353_v1 = vpack.c.bf16 %v5621_v50, %v5618_v30  ;;  %v4482_v37 = vadd.f32 %v12845_v40, %v4481_v32  ;;  %v10224_v23 = vpop.f32.mrf.mxu1 }
 0x51b   : > { %v4483_v4 = vpop.f32.mrf.mxu0 }
 0x51c   : > { %9527 = vst [vmem:[%s11354_s12 + $0x400] sm:$0xff] %v9353_v1   ;;  %v5626_v48 = vadd.f32 %v13135_v61, %v4482_v37  ;;  %v13189_v12 = vpop.f32.mrf.mxu1 }
 0x51d   : > { %v4484_v27 = vpop.f32.mrf.mxu0 }
 0x51e   : > { %v4485_v31 = vadd.f32 %v12845_v40, %v4484_v27  ;;  %v10227_v55 = vpop.f32.mrf.mxu1 }
 0x51f   : > { %v4486_v14 = vpop.f32.mrf.mxu0 }
 0x520   : > { %v5629_v54 = vadd.f32 %v13140_v5, %v4485_v31  ;;  %v13199_v5 = vpop.f32.mrf.mxu1 }
 0x521   : > { %v4489_v51 = vpop.f32.mrf.mxu0 }
 0x522   : > { %v9358_v10 = vpack.c.bf16 %v5629_v54, %v5626_v48  ;;  %v4490_v40 = vadd.f32 %v13195_v44, %v4489_v51  ;;  %v10228_v63 = vpop.f32.mrf.mxu1 }
 0x523   : > { %v4491_v21 = vpop.f32.mrf.mxu0 }
 0x524   : > { %9528 = vst [vmem:[%s11354_s12 + $0x408] sm:$0xff] %v9358_v10   ;;  %v5634_v24 = vadd.f32 %v13144_v6, %v4490_v40  ;;  %v13203_v46 = vpop.f32.mrf.mxu1 }
 0x525   : > { %v4492_v53 = vpop.f32.mrf.mxu0 }
 0x526   : > { %v4493_v61 = vadd.f32 %v13195_v44, %v4492_v53  ;;  %v10231_v7 = vpop.f32.mrf.mxu1 }
 0x527   : > { %v4494_v47 = vpop.f32.mrf.mxu0 }
 0x528   : > { %v5637_v25 = vadd.f32 %v13149_v13, %v4493_v61  ;;  %v5684_v34 = vpop.f32.mrf.mxu1 }
 0x529   : > { %v4497_v2 = vpop.f32.mrf.mxu0 }
 0x52a   : > { %v9363_v22 = vpack.c.bf16 %v5637_v25, %v5634_v24  ;;  %v4498_v8 = vadd.f32 %v13195_v44, %v4497_v2  ;;  %v10232_v11 = vpop.f32.mrf.mxu1 }
 0x52b   : > { %v4499_v26 = vpop.f32.mrf.mxu0 }
 0x52c   : > { %9529 = vst [vmem:[%s11354_s12 + $0x410] sm:$0xff] %v9363_v22   ;;  %v5642_v6 = vadd.f32 %v13153_v17, %v4498_v8  ;;  %v13210_v36 = vpop.f32.mrf.mxu1 }
 0x52d   : > { %v4500_v58 = vpop.f32.mrf.mxu0 }
 0x52e   : > { %v4501_v60 = vadd.f32 %v13195_v44, %v4500_v58  ;;  %v10235_v20 = vpop.f32.mrf.mxu1 }
 0x52f   : > { %v4502_v35 = vpop.f32.mrf.mxu0 }
 0x530   : > { %v5645_v13 = vadd.f32 %v13158_v45, %v4501_v60  ;;  %v5692_v52 = vpop.f32.mrf.mxu1 }
 0x531   : > { %v4505_v15 = vpop.f32.mrf.mxu0 }
 0x532   : > { %v9368_v41 = vpack.c.bf16 %v5645_v13, %v5642_v6  ;;  %v4506_v18 = vadd.f32 %v13195_v44, %v4505_v15  ;;  %v10236_v3 = vpop.f32.mrf.mxu1 }
 0x533   : > { %v4507_v49 = vpop.f32.mrf.mxu0 }
 0x534   : > { %9530 = vst [vmem:[%s11354_s12 + $0x418] sm:$0xff] %v9368_v41   ;;  %v5650_v17 = vadd.f32 %v13162_v28, %v4506_v18  ;;  %v5697_v57 = vpop.f32.mrf.mxu1 }
 0x535   : > { %v4508_v16 = vpop.f32.mrf.mxu0 }
 0x536   : > { %v4509_v19 = vadd.f32 %v13195_v44, %v4508_v16  ;;  %v10239_v50 = vpop.f32.mrf.mxu1 }
 0x537   : > { %v4510_v39 = vpop.f32.mrf.mxu0 }
 0x538   : > { %v5653_v45 = vadd.f32 %v13167_v0, %v4509_v19  ;;  %v5700_v1 = vpop.f32.mrf.mxu1 }
 0x539   : > { %v4513_v29 = vpop.f32.mrf.mxu0 }
 0x53a   : > { %v9373_v43 = vpack.c.bf16 %v5653_v45, %v5650_v17  ;;  %v4514_v30 = vadd.f32 %v13195_v44, %v4513_v29  ;;  %v10240_v0 = vpop.f32.mrf.mxu1 }
 0x53b   : > { %v4515_v59 = vpop.f32.mrf.mxu0 }
 0x53c   : > { %9531 = vst [vmem:[%s11354_s12 + $0x420] sm:$0xff] %v9373_v43   ;;  %v5658_v37 = vadd.f32 %v13171_v42, %v4514_v30 }
 0x53d   : > { %v4516_v33 = vpop.f32.mrf.mxu0 }
 0x53e   : > { %v4517_v32 = vadd.f32 %v13195_v44, %v4516_v33 }
 0x53f   : > { %v4518_v4 = vpop.f32.mrf.mxu0 }
 0x540   : > { %v5661_v28 = vadd.f32 %v13176_v56, %v4517_v32 }
 0x541   : > { %v4521_v38 = vpop.f32.mrf.mxu0 }
 0x542   : > { %v9378_v27 = vpack.c.bf16 %v5661_v28, %v5658_v37  ;;  %v4522_v14 = vadd.f32 %v13195_v44, %v4521_v38 }
 0x543   : > { %v4523_v31 = vpop.f32.mrf.mxu0 }
 0x544   : > { %9532 = vst [vmem:[%s11354_s12 + $0x428] sm:$0xff] %v9378_v27   ;;  %v5666_v51 = vadd.f32 %v13180_v62, %v4522_v14 }
 0x545   : > { %v4524_v48 = vpop.f32.mrf.mxu0 }
 0x546   : > { %v4525_v54 = vadd.f32 %v13195_v44, %v4524_v48 }
 0x547   : > { %v4526_v23 = vpop.f32.mrf.mxu0 }
 0x548   : > { %v5669_v10 = vadd.f32 %v13185_v9, %v4525_v54 }
 0x549   : > { %v4529_v42 = vpop.f32.mrf.mxu0 }
 0x54a   : > { %v9383_v21 = vpack.c.bf16 %v5669_v10, %v5666_v51  ;;  %v4530_v56 = vadd.f32 %v13195_v44, %v4529_v42 }
 0x54b   : > { %v4531_v40 = vpop.f32.mrf.mxu0 }
 0x54c   : > { %9533 = vst [vmem:[%s11354_s12 + $0x430] sm:$0xff] %v9383_v21   ;;  %v5674_v47 = vadd.f32 %v13189_v12, %v4530_v56 }
 0x54d   : > { %v4532_v55 = vpop.f32.mrf.mxu0 }
 0x54e   : > { %v4533_v53 = vadd.f32 %v13195_v44, %v4532_v55 }
 0x54f   : > { %v4534_v61 = vpop.f32.mrf.mxu0 }
 0x550   : > { %v5677_v24 = vadd.f32 %v13199_v5, %v4533_v53 }
 0x551   : > { %v4537_v25 = vpop.f32.mrf.mxu0 }
 0x552   : > { %v9388_v63 = vpack.c.bf16 %v5677_v24, %v5674_v47  ;;  %v4538_v9 = vadd.f32 %v13195_v44, %v4537_v25 }
 0x553   : > { %v4539_v62 = vpop.f32.mrf.mxu0 }
 0x554   : > { %9534 = vst [vmem:[%s11354_s12 + $0x438] sm:$0xff] %v9388_v63   ;;  %v5682_v8 = vadd.f32 %v13203_v46, %v4538_v9 }
 0x555   : > { %v4540_v2 = vpop.f32.mrf.mxu0 }
 0x556   : > { %v4541_v22 = vadd.f32 %v13195_v44, %v4540_v2 }
 0x557   : > { %v4542_v26 = vpop.f32.mrf.mxu0 }
 0x558   : > { %v5685_v7 = vadd.f32 %v5684_v34, %v4541_v22 }
 0x559   : > { %v4545_v58 = vpop.f32.mrf.mxu0 }
 0x55a   : > { %v9393_v60 = vpack.c.bf16 %v5685_v7, %v5682_v8  ;;  %v4546_v12 = vadd.f32 %v13195_v44, %v4545_v58 }
 0x55b   : > { %v4547_v35 = vpop.f32.mrf.mxu0 }
 0x55c   : > { %9535 = vst [vmem:[%s11354_s12 + $0x440] sm:$0xff] %v9393_v60   ;;  %v5690_v11 = vadd.f32 %v13210_v36, %v4546_v12 }
 0x55d   : > { %v4548_v5 = vpop.f32.mrf.mxu0 }
 0x55e   : > { %v4549_v6 = vadd.f32 %v13195_v44, %v4548_v5 }
 0x55f   : > { %v4550_v13 = vpop.f32.mrf.mxu0 }
 0x560   : > { %v5693_v15 = vadd.f32 %v5692_v52, %v4549_v6 }
 0x561   : > { %v4553_v41 = vpop.f32.mrf.mxu0 }
 0x562   : > { %v9398_v49 = vpack.c.bf16 %v5693_v15, %v5690_v11  ;;  %v4554_v46 = vadd.f32 %v13195_v44, %v4553_v41 }
 0x563   : > { %v4555_v18 = vpop.f32.mrf.mxu0 }
 0x564   : > { %9536 = vst [vmem:[%s11354_s12 + $0x448] sm:$0xff] %v9398_v49   ;;  %v5698_v34 = vadd.f32 %v5697_v57, %v4554_v46  ;;  %7095 = sbr.rel (!%p11049_p4) target bundleno = 1466 (0x5ba), region = 36 }
 0x565   : > { %v4556_v20 = vpop.f32.mrf.mxu0 }
 0x566   : > { %v8706_v16 = vpack.c.bf16 %v5698_v34, %v5698_v34 }
 0x567   : > { %v4557_v19 = vpop.f32.mrf.mxu0 }
 0x568   : > { %7088 = vst [vmem:[%s11354_s12 + $0x450] sm:$0xf] %v8706_v16 }
 0x569   : > { %s13454_s14 = smov (!%p7098_p8, %s7097_s14), 277 }
 0x56a   : > { %s8415_s24 = sshll.u32 %s13454_s14, 6 }
 0x56b   : > { %p8418_p9 = scmp.eq.s32.totalorder %s8415_s24, 0 }
 0x56c   : > { %s13256_s26 = sshrl.u32 (!%p8418_p9), %s13454_s14, 6 }
 0x56d   : > { %7106 = sbr.rel (%p8418_p9) target bundleno = 1466 (0x5ba), region = 40  ;;  %p8419_p10 = scmp.le.s32.totalorder (!%p8418_p9), %s13256_s26, 0 }
 0x572   : > { %7513 = sbr.rel (%p8419_p10) target bundleno = 1449 (0x5a9), region = 112  ;;  %s13447_s15 = smov (!%p8419_p10), %s13250_s23 }
 0x573   : > { %s13448_s20 = smov (!%p8419_p10), %s11354_s12  ;;  %s13265_s25 = smov (!%p8419_p10), 0  }
 0x574   : > { %s13267_s27 = smov (!%p8419_p10), 0  }
 0x577 LB: >> { %v7123_v44 = vld [vmem:[%s10975_s20] sm:$0xf]  ;;  %v7125_v36 = vld [vmem:[%s10975_s20 + $0x4] sm:$0xf]  ;;  %v7127_v52 = vld [vmem:[%s10975_s20 + $0x8] sm:$0xf]  ;;  %s10983_s27 = sphi %s13267_s27, %s7117_s27   ;;  %s10979_s25 = sphi %s13265_s25, %s13449_s25   ;;  %s10975_s20 = sphi %s13448_s20, %s7256_s20   ;;  %s10971_s15 = sphi %s13447_s15, %s7257_s15  }
 0x578   : >> { %7124 = vst [vmem:[%s10971_s15] sm:$0xf] %v7123_v44  ;;  %7126 = vst [vmem:[%s10971_s15 + $0x4] sm:$0xf] %v7125_v36  ;;  %v7129_v39 = vld [vmem:[%s10975_s20 + $0xc] sm:$0xf]  ;;  %s7251_s28 = sadd.s32 1, %s10979_s25 }
 0x579   : >> { %7128 = vst [vmem:[%s10971_s15 + $0x8] sm:$0xf] %v7127_v52  ;;  %v7131_v17 = vld [vmem:[%s10975_s20 + $0x10] sm:$0xf]  ;;  %v7133_v45 = vld [vmem:[%s10975_s20 + $0x14] sm:$0xf]  ;;  %p7252_p11 = scmp.ge.s32.totalorder %s7251_s28, %s13256_s26 }
 0x57a   : >> { %7130 = vst [vmem:[%s10971_s15 + $0xc] sm:$0xf] %v7129_v39  ;;  %7132 = vst [vmem:[%s10971_s15 + $0x10] sm:$0xf] %v7131_v17  ;;  %v7135_v3 = vld [vmem:[%s10975_s20 + $0x18] sm:$0xf] }
 0x57b   : >> { %7134 = vst [vmem:[%s10971_s15 + $0x14] sm:$0xf] %v7133_v45  ;;  %v7137_v29 = vld [vmem:[%s10975_s20 + $0x1c] sm:$0xf]  ;;  %v7139_v43 = vld [vmem:[%s10975_s20 + $0x20] sm:$0xf] }
 0x57c   : >> { %7136 = vst [vmem:[%s10971_s15 + $0x18] sm:$0xf] %v7135_v3  ;;  %7138 = vst [vmem:[%s10971_s15 + $0x1c] sm:$0xf] %v7137_v29  ;;  %v7141_v57 = vld [vmem:[%s10975_s20 + $0x24] sm:$0xf] }
 0x57d   : >> { %7140 = vst [vmem:[%s10971_s15 + $0x20] sm:$0xf] %v7139_v43  ;;  %v7143_v59 = vld [vmem:[%s10975_s20 + $0x28] sm:$0xf]  ;;  %v7145_v30 = vld [vmem:[%s10975_s20 + $0x2c] sm:$0xf] }
 0x57e   : >> { %7142 = vst [vmem:[%s10971_s15 + $0x24] sm:$0xf] %v7141_v57  ;;  %7144 = vst [vmem:[%s10971_s15 + $0x28] sm:$0xf] %v7143_v59  ;;  %v7147_v50 = vld [vmem:[%s10975_s20 + $0x30] sm:$0xf] }
 0x57f   : >> { %7146 = vst [vmem:[%s10971_s15 + $0x2c] sm:$0xf] %v7145_v30  ;;  %v7149_v33 = vld [vmem:[%s10975_s20 + $0x34] sm:$0xf]  ;;  %v7151_v32 = vld [vmem:[%s10975_s20 + $0x38] sm:$0xf] }
 0x580   : >> { %7148 = vst [vmem:[%s10971_s15 + $0x30] sm:$0xf] %v7147_v50  ;;  %7150 = vst [vmem:[%s10971_s15 + $0x34] sm:$0xf] %v7149_v33  ;;  %v7153_v1 = vld [vmem:[%s10975_s20 + $0x3c] sm:$0xf] }
 0x581   : >> { %7152 = vst [vmem:[%s10971_s15 + $0x38] sm:$0xf] %v7151_v32  ;;  %v7155_v4 = vld [vmem:[%s10975_s20 + $0x40] sm:$0xf]  ;;  %v7157_v37 = vld [vmem:[%s10975_s20 + $0x44] sm:$0xf] }
 0x582   : >> { %7154 = vst [vmem:[%s10971_s15 + $0x3c] sm:$0xf] %v7153_v1  ;;  %7156 = vst [vmem:[%s10971_s15 + $0x40] sm:$0xf] %v7155_v4  ;;  %v7159_v28 = vld [vmem:[%s10975_s20 + $0x48] sm:$0xf] }
 0x583   : >> { %7158 = vst [vmem:[%s10971_s15 + $0x44] sm:$0xf] %v7157_v37  ;;  %v7161_v0 = vld [vmem:[%s10975_s20 + $0x4c] sm:$0xf]  ;;  %v7163_v38 = vld [vmem:[%s10975_s20 + $0x50] sm:$0xf] }
 0x584   : >> { %7160 = vst [vmem:[%s10971_s15 + $0x48] sm:$0xf] %v7159_v28  ;;  %7162 = vst [vmem:[%s10971_s15 + $0x4c] sm:$0xf] %v7161_v0  ;;  %v7165_v27 = vld [vmem:[%s10975_s20 + $0x54] sm:$0xf] }
 0x585   : >> { %7164 = vst [vmem:[%s10971_s15 + $0x50] sm:$0xf] %v7163_v38  ;;  %v7167_v31 = vld [vmem:[%s10975_s20 + $0x58] sm:$0xf]  ;;  %v7169_v14 = vld [vmem:[%s10975_s20 + $0x5c] sm:$0xf] }
 0x586   : >> { %7166 = vst [vmem:[%s10971_s15 + $0x54] sm:$0xf] %v7165_v27  ;;  %7168 = vst [vmem:[%s10971_s15 + $0x58] sm:$0xf] %v7167_v31  ;;  %v7171_v48 = vld [vmem:[%s10975_s20 + $0x60] sm:$0xf] }
 0x587   : >> { %7170 = vst [vmem:[%s10971_s15 + $0x5c] sm:$0xf] %v7169_v14  ;;  %v7173_v54 = vld [vmem:[%s10975_s20 + $0x64] sm:$0xf]  ;;  %v7175_v23 = vld [vmem:[%s10975_s20 + $0x68] sm:$0xf] }
 0x588   : >> { %7172 = vst [vmem:[%s10971_s15 + $0x60] sm:$0xf] %v7171_v48  ;;  %7174 = vst [vmem:[%s10971_s15 + $0x64] sm:$0xf] %v7173_v54  ;;  %v7177_v51 = vld [vmem:[%s10975_s20 + $0x6c] sm:$0xf] }
 0x589   : >> { %7176 = vst [vmem:[%s10971_s15 + $0x68] sm:$0xf] %v7175_v23  ;;  %v7179_v10 = vld [vmem:[%s10975_s20 + $0x70] sm:$0xf]  ;;  %v7181_v42 = vld [vmem:[%s10975_s20 + $0x74] sm:$0xf] }
 0x58a   : >> { %7178 = vst [vmem:[%s10971_s15 + $0x6c] sm:$0xf] %v7177_v51  ;;  %7180 = vst [vmem:[%s10971_s15 + $0x70] sm:$0xf] %v7179_v10  ;;  %v7183_v21 = vld [vmem:[%s10975_s20 + $0x78] sm:$0xf] }
 0x58b   : >> { %7182 = vst [vmem:[%s10971_s15 + $0x74] sm:$0xf] %v7181_v42  ;;  %v7185_v40 = vld [vmem:[%s10975_s20 + $0x7c] sm:$0xf]  ;;  %v7187_v56 = vld [vmem:[%s10975_s20 + $0x80] sm:$0xf] }
 0x58c   : >> { %7184 = vst [vmem:[%s10971_s15 + $0x78] sm:$0xf] %v7183_v21  ;;  %7186 = vst [vmem:[%s10971_s15 + $0x7c] sm:$0xf] %v7185_v40  ;;  %v7189_v55 = vld [vmem:[%s10975_s20 + $0x84] sm:$0xf] }
 0x58d   : >> { %7188 = vst [vmem:[%s10971_s15 + $0x80] sm:$0xf] %v7187_v56  ;;  %v7191_v53 = vld [vmem:[%s10975_s20 + $0x88] sm:$0xf]  ;;  %v7193_v61 = vld [vmem:[%s10975_s20 + $0x8c] sm:$0xf] }
 0x58e   : >> { %7190 = vst [vmem:[%s10971_s15 + $0x84] sm:$0xf] %v7189_v55  ;;  %7192 = vst [vmem:[%s10971_s15 + $0x88] sm:$0xf] %v7191_v53  ;;  %v7195_v47 = vld [vmem:[%s10975_s20 + $0x90] sm:$0xf] }
 0x58f   : >> { %7194 = vst [vmem:[%s10971_s15 + $0x8c] sm:$0xf] %v7193_v61  ;;  %v7197_v24 = vld [vmem:[%s10975_s20 + $0x94] sm:$0xf]  ;;  %v7199_v25 = vld [vmem:[%s10975_s20 + $0x98] sm:$0xf] }
 0x590   : >> { %7196 = vst [vmem:[%s10971_s15 + $0x90] sm:$0xf] %v7195_v47  ;;  %7198 = vst [vmem:[%s10971_s15 + $0x94] sm:$0xf] %v7197_v24  ;;  %v7201_v63 = vld [vmem:[%s10975_s20 + $0x9c] sm:$0xf] }
 0x591   : >> { %7200 = vst [vmem:[%s10971_s15 + $0x98] sm:$0xf] %v7199_v25  ;;  %v7203_v62 = vld [vmem:[%s10975_s20 + $0xa0] sm:$0xf]  ;;  %v7205_v9 = vld [vmem:[%s10975_s20 + $0xa4] sm:$0xf] }
 0x592   : >> { %7202 = vst [vmem:[%s10971_s15 + $0x9c] sm:$0xf] %v7201_v63  ;;  %7204 = vst [vmem:[%s10971_s15 + $0xa0] sm:$0xf] %v7203_v62  ;;  %v7207_v2 = vld [vmem:[%s10975_s20 + $0xa8] sm:$0xf] }
 0x593   : >> { %7206 = vst [vmem:[%s10971_s15 + $0xa4] sm:$0xf] %v7205_v9  ;;  %v7209_v22 = vld [vmem:[%s10975_s20 + $0xac] sm:$0xf]  ;;  %v7211_v26 = vld [vmem:[%s10975_s20 + $0xb0] sm:$0xf] }
 0x594   : >> { %7208 = vst [vmem:[%s10971_s15 + $0xa8] sm:$0xf] %v7207_v2  ;;  %7210 = vst [vmem:[%s10971_s15 + $0xac] sm:$0xf] %v7209_v22  ;;  %v7213_v8 = vld [vmem:[%s10975_s20 + $0xb4] sm:$0xf] }
 0x595   : >> { %7212 = vst [vmem:[%s10971_s15 + $0xb0] sm:$0xf] %v7211_v26  ;;  %v7215_v7 = vld [vmem:[%s10975_s20 + $0xb8] sm:$0xf]  ;;  %v7217_v58 = vld [vmem:[%s10975_s20 + $0xbc] sm:$0xf] }
 0x596   : >> { %7214 = vst [vmem:[%s10971_s15 + $0xb4] sm:$0xf] %v7213_v8  ;;  %7216 = vst [vmem:[%s10971_s15 + $0xb8] sm:$0xf] %v7215_v7  ;;  %v7219_v60 = vld [vmem:[%s10975_s20 + $0xc0] sm:$0xf] }
 0x597   : >> { %7218 = vst [vmem:[%s10971_s15 + $0xbc] sm:$0xf] %v7217_v58  ;;  %v7221_v35 = vld [vmem:[%s10975_s20 + $0xc4] sm:$0xf]  ;;  %v7223_v12 = vld [vmem:[%s10975_s20 + $0xc8] sm:$0xf] }
 0x598   : >> { %7220 = vst [vmem:[%s10971_s15 + $0xc0] sm:$0xf] %v7219_v60  ;;  %7222 = vst [vmem:[%s10971_s15 + $0xc4] sm:$0xf] %v7221_v35  ;;  %v7225_v5 = vld [vmem:[%s10975_s20 + $0xcc] sm:$0xf] }
 0x599   : >> { %7224 = vst [vmem:[%s10971_s15 + $0xc8] sm:$0xf] %v7223_v12  ;;  %v7227_v6 = vld [vmem:[%s10975_s20 + $0xd0] sm:$0xf]  ;;  %v7229_v13 = vld [vmem:[%s10975_s20 + $0xd4] sm:$0xf] }
 0x59a   : >> { %7226 = vst [vmem:[%s10971_s15 + $0xcc] sm:$0xf] %v7225_v5  ;;  %7228 = vst [vmem:[%s10971_s15 + $0xd0] sm:$0xf] %v7227_v6  ;;  %v7231_v11 = vld [vmem:[%s10975_s20 + $0xd8] sm:$0xf] }
 0x59b   : >> { %7230 = vst [vmem:[%s10971_s15 + $0xd4] sm:$0xf] %v7229_v13  ;;  %v7233_v15 = vld [vmem:[%s10975_s20 + $0xdc] sm:$0xf]  ;;  %v7235_v41 = vld [vmem:[%s10975_s20 + $0xe0] sm:$0xf] }
 0x59c   : >> { %7232 = vst [vmem:[%s10971_s15 + $0xd8] sm:$0xf] %v7231_v11  ;;  %7234 = vst [vmem:[%s10971_s15 + $0xdc] sm:$0xf] %v7233_v15  ;;  %v7237_v49 = vld [vmem:[%s10975_s20 + $0xe4] sm:$0xf] }
 0x59d   : >> { %7236 = vst [vmem:[%s10971_s15 + $0xe0] sm:$0xf] %v7235_v41  ;;  %v7239_v46 = vld [vmem:[%s10975_s20 + $0xe8] sm:$0xf]  ;;  %v7241_v18 = vld [vmem:[%s10975_s20 + $0xec] sm:$0xf] }
 0x59e   : >> { %7238 = vst [vmem:[%s10971_s15 + $0xe4] sm:$0xf] %v7237_v49  ;;  %7240 = vst [vmem:[%s10971_s15 + $0xe8] sm:$0xf] %v7239_v46  ;;  %v7243_v34 = vld [vmem:[%s10975_s20 + $0xf0] sm:$0xf] }
 0x59f   : >> { %7242 = vst [vmem:[%s10971_s15 + $0xec] sm:$0xf] %v7241_v18  ;;  %v7245_v20 = vld [vmem:[%s10975_s20 + $0xf4] sm:$0xf]  ;;  %v7247_v16 = vld [vmem:[%s10975_s20 + $0xf8] sm:$0xf] }
 0x5a0   : >> { %7244 = vst [vmem:[%s10971_s15 + $0xf0] sm:$0xf] %v7243_v34  ;;  %7246 = vst [vmem:[%s10971_s15 + $0xf4] sm:$0xf] %v7245_v20  ;;  %v7249_v19 = vld [vmem:[%s10975_s20 + $0xfc] sm:$0xf] }
 0x5a1   : >> { %7248 = vst [vmem:[%s10971_s15 + $0xf8] sm:$0xf] %v7247_v16  ;;  %7250 = vst [vmem:[%s10971_s15 + $0xfc] sm:$0xf] %v7249_v19  ;;  %s13456_s28 = smov (%p7252_p11, %s7251_s28), 0  ;;  %s7117_s27 = sadd.s32 1, %s10983_s27  }
 0x5a2   : >> { %s8420_s29 = sshll.u32 %s13456_s28, 8  ;;  %p7116_p12 = scmp.ge.s32.totalorder %s7117_s27, %s13256_s26 }
 0x5a3   : >> { %s7256_s20 = scalar_lea.vmem %s11354_s12, %s8420_s29 [#allocation2]   ;;  %s7257_s15 = scalar_lea.vmem %s13250_s23, %s8420_s29  }
 0x5a4   : >> { %s13449_s25 = smov %s13456_s28  ;;  %7119 = sbr.rel (!%p7116_p12) target bundleno = 1399 (0x577), region = 118 }
 0x5a9 PF: > { %s13424_s30 = sand.u32 63, %s13454_s14   ;;  %s8708_s4 = sshll.u32 %s13256_s26, 8 }
 0x5aa   : > { %s7262_s5 = scalar_lea.vmem %s11354_s12, %s8708_s4 [#allocation2]   ;;  %s7264_s6 = scalar_lea.vmem %s13250_s23, %s8708_s4  }
 0x5ab   : > { %p8425_p13 = scmp.le.s32.totalorder %s13424_s30, 0 }
 0x5ac   : > { %s10985_s7 = smov (!%p8425_p13), %s7264_s6   ;;  %s10989_s8 = smov (!%p8425_p13), %s7262_s5  }
 0x5ad   : > { %7527 = sbr.rel (%p8425_p13) target bundleno = 1466 (0x5ba), region = 123  ;;  %s10993_s9 = smov (!%p8425_p13), 0  }
 0x5ae   : > { %s10997_s10 = smov (!%p8425_p13), 0  }
 0x5b2 LB: >> { %v7274_v44 = vld [vmem:[%s10991_s8] sm:$0xf]  ;;  %s7276_s17 = sadd.s32 1, %s10995_s9  ;;  %s7268_s10 = sadd.s32 1, %s10999_s10   ;;  %s10999_s10 = sphi %s10997_s10, %s7268_s10   ;;  %s10995_s9 = sphi %s10993_s9, %s10994_s9   ;;  %s10991_s8 = sphi %s10989_s8, %s7281_s8   ;;  %s10987_s7 = sphi %s10985_s7, %s7282_s7  }
 0x5b3   : >> { %7275 = vst [vmem:[%s10987_s7] sm:$0xf] %v7274_v44  ;;  %p7277_p0 = scmp.ge.s32.totalorder %s7276_s17, %s13424_s30  ;;  %p7267_p1 = scmp.ge.s32.totalorder %s7268_s10, %s13424_s30 }
 0x5b5   : >> { %s13458_s17 = smov (%p7277_p0, %s7276_s17), 0  ;;  %7270 = sbr.rel (!%p7267_p1) target bundleno = 1458 (0x5b2), region = 129 }
 0x5b6   : >> { %s8426_s12 = sshll.u32 %s13458_s17, 2  ;;  %s10994_s9 = smov %s13458_s17  }
 0x5b7   : >> { %s7281_s8 = scalar_lea.vmem %s7262_s5, %s8426_s12 [#allocation2]   ;;  %s7282_s7 = scalar_lea.vmem %s7264_s6, %s8426_s12  }
 0x5ba PF: > { %p10_p2 = scmp.ge.s32.totalorder %s11039_s16, 4   ;;  %s13450_s12 = smov %s10963_s13 }
 0x5bb   : > { %s13451_s13 = smov %s11047_s19  ;;  %s13452_s14 = smov %s11039_s16 }
 0x5bc   :  { %12 = sbr.rel (!%p10_p2) target bundleno = 2 (0x2), region = 140 }

// kernel: neuronal_network_forward.5
= control target key start
LH: loop header
LB: loop body
LE: loop exit
PB: predicated region body
PF: predicated region fallthrough
CT: control target
= control target key end

     0   :  { %s8595_s1 = inlined_call_operand.vmem [shape: bf16[3200,256], index: 1, kind: input, shape index: {}]   ;;  %s8596_s0 = inlined_call_operand.vmem [shape: bf16[98,3200], index: 0, kind: input, shape index: {}]   ;;  %s8597_s2 = inlined_call_operand.vmem [shape: f32[1,256], index: 2, kind: input, shape index: {}]   ;;  %s8598_s3 = inlined_call_operand.vmem [shape: bf16[98,256], index: 3, kind: output, shape index: {}]  }
   0x1   :  { %v5468_v0 = vld [vmem:[%s8595_s1 + $0x74] ss:$8 sps:$4 sm:$0xff]   ;;  %v5472_v2 = vld [vmem:[%s8595_s1 + $0x70] ss:$8 sps:$4 sm:$0xff]   ;;  %v5474_v4 = vld [vmem:[%s8595_s1 + $0x64] ss:$8 sps:$4 sm:$0xff]  }
   0x2   :  { %v5470_v1 = vld [vmem:[%s8595_s1 + $0x174] ss:$8 sps:$4 sm:$0xff]   ;;  %3440 = vmatprep.subr.bf16.mxu0 %v5468_v0  ;;  %v5473_v3 = vld [vmem:[%s8595_s1 + $0x170] ss:$8 sps:$4 sm:$0xff]   ;;  %v5476_v5 = vld [vmem:[%s8595_s1 + $0x164] ss:$8 sps:$4 sm:$0xff]  }
   0x3   :  { %3541 = vmatprep.subr.bf16.mxu1 %v5470_v1  ;;  %3441 = vmatpush1.bf16.msra.mxu0 %v5472_v2  ;;  %v5478_v6 = vld [vmem:[%s8595_s1 + $0x60] ss:$8 sps:$4 sm:$0xff]   ;;  %v5480_v8 = vld [vmem:[%s8595_s1 + $0x54] ss:$8 sps:$4 sm:$0xff]   ;;  %v5484_v10 = vld [vmem:[%s8595_s1 + $0x50] ss:$8 sps:$4 sm:$0xff]  }
   0x4   :  { %3542 = vmatpush1.bf16.msra.mxu1 %v5473_v3  ;;  %3442 = vmatprep.subr.bf16.mxu0 %v5474_v4  ;;  %v5479_v7 = vld [vmem:[%s8595_s1 + $0x160] ss:$8 sps:$4 sm:$0xff]   ;;  %v5482_v9 = vld [vmem:[%s8595_s1 + $0x154] ss:$8 sps:$4 sm:$0xff]   ;;  %v5485_v11 = vld [vmem:[%s8595_s1 + $0x150] ss:$8 sps:$4 sm:$0xff]  }
   0x5   :  { %3543 = vmatprep.subr.bf16.mxu1 %v5476_v5  ;;  %v5486_v12 = vld [vmem:[%s8595_s1 + $0x44] ss:$8 sps:$4 sm:$0xff]   ;;  %v5490_v14 = vld [vmem:[%s8595_s1 + $0x40] ss:$8 sps:$4 sm:$0xff]   ;;  %v5492_v16 = vld [vmem:[%s8595_s1 + $0x34] ss:$8 sps:$4 sm:$0xff]  }
   0x6   :  { %v5488_v13 = vld [vmem:[%s8595_s1 + $0x144] ss:$8 sps:$4 sm:$0xff]   ;;  %v5491_v15 = vld [vmem:[%s8595_s1 + $0x140] ss:$8 sps:$4 sm:$0xff]   ;;  %v5494_v17 = vld [vmem:[%s8595_s1 + $0x134] ss:$8 sps:$4 sm:$0xff]  }
   0x7   :  { %3443 = vmatpush1.bf16.msra.mxu0 %v5478_v6  ;;  %v5496_v18 = vld [vmem:[%s8595_s1 + $0x30] ss:$8 sps:$4 sm:$0xff]   ;;  %v5498_v20 = vld [vmem:[%s8595_s1 + $0x24] ss:$8 sps:$4 sm:$0xff]   ;;  %v5502_v22 = vld [vmem:[%s8595_s1 + $0x20] ss:$8 sps:$4 sm:$0xff]  }
   0x8   :  { %3544 = vmatpush1.bf16.msra.mxu1 %v5479_v7  ;;  %3444 = vmatprep.subr.bf16.mxu0 %v5480_v8  ;;  %v5497_v19 = vld [vmem:[%s8595_s1 + $0x130] ss:$8 sps:$4 sm:$0xff]   ;;  %v5500_v21 = vld [vmem:[%s8595_s1 + $0x124] ss:$8 sps:$4 sm:$0xff]   ;;  %v5503_v23 = vld [vmem:[%s8595_s1 + $0x120] ss:$8 sps:$4 sm:$0xff]  }
   0x9   :  { %3545 = vmatprep.subr.bf16.mxu1 %v5482_v9  ;;  %v5504_v24 = vld [vmem:[%s8595_s1 + $0x14] ss:$8 sps:$4 sm:$0xff]   ;;  %v5508_v26 = vld [vmem:[%s8595_s1 + $0x10] ss:$8 sps:$4 sm:$0xff]   ;;  %v5510_v28 = vld [vmem:[%s8595_s1 + $0x4] ss:$8 sps:$4 sm:$0xff]  }
   0xa   :  { %v5506_v25 = vld [vmem:[%s8595_s1 + $0x114] ss:$8 sps:$4 sm:$0xff]   ;;  %v5509_v27 = vld [vmem:[%s8595_s1 + $0x110] ss:$8 sps:$4 sm:$0xff]   ;;  %v5512_v29 = vld [vmem:[%s8595_s1 + $0x104] ss:$8 sps:$4 sm:$0xff]  }
   0xb   :  { %3445 = vmatpush1.bf16.msra.mxu0 %v5484_v10  ;;  %v5514_v30 = vld [vmem:[%s8595_s1] ss:$8 sps:$4 sm:$0xff]   ;;  %v5516_v32 = vld [vmem:[%s8595_s1 + $0xf4] ss:$8 sps:$4 sm:$0xff]   ;;  %v5520_v34 = vld [vmem:[%s8595_s1 + $0xf0] ss:$8 sps:$4 sm:$0xff]  }
   0xc   :  { %3546 = vmatpush1.bf16.msra.mxu1 %v5485_v11  ;;  %3446 = vmatprep.subr.bf16.mxu0 %v5486_v12  ;;  %v5515_v31 = vld [vmem:[%s8595_s1 + $0x100] ss:$8 sps:$4 sm:$0xff]   ;;  %v5518_v33 = vld [vmem:[%s8595_s1 + $0x1f4] ss:$8 sps:$4 sm:$0xff]   ;;  %v5521_v35 = vld [vmem:[%s8595_s1 + $0x1f0] ss:$8 sps:$4 sm:$0xff]  }
   0xd   :  { %3547 = vmatprep.subr.bf16.mxu1 %v5488_v13  ;;  %v5522_v36 = vld [vmem:[%s8595_s1 + $0xe4] ss:$8 sps:$4 sm:$0xff]   ;;  %v5526_v38 = vld [vmem:[%s8595_s1 + $0xe0] ss:$8 sps:$4 sm:$0xff]   ;;  %v5528_v40 = vld [vmem:[%s8595_s1 + $0xd4] ss:$8 sps:$4 sm:$0xff]  }
   0xe   :  { %v5524_v37 = vld [vmem:[%s8595_s1 + $0x1e4] ss:$8 sps:$4 sm:$0xff]   ;;  %v5527_v39 = vld [vmem:[%s8595_s1 + $0x1e0] ss:$8 sps:$4 sm:$0xff]   ;;  %v5530_v41 = vld [vmem:[%s8595_s1 + $0x1d4] ss:$8 sps:$4 sm:$0xff]  }
   0xf   :  { %3447 = vmatpush1.bf16.msra.mxu0 %v5490_v14  ;;  %v5532_v42 = vld [vmem:[%s8595_s1 + $0xd0] ss:$8 sps:$4 sm:$0xff]   ;;  %v5534_v44 = vld [vmem:[%s8595_s1 + $0xc4] ss:$8 sps:$4 sm:$0xff]   ;;  %v5538_v46 = vld [vmem:[%s8595_s1 + $0xc0] ss:$8 sps:$4 sm:$0xff]  }
  0x10   :  { %3548 = vmatpush1.bf16.msra.mxu1 %v5491_v15  ;;  %3448 = vmatprep.subr.bf16.mxu0 %v5492_v16  ;;  %v5533_v43 = vld [vmem:[%s8595_s1 + $0x1d0] ss:$8 sps:$4 sm:$0xff]   ;;  %v5536_v45 = vld [vmem:[%s8595_s1 + $0x1c4] ss:$8 sps:$4 sm:$0xff]   ;;  %v5539_v47 = vld [vmem:[%s8595_s1 + $0x1c0] ss:$8 sps:$4 sm:$0xff]  }
  0x11   :  { %3549 = vmatprep.subr.bf16.mxu1 %v5494_v17  ;;  %v5540_v48 = vld [vmem:[%s8595_s1 + $0xb4] ss:$8 sps:$4 sm:$0xff]   ;;  %v5566_v49 = vld [vmem:[%s8596_s0 + $0x4] ss:$100 sps:$4 sm:$0xff]   ;;  %v5569_v51 = vld [vmem:[%s8596_s0 + $0xc] ss:$100 sps:$4 sm:$0xff]  }
  0x12   :  { %v5542_v50 = vld [vmem:[%s8595_s1 + $0x1b4] ss:$8 sps:$4 sm:$0xff]   ;;  %3472 = vmatprep.mubr.bf16.mxu0 %v5566_v49  ;;  %v5544_v52 = vld [vmem:[%s8595_s1 + $0xb0] ss:$8 sps:$4 sm:$0xff]   ;;  %3573 = vmatprep.mubr.bf16.mxu1 %v5569_v51  ;;  %v5546_v54 = vld [vmem:[%s8595_s1 + $0xa4] ss:$8 sps:$4 sm:$0xff]  }
  0x13   :  { %3449 = vmatpush1.bf16.msra.mxu0 %v5496_v18  ;;  %v5545_v53 = vld [vmem:[%s8595_s1 + $0x1b0] ss:$8 sps:$4 sm:$0xff]   ;;  %v5548_v55 = vld [vmem:[%s8595_s1 + $0x1a4] ss:$8 sps:$4 sm:$0xff]   ;;  %v5550_v56 = vld [vmem:[%s8595_s1 + $0xa0] ss:$8 sps:$4 sm:$0xff]  }
  0x14   :  { %3550 = vmatpush1.bf16.msra.mxu1 %v5497_v19  ;;  %3450 = vmatprep.subr.bf16.mxu0 %v5498_v20  ;;  %v5551_v57 = vld [vmem:[%s8595_s1 + $0x1a0] ss:$8 sps:$4 sm:$0xff]   ;;  %v5552_v58 = vld [vmem:[%s8595_s1 + $0x94] ss:$8 sps:$4 sm:$0xff]   ;;  %v5556_v60 = vld [vmem:[%s8595_s1 + $0x90] ss:$8 sps:$4 sm:$0xff]  }
  0x15   :  { %3551 = vmatprep.subr.bf16.mxu1 %v5500_v21  ;;  %v5554_v59 = vld [vmem:[%s8595_s1 + $0x194] ss:$8 sps:$4 sm:$0xff]   ;;  %v5557_v61 = vld [vmem:[%s8595_s1 + $0x190] ss:$8 sps:$4 sm:$0xff]   ;;  %v5558_v62 = vld [vmem:[%s8595_s1 + $0x84] ss:$8 sps:$4 sm:$0xff]  }
  0x16   :  { %v5560_v63 = vld [vmem:[%s8595_s1 + $0x184] ss:$8 sps:$4 sm:$0xff]   ;;  %v5562_v0 = vld [vmem:[%s8595_s1 + $0x80] ss:$8 sps:$4 sm:$0xff]   ;;  %v5572_v2 = vld [vmem:[%s8595_s1 + $0x274] ss:$8 sps:$4 sm:$0xff]  }
  0x17   :  { %3451 = vmatpush1.bf16.msra.mxu0 %v5502_v22  ;;  %v5563_v1 = vld [vmem:[%s8595_s1 + $0x180] ss:$8 sps:$4 sm:$0xff]   ;;  %v5575_v3 = vld [vmem:[%s8595_s1 + $0x374] ss:$8 sps:$4 sm:$0xff]   ;;  %v5570_v6 = vld [vmem:[%s8595_s1 + $0x270] ss:$8 sps:$4 sm:$0xff]  }
  0x18   :  { %3552 = vmatpush1.bf16.msra.mxu1 %v5503_v23  ;;  %3452 = vmatprep.subr.bf16.mxu0 %v5504_v24  ;;  %v5564_v4 = vld [vmem:[%s8596_s0] ss:$100 sps:$4 sm:$0xff]   ;;  %v5567_v5 = vld [vmem:[%s8596_s0 + $0x8] ss:$100 sps:$4 sm:$0xff]   ;;  %v5573_v7 = vld [vmem:[%s8595_s1 + $0x370] ss:$8 sps:$4 sm:$0xff]  }
  0x19   :  { %3553 = vmatprep.subr.bf16.mxu1 %v5506_v25  ;;  %v5578_v8 = vld [vmem:[%s8595_s1 + $0x264] ss:$8 sps:$4 sm:$0xff]   ;;  %v5591_v11 = vld [vmem:[%s8596_s0 + $0xd4] ss:$100 sps:$4 sm:$0xff]   ;;  %v5576_v12 = vld [vmem:[%s8595_s1 + $0x260] ss:$8 sps:$4 sm:$0xff]  }
  0x1a   :  { %v5581_v9 = vld [vmem:[%s8595_s1 + $0x364] ss:$8 sps:$4 sm:$0xff]   ;;  %v5579_v13 = vld [vmem:[%s8595_s1 + $0x360] ss:$8 sps:$4 sm:$0xff]   ;;  %v5584_v14 = vld [vmem:[%s8595_s1 + $0x254] ss:$8 sps:$4 sm:$0xff]  }
  0x1b   :  { %3453 = vmatpush1.bf16.msra.mxu0 %v5508_v26  ;;  %v5588_v10 = vld [vmem:[%s8596_s0 + $0xcc] ss:$100 sps:$4 sm:$0xff]   ;;  %v5587_v15 = vld [vmem:[%s8595_s1 + $0x354] ss:$8 sps:$4 sm:$0xff]   ;;  %v5593_v24 = vld [vmem:[%s8595_s1 + $0x240] ss:$8 sps:$4 sm:$0xff]  }
  0x1c   :  { %3554 = vmatpush1.bf16.msra.mxu1 %v5509_v27  ;;  %3454 = vmatprep.subr.bf16.mxu0 %v5510_v28  ;;  %v5582_v16 = vld [vmem:[%s8595_s1 + $0x250] ss:$8 sps:$4 sm:$0xff]   ;;  %v5590_v17 = vld [vmem:[%s8596_s0 + $0xc8] ss:$100 sps:$4 sm:$0xff]   ;;  %v5609_v23 = vld [vmem:[%s8596_s0 + $0x19c] ss:$100 sps:$4 sm:$0xff]  }
  0x1d   :  { %3555 = vmatprep.subr.bf16.mxu1 %v5512_v29  ;;  %v5599_v18 = vld [vmem:[%s8596_s0 + $0xd0] ss:$100 sps:$4 sm:$0xff]   ;;  %v5595_v20 = vld [vmem:[%s8595_s1 + $0x244] ss:$8 sps:$4 sm:$0xff]   ;;  %v5596_v25 = vld [vmem:[%s8595_s1 + $0x340] ss:$8 sps:$4 sm:$0xff]  }
  0x1e   :  { %v5585_v19 = vld [vmem:[%s8595_s1 + $0x350] ss:$8 sps:$4 sm:$0xff]   ;;  %v5598_v21 = vld [vmem:[%s8595_s1 + $0x344] ss:$8 sps:$4 sm:$0xff]   ;;  %v5602_v26 = vld [vmem:[%s8595_s1 + $0x234] ss:$8 sps:$4 sm:$0xff]  }
  0x1f   :  { %3455 = vmatpush1.bf16.msra.mxu0 %v5514_v30  ;;  %v5606_v22 = vld [vmem:[%s8596_s0 + $0x194] ss:$100 sps:$4 sm:$0xff]   ;;  %v5632_v49 = vld [vmem:[%s8595_s1 + $0x300] ss:$8 sps:$4 sm:$0xff]  }
  0x20   :  { %3556 = vmatpush1.bf16.msra.mxu1 %v5515_v31  ;;  %3456 = vmatprep.subr.bf16.mxu0 %v5516_v32  ;;  %v5605_v27 = vld [vmem:[%s8595_s1 + $0x334] ss:$8 sps:$4 sm:$0xff]   ;;  %v5600_v28 = vld [vmem:[%s8595_s1 + $0x230] ss:$8 sps:$4 sm:$0xff]   ;;  %v5613_v32 = vld [vmem:[%s8595_s1 + $0x224] ss:$8 sps:$4 sm:$0xff]  }
  0x21   :  { %3557 = vmatprep.subr.bf16.mxu1 %v5518_v33  ;;  %v5608_v29 = vld [vmem:[%s8596_s0 + $0x190] ss:$100 sps:$4 sm:$0xff]   ;;  %v5617_v30 = vld [vmem:[%s8596_s0 + $0x198] ss:$100 sps:$4 sm:$0xff]   ;;  %v5616_v33 = vld [vmem:[%s8595_s1 + $0x324] ss:$8 sps:$4 sm:$0xff]  }
  0x22   :  { %v5603_v31 = vld [vmem:[%s8595_s1 + $0x330] ss:$8 sps:$4 sm:$0xff]   ;;  %v5641_v51 = vld [vmem:[%s8595_s1 + $0x3f4] ss:$8 sps:$4 sm:$0xff]  }
  0x23   :  { %3457 = vmatpush2.bf16.msra.mxu0 %v5520_v34  ;;  %v5624_v34 = vld [vmem:[%s8596_s0 + $0x25c] ss:$100 sps:$4 sm:$0xff]  }
  0x24   :  { %3558 = vmatpush2.bf16.msra.mxu1 %v5521_v35  ;;  %3458 = vmatprep.subr.bf16.mxu0 %v5522_v36  ;;  %v5627_v35 = vld [vmem:[%s8596_s0 + $0x264] ss:$100 sps:$4 sm:$0xff]  }
  0x25   :  { %3559 = vmatprep.subr.bf16.mxu1 %v5524_v37  ;;  %v5611_v36 = vld [vmem:[%s8595_s1 + $0x220] ss:$8 sps:$4 sm:$0xff]  }
  0x26   :  { %v5614_v37 = vld [vmem:[%s8595_s1 + $0x320] ss:$8 sps:$4 sm:$0xff]  }
  0x27   :  { %3459 = vmatpush2.bf16.msra.mxu0 %v5526_v38  ;;  %v5620_v38 = vld [vmem:[%s8595_s1 + $0x214] ss:$8 sps:$4 sm:$0xff]  }
  0x28   :  { %3560 = vmatpush2.bf16.msra.mxu1 %v5527_v39  ;;  %3460 = vmatprep.subr.bf16.mxu0 %v5528_v40  ;;  %v5623_v39 = vld [vmem:[%s8595_s1 + $0x314] ss:$8 sps:$4 sm:$0xff]   ;;  %v5618_v40 = vld [vmem:[%s8595_s1 + $0x210] ss:$8 sps:$4 sm:$0xff]  }
  0x29   :  { %3561 = vmatprep.subr.bf16.mxu1 %v5530_v41  ;;  %v5626_v41 = vld [vmem:[%s8596_s0 + $0x258] ss:$100 sps:$4 sm:$0xff]  }
  0x2b   :  { %3461 = vmatpush2.bf16.msra.mxu0 %v5532_v42  ;;  %v5635_v42 = vld [vmem:[%s8596_s0 + $0x260] ss:$100 sps:$4 sm:$0xff]  }
  0x2c   :  { %3562 = vmatpush2.bf16.msra.mxu1 %v5533_v43  ;;  %3462 = vmatprep.subr.bf16.mxu0 %v5534_v44  ;;  %v5621_v43 = vld [vmem:[%s8595_s1 + $0x310] ss:$8 sps:$4 sm:$0xff]   ;;  %v5631_v44 = vld [vmem:[%s8595_s1 + $0x204] ss:$8 sps:$4 sm:$0xff]  }
  0x2d   :  { %3563 = vmatprep.subr.bf16.mxu1 %v5536_v45  ;;  %v5634_v45 = vld [vmem:[%s8595_s1 + $0x304] ss:$8 sps:$4 sm:$0xff]  }
  0x2f   :  { %3463 = vmatpush2.bf16.msra.mxu0 %v5538_v46  ;;  %v5642_v46 = vld [vmem:[%s8596_s0 + $0x324] ss:$100 sps:$4 sm:$0xff]  }
  0x30   :  { %3564 = vmatpush2.bf16.msra.mxu1 %v5539_v47  ;;  %3464 = vmatprep.subr.bf16.mxu0 %v5540_v48  ;;  %v5645_v47 = vld [vmem:[%s8596_s0 + $0x32c] ss:$100 sps:$4 sm:$0xff]   ;;  %v5629_v48 = vld [vmem:[%s8595_s1 + $0x200] ss:$8 sps:$4 sm:$0xff]  }
  0x31   :  { %3565 = vmatprep.subr.bf16.mxu1 %v5542_v50  ;;  %v5638_v50 = vld [vmem:[%s8595_s1 + $0x2f4] ss:$8 sps:$4 sm:$0xff]  }
  0x33   :  { %3465 = vmatpush2.bf16.msra.mxu0 %v5544_v52  ;;  %v5636_v52 = vld [vmem:[%s8595_s1 + $0x2f0] ss:$8 sps:$4 sm:$0xff]  }
  0x34   :  { %3566 = vmatpush2.bf16.msra.mxu1 %v5545_v53  ;;  %3466 = vmatprep.subr.bf16.mxu0 %v5546_v54  ;;  %v5644_v53 = vld [vmem:[%s8596_s0 + $0x320] ss:$100 sps:$4 sm:$0xff]   ;;  %v5653_v54 = vld [vmem:[%s8596_s0 + $0x328] ss:$100 sps:$4 sm:$0xff]  }
  0x35   :  { %3567 = vmatprep.subr.bf16.mxu1 %v5548_v55  ;;  %v5639_v55 = vld [vmem:[%s8595_s1 + $0x3f0] ss:$8 sps:$4 sm:$0xff]  }
  0x37   :  { %3467 = vmatpush2.bf16.msra.mxu0 %v5550_v56  ;;  %v5649_v56 = vld [vmem:[%s8595_s1 + $0x2e4] ss:$8 sps:$4 sm:$0xff]  }
  0x38   :  { %3568 = vmatpush2.bf16.msra.mxu1 %v5551_v57  ;;  %3468 = vmatprep.subr.bf16.mxu0 %v5552_v58  ;;  %v5652_v57 = vld [vmem:[%s8595_s1 + $0x3e4] ss:$8 sps:$4 sm:$0xff]  }
  0x39   :  { %3569 = vmatprep.subr.bf16.mxu1 %v5554_v59  ;;  %v5660_v58 = vld [vmem:[%s8596_s0 + $0x3ec] ss:$100 sps:$4 sm:$0xff]   ;;  %v5647_v59 = vld [vmem:[%s8595_s1 + $0x2e0] ss:$8 sps:$4 sm:$0xff]  }
  0x3b   :  { %3469 = vmatpush2.bf16.msra.mxu0 %v5556_v60  ;;  %v5663_v60 = vld [vmem:[%s8596_s0 + $0x3f4] ss:$100 sps:$4 sm:$0xff]  }
  0x3c   :  { %3570 = vmatpush2.bf16.msra.mxu1 %v5557_v61  ;;  %3470 = vmatprep.subr.bf16.mxu0 %v5558_v62  ;;  %v5650_v61 = vld [vmem:[%s8595_s1 + $0x3e0] ss:$8 sps:$4 sm:$0xff]   ;;  %v5656_v62 = vld [vmem:[%s8595_s1 + $0x2d4] ss:$8 sps:$4 sm:$0xff]  }
  0x3d   :  { %3571 = vmatprep.subr.bf16.mxu1 %v5560_v63  ;;  %v5659_v63 = vld [vmem:[%s8595_s1 + $0x3d4] ss:$8 sps:$4 sm:$0xff]  }
  0x3f   :  { %3471 = vmatpush2.bf16.msra.mxu0 %v5562_v0  ;;  %v5662_v0 = vld [vmem:[%s8596_s0 + $0x3e8] ss:$100 sps:$4 sm:$0xff]  }
  0x40   :  { %3572 = vmatpush2.bf16.msra.mxu1 %v5563_v1  ;;  %3642 = vmatprep.subr.bf16.mxu0 %v5572_v2  ;;  %v5671_v1 = vld [vmem:[%s8596_s0 + $0x3f0] ss:$100 sps:$4 sm:$0xff]  }
  0x41   :  { %3743 = vmatprep.subr.bf16.mxu1 %v5575_v3  ;;  %v171_v2 = vld [vmem:[%s8596_s0 + $0x4b0] sm:$0x11]  ;;  %v172_v3 = vld [vmem:[%s8596_s0 + $0x4b8] sm:$0x11] }
  0x42   :  { %3473 = vmatmul.mubr.bf16.vlgmr.msra.gmra.mxu0 %v5564_v4  ;;  %v5654_v4 = vld [vmem:[%s8595_s1 + $0x2d0] ss:$8 sps:$4 sm:$0xff]  }
  0x43   :  { %3574 = vmatmul.mubr.bf16.vlgmr.msra.gmra.mxu1 %v5567_v5  ;;  %3643 = vmatpush1.bf16.msra.mxu0 %v5570_v6  ;;  %v5657_v5 = vld [vmem:[%s8595_s1 + $0x3d0] ss:$8 sps:$4 sm:$0xff]   ;;  %v5667_v6 = vld [vmem:[%s8595_s1 + $0x2c4] ss:$8 sps:$4 sm:$0xff]  }
  0x44   :  { %3744 = vmatpush1.bf16.msra.mxu1 %v5573_v7  ;;  %3644 = vmatprep.subr.bf16.mxu0 %v5578_v8  ;;  %v5670_v7 = vld [vmem:[%s8595_s1 + $0x3c4] ss:$8 sps:$4 sm:$0xff]   ;;  %v5001_v8 = vcombine.high %v171_v2, %v171_v2 }
  0x45   :  { %3745 = vmatprep.subr.bf16.mxu1 %v5581_v9  ;;  %3482 = vmatprep.mubr.bf16.mxu0 %v5588_v10  ;;  %v5003_v9 = vcombine.high %v172_v3, %v172_v3  ;;  %v5665_v10 = vld [vmem:[%s8595_s1 + $0x2c0] ss:$8 sps:$4 sm:$0xff]  }
  0x46   :  { %3583 = vmatprep.mubr.bf16.mxu1 %v5591_v11  ;;  %v5668_v11 = vld [vmem:[%s8595_s1 + $0x3c0] ss:$8 sps:$4 sm:$0xff]  }
  0x47   :  { %3645 = vmatpush1.bf16.msra.mxu0 %v5576_v12  ;;  %v5674_v12 = vld [vmem:[%s8595_s1 + $0x2b4] ss:$8 sps:$4 sm:$0xff]  }
  0x48   :  { %3746 = vmatpush1.bf16.msra.mxu1 %v5579_v13  ;;  %3646 = vmatprep.subr.bf16.mxu0 %v5584_v14  ;;  %v5677_v13 = vld [vmem:[%s8595_s1 + $0x3b4] ss:$8 sps:$4 sm:$0xff]   ;;  %v5672_v14 = vld [vmem:[%s8595_s1 + $0x2b0] ss:$8 sps:$4 sm:$0xff]  }
  0x49   :  { %3747 = vmatprep.subr.bf16.mxu1 %v5587_v15  ;;  %v5000_v15 = vcombine.low %v171_v2, %v171_v2  ;;  %v5748_v2 = vld [vmem:[%s8595_s1 + $0x420] ss:$8 sps:$4 sm:$0xff]  }
  0x4a   :  { %3483 = vmatmul.mubr.bf16.gmra.mxu0 %v5590_v17  ;;  %v5675_v17 = vld [vmem:[%s8595_s1 + $0x3b0] ss:$8 sps:$4 sm:$0xff]  }
  0x4b   :  { %3584 = vmatmul.mubr.bf16.gmra.mxu1 %v5599_v18  ;;  %3647 = vmatpush1.bf16.msra.mxu0 %v5582_v16  ;;  %v5002_v16 = vcombine.low %v172_v3, %v172_v3  ;;  %v5682_v18 = vld [vmem:[%s8595_s1 + $0x2a4] ss:$8 sps:$4 sm:$0xff]   ;;  %v5751_v3 = vld [vmem:[%s8595_s1 + $0x520] ss:$8 sps:$4 sm:$0xff]  }
  0x4c   :  { %3748 = vmatpush1.bf16.msra.mxu1 %v5585_v19  ;;  %3648 = vmatprep.subr.bf16.mxu0 %v5595_v20  ;;  %v5685_v19 = vld [vmem:[%s8595_s1 + $0x3a4] ss:$8 sps:$4 sm:$0xff]   ;;  %v5702_v20 = vld [vmem:[%s8596_s0 + $0x14] ss:$100 sps:$4 sm:$0xff]  }
  0x4d   :  { %3749 = vmatprep.subr.bf16.mxu1 %v5598_v21  ;;  %3492 = vmatprep.mubr.bf16.mxu0 %v5606_v22  ;;  %v5705_v21 = vld [vmem:[%s8596_s0 + $0x1c] ss:$100 sps:$4 sm:$0xff]  }
  0x4e   :  { %3593 = vmatprep.mubr.bf16.mxu1 %v5609_v23  ;;  %v5680_v22 = vld [vmem:[%s8595_s1 + $0x2a0] ss:$8 sps:$4 sm:$0xff]  }
  0x4f   :  { %3649 = vmatpush1.bf16.msra.mxu0 %v5593_v24  ;;  %v5683_v23 = vld [vmem:[%s8595_s1 + $0x3a0] ss:$8 sps:$4 sm:$0xff]   ;;  %v5689_v24 = vld [vmem:[%s8595_s1 + $0x294] ss:$8 sps:$4 sm:$0xff]  }
  0x50   :  { %3750 = vmatpush1.bf16.msra.mxu1 %v5596_v25  ;;  %3650 = vmatprep.subr.bf16.mxu0 %v5602_v26  ;;  %v5692_v25 = vld [vmem:[%s8595_s1 + $0x394] ss:$8 sps:$4 sm:$0xff]   ;;  %v5687_v26 = vld [vmem:[%s8595_s1 + $0x290] ss:$8 sps:$4 sm:$0xff]  }
  0x51   :  { %3751 = vmatprep.subr.bf16.mxu1 %v5605_v27  ;;  %v5690_v27 = vld [vmem:[%s8595_s1 + $0x390] ss:$8 sps:$4 sm:$0xff]  }
  0x52   :  { %3493 = vmatmul.mubr.bf16.gmra.mxu0 %v5608_v29  ;;  %v5699_v29 = vld [vmem:[%s8595_s1 + $0x384] ss:$8 sps:$4 sm:$0xff]  }
  0x53   :  { %3594 = vmatmul.mubr.bf16.gmra.mxu1 %v5617_v30  ;;  %3651 = vmatpush1.bf16.msra.mxu0 %v5600_v28  ;;  %v5696_v28 = vld [vmem:[%s8595_s1 + $0x284] ss:$8 sps:$4 sm:$0xff]   ;;  %v5694_v30 = vld [vmem:[%s8595_s1 + $0x280] ss:$8 sps:$4 sm:$0xff]  }
  0x54   :  { %3752 = vmatpush1.bf16.msra.mxu1 %v5603_v31  ;;  %3652 = vmatprep.subr.bf16.mxu0 %v5613_v32  ;;  %v5697_v31 = vld [vmem:[%s8595_s1 + $0x380] ss:$8 sps:$4 sm:$0xff]   ;;  %v5700_v32 = vld [vmem:[%s8596_s0 + $0x10] ss:$100 sps:$4 sm:$0xff]  }
  0x55   :  { %3753 = vmatprep.subr.bf16.mxu1 %v5616_v33  ;;  %3502 = vmatprep.mubr.bf16.mxu0 %v5624_v34  ;;  %v5708_v33 = vld [vmem:[%s8595_s1 + $0x474] ss:$8 sps:$4 sm:$0xff]  }
  0x56   :  { %3603 = vmatprep.mubr.bf16.mxu1 %v5627_v35  ;;  %v5711_v34 = vld [vmem:[%s8595_s1 + $0x574] ss:$8 sps:$4 sm:$0xff]  }
  0x57   :  { %3653 = vmatpush1.bf16.msra.mxu0 %v5611_v36  ;;  %v5703_v35 = vld [vmem:[%s8596_s0 + $0x18] ss:$100 sps:$4 sm:$0xff]  }
  0x58   :  { %3754 = vmatpush1.bf16.msra.mxu1 %v5614_v37  ;;  %3654 = vmatprep.subr.bf16.mxu0 %v5620_v38  ;;  %v5706_v36 = vld [vmem:[%s8595_s1 + $0x470] ss:$8 sps:$4 sm:$0xff]   ;;  %v5714_v38 = vld [vmem:[%s8595_s1 + $0x464] ss:$8 sps:$4 sm:$0xff]  }
  0x59   :  { %3755 = vmatprep.subr.bf16.mxu1 %v5623_v39  ;;  %v5709_v37 = vld [vmem:[%s8595_s1 + $0x570] ss:$8 sps:$4 sm:$0xff]   ;;  %v5717_v39 = vld [vmem:[%s8595_s1 + $0x564] ss:$8 sps:$4 sm:$0xff]  }
  0x5a   :  { %3503 = vmatmul.mubr.bf16.gmra.mxu0 %v5626_v41  ;;  %v5727_v41 = vld [vmem:[%s8596_s0 + $0xe4] ss:$100 sps:$4 sm:$0xff]  }
  0x5b   :  { %3604 = vmatmul.mubr.bf16.gmra.mxu1 %v5635_v42  ;;  %3655 = vmatpush1.bf16.msra.mxu0 %v5618_v40  ;;  %v5718_v40 = vld [vmem:[%s8596_s0 + $0xdc] ss:$100 sps:$4 sm:$0xff]  }
  0x5c   :  { %3756 = vmatpush1.bf16.msra.mxu1 %v5621_v43  ;;  %3656 = vmatprep.subr.bf16.mxu0 %v5631_v44  ;;  %v5712_v42 = vld [vmem:[%s8595_s1 + $0x460] ss:$8 sps:$4 sm:$0xff]   ;;  %v5720_v44 = vld [vmem:[%s8596_s0 + $0xd8] ss:$100 sps:$4 sm:$0xff]  }
  0x5d   :  { %3757 = vmatprep.subr.bf16.mxu1 %v5634_v45  ;;  %3512 = vmatprep.mubr.bf16.mxu0 %v5642_v46  ;;  %v5715_v43 = vld [vmem:[%s8595_s1 + $0x560] ss:$8 sps:$4 sm:$0xff]   ;;  %v5723_v45 = vld [vmem:[%s8595_s1 + $0x454] ss:$8 sps:$4 sm:$0xff]  }
  0x5e   :  { %3613 = vmatprep.mubr.bf16.mxu1 %v5645_v47  ;;  %v5726_v46 = vld [vmem:[%s8595_s1 + $0x554] ss:$8 sps:$4 sm:$0xff]   ;;  %v5721_v47 = vld [vmem:[%s8595_s1 + $0x450] ss:$8 sps:$4 sm:$0xff]  }
  0x5f   :  { %3657 = vmatpush1.bf16.msra.mxu0 %v5629_v48  ;;  %v5729_v48 = vld [vmem:[%s8596_s0 + $0xe0] ss:$100 sps:$4 sm:$0xff]  }
  0x60   :  { %3758 = vmatpush1.bf16.msra.mxu1 %v5632_v49  ;;  %3658 = vmatprep.subr.bf16.mxu0 %v5638_v50  ;;  %v5724_v49 = vld [vmem:[%s8595_s1 + $0x550] ss:$8 sps:$4 sm:$0xff]   ;;  %v5732_v50 = vld [vmem:[%s8595_s1 + $0x444] ss:$8 sps:$4 sm:$0xff]  }
  0x61   :  { %3759 = vmatprep.subr.bf16.mxu1 %v5641_v51  ;;  %v5735_v51 = vld [vmem:[%s8595_s1 + $0x544] ss:$8 sps:$4 sm:$0xff]  }
  0x62   :  { %3513 = vmatmul.mubr.bf16.gmra.mxu0 %v5644_v53  ;;  %v5745_v53 = vld [vmem:[%s8596_s0 + $0x1ac] ss:$100 sps:$4 sm:$0xff]  }
  0x63   :  { %3614 = vmatmul.mubr.bf16.gmra.mxu1 %v5653_v54  ;;  %3659 = vmatpush2.bf16.msra.mxu0 %v5636_v52  ;;  %v5736_v52 = vld [vmem:[%s8596_s0 + $0x1a4] ss:$100 sps:$4 sm:$0xff]  }
  0x64   :  { %3760 = vmatpush2.bf16.msra.mxu1 %v5639_v55  ;;  %3660 = vmatprep.subr.bf16.mxu0 %v5649_v56  ;;  %v5730_v54 = vld [vmem:[%s8595_s1 + $0x440] ss:$8 sps:$4 sm:$0xff]  }
  0x65   :  { %3761 = vmatprep.subr.bf16.mxu1 %v5652_v57  ;;  %3522 = vmatprep.mubr.bf16.mxu0 %v5660_v58  ;;  %v5733_v55 = vld [vmem:[%s8595_s1 + $0x540] ss:$8 sps:$4 sm:$0xff]   ;;  %v5741_v57 = vld [vmem:[%s8595_s1 + $0x434] ss:$8 sps:$4 sm:$0xff]  }
  0x66   :  { %3623 = vmatprep.mubr.bf16.mxu1 %v5663_v60  ;;  %v5738_v56 = vld [vmem:[%s8596_s0 + $0x1a0] ss:$100 sps:$4 sm:$0xff]   ;;  %v5744_v58 = vld [vmem:[%s8595_s1 + $0x534] ss:$8 sps:$4 sm:$0xff]   ;;  %v5747_v60 = vld [vmem:[%s8596_s0 + $0x1a8] ss:$100 sps:$4 sm:$0xff]  }
  0x67   :  { %3661 = vmatpush2.bf16.msra.mxu0 %v5647_v59  ;;  %v5739_v59 = vld [vmem:[%s8595_s1 + $0x430] ss:$8 sps:$4 sm:$0xff]  }
  0x68   :  { %3762 = vmatpush2.bf16.msra.mxu1 %v5650_v61  ;;  %3662 = vmatprep.subr.bf16.mxu0 %v5656_v62  ;;  %v5742_v61 = vld [vmem:[%s8595_s1 + $0x530] ss:$8 sps:$4 sm:$0xff]   ;;  %v5750_v62 = vld [vmem:[%s8595_s1 + $0x424] ss:$8 sps:$4 sm:$0xff]  }
  0x69   :  { %3763 = vmatprep.subr.bf16.mxu1 %v5659_v63  ;;  %v5753_v63 = vld [vmem:[%s8595_s1 + $0x524] ss:$8 sps:$4 sm:$0xff]  }
  0x6a   :  { %3523 = vmatmul.mubr.bf16.gmra.mxu0 %v5662_v0  ;;  %v5754_v0 = vld [vmem:[%s8596_s0 + $0x26c] ss:$100 sps:$4 sm:$0xff]  }
  0x6b   :  { %3624 = vmatmul.mubr.bf16.gmra.mxu1 %v5671_v1  ;;  %3663 = vmatpush2.bf16.msra.mxu0 %v5654_v4  ;;  %v5763_v1 = vld [vmem:[%s8596_s0 + $0x274] ss:$100 sps:$4 sm:$0xff]  }
  0x6c   :  { %3764 = vmatpush2.bf16.msra.mxu1 %v5657_v5  ;;  %3664 = vmatprep.subr.bf16.mxu0 %v5667_v6  ;;  %v5759_v4 = vld [vmem:[%s8595_s1 + $0x414] ss:$8 sps:$4 sm:$0xff]   ;;  %v5756_v6 = vld [vmem:[%s8596_s0 + $0x268] ss:$100 sps:$4 sm:$0xff]  }
  0x6d   :  { %3765 = vmatprep.subr.bf16.mxu1 %v5670_v7  ;;  %3532 = vmatprep.mubr.bf16.mxu0 %v5001_v8  ;;  %v5762_v5 = vld [vmem:[%s8595_s1 + $0x514] ss:$8 sps:$4 sm:$0xff]   ;;  %v5757_v7 = vld [vmem:[%s8595_s1 + $0x410] ss:$8 sps:$4 sm:$0xff]  }
  0x6e   :  { %3633 = vmatprep.mubr.bf16.mxu1 %v5003_v9  ;;  %v5765_v8 = vld [vmem:[%s8596_s0 + $0x270] ss:$100 sps:$4 sm:$0xff]  }
  0x6f   :  { %3665 = vmatpush2.bf16.msra.mxu0 %v5665_v10  ;;  %v5760_v9 = vld [vmem:[%s8595_s1 + $0x510] ss:$8 sps:$4 sm:$0xff]   ;;  %v5768_v10 = vld [vmem:[%s8595_s1 + $0x404] ss:$8 sps:$4 sm:$0xff]  }
  0x70   :  { %3766 = vmatpush2.bf16.msra.mxu1 %v5668_v11  ;;  %3666 = vmatprep.subr.bf16.mxu0 %v5674_v12  ;;  %v5771_v11 = vld [vmem:[%s8595_s1 + $0x504] ss:$8 sps:$4 sm:$0xff]   ;;  %v5772_v12 = vld [vmem:[%s8596_s0 + $0x334] ss:$100 sps:$4 sm:$0xff]  }
  0x71   :  { %3767 = vmatprep.subr.bf16.mxu1 %v5677_v13  ;;  %v5781_v13 = vld [vmem:[%s8596_s0 + $0x33c] ss:$100 sps:$4 sm:$0xff]  }
  0x72   :  { %3533 = vmatmul.mubr.bf16.gmra.mxu0 %v5000_v15  ;;  %v5769_v15 = vld [vmem:[%s8595_s1 + $0x500] ss:$8 sps:$4 sm:$0xff]  }
  0x73   :  { %3634 = vmatmul.mubr.bf16.gmra.mxu1 %v5002_v16  ;;  %3667 = vmatpush2.bf16.msra.mxu0 %v5672_v14  ;;  %v5766_v14 = vld [vmem:[%s8595_s1 + $0x400] ss:$8 sps:$4 sm:$0xff]   ;;  %v5777_v16 = vld [vmem:[%s8595_s1 + $0x4f4] ss:$8 sps:$4 sm:$0xff]  }
  0x74   :  { %3768 = vmatpush2.bf16.msra.mxu1 %v5675_v17  ;;  %3668 = vmatprep.subr.bf16.mxu0 %v5682_v18  ;;  %v5780_v17 = vld [vmem:[%s8595_s1 + $0x5f4] ss:$8 sps:$4 sm:$0xff]  }
  0x75   :  { %3769 = vmatprep.subr.bf16.mxu1 %v5685_v19  ;;  %3674 = vmatprep.mubr.bf16.mxu0 %v5702_v20  ;;  %v5774_v18 = vld [vmem:[%s8596_s0 + $0x330] ss:$100 sps:$4 sm:$0xff]  }
  0x76   :  { %3775 = vmatprep.mubr.bf16.mxu1 %v5705_v21  ;;  %v5775_v19 = vld [vmem:[%s8595_s1 + $0x4f0] ss:$8 sps:$4 sm:$0xff]  }
  0x77   :  { %3669 = vmatpush2.bf16.msra.mxu0 %v5680_v22  ;;  %v5778_v20 = vld [vmem:[%s8595_s1 + $0x5f0] ss:$8 sps:$4 sm:$0xff]   ;;  %v5786_v22 = vld [vmem:[%s8595_s1 + $0x4e4] ss:$8 sps:$4 sm:$0xff]  }
  0x78   :  { %3770 = vmatpush2.bf16.msra.mxu1 %v5683_v23  ;;  %3670 = vmatprep.subr.bf16.mxu0 %v5689_v24  ;;  %v5783_v21 = vld [vmem:[%s8596_s0 + $0x338] ss:$100 sps:$4 sm:$0xff]   ;;  %v5789_v23 = vld [vmem:[%s8595_s1 + $0x5e4] ss:$8 sps:$4 sm:$0xff]  }
  0x79   :  { %3771 = vmatprep.subr.bf16.mxu1 %v5692_v25  ;;  %v5790_v24 = vld [vmem:[%s8596_s0 + $0x3fc] ss:$100 sps:$4 sm:$0xff]   ;;  %v5799_v25 = vld [vmem:[%s8596_s0 + $0x404] ss:$100 sps:$4 sm:$0xff]  }
  0x7b   :  { %3671 = vmatpush2.bf16.msra.mxu0 %v5687_v26  ;;  %v5784_v26 = vld [vmem:[%s8595_s1 + $0x4e0] ss:$8 sps:$4 sm:$0xff]  }
  0x7c   :  { %3772 = vmatpush2.bf16.msra.mxu1 %v5690_v27  ;;  %3672 = vmatprep.subr.bf16.mxu0 %v5696_v28  ;;  %v5787_v27 = vld [vmem:[%s8595_s1 + $0x5e0] ss:$8 sps:$4 sm:$0xff]   ;;  %v5795_v28 = vld [vmem:[%s8595_s1 + $0x4d4] ss:$8 sps:$4 sm:$0xff]  }
  0x7d   :  { %3773 = vmatprep.subr.bf16.mxu1 %v5699_v29  ;;  %v5792_v29 = vld [vmem:[%s8596_s0 + $0x3f8] ss:$100 sps:$4 sm:$0xff]  }
  0x7f   :  { %3673 = vmatpush2.bf16.msra.mxu0 %v5694_v30  ;;  %v5798_v30 = vld [vmem:[%s8595_s1 + $0x5d4] ss:$8 sps:$4 sm:$0xff]  }
  0x80   :  { %3774 = vmatpush2.bf16.msra.mxu1 %v5697_v31  ;;  %3844 = vmatprep.subr.bf16.mxu0 %v5708_v33  ;;  %v5793_v31 = vld [vmem:[%s8595_s1 + $0x4d0] ss:$8 sps:$4 sm:$0xff]   ;;  %v5801_v33 = vld [vmem:[%s8596_s0 + $0x400] ss:$100 sps:$4 sm:$0xff]  }
  0x81   :  { %3945 = vmatprep.subr.bf16.mxu1 %v5711_v34  ;;  %v173_v34 = vld [vmem:[%s8596_s0 + $0x4c0] sm:$0x11] }
  0x82   :  { %3675 = vmatmul.mubr.bf16.vlgmr.msra.gmra.mxu0 %v5700_v32  ;;  %v5796_v32 = vld [vmem:[%s8595_s1 + $0x5d0] ss:$8 sps:$4 sm:$0xff]  }
  0x83   :  { %3776 = vmatmul.mubr.bf16.vlgmr.msra.gmra.mxu1 %v5703_v35  ;;  %3845 = vmatpush1.bf16.msra.mxu0 %v5706_v36  ;;  %v174_v35 = vld [vmem:[%s8596_s0 + $0x4c8] sm:$0x11] }
  0x84   :  { %3946 = vmatpush1.bf16.msra.mxu1 %v5709_v37  ;;  %3846 = vmatprep.subr.bf16.mxu0 %v5714_v38  ;;  %v5804_v36 = vld [vmem:[%s8595_s1 + $0x4c4] ss:$8 sps:$4 sm:$0xff]   ;;  %v5005_v38 = vcombine.high %v173_v34, %v173_v34 }
  0x85   :  { %3947 = vmatprep.subr.bf16.mxu1 %v5717_v39  ;;  %3684 = vmatprep.mubr.bf16.mxu0 %v5718_v40  ;;  %v5807_v37 = vld [vmem:[%s8595_s1 + $0x5c4] ss:$8 sps:$4 sm:$0xff]   ;;  %v5007_v39 = vcombine.high %v174_v35, %v174_v35  ;;  %v5802_v40 = vld [vmem:[%s8595_s1 + $0x4c0] ss:$8 sps:$4 sm:$0xff]  }
  0x86   :  { %3785 = vmatprep.mubr.bf16.mxu1 %v5727_v41  ;;  %v5805_v41 = vld [vmem:[%s8595_s1 + $0x5c0] ss:$8 sps:$4 sm:$0xff]  }
  0x87   :  { %3847 = vmatpush1.bf16.msra.mxu0 %v5712_v42  ;;  %v5812_v42 = vld [vmem:[%s8595_s1 + $0x4b4] ss:$8 sps:$4 sm:$0xff]  }
  0x88   :  { %3948 = vmatpush1.bf16.msra.mxu1 %v5715_v43  ;;  %3848 = vmatprep.subr.bf16.mxu0 %v5723_v45  ;;  %v5815_v43 = vld [vmem:[%s8595_s1 + $0x5b4] ss:$8 sps:$4 sm:$0xff]   ;;  %v5810_v45 = vld [vmem:[%s8595_s1 + $0x4b0] ss:$8 sps:$4 sm:$0xff]  }
  0x89   :  { %3949 = vmatprep.subr.bf16.mxu1 %v5726_v46  ;;  %v5813_v46 = vld [vmem:[%s8595_s1 + $0x5b0] ss:$8 sps:$4 sm:$0xff]  }
  0x8a   :  { %3685 = vmatmul.mubr.bf16.gmra.mxu0 %v5720_v44  ;;  %v5004_v44 = vcombine.low %v173_v34, %v173_v34  ;;  %v5892_v34 = vld [vmem:[%s8596_s0 + $0x278] ss:$100 sps:$4 sm:$0xff]  }
  0x8b   :  { %3786 = vmatmul.mubr.bf16.gmra.mxu1 %v5729_v48  ;;  %3849 = vmatpush1.bf16.msra.mxu0 %v5721_v47  ;;  %v5006_v47 = vcombine.low %v174_v35, %v174_v35  ;;  %v5820_v48 = vld [vmem:[%s8595_s1 + $0x4a4] ss:$8 sps:$4 sm:$0xff]   ;;  %v5895_v35 = vld [vmem:[%s8595_s1 + $0x614] ss:$8 sps:$4 sm:$0xff]  }
  0x8c   :  { %3950 = vmatpush1.bf16.msra.mxu1 %v5724_v49  ;;  %3850 = vmatprep.subr.bf16.mxu0 %v5732_v50  ;;  %v5823_v49 = vld [vmem:[%s8595_s1 + $0x5a4] ss:$8 sps:$4 sm:$0xff]  }
  0x8d   :  { %3951 = vmatprep.subr.bf16.mxu1 %v5735_v51  ;;  %3694 = vmatprep.mubr.bf16.mxu0 %v5736_v52  ;;  %v5838_v50 = vld [vmem:[%s8596_s0 + $0x24] ss:$100 sps:$4 sm:$0xff]   ;;  %v5841_v51 = vld [vmem:[%s8596_s0 + $0x2c] ss:$100 sps:$4 sm:$0xff]  }
  0x8e   :  { %3795 = vmatprep.mubr.bf16.mxu1 %v5745_v53  ;;  %v5818_v52 = vld [vmem:[%s8595_s1 + $0x4a0] ss:$8 sps:$4 sm:$0xff]  }
  0x8f   :  { %3851 = vmatpush1.bf16.msra.mxu0 %v5730_v54  ;;  %v5821_v53 = vld [vmem:[%s8595_s1 + $0x5a0] ss:$8 sps:$4 sm:$0xff]   ;;  %v5826_v54 = vld [vmem:[%s8595_s1 + $0x494] ss:$8 sps:$4 sm:$0xff]  }
  0x90   :  { %3952 = vmatpush1.bf16.msra.mxu1 %v5733_v55  ;;  %3852 = vmatprep.subr.bf16.mxu0 %v5741_v57  ;;  %v5829_v55 = vld [vmem:[%s8595_s1 + $0x594] ss:$8 sps:$4 sm:$0xff]   ;;  %v5827_v57 = vld [vmem:[%s8595_s1 + $0x590] ss:$8 sps:$4 sm:$0xff]  }
  0x91   :  { %3953 = vmatprep.subr.bf16.mxu1 %v5744_v58  ;;  %v5832_v58 = vld [vmem:[%s8595_s1 + $0x484] ss:$8 sps:$4 sm:$0xff]  }
  0x92   :  { %3695 = vmatmul.mubr.bf16.gmra.mxu0 %v5738_v56  ;;  %v5824_v56 = vld [vmem:[%s8595_s1 + $0x490] ss:$8 sps:$4 sm:$0xff]  }
  0x93   :  { %3796 = vmatmul.mubr.bf16.gmra.mxu1 %v5747_v60  ;;  %3853 = vmatpush1.bf16.msra.mxu0 %v5739_v59  ;;  %v5835_v59 = vld [vmem:[%s8595_s1 + $0x584] ss:$8 sps:$4 sm:$0xff]   ;;  %v5830_v60 = vld [vmem:[%s8595_s1 + $0x480] ss:$8 sps:$4 sm:$0xff]  }
  0x94   :  { %3954 = vmatpush1.bf16.msra.mxu1 %v5742_v61  ;;  %3854 = vmatprep.subr.bf16.mxu0 %v5750_v62  ;;  %v5833_v61 = vld [vmem:[%s8595_s1 + $0x580] ss:$8 sps:$4 sm:$0xff]   ;;  %v5844_v62 = vld [vmem:[%s8595_s1 + $0x674] ss:$8 sps:$4 sm:$0xff]  }
  0x95   :  { %3955 = vmatprep.subr.bf16.mxu1 %v5753_v63  ;;  %3704 = vmatprep.mubr.bf16.mxu0 %v5754_v0  ;;  %v5847_v63 = vld [vmem:[%s8595_s1 + $0x774] ss:$8 sps:$4 sm:$0xff]   ;;  %v5836_v0 = vld [vmem:[%s8596_s0 + $0x20] ss:$100 sps:$4 sm:$0xff]  }
  0x96   :  { %3805 = vmatprep.mubr.bf16.mxu1 %v5763_v1  ;;  %v5839_v1 = vld [vmem:[%s8596_s0 + $0x28] ss:$100 sps:$4 sm:$0xff]  }
  0x97   :  { %3855 = vmatpush1.bf16.msra.mxu0 %v5748_v2  ;;  %v5842_v2 = vld [vmem:[%s8595_s1 + $0x670] ss:$8 sps:$4 sm:$0xff]  }
  0x98   :  { %3956 = vmatpush1.bf16.msra.mxu1 %v5751_v3  ;;  %3856 = vmatprep.subr.bf16.mxu0 %v5759_v4  ;;  %v5845_v3 = vld [vmem:[%s8595_s1 + $0x770] ss:$8 sps:$4 sm:$0xff]   ;;  %v5850_v4 = vld [vmem:[%s8595_s1 + $0x664] ss:$8 sps:$4 sm:$0xff]  }
  0x99   :  { %3957 = vmatprep.subr.bf16.mxu1 %v5762_v5  ;;  %v5853_v5 = vld [vmem:[%s8595_s1 + $0x764] ss:$8 sps:$4 sm:$0xff]  }
  0x9a   :  { %3705 = vmatmul.mubr.bf16.gmra.mxu0 %v5756_v6  ;;  %v5854_v6 = vld [vmem:[%s8596_s0 + $0xec] ss:$100 sps:$4 sm:$0xff]  }
  0x9b   :  { %3806 = vmatmul.mubr.bf16.gmra.mxu1 %v5765_v8  ;;  %3857 = vmatpush1.bf16.msra.mxu0 %v5757_v7  ;;  %v5863_v7 = vld [vmem:[%s8596_s0 + $0xf4] ss:$100 sps:$4 sm:$0xff]   ;;  %v5848_v8 = vld [vmem:[%s8595_s1 + $0x660] ss:$8 sps:$4 sm:$0xff]  }
  0x9c   :  { %3958 = vmatpush1.bf16.msra.mxu1 %v5760_v9  ;;  %3858 = vmatprep.subr.bf16.mxu0 %v5768_v10  ;;  %v5851_v9 = vld [vmem:[%s8595_s1 + $0x760] ss:$8 sps:$4 sm:$0xff]   ;;  %v5859_v10 = vld [vmem:[%s8595_s1 + $0x654] ss:$8 sps:$4 sm:$0xff]  }
  0x9d   :  { %3959 = vmatprep.subr.bf16.mxu1 %v5771_v11  ;;  %3714 = vmatprep.mubr.bf16.mxu0 %v5772_v12  ;;  %v5862_v11 = vld [vmem:[%s8595_s1 + $0x754] ss:$8 sps:$4 sm:$0xff]   ;;  %v5856_v12 = vld [vmem:[%s8596_s0 + $0xe8] ss:$100 sps:$4 sm:$0xff]  }
  0x9e   :  { %3815 = vmatprep.mubr.bf16.mxu1 %v5781_v13  ;;  %v5857_v13 = vld [vmem:[%s8595_s1 + $0x650] ss:$8 sps:$4 sm:$0xff]  }
  0x9f   :  { %3859 = vmatpush1.bf16.msra.mxu0 %v5766_v14  ;;  %v5860_v14 = vld [vmem:[%s8595_s1 + $0x750] ss:$8 sps:$4 sm:$0xff]  }
  0xa0   :  { %3960 = vmatpush1.bf16.msra.mxu1 %v5769_v15  ;;  %3860 = vmatprep.subr.bf16.mxu0 %v5777_v16  ;;  %v5865_v15 = vld [vmem:[%s8596_s0 + $0xf0] ss:$100 sps:$4 sm:$0xff]   ;;  %v5868_v16 = vld [vmem:[%s8595_s1 + $0x644] ss:$8 sps:$4 sm:$0xff]  }
  0xa1   :  { %3961 = vmatprep.subr.bf16.mxu1 %v5780_v17  ;;  %v5871_v17 = vld [vmem:[%s8595_s1 + $0x744] ss:$8 sps:$4 sm:$0xff]  }
  0xa2   :  { %3715 = vmatmul.mubr.bf16.gmra.mxu0 %v5774_v18  ;;  %v5872_v18 = vld [vmem:[%s8596_s0 + $0x1b4] ss:$100 sps:$4 sm:$0xff]  }
  0xa3   :  { %3816 = vmatmul.mubr.bf16.gmra.mxu1 %v5783_v21  ;;  %3861 = vmatpush2.bf16.msra.mxu0 %v5775_v19  ;;  %v5881_v19 = vld [vmem:[%s8596_s0 + $0x1bc] ss:$100 sps:$4 sm:$0xff]  }
  0xa4   :  { %3962 = vmatpush2.bf16.msra.mxu1 %v5778_v20  ;;  %3862 = vmatprep.subr.bf16.mxu0 %v5786_v22  ;;  %v5866_v20 = vld [vmem:[%s8595_s1 + $0x640] ss:$8 sps:$4 sm:$0xff]   ;;  %v5877_v22 = vld [vmem:[%s8595_s1 + $0x634] ss:$8 sps:$4 sm:$0xff]  }
  0xa5   :  { %3963 = vmatprep.subr.bf16.mxu1 %v5789_v23  ;;  %3724 = vmatprep.mubr.bf16.mxu0 %v5790_v24  ;;  %v5869_v21 = vld [vmem:[%s8595_s1 + $0x740] ss:$8 sps:$4 sm:$0xff]   ;;  %v5880_v23 = vld [vmem:[%s8595_s1 + $0x734] ss:$8 sps:$4 sm:$0xff]  }
  0xa6   :  { %3825 = vmatprep.mubr.bf16.mxu1 %v5799_v25  ;;  %v5874_v24 = vld [vmem:[%s8596_s0 + $0x1b0] ss:$100 sps:$4 sm:$0xff]  }
  0xa7   :  { %3863 = vmatpush2.bf16.msra.mxu0 %v5784_v26  ;;  %v5875_v25 = vld [vmem:[%s8595_s1 + $0x630] ss:$8 sps:$4 sm:$0xff]  }
  0xa8   :  { %3964 = vmatpush2.bf16.msra.mxu1 %v5787_v27  ;;  %3864 = vmatprep.subr.bf16.mxu0 %v5795_v28  ;;  %v5883_v26 = vld [vmem:[%s8596_s0 + $0x1b8] ss:$100 sps:$4 sm:$0xff]   ;;  %v5886_v28 = vld [vmem:[%s8595_s1 + $0x624] ss:$8 sps:$4 sm:$0xff]  }
  0xa9   :  { %3965 = vmatprep.subr.bf16.mxu1 %v5798_v30  ;;  %v5878_v27 = vld [vmem:[%s8595_s1 + $0x730] ss:$8 sps:$4 sm:$0xff]   ;;  %v5890_v30 = vld [vmem:[%s8596_s0 + $0x27c] ss:$100 sps:$4 sm:$0xff]  }
  0xaa   :  { %3725 = vmatmul.mubr.bf16.gmra.mxu0 %v5792_v29  ;;  %v5889_v29 = vld [vmem:[%s8595_s1 + $0x724] ss:$8 sps:$4 sm:$0xff]  }
  0xab   :  { %3826 = vmatmul.mubr.bf16.gmra.mxu1 %v5801_v33  ;;  %3865 = vmatpush2.bf16.msra.mxu0 %v5793_v31  ;;  %v5899_v31 = vld [vmem:[%s8596_s0 + $0x284] ss:$100 sps:$4 sm:$0xff]  }
  0xac   :  { %3966 = vmatpush2.bf16.msra.mxu1 %v5796_v32  ;;  %3866 = vmatprep.subr.bf16.mxu0 %v5804_v36  ;;  %v5884_v32 = vld [vmem:[%s8595_s1 + $0x620] ss:$8 sps:$4 sm:$0xff]   ;;  %v5898_v36 = vld [vmem:[%s8595_s1 + $0x714] ss:$8 sps:$4 sm:$0xff]  }
  0xad   :  { %3967 = vmatprep.subr.bf16.mxu1 %v5807_v37  ;;  %3734 = vmatprep.mubr.bf16.mxu0 %v5005_v38  ;;  %v5887_v33 = vld [vmem:[%s8595_s1 + $0x720] ss:$8 sps:$4 sm:$0xff]   ;;  %v5893_v37 = vld [vmem:[%s8595_s1 + $0x610] ss:$8 sps:$4 sm:$0xff]  }
  0xae   :  { %3835 = vmatprep.mubr.bf16.mxu1 %v5007_v39  ;;  %v5901_v38 = vld [vmem:[%s8596_s0 + $0x280] ss:$100 sps:$4 sm:$0xff]   ;;  %v5896_v39 = vld [vmem:[%s8595_s1 + $0x710] ss:$8 sps:$4 sm:$0xff]  }
  0xaf   :  { %3867 = vmatpush2.bf16.msra.mxu0 %v5802_v40  ;;  %v5904_v40 = vld [vmem:[%s8595_s1 + $0x604] ss:$8 sps:$4 sm:$0xff]  }
  0xb0   :  { %3968 = vmatpush2.bf16.msra.mxu1 %v5805_v41  ;;  %3868 = vmatprep.subr.bf16.mxu0 %v5812_v42  ;;  %v5907_v41 = vld [vmem:[%s8595_s1 + $0x704] ss:$8 sps:$4 sm:$0xff]  }
  0xb1   :  { %3969 = vmatprep.subr.bf16.mxu1 %v5815_v43  ;;  %v5908_v42 = vld [vmem:[%s8596_s0 + $0x344] ss:$100 sps:$4 sm:$0xff]   ;;  %v5917_v43 = vld [vmem:[%s8596_s0 + $0x34c] ss:$100 sps:$4 sm:$0xff]  }
  0xb2   :  { %3735 = vmatmul.mubr.bf16.gmra.mxu0 %v5004_v44  ;;  %v5902_v44 = vld [vmem:[%s8595_s1 + $0x600] ss:$8 sps:$4 sm:$0xff]  }
  0xb3   :  { %3836 = vmatmul.mubr.bf16.gmra.mxu1 %v5006_v47  ;;  %3869 = vmatpush2.bf16.msra.mxu0 %v5810_v45  ;;  %v5905_v45 = vld [vmem:[%s8595_s1 + $0x700] ss:$8 sps:$4 sm:$0xff]   ;;  %v5913_v47 = vld [vmem:[%s8595_s1 + $0x6f4] ss:$8 sps:$4 sm:$0xff]  }
  0xb4   :  { %3970 = vmatpush2.bf16.msra.mxu1 %v5813_v46  ;;  %3870 = vmatprep.subr.bf16.mxu0 %v5820_v48  ;;  %v5910_v46 = vld [vmem:[%s8596_s0 + $0x340] ss:$100 sps:$4 sm:$0xff]   ;;  %v5916_v48 = vld [vmem:[%s8595_s1 + $0x7f4] ss:$8 sps:$4 sm:$0xff]  }
  0xb5   :  { %3971 = vmatprep.subr.bf16.mxu1 %v5823_v49  ;;  %3876 = vmatprep.mubr.bf16.mxu0 %v5838_v50  ;;  %v5911_v49 = vld [vmem:[%s8595_s1 + $0x6f0] ss:$8 sps:$4 sm:$0xff]  }
  0xb6   :  { %3977 = vmatprep.mubr.bf16.mxu1 %v5841_v51  ;;  %v5914_v50 = vld [vmem:[%s8595_s1 + $0x7f0] ss:$8 sps:$4 sm:$0xff]   ;;  %v5919_v51 = vld [vmem:[%s8596_s0 + $0x348] ss:$100 sps:$4 sm:$0xff]  }
  0xb7   :  { %3871 = vmatpush2.bf16.msra.mxu0 %v5818_v52  ;;  %v5922_v52 = vld [vmem:[%s8595_s1 + $0x6e4] ss:$8 sps:$4 sm:$0xff]  }
  0xb8   :  { %3972 = vmatpush2.bf16.msra.mxu1 %v5821_v53  ;;  %3872 = vmatprep.subr.bf16.mxu0 %v5826_v54  ;;  %v5925_v53 = vld [vmem:[%s8595_s1 + $0x7e4] ss:$8 sps:$4 sm:$0xff]  }
  0xb9   :  { %3973 = vmatprep.subr.bf16.mxu1 %v5829_v55  ;;  %v5926_v54 = vld [vmem:[%s8596_s0 + $0x40c] ss:$100 sps:$4 sm:$0xff]   ;;  %v5935_v55 = vld [vmem:[%s8596_s0 + $0x414] ss:$100 sps:$4 sm:$0xff]  }
  0xbb   :  { %3873 = vmatpush2.bf16.msra.mxu0 %v5824_v56  ;;  %v5920_v56 = vld [vmem:[%s8595_s1 + $0x6e0] ss:$8 sps:$4 sm:$0xff]  }
  0xbc   :  { %3974 = vmatpush2.bf16.msra.mxu1 %v5827_v57  ;;  %3874 = vmatprep.subr.bf16.mxu0 %v5832_v58  ;;  %v5923_v57 = vld [vmem:[%s8595_s1 + $0x7e0] ss:$8 sps:$4 sm:$0xff]   ;;  %v5931_v58 = vld [vmem:[%s8595_s1 + $0x6d4] ss:$8 sps:$4 sm:$0xff]  }
  0xbd   :  { %3975 = vmatprep.subr.bf16.mxu1 %v5835_v59  ;;  %v5928_v59 = vld [vmem:[%s8596_s0 + $0x408] ss:$100 sps:$4 sm:$0xff]  }
  0xbf   :  { %3875 = vmatpush2.bf16.msra.mxu0 %v5830_v60  ;;  %v5934_v60 = vld [vmem:[%s8595_s1 + $0x7d4] ss:$8 sps:$4 sm:$0xff]  }
  0xc0   :  { %3976 = vmatpush2.bf16.msra.mxu1 %v5833_v61  ;;  %4046 = vmatprep.subr.bf16.mxu0 %v5844_v62  ;;  %v5929_v61 = vld [vmem:[%s8595_s1 + $0x6d0] ss:$8 sps:$4 sm:$0xff]  }
  0xc1   :  { %4147 = vmatprep.subr.bf16.mxu1 %v5847_v63  ;;  %v5937_v62 = vld [vmem:[%s8596_s0 + $0x410] ss:$100 sps:$4 sm:$0xff]  }
  0xc2   :  { %3877 = vmatmul.mubr.bf16.vlgmr.msra.gmra.mxu0 %v5836_v0  ;;  %v175_v63 = vld [vmem:[%s8596_s0 + $0x4d0] sm:$0x11]  ;;  %v176_v0 = vld [vmem:[%s8596_s0 + $0x4d8] sm:$0x11] }
  0xc3   :  { %3978 = vmatmul.mubr.bf16.vlgmr.msra.gmra.mxu1 %v5839_v1  ;;  %4047 = vmatpush1.bf16.msra.mxu0 %v5842_v2  ;;  %v5932_v1 = vld [vmem:[%s8595_s1 + $0x7d0] ss:$8 sps:$4 sm:$0xff]   ;;  %v5940_v2 = vld [vmem:[%s8595_s1 + $0x6c4] ss:$8 sps:$4 sm:$0xff]  }
  0xc4   :  { %4148 = vmatpush1.bf16.msra.mxu1 %v5845_v3  ;;  %4048 = vmatprep.subr.bf16.mxu0 %v5850_v4  ;;  %v5943_v3 = vld [vmem:[%s8595_s1 + $0x7c4] ss:$8 sps:$4 sm:$0xff]   ;;  %v5009_v4 = vcombine.high %v175_v63, %v175_v63 }
  0xc5   :  { %4149 = vmatprep.subr.bf16.mxu1 %v5853_v5  ;;  %3886 = vmatprep.mubr.bf16.mxu0 %v5854_v6  ;;  %v5011_v5 = vcombine.high %v176_v0, %v176_v0  ;;  %v5938_v6 = vld [vmem:[%s8595_s1 + $0x6c0] ss:$8 sps:$4 sm:$0xff]  }
  0xc6   :  { %3987 = vmatprep.mubr.bf16.mxu1 %v5863_v7  ;;  %v5941_v7 = vld [vmem:[%s8595_s1 + $0x7c0] ss:$8 sps:$4 sm:$0xff]  }
  0xc7   :  { %4049 = vmatpush1.bf16.msra.mxu0 %v5848_v8  ;;  %v5948_v8 = vld [vmem:[%s8595_s1 + $0x6b4] ss:$8 sps:$4 sm:$0xff]  }
  0xc8   :  { %4150 = vmatpush1.bf16.msra.mxu1 %v5851_v9  ;;  %4050 = vmatprep.subr.bf16.mxu0 %v5859_v10  ;;  %v5951_v9 = vld [vmem:[%s8595_s1 + $0x7b4] ss:$8 sps:$4 sm:$0xff]   ;;  %v5008_v10 = vcombine.low %v175_v63, %v175_v63 }
  0xc9   :  { %4151 = vmatprep.subr.bf16.mxu1 %v5862_v11  ;;  %v5946_v11 = vld [vmem:[%s8595_s1 + $0x6b0] ss:$8 sps:$4 sm:$0xff]  }
  0xca   :  { %3887 = vmatmul.mubr.bf16.gmra.mxu0 %v5856_v12  ;;  %v5949_v12 = vld [vmem:[%s8595_s1 + $0x7b0] ss:$8 sps:$4 sm:$0xff]  }
  0xcb   :  { %3988 = vmatmul.mubr.bf16.gmra.mxu1 %v5865_v15  ;;  %4051 = vmatpush1.bf16.msra.mxu0 %v5857_v13  ;;  %v5010_v13 = vcombine.low %v176_v0, %v176_v0  ;;  %v5959_v15 = vld [vmem:[%s8595_s1 + $0x7a4] ss:$8 sps:$4 sm:$0xff]  }
  0xcc   :  { %4152 = vmatpush1.bf16.msra.mxu1 %v5860_v14  ;;  %4052 = vmatprep.subr.bf16.mxu0 %v5868_v16  ;;  %v5956_v14 = vld [vmem:[%s8595_s1 + $0x6a4] ss:$8 sps:$4 sm:$0xff]   ;;  %v5974_v16 = vld [vmem:[%s8596_s0 + $0x34] ss:$100 sps:$4 sm:$0xff]  }
  0xcd   :  { %4153 = vmatprep.subr.bf16.mxu1 %v5871_v17  ;;  %3896 = vmatprep.mubr.bf16.mxu0 %v5872_v18  ;;  %v5977_v17 = vld [vmem:[%s8596_s0 + $0x3c] ss:$100 sps:$4 sm:$0xff]   ;;  %v6004_v0 = vld [vmem:[%s8595_s1 + $0x844] ss:$8 sps:$4 sm:$0xff]  }
  0xce   :  { %3997 = vmatprep.mubr.bf16.mxu1 %v5881_v19  ;;  %v5954_v18 = vld [vmem:[%s8595_s1 + $0x6a0] ss:$8 sps:$4 sm:$0xff]  }
  0xcf   :  { %4053 = vmatpush1.bf16.msra.mxu0 %v5866_v20  ;;  %v5957_v19 = vld [vmem:[%s8595_s1 + $0x7a0] ss:$8 sps:$4 sm:$0xff]   ;;  %v5962_v20 = vld [vmem:[%s8595_s1 + $0x694] ss:$8 sps:$4 sm:$0xff]  }
  0xd0   :  { %4154 = vmatpush1.bf16.msra.mxu1 %v5869_v21  ;;  %4054 = vmatprep.subr.bf16.mxu0 %v5877_v22  ;;  %v586_v21 = vlaneseq  ;;  %v5965_v22 = vld [vmem:[%s8595_s1 + $0x794] ss:$8 sps:$4 sm:$0xff]  }
  0xd1   :  { %4155 = vmatprep.subr.bf16.mxu1 %v5880_v23  ;;  %v5960_v23 = vld [vmem:[%s8595_s1 + $0x690] ss:$8 sps:$4 sm:$0xff]  }
  0xd2   :  { %3897 = vmatmul.mubr.bf16.gmra.mxu0 %v5874_v24  ;;  %v5963_v24 = vld [vmem:[%s8595_s1 + $0x790] ss:$8 sps:$4 sm:$0xff]  }
  0xd3   :  { %3998 = vmatmul.mubr.bf16.gmra.mxu1 %v5883_v26  ;;  %4055 = vmatpush1.bf16.msra.mxu0 %v5875_v25  ;;  %v5968_v25 = vld [vmem:[%s8595_s1 + $0x684] ss:$8 sps:$4 sm:$0xff]   ;;  %v587_v26 = vshrl.u32 %v586_v21, 7 }
  0xd4   :  { %4156 = vmatpush1.bf16.msra.mxu1 %v5878_v27  ;;  %4056 = vmatprep.subr.bf16.mxu0 %v5886_v28  ;;  %v5971_v27 = vld [vmem:[%s8595_s1 + $0x784] ss:$8 sps:$4 sm:$0xff]   ;;  %v5966_v28 = vld [vmem:[%s8595_s1 + $0x680] ss:$8 sps:$4 sm:$0xff]  }
  0xd5   :  { %4157 = vmatprep.subr.bf16.mxu1 %v5889_v29  ;;  %3906 = vmatprep.mubr.bf16.mxu0 %v5890_v30  ;;  %v5969_v29 = vld [vmem:[%s8595_s1 + $0x780] ss:$8 sps:$4 sm:$0xff]  }
  0xd6   :  { %4007 = vmatprep.mubr.bf16.mxu1 %v5899_v31  ;;  %v584_v30 = vld [vmem:[%s8597_s2] sm:$0x3]  ;;  %v588_v31 = vsub.s32 0, %v587_v26 }
  0xd7   :  { %4057 = vmatpush1.bf16.msra.mxu0 %v5884_v32  ;;  %v5980_v32 = vld [vmem:[%s8595_s1 + $0x874] ss:$8 sps:$4 sm:$0xff]  }
  0xd8   :  { %4158 = vmatpush1.bf16.msra.mxu1 %v5887_v33  ;;  %4058 = vmatprep.subr.bf16.mxu0 %v5895_v35  ;;  %v5972_v33 = vld [vmem:[%s8596_s0 + $0x30] ss:$100 sps:$4 sm:$0xff]   ;;  %v5975_v35 = vld [vmem:[%s8596_s0 + $0x38] ss:$100 sps:$4 sm:$0xff]  }
  0xd9   :  { %4159 = vmatprep.subr.bf16.mxu1 %v5898_v36  ;;  %v592_v36 = vsub.s32 1, %v587_v26 }
  0xda   :  { %3907 = vmatmul.mubr.bf16.gmra.mxu0 %v5892_v34  ;;  %v5983_v34 = vld [vmem:[%s8595_s1 + $0x974] ss:$8 sps:$4 sm:$0xff]  }
  0xdb   :  { %4008 = vmatmul.mubr.bf16.gmra.mxu1 %v5901_v38  ;;  %4059 = vmatpush1.bf16.msra.mxu0 %v5893_v37  ;;  %v5978_v37 = vld [vmem:[%s8595_s1 + $0x870] ss:$8 sps:$4 sm:$0xff]  }
  0xdc   :  { %4160 = vmatpush1.bf16.msra.mxu1 %v5896_v39  ;;  %4060 = vmatprep.subr.bf16.mxu0 %v5904_v40  ;;  %v5981_v38 = vld [vmem:[%s8595_s1 + $0x970] ss:$8 sps:$4 sm:$0xff]   ;;  %v7365_v39 = vrot.slane %v584_v30, %v588_v31  ;;  %v5986_v40 = vld [vmem:[%s8595_s1 + $0x864] ss:$8 sps:$4 sm:$0xff]  }
  0xdd   :  { %4161 = vmatprep.subr.bf16.mxu1 %v5907_v41  ;;  %3916 = vmatprep.mubr.bf16.mxu0 %v5908_v42  ;;  %v5989_v41 = vld [vmem:[%s8595_s1 + $0x964] ss:$8 sps:$4 sm:$0xff]   ;;  %v5990_v42 = vld [vmem:[%s8596_s0 + $0xfc] ss:$100 sps:$4 sm:$0xff]  }
  0xde   :  { %4017 = vmatprep.mubr.bf16.mxu1 %v5917_v43  ;;  %v7376_v43 = vrot.slane %v584_v30, %v592_v36  ;;  %v6022_v30 = vld [vmem:[%s8595_s1 + $0x824] ss:$8 sps:$4 sm:$0xff]  }
  0xdf   :  { %4061 = vmatpush1.bf16.msra.mxu0 %v5902_v44  ;;  %v5999_v44 = vld [vmem:[%s8596_s0 + $0x104] ss:$100 sps:$4 sm:$0xff]  }
  0xe0   :  { %4162 = vmatpush1.bf16.msra.mxu1 %v5905_v45  ;;  %4062 = vmatprep.subr.bf16.mxu0 %v5913_v47  ;;  %v5984_v47 = vld [vmem:[%s8595_s1 + $0x860] ss:$8 sps:$4 sm:$0xff]   ;;  %v6025_v31 = vld [vmem:[%s8595_s1 + $0x924] ss:$8 sps:$4 sm:$0xff]  }
  0xe1   :  { %4163 = vmatprep.subr.bf16.mxu1 %v5916_v48 }
  0xe2   :  { %3917 = vmatmul.mubr.bf16.gmra.mxu0 %v5910_v46 }
  0xe3   :  { %4018 = vmatmul.mubr.bf16.gmra.mxu1 %v5919_v51  ;;  %4063 = vmatpush2.bf16.msra.mxu0 %v5911_v49  ;;  %v5987_v49 = vld [vmem:[%s8595_s1 + $0x960] ss:$8 sps:$4 sm:$0xff]  }
  0xe4   :  { %4164 = vmatpush2.bf16.msra.mxu1 %v5914_v50  ;;  %4064 = vmatprep.subr.bf16.mxu0 %v5922_v52  ;;  %v5995_v50 = vld [vmem:[%s8595_s1 + $0x854] ss:$8 sps:$4 sm:$0xff]  }
  0xe5   :  { %4165 = vmatprep.subr.bf16.mxu1 %v5925_v53  ;;  %3926 = vmatprep.mubr.bf16.mxu0 %v5926_v54  ;;  %v5992_v53 = vld [vmem:[%s8596_s0 + $0xf8] ss:$100 sps:$4 sm:$0xff]  }
  0xe6   :  { %4027 = vmatprep.mubr.bf16.mxu1 %v5935_v55  ;;  %v5998_v54 = vld [vmem:[%s8595_s1 + $0x954] ss:$8 sps:$4 sm:$0xff]  }
  0xe7   :  { %4065 = vmatpush2.bf16.msra.mxu0 %v5920_v56 }
  0xe8   :  { %4166 = vmatpush2.bf16.msra.mxu1 %v5923_v57  ;;  %4066 = vmatprep.subr.bf16.mxu0 %v5931_v58  ;;  %v5993_v57 = vld [vmem:[%s8595_s1 + $0x850] ss:$8 sps:$4 sm:$0xff]  }
  0xe9   :  { %4167 = vmatprep.subr.bf16.mxu1 %v5934_v60  ;;  %v5996_v60 = vld [vmem:[%s8595_s1 + $0x950] ss:$8 sps:$4 sm:$0xff]  }
  0xea   :  { %3927 = vmatmul.mubr.bf16.gmra.mxu0 %v5928_v59 }
  0xeb   :  { %4028 = vmatmul.mubr.bf16.gmra.mxu1 %v5937_v62  ;;  %4067 = vmatpush2.bf16.msra.mxu0 %v5929_v61  ;;  %v6001_v61 = vld [vmem:[%s8596_s0 + $0x100] ss:$100 sps:$4 sm:$0xff]  }
  0xec   :  { %4168 = vmatpush2.bf16.msra.mxu1 %v5932_v1  ;;  %4068 = vmatprep.subr.bf16.mxu0 %v5940_v2  ;;  %v6007_v1 = vld [vmem:[%s8595_s1 + $0x944] ss:$8 sps:$4 sm:$0xff]  }
  0xed   :  { %4169 = vmatprep.subr.bf16.mxu1 %v5943_v3  ;;  %3936 = vmatprep.mubr.bf16.mxu0 %v5009_v4  ;;  %v6008_v4 = vld [vmem:[%s8596_s0 + $0x1c4] ss:$100 sps:$4 sm:$0xff]  }
  0xee   :  { %4037 = vmatprep.mubr.bf16.mxu1 %v5011_v5 }
  0xef   :  { %4069 = vmatpush2.bf16.msra.mxu0 %v5938_v6 }
  0xf0   :  { %4170 = vmatpush2.bf16.msra.mxu1 %v5941_v7  ;;  %4070 = vmatprep.subr.bf16.mxu0 %v5948_v8  ;;  %v6017_v7 = vld [vmem:[%s8596_s0 + $0x1cc] ss:$100 sps:$4 sm:$0xff]  }
  0xf1   :  { %4171 = vmatprep.subr.bf16.mxu1 %v5951_v9  ;;  %v6002_v9 = vld [vmem:[%s8595_s1 + $0x840] ss:$8 sps:$4 sm:$0xff]  }
  0xf2   :  { %3937 = vmatmul.mubr.bf16.gmra.mxu0 %v5008_v10 }
  0xf3   :  { %4038 = vmatmul.mubr.bf16.gmra.mxu1 %v5010_v13  ;;  %4071 = vmatpush2.bf16.msra.mxu0 %v5946_v11  ;;  %v6005_v13 = vld [vmem:[%s8595_s1 + $0x940] ss:$8 sps:$4 sm:$0xff]  }
  0xf4   :  { %4172 = vmatpush2.bf16.msra.mxu1 %v5949_v12  ;;  %4072 = vmatprep.subr.bf16.mxu0 %v5956_v14  ;;  %v6013_v14 = vld [vmem:[%s8595_s1 + $0x834] ss:$8 sps:$4 sm:$0xff]  }
  0xf5   :  { %4173 = vmatprep.subr.bf16.mxu1 %v5959_v15  ;;  %4078 = vmatprep.mubr.bf16.mxu0 %v5974_v16 }
  0xf6   :  { %4179 = vmatprep.mubr.bf16.mxu1 %v5977_v17  ;;  %v6016_v17 = vld [vmem:[%s8595_s1 + $0x934] ss:$8 sps:$4 sm:$0xff]  }
  0xf7   :  { %4073 = vmatpush2.bf16.msra.mxu0 %v5954_v18 }
  0xf8   :  { %4174 = vmatpush2.bf16.msra.mxu1 %v5957_v19  ;;  %4074 = vmatprep.subr.bf16.mxu0 %v5962_v20  ;;  %v6010_v20 = vld [vmem:[%s8596_s0 + $0x1c0] ss:$100 sps:$4 sm:$0xff]  }
  0xf9   :  { %4175 = vmatprep.subr.bf16.mxu1 %v5965_v22  ;;  %v6011_v22 = vld [vmem:[%s8595_s1 + $0x830] ss:$8 sps:$4 sm:$0xff]  }
  0xfb   :  { %4075 = vmatpush2.bf16.msra.mxu0 %v5960_v23 }
  0xfc   :  { %4176 = vmatpush2.bf16.msra.mxu1 %v5963_v24  ;;  %4076 = vmatprep.subr.bf16.mxu0 %v5968_v25  ;;  %v6019_v24 = vld [vmem:[%s8596_s0 + $0x1c8] ss:$100 sps:$4 sm:$0xff]  }
  0xfd   :  { %4177 = vmatprep.subr.bf16.mxu1 %v5971_v27  ;;  %v6014_v27 = vld [vmem:[%s8595_s1 + $0x930] ss:$8 sps:$4 sm:$0xff]  }
  0xff   :  { %4077 = vmatpush2.bf16.msra.mxu0 %v5966_v28 }
 0x100   :  { %4178 = vmatpush2.bf16.msra.mxu1 %v5969_v29  ;;  %4248 = vmatprep.subr.bf16.mxu0 %v5980_v32 }
 0x101   :  { %4349 = vmatprep.subr.bf16.mxu1 %v5983_v34  ;;  %v6026_v34 = vld [vmem:[%s8596_s0 + $0x28c] ss:$100 sps:$4 sm:$0xff]  }
 0x102   :  { %v3474_v45 = vpop.f32.mrf.mxu0  ;;  %4079 = vmatmul.mubr.bf16.vlgmr.msra.gmra.mxu0 %v5972_v33 }
 0x103   :  { %4180 = vmatmul.mubr.bf16.vlgmr.msra.gmra.mxu1 %v5975_v35  ;;  %v3575_v46 = vpop.f32.mrf.mxu1  ;;  %v3475_v48 = vadd.f32 %v3474_v45, %v7365_v39  ;;  %4249 = vmatpush1.bf16.msra.mxu0 %v5978_v37  ;;  %v6035_v35 = vld [vmem:[%s8596_s0 + $0x294] ss:$100 sps:$4 sm:$0xff]   ;;  %v6020_v37 = vld [vmem:[%s8595_s1 + $0x820] ss:$8 sps:$4 sm:$0xff]  }
 0x104   :  { %4350 = vmatpush1.bf16.msra.mxu1 %v5981_v38  ;;  %v3476_v51 = vpop.f32.mrf.mxu0  ;;  %4250 = vmatprep.subr.bf16.mxu0 %v5986_v40 }
 0x105   :  { %v3577_v52 = vpop.f32.mrf.mxu1  ;;  %4351 = vmatprep.subr.bf16.mxu1 %v5989_v41  ;;  %v3477_v55 = vadd.f32 %v3476_v51, %v7376_v43  ;;  %v7398_v56 = vadd.f32 %v3575_v46, %v3475_v48  ;;  %4088 = vmatprep.mubr.bf16.mxu0 %v5990_v42  ;;  %v6023_v42 = vld [vmem:[%s8595_s1 + $0x920] ss:$8 sps:$4 sm:$0xff]   ;;  %v6031_v46 = vld [vmem:[%s8595_s1 + $0x814] ss:$8 sps:$4 sm:$0xff]   ;;  %v6029_v51 = vld [vmem:[%s8595_s1 + $0x810] ss:$8 sps:$4 sm:$0xff]  }
 0x106   :  { %4189 = vmatprep.mubr.bf16.mxu1 %v5999_v44  ;;  %v3478_v58 = vpop.f32.mrf.mxu0 }
 0x107   :  { %v3579_v59 = vpop.f32.mrf.mxu1  ;;  %v3479_v62 = vadd.f32 %v3478_v58, %v7365_v39  ;;  %v7410_v63 = vadd.f32 %v3577_v52, %v3477_v55  ;;  %4251 = vmatpush1.bf16.msra.mxu0 %v5984_v47  ;;  %v6034_v47 = vld [vmem:[%s8595_s1 + $0x914] ss:$8 sps:$4 sm:$0xff]   ;;  %v6032_v58 = vld [vmem:[%s8595_s1 + $0x910] ss:$8 sps:$4 sm:$0xff]  }
 0x108   :  { %4352 = vmatpush1.bf16.msra.mxu1 %v5987_v49  ;;  %v3480_v2 = vpop.f32.mrf.mxu0  ;;  %4252 = vmatprep.subr.bf16.mxu0 %v5995_v50  ;;  %v6028_v50 = vld [vmem:[%s8596_s0 + $0x288] ss:$100 sps:$4 sm:$0xff]  }
 0x109   :  { %v3581_v3 = vpop.f32.mrf.mxu1  ;;  %4353 = vmatprep.subr.bf16.mxu1 %v5998_v54  ;;  %v3481_v5 = vadd.f32 %v3480_v2, %v7376_v43  ;;  %v7422_v6 = vadd.f32 %v3579_v59, %v3479_v62  ;;  %v6037_v54 = vld [vmem:[%s8596_s0 + $0x290] ss:$100 sps:$4 sm:$0xff]   ;;  %v6043_v62 = vld [vmem:[%s8595_s1 + $0x904] ss:$8 sps:$4 sm:$0xff]  }
 0x10a   :  { %4089 = vmatmul.mubr.bf16.gmra.mxu0 %v5992_v53  ;;  %v3484_v8 = vpop.f32.mrf.mxu0  ;;  %v6044_v2 = vld [vmem:[%s8596_s0 + $0x354] ss:$100 sps:$4 sm:$0xff]  }
 0x10b   :  { %4190 = vmatmul.mubr.bf16.gmra.mxu1 %v6001_v61  ;;  %v3585_v10 = vpop.f32.mrf.mxu1  ;;  %v7430_v11 = vadd.f32 %v3581_v3, %v3481_v5  ;;  %4253 = vmatpush1.bf16.msra.mxu0 %v5993_v57  ;;  %v3485_v12 = vadd.f32 %v3484_v8, %v7365_v39  ;;  %v6040_v61 = vld [vmem:[%s8595_s1 + $0x804] ss:$8 sps:$4 sm:$0xff]   ;;  %v6053_v3 = vld [vmem:[%s8596_s0 + $0x35c] ss:$100 sps:$4 sm:$0xff]  }
 0x10c   :  { %4354 = vmatpush1.bf16.msra.mxu1 %v5996_v60  ;;  %4254 = vmatprep.subr.bf16.mxu0 %v6004_v0  ;;  %v3486_v15 = vpop.f32.mrf.mxu0  ;;  %v6038_v5 = vld [vmem:[%s8595_s1 + $0x800] ss:$8 sps:$4 sm:$0xff]  }
 0x10d   :  { %4355 = vmatprep.subr.bf16.mxu1 %v6007_v1  ;;  %v3587_v16 = vpop.f32.mrf.mxu1  ;;  %v3487_v18 = vadd.f32 %v3486_v15, %v7376_v43  ;;  %v7443_v19 = vadd.f32 %v3585_v10, %v3485_v12  ;;  %4098 = vmatprep.mubr.bf16.mxu0 %v6008_v4  ;;  %v6041_v10 = vld [vmem:[%s8595_s1 + $0x900] ss:$8 sps:$4 sm:$0xff]   ;;  %v6052_v15 = vld [vmem:[%s8595_s1 + $0x9f4] ss:$8 sps:$4 sm:$0xff]  }
 0x10e   :  { %4199 = vmatprep.mubr.bf16.mxu1 %v6017_v7  ;;  %v3488_v21 = vpop.f32.mrf.mxu0 }
 0x10f   :  { %v3589_v23 = vpop.f32.mrf.mxu1  ;;  %4255 = vmatpush1.bf16.msra.mxu0 %v6002_v9  ;;  %v3489_v25 = vadd.f32 %v3488_v21, %v7365_v39  ;;  %v7455_v26 = vadd.f32 %v3587_v16, %v3487_v18  ;;  %v6046_v18 = vld [vmem:[%s8596_s0 + $0x350] ss:$100 sps:$4 sm:$0xff]  }
 0x110   :  { %4356 = vmatpush1.bf16.msra.mxu1 %v6005_v13  ;;  %4256 = vmatprep.subr.bf16.mxu0 %v6013_v14  ;;  %v3490_v28 = vpop.f32.mrf.mxu0  ;;  %v6049_v14 = vld [vmem:[%s8595_s1 + $0x8f4] ss:$8 sps:$4 sm:$0xff]  }
 0x111   :  { %4357 = vmatprep.subr.bf16.mxu1 %v6016_v17  ;;  %v3591_v29 = vpop.f32.mrf.mxu1  ;;  %v3491_v32 = vadd.f32 %v3490_v28, %v7376_v43  ;;  %v7467_v33 = vadd.f32 %v3589_v23, %v3489_v25  ;;  %v6055_v23 = vld [vmem:[%s8596_s0 + $0x358] ss:$100 sps:$4 sm:$0xff]  }
 0x112   :  { %4099 = vmatmul.mubr.bf16.gmra.mxu0 %v6010_v20  ;;  %v3494_v36 = vpop.f32.mrf.mxu0  ;;  %v6047_v20 = vld [vmem:[%s8595_s1 + $0x8f0] ss:$8 sps:$4 sm:$0xff]  }
 0x113   :  { %4200 = vmatmul.mubr.bf16.gmra.mxu1 %v6019_v24  ;;  %v3595_v38 = vpop.f32.mrf.mxu1  ;;  %4257 = vmatpush1.bf16.msra.mxu0 %v6011_v22  ;;  %v3495_v40 = vadd.f32 %v3494_v36, %v7365_v39  ;;  %v7479_v41 = vadd.f32 %v3591_v29, %v3491_v32  ;;  %v6071_v36 = vld [vmem:[%s8596_s0 + $0x424] ss:$100 sps:$4 sm:$0xff]  }
 0x114   :  { %4358 = vmatpush1.bf16.msra.mxu1 %v6014_v27  ;;  %4258 = vmatprep.subr.bf16.mxu0 %v6022_v30  ;;  %v3496_v44 = vpop.f32.mrf.mxu0  ;;  %v6050_v27 = vld [vmem:[%s8595_s1 + $0x9f0] ss:$8 sps:$4 sm:$0xff]   ;;  %v6058_v30 = vld [vmem:[%s8595_s1 + $0x8e4] ss:$8 sps:$4 sm:$0xff]  }
 0x115   :  { %4359 = vmatprep.subr.bf16.mxu1 %v6025_v31  ;;  %v3597_v45 = vpop.f32.mrf.mxu1  ;;  %v3497_v48 = vadd.f32 %v3496_v44, %v7376_v43  ;;  %v7491_v49 = vadd.f32 %v3595_v38, %v3495_v40  ;;  %4108 = vmatprep.mubr.bf16.mxu0 %v6026_v34  ;;  %v6061_v31 = vld [vmem:[%s8595_s1 + $0x9e4] ss:$8 sps:$4 sm:$0xff]   ;;  %v6056_v38 = vld [vmem:[%s8595_s1 + $0x8e0] ss:$8 sps:$4 sm:$0xff]  }
 0x116   :  { %4209 = vmatprep.mubr.bf16.mxu1 %v6035_v35  ;;  %v3498_v52 = vpop.f32.mrf.mxu0  ;;  %v6062_v35 = vld [vmem:[%s8596_s0 + $0x41c] ss:$100 sps:$4 sm:$0xff]  }
 0x117   :  { %v3599_v53 = vpop.f32.mrf.mxu1  ;;  %4259 = vmatpush1.bf16.msra.mxu0 %v6020_v37  ;;  %v3499_v55 = vadd.f32 %v3498_v52, %v7365_v39  ;;  %v7503_v57 = vadd.f32 %v3597_v45, %v3497_v48  ;;  %v6059_v45 = vld [vmem:[%s8595_s1 + $0x9e0] ss:$8 sps:$4 sm:$0xff]   ;;  %v6064_v48 = vld [vmem:[%s8596_s0 + $0x418] ss:$100 sps:$4 sm:$0xff]  }
 0x118   :  { %4360 = vmatpush1.bf16.msra.mxu1 %v6023_v42  ;;  %4260 = vmatprep.subr.bf16.mxu0 %v6031_v46  ;;  %v3500_v59 = vpop.f32.mrf.mxu0 }
 0x119   :  { %4361 = vmatprep.subr.bf16.mxu1 %v6034_v47  ;;  %v3601_v60 = vpop.f32.mrf.mxu1  ;;  %v3501_v0 = vadd.f32 %v3500_v59, %v7376_v43  ;;  %v7515_v1 = vadd.f32 %v3599_v53, %v3499_v55  ;;  %v6073_v55 = vld [vmem:[%s8596_s0 + $0x420] ss:$100 sps:$4 sm:$0xff]  }
 0x11a   :  { %4109 = vmatmul.mubr.bf16.gmra.mxu0 %v6028_v50  ;;  %v3504_v4 = vpop.f32.mrf.mxu0  ;;  %v6067_v50 = vld [vmem:[%s8595_s1 + $0x8d4] ss:$8 sps:$4 sm:$0xff]  }
 0x11b   :  { %4210 = vmatmul.mubr.bf16.gmra.mxu1 %v6037_v54  ;;  %v3605_v7 = vpop.f32.mrf.mxu1  ;;  %4261 = vmatpush1.bf16.msra.mxu0 %v6029_v51  ;;  %v3505_v8 = vadd.f32 %v3504_v4, %v7365_v39  ;;  %v7527_v9 = vadd.f32 %v3601_v60, %v3501_v0  ;;  %v6070_v51 = vld [vmem:[%s8595_s1 + $0x9d4] ss:$8 sps:$4 sm:$0xff]   ;;  %v6065_v54 = vld [vmem:[%s8595_s1 + $0x8d0] ss:$8 sps:$4 sm:$0xff]  }
 0x11c   :  { %4362 = vmatpush1.bf16.msra.mxu1 %v6032_v58  ;;  %4262 = vmatprep.subr.bf16.mxu0 %v6040_v61  ;;  %v3506_v12 = vpop.f32.mrf.mxu0  ;;  %v177_v58 = vld [vmem:[%s8596_s0 + $0x4e0] sm:$0x11]  ;;  %v178_v61 = vld [vmem:[%s8596_s0 + $0x4e8] sm:$0x11] }
 0x11d   :  { %4363 = vmatprep.subr.bf16.mxu1 %v6043_v62  ;;  %v3607_v13 = vpop.f32.mrf.mxu1  ;;  %v3507_v16 = vadd.f32 %v3506_v12, %v7376_v43  ;;  %v7539_v17 = vadd.f32 %v3605_v7, %v3505_v8  ;;  %4118 = vmatprep.mubr.bf16.mxu0 %v6044_v2  ;;  %v6068_v2 = vld [vmem:[%s8595_s1 + $0x9d0] ss:$8 sps:$4 sm:$0xff]   ;;  %v6079_v7 = vld [vmem:[%s8595_s1 + $0x9c4] ss:$8 sps:$4 sm:$0xff]   ;;  %v5013_v12 = vcombine.high %v177_v58, %v177_v58 }
 0x11e   :  { %4219 = vmatprep.mubr.bf16.mxu1 %v6053_v3  ;;  %v3508_v21 = vpop.f32.mrf.mxu0 }
 0x11f   :  { %v3609_v22 = vpop.f32.mrf.mxu1  ;;  %4263 = vmatpush1.bf16.msra.mxu0 %v6038_v5  ;;  %v3509_v24 = vadd.f32 %v3508_v21, %v7365_v39  ;;  %v7551_v25 = vadd.f32 %v3607_v13, %v3507_v16  ;;  %v6076_v5 = vld [vmem:[%s8595_s1 + $0x8c4] ss:$8 sps:$4 sm:$0xff]   ;;  %v5015_v13 = vcombine.high %v178_v61, %v178_v61  ;;  %v6077_v21 = vld [vmem:[%s8595_s1 + $0x9c0] ss:$8 sps:$4 sm:$0xff]  }
 0x120   :  { %4364 = vmatpush1.bf16.msra.mxu1 %v6041_v10  ;;  %4264 = vmatprep.subr.bf16.mxu0 %v6049_v14  ;;  %v3510_v28 = vpop.f32.mrf.mxu0 }
 0x121   :  { %4365 = vmatprep.subr.bf16.mxu1 %v6052_v15  ;;  %v3611_v29 = vpop.f32.mrf.mxu1  ;;  %v3511_v32 = vadd.f32 %v3510_v28, %v7376_v43  ;;  %v7563_v34 = vadd.f32 %v3609_v22, %v3509_v24  ;;  %v6074_v15 = vld [vmem:[%s8595_s1 + $0x8c0] ss:$8 sps:$4 sm:$0xff]   ;;  %v6084_v24 = vld [vmem:[%s8595_s1 + $0x8b4] ss:$8 sps:$4 sm:$0xff]  }
 0x122   :  { %4119 = vmatmul.mubr.bf16.gmra.mxu0 %v6046_v18  ;;  %v3514_v37 = vpop.f32.mrf.mxu0 }
 0x123   :  { %4220 = vmatmul.mubr.bf16.gmra.mxu1 %v6055_v23  ;;  %v3615_v40 = vpop.f32.mrf.mxu1  ;;  %4265 = vmatpush2.bf16.msra.mxu0 %v6047_v20  ;;  %v3515_v42 = vadd.f32 %v3514_v37, %v7365_v39  ;;  %v7575_v44 = vadd.f32 %v3611_v29, %v3511_v32  ;;  %v6082_v32 = vld [vmem:[%s8595_s1 + $0x8b0] ss:$8 sps:$4 sm:$0xff]  }
 0x124   :  { %4366 = vmatpush2.bf16.msra.mxu1 %v6050_v27  ;;  %4266 = vmatprep.subr.bf16.mxu0 %v6058_v30  ;;  %v3516_v46 = vpop.f32.mrf.mxu0  ;;  %v6087_v27 = vld [vmem:[%s8595_s1 + $0x9b4] ss:$8 sps:$4 sm:$0xff]  }
 0x125   :  { %4367 = vmatprep.subr.bf16.mxu1 %v6061_v31  ;;  %v3617_v47 = vpop.f32.mrf.mxu1  ;;  %v3517_v52 = vadd.f32 %v3516_v46, %v7376_v43  ;;  %v7590_v53 = vadd.f32 %v3615_v40, %v3515_v42  ;;  %4128 = vmatprep.mubr.bf16.mxu0 %v6062_v35  ;;  %v5012_v31 = vcombine.low %v177_v58, %v177_v58  ;;  %v6085_v40 = vld [vmem:[%s8595_s1 + $0x9b0] ss:$8 sps:$4 sm:$0xff]   ;;  %v6092_v46 = vld [vmem:[%s8595_s1 + $0x8a4] ss:$8 sps:$4 sm:$0xff]  }
 0x126   :  { %4229 = vmatprep.mubr.bf16.mxu1 %v6071_v36  ;;  %v3518_v59 = vpop.f32.mrf.mxu0  ;;  %v5014_v36 = vcombine.low %v178_v61, %v178_v61  ;;  %v6093_v61 = vld [vmem:[%s8595_s1 + $0x9a0] ss:$8 sps:$4 sm:$0xff]  }
 0x127   :  { %v3619_v60 = vpop.f32.mrf.mxu1  ;;  %4267 = vmatpush2.bf16.msra.mxu0 %v6056_v38  ;;  %v3519_v62 = vadd.f32 %v3518_v59, %v7365_v39  ;;  %v7605_v0 = vadd.f32 %v3617_v47, %v3517_v52  ;;  %v6095_v47 = vld [vmem:[%s8595_s1 + $0x9a4] ss:$8 sps:$4 sm:$0xff]  }
 0x128   :  { %4368 = vmatpush2.bf16.msra.mxu1 %v6059_v45  ;;  %4268 = vmatprep.subr.bf16.mxu0 %v6067_v50  ;;  %v3520_v3 = vpop.f32.mrf.mxu0  ;;  %v6113_v52 = vld [vmem:[%s8596_s0 + $0x4c] ss:$100 sps:$4 sm:$0xff]  }
 0x129   :  { %4369 = vmatprep.subr.bf16.mxu1 %v6070_v51  ;;  %v3621_v4 = vpop.f32.mrf.mxu1  ;;  %v3521_v8 = vadd.f32 %v3520_v3, %v7376_v43  ;;  %v7617_v10 = vadd.f32 %v3619_v60, %v3519_v62  ;;  %v6110_v51 = vld [vmem:[%s8596_s0 + $0x44] ss:$100 sps:$4 sm:$0xff]   ;;  %v6101_v3 = vld [vmem:[%s8595_s1 + $0x994] ss:$8 sps:$4 sm:$0xff]  }
 0x12a   :  { %4129 = vmatmul.mubr.bf16.gmra.mxu0 %v6064_v48  ;;  %v3524_v14 = vpop.f32.mrf.mxu0 }
 0x12b   :  { %4230 = vmatmul.mubr.bf16.gmra.mxu1 %v6073_v55  ;;  %v3625_v16 = vpop.f32.mrf.mxu1  ;;  %4269 = vmatpush2.bf16.msra.mxu0 %v6065_v54  ;;  %v3525_v18 = vadd.f32 %v3524_v14, %v7365_v39  ;;  %v7623_v20 = vadd.f32 %v3621_v4, %v3521_v8  ;;  %v6090_v55 = vld [vmem:[%s8595_s1 + $0x8a0] ss:$8 sps:$4 sm:$0xff]   ;;  %v6096_v8 = vld [vmem:[%s8595_s1 + $0x890] ss:$8 sps:$4 sm:$0xff]  }
 0x12c   :  { %4370 = vmatpush2.bf16.msra.mxu1 %v6068_v2  ;;  %4270 = vmatprep.subr.bf16.mxu0 %v6076_v5  ;;  %v3526_v22 = vpop.f32.mrf.mxu0  ;;  %v6098_v2 = vld [vmem:[%s8595_s1 + $0x894] ss:$8 sps:$4 sm:$0xff]  }
 0x12d   :  { %4371 = vmatprep.subr.bf16.mxu1 %v6079_v7  ;;  %v3627_v23 = vpop.f32.mrf.mxu1  ;;  %v3527_v28 = vadd.f32 %v3526_v22, %v7376_v43  ;;  %v7635_v29 = vadd.f32 %v3625_v16, %v3525_v18  ;;  %4138 = vmatprep.mubr.bf16.mxu0 %v5013_v12  ;;  %v6107_v16 = vld [vmem:[%s8595_s1 + $0x984] ss:$8 sps:$4 sm:$0xff]   ;;  %v6105_v22 = vld [vmem:[%s8595_s1 + $0x980] ss:$8 sps:$4 sm:$0xff]  }
 0x12e   :  { %4239 = vmatprep.mubr.bf16.mxu1 %v5015_v13  ;;  %v3528_v30 = vpop.f32.mrf.mxu0  ;;  %v6099_v13 = vld [vmem:[%s8595_s1 + $0x990] ss:$8 sps:$4 sm:$0xff]  }
 0x12f   :  { %v3629_v35 = vpop.f32.mrf.mxu1  ;;  %4271 = vmatpush2.bf16.msra.mxu0 %v6074_v15  ;;  %v3529_v37 = vadd.f32 %v3528_v30, %v7365_v39  ;;  %v7641_v38 = vadd.f32 %v3627_v23, %v3527_v28  ;;  %v6104_v15 = vld [vmem:[%s8595_s1 + $0x884] ss:$8 sps:$4 sm:$0xff]   ;;  %v6116_v23 = vld [vmem:[%s8595_s1 + $0xa74] ss:$8 sps:$4 sm:$0xff]   ;;  %v6114_v30 = vld [vmem:[%s8595_s1 + $0xa70] ss:$8 sps:$4 sm:$0xff]  }
 0x130   :  { %4372 = vmatpush2.bf16.msra.mxu1 %v6077_v21  ;;  %4272 = vmatprep.subr.bf16.mxu0 %v6084_v24  ;;  %v3530_v42 = vpop.f32.mrf.mxu0  ;;  %v6102_v21 = vld [vmem:[%s8595_s1 + $0x880] ss:$8 sps:$4 sm:$0xff]   ;;  %v6119_v24 = vld [vmem:[%s8595_s1 + $0xb74] ss:$8 sps:$4 sm:$0xff]  }
 0x131   :  { %4373 = vmatprep.subr.bf16.mxu1 %v6087_v27  ;;  %v3631_v45 = vpop.f32.mrf.mxu1  ;;  %v3531_v48 = vadd.f32 %v3530_v42, %v7376_v43  ;;  %v7653_v50 = vadd.f32 %v3629_v35, %v3529_v37  ;;  %v6108_v27 = vld [vmem:[%s8596_s0 + $0x40] ss:$100 sps:$4 sm:$0xff]   ;;  %v6111_v28 = vld [vmem:[%s8596_s0 + $0x48] ss:$100 sps:$4 sm:$0xff]   ;;  %v6137_v37 = vld [vmem:[%s8596_s0 + $0x114] ss:$100 sps:$4 sm:$0xff]  }
 0x132   :  { %4139 = vmatmul.mubr.bf16.gmra.mxu0 %v5012_v31  ;;  %v3534_v54 = vpop.f32.mrf.mxu0  ;;  %v6117_v31 = vld [vmem:[%s8595_s1 + $0xb70] ss:$8 sps:$4 sm:$0xff]   ;;  %v6125_v35 = vld [vmem:[%s8595_s1 + $0xb64] ss:$8 sps:$4 sm:$0xff]  }
 0x133   :  { %4240 = vmatmul.mubr.bf16.gmra.mxu1 %v5014_v36  ;;  %v3635_v58 = vpop.f32.mrf.mxu1  ;;  %4273 = vmatpush2.bf16.msra.mxu0 %v6082_v32  ;;  %v3535_v59 = vadd.f32 %v3534_v54, %v7365_v39  ;;  %v7665_v60 = vadd.f32 %v3631_v45, %v3531_v48  ;;  %v6122_v32 = vld [vmem:[%s8595_s1 + $0xa64] ss:$8 sps:$4 sm:$0xff]   ;;  %v6120_v45 = vld [vmem:[%s8595_s1 + $0xa60] ss:$8 sps:$4 sm:$0xff]   ;;  %v6134_v54 = vld [vmem:[%s8595_s1 + $0xb54] ss:$8 sps:$4 sm:$0xff]  }
 0x134   :  { %4374 = vmatpush2.bf16.msra.mxu1 %v6085_v40  ;;  %4274 = vmatprep.subr.bf16.mxu0 %v6092_v46  ;;  %v3536_v62 = vpop.f32.mrf.mxu0  ;;  %v6128_v36 = vld [vmem:[%s8596_s0 + $0x10c] ss:$100 sps:$4 sm:$0xff]  }
 0x135   :  { %4375 = vmatprep.subr.bf16.mxu1 %v6095_v47  ;;  %v3637_v4 = vpop.f32.mrf.mxu1  ;;  %v3537_v39 = vadd.f32 %v3536_v62, %v7376_v43  ;;  %v7677_v5 = vadd.f32 %v3635_v58, %v3535_v59  ;;  %4280 = vmatprep.mubr.bf16.mxu0 %v6110_v51  ;;  %v6123_v47 = vld [vmem:[%s8595_s1 + $0xb60] ss:$8 sps:$4 sm:$0xff]   ;;  %v6129_v59 = vld [vmem:[%s8595_s1 + $0xa50] ss:$8 sps:$4 sm:$0xff]  }
 0x136   :  { %4381 = vmatprep.mubr.bf16.mxu1 %v6113_v52  ;;  %v3538_v7 = vpop.f32.mrf.mxu0  ;;  %v6131_v52 = vld [vmem:[%s8595_s1 + $0xa54] ss:$8 sps:$4 sm:$0xff]   ;;  %v6126_v58 = vld [vmem:[%s8596_s0 + $0x108] ss:$100 sps:$4 sm:$0xff]  }
 0x137   :  { %v3639_v12 = vpop.f32.mrf.mxu1  ;;  %4275 = vmatpush2.bf16.msra.mxu0 %v6090_v55  ;;  %v7685_v14 = vadd.f32 %v3637_v4, %v3537_v39  ;;  %v6132_v4 = vld [vmem:[%s8595_s1 + $0xb50] ss:$8 sps:$4 sm:$0xff]   ;;  %v6140_v39 = vld [vmem:[%s8595_s1 + $0xa44] ss:$8 sps:$4 sm:$0xff]  }
 0x138   :  { %4376 = vmatpush2.bf16.msra.mxu1 %v6093_v61  ;;  %4276 = vmatprep.subr.bf16.mxu0 %v6098_v2  ;;  %v3539_v43 = vpop.f32.mrf.mxu0  ;;  %v6135_v2 = vld [vmem:[%s8596_s0 + $0x110] ss:$100 sps:$4 sm:$0xff]  }
 0x139   :  { %4377 = vmatprep.subr.bf16.mxu1 %v6101_v3  ;;  %v3640_v18 = vpop.f32.mrf.mxu1  ;;  %v6146_v12 = vld [vmem:[%s8596_s0 + $0x1d4] ss:$100 sps:$4 sm:$0xff]  }
 0x13b   :  { %4277 = vmatpush2.bf16.msra.mxu0 %v6096_v8 }
 0x13c   :  { %4378 = vmatpush2.bf16.msra.mxu1 %v6099_v13  ;;  %4278 = vmatprep.subr.bf16.mxu0 %v6104_v15  ;;  %v6155_v15 = vld [vmem:[%s8596_s0 + $0x1dc] ss:$100 sps:$4 sm:$0xff]  }
 0x13d   :  { %4379 = vmatprep.subr.bf16.mxu1 %v6107_v16 }
 0x13f   :  { %4279 = vmatpush2.bf16.msra.mxu0 %v6102_v21  ;;  %v6138_v21 = vld [vmem:[%s8595_s1 + $0xa40] ss:$8 sps:$4 sm:$0xff]  }
 0x140   :  { %4380 = vmatpush2.bf16.msra.mxu1 %v6105_v22  ;;  %4450 = vmatprep.subr.bf16.mxu0 %v6116_v23 }
 0x141   :  { %4551 = vmatprep.subr.bf16.mxu1 %v6119_v24  ;;  %v6149_v24 = vld [vmem:[%s8595_s1 + $0xa34] ss:$8 sps:$4 sm:$0xff]  }
 0x142   :  { %v3676_v40 = vpop.f32.mrf.mxu0  ;;  %4281 = vmatmul.mubr.bf16.vlgmr.msra.gmra.mxu0 %v6108_v27 }
 0x143   :  { %4382 = vmatmul.mubr.bf16.vlgmr.msra.gmra.mxu1 %v6111_v28  ;;  %v3777_v42 = vpop.f32.mrf.mxu1  ;;  %v3677_v46 = vadd.f32 %v3676_v40, %v7398_v56  ;;  %4451 = vmatpush1.bf16.msra.mxu0 %v6114_v30  ;;  %v6152_v30 = vld [vmem:[%s8595_s1 + $0xb34] ss:$8 sps:$4 sm:$0xff]   ;;  %v6150_v40 = vld [vmem:[%s8595_s1 + $0xb30] ss:$8 sps:$4 sm:$0xff]  }
 0x144   :  { %4552 = vmatpush1.bf16.msra.mxu1 %v6117_v31  ;;  %v3678_v48 = vpop.f32.mrf.mxu0  ;;  %4452 = vmatprep.subr.bf16.mxu0 %v6122_v32 }
 0x145   :  { %v3779_v51 = vpop.f32.mrf.mxu1  ;;  %4553 = vmatprep.subr.bf16.mxu1 %v6125_v35  ;;  %v3679_v56 = vadd.f32 %v3678_v48, %v7410_v63  ;;  %v7743_v55 = vadd.f32 %v3777_v42, %v3677_v46  ;;  %4290 = vmatprep.mubr.bf16.mxu0 %v6128_v36  ;;  %v6147_v35 = vld [vmem:[%s8595_s1 + $0xa30] ss:$8 sps:$4 sm:$0xff]   ;;  %v6158_v46 = vld [vmem:[%s8595_s1 + $0xa24] ss:$8 sps:$4 sm:$0xff]  }
 0x146   :  { %4391 = vmatprep.mubr.bf16.mxu1 %v6137_v37  ;;  %v3680_v61 = vpop.f32.mrf.mxu0  ;;  %v6153_v42 = vld [vmem:[%s8596_s0 + $0x1d8] ss:$100 sps:$4 sm:$0xff]  }
 0x147   :  { %v3781_v62 = vpop.f32.mrf.mxu1  ;;  %v3681_v63 = vadd.f32 %v3680_v61, %v7422_v6  ;;  %v7755_v3 = vadd.f32 %v3779_v51, %v3679_v56  ;;  %4453 = vmatpush1.bf16.msra.mxu0 %v6120_v45  ;;  %v6143_v6 = vld [vmem:[%s8595_s1 + $0xb44] ss:$8 sps:$4 sm:$0xff]   ;;  %v6156_v61 = vld [vmem:[%s8595_s1 + $0xa20] ss:$8 sps:$4 sm:$0xff]  }
 0x148   :  { %4554 = vmatpush1.bf16.msra.mxu1 %v6123_v47  ;;  %v3682_v7 = vpop.f32.mrf.mxu0  ;;  %4454 = vmatprep.subr.bf16.mxu0 %v6131_v52  ;;  %v6161_v47 = vld [vmem:[%s8595_s1 + $0xb24] ss:$8 sps:$4 sm:$0xff]  }
 0x149   :  { %v3783_v8 = vpop.f32.mrf.mxu1  ;;  %4555 = vmatprep.subr.bf16.mxu1 %v6134_v54  ;;  %v3683_v13 = vadd.f32 %v3682_v7, %v7430_v11  ;;  %v7770_v43 = vadd.f32 %v3781_v62, %v3681_v63  ;;  %v6141_v11 = vld [vmem:[%s8595_s1 + $0xb40] ss:$8 sps:$4 sm:$0xff]   ;;  %v6167_v63 = vld [vmem:[%s8595_s1 + $0xa14] ss:$8 sps:$4 sm:$0xff]  }
 0x14a   :  { %v3686_v16 = vpop.f32.mrf.mxu0  ;;  %4291 = vmatmul.mubr.bf16.gmra.mxu0 %v6126_v58  ;;  %v6173_v56 = vld [vmem:[%s8596_s0 + $0x2a4] ss:$100 sps:$4 sm:$0xff]   ;;  %v6170_v7 = vld [vmem:[%s8595_s1 + $0xb14] ss:$8 sps:$4 sm:$0xff]  }
 0x14b   :  { %v3787_v18 = vpop.f32.mrf.mxu1  ;;  %4392 = vmatmul.mubr.bf16.gmra.mxu1 %v6135_v2  ;;  %v3687_v22 = vadd.f32 %v3686_v16, %v7443_v19  ;;  %v7779_v23 = vadd.f32 %v3783_v8, %v3683_v13  ;;  %4455 = vmatpush1.bf16.msra.mxu0 %v6129_v59  ;;  %v6144_v19 = vld [vmem:[%s8596_s0 + $0x1d0] ss:$100 sps:$4 sm:$0xff]  }
 0x14c   :  { %4556 = vmatpush1.bf16.msra.mxu1 %v6132_v4  ;;  %v3688_v27 = vpop.f32.mrf.mxu0  ;;  %4456 = vmatprep.subr.bf16.mxu0 %v6140_v39  ;;  %v6168_v16 = vld [vmem:[%s8595_s1 + $0xb10] ss:$8 sps:$4 sm:$0xff]  }
 0x14d   :  { %v3789_v28 = vpop.f32.mrf.mxu1  ;;  %4557 = vmatprep.subr.bf16.mxu1 %v6143_v6  ;;  %v3689_v31 = vadd.f32 %v3688_v27, %v7455_v26  ;;  %v7794_v32 = vadd.f32 %v3787_v18, %v3687_v22  ;;  %4300 = vmatprep.mubr.bf16.mxu0 %v6146_v12  ;;  %v6165_v12 = vld [vmem:[%s8595_s1 + $0xa10] ss:$8 sps:$4 sm:$0xff]   ;;  %v6171_v18 = vld [vmem:[%s8596_s0 + $0x2a0] ss:$100 sps:$4 sm:$0xff]  }
 0x14e   :  { %4401 = vmatprep.mubr.bf16.mxu1 %v6155_v15  ;;  %v3690_v36 = vpop.f32.mrf.mxu0  ;;  %v6176_v22 = vld [vmem:[%s8595_s1 + $0xa04] ss:$8 sps:$4 sm:$0xff]  }
 0x14f   :  { %v3791_v37 = vpop.f32.mrf.mxu1  ;;  %v3691_v26 = vadd.f32 %v3690_v36, %v7467_v33  ;;  %v7806_v45 = vadd.f32 %v3789_v28, %v3689_v31  ;;  %4457 = vmatpush1.bf16.msra.mxu0 %v6138_v21  ;;  %v6164_v33 = vld [vmem:[%s8596_s0 + $0x29c] ss:$100 sps:$4 sm:$0xff]  }
 0x150   :  { %4558 = vmatpush1.bf16.msra.mxu1 %v6141_v11  ;;  %v3692_v48 = vpop.f32.mrf.mxu0  ;;  %4458 = vmatprep.subr.bf16.mxu0 %v6149_v24  ;;  %v6179_v11 = vld [vmem:[%s8595_s1 + $0xb04] ss:$8 sps:$4 sm:$0xff]   ;;  %v6174_v36 = vld [vmem:[%s8595_s1 + $0xa00] ss:$8 sps:$4 sm:$0xff]  }
 0x151   :  { %v3793_v51 = vpop.f32.mrf.mxu1  ;;  %4559 = vmatprep.subr.bf16.mxu1 %v6152_v30  ;;  %v3693_v52 = vadd.f32 %v3692_v48, %v7479_v41  ;;  %v7818_v54 = vadd.f32 %v3791_v37, %v3691_v26  ;;  %v6159_v41 = vld [vmem:[%s8595_s1 + $0xb20] ss:$8 sps:$4 sm:$0xff]   ;;  %v6191_v30 = vld [vmem:[%s8596_s0 + $0x36c] ss:$100 sps:$4 sm:$0xff]  }
 0x152   :  { %v3696_v58 = vpop.f32.mrf.mxu0  ;;  %4301 = vmatmul.mubr.bf16.gmra.mxu0 %v6144_v19 }
 0x153   :  { %v3797_v59 = vpop.f32.mrf.mxu1  ;;  %4402 = vmatmul.mubr.bf16.gmra.mxu1 %v6153_v42  ;;  %v3697_v62 = vadd.f32 %v3696_v58, %v7491_v49  ;;  %v7827_v2 = vadd.f32 %v3793_v51, %v3693_v52  ;;  %4459 = vmatpush1.bf16.msra.mxu0 %v6147_v35  ;;  %v6162_v49 = vld [vmem:[%s8596_s0 + $0x298] ss:$100 sps:$4 sm:$0xff]  }
 0x154   :  { %4560 = vmatpush1.bf16.msra.mxu1 %v6150_v40  ;;  %v3698_v4 = vpop.f32.mrf.mxu0  ;;  %4460 = vmatprep.subr.bf16.mxu0 %v6158_v46  ;;  %v6185_v42 = vld [vmem:[%s8595_s1 + $0xaf4] ss:$8 sps:$4 sm:$0xff]   ;;  %v6186_v58 = vld [vmem:[%s8595_s1 + $0xbf0] ss:$8 sps:$4 sm:$0xff]  }
 0x155   :  { %v3799_v39 = vpop.f32.mrf.mxu1  ;;  %4561 = vmatprep.subr.bf16.mxu1 %v6161_v47  ;;  %v3699_v8 = vadd.f32 %v3698_v4, %v7503_v57  ;;  %v7842_v6 = vadd.f32 %v3797_v59, %v3697_v62  ;;  %4310 = vmatprep.mubr.bf16.mxu0 %v6164_v33  ;;  %v6188_v47 = vld [vmem:[%s8595_s1 + $0xbf4] ss:$8 sps:$4 sm:$0xff]   ;;  %v6183_v33 = vld [vmem:[%s8595_s1 + $0xaf0] ss:$8 sps:$4 sm:$0xff]   ;;  %v6189_v59 = vld [vmem:[%s8596_s0 + $0x368] ss:$100 sps:$4 sm:$0xff]  }
 0x156   :  { %4411 = vmatprep.mubr.bf16.mxu1 %v6173_v56  ;;  %v3700_v13 = vpop.f32.mrf.mxu0  ;;  %v6194_v62 = vld [vmem:[%s8595_s1 + $0xae4] ss:$8 sps:$4 sm:$0xff]  }
 0x157   :  { %v3801_v15 = vpop.f32.mrf.mxu1  ;;  %v3701_v57 = vadd.f32 %v3700_v13, %v7515_v1  ;;  %v7854_v21 = vadd.f32 %v3799_v39, %v3699_v8  ;;  %4461 = vmatpush1.bf16.msra.mxu0 %v6156_v61  ;;  %v6182_v1 = vld [vmem:[%s8596_s0 + $0x364] ss:$100 sps:$4 sm:$0xff]  }
 0x158   :  { %4562 = vmatpush1.bf16.msra.mxu1 %v6159_v41  ;;  %v3702_v24 = vpop.f32.mrf.mxu0  ;;  %4462 = vmatprep.subr.bf16.mxu0 %v6167_v63  ;;  %v6197_v41 = vld [vmem:[%s8595_s1 + $0xbe4] ss:$8 sps:$4 sm:$0xff]   ;;  %v6192_v13 = vld [vmem:[%s8595_s1 + $0xae0] ss:$8 sps:$4 sm:$0xff]  }
 0x159   :  { %v3803_v27 = vpop.f32.mrf.mxu1  ;;  %4563 = vmatprep.subr.bf16.mxu1 %v6170_v7  ;;  %v3703_v28 = vadd.f32 %v3702_v24, %v7527_v9  ;;  %v7866_v19 = vadd.f32 %v3801_v15, %v3701_v57  ;;  %v6177_v9 = vld [vmem:[%s8595_s1 + $0xb00] ss:$8 sps:$4 sm:$0xff]   ;;  %v6209_v7 = vld [vmem:[%s8596_s0 + $0x434] ss:$100 sps:$4 sm:$0xff]  }
 0x15a   :  { %v3706_v31 = vpop.f32.mrf.mxu0  ;;  %4311 = vmatmul.mubr.bf16.gmra.mxu0 %v6162_v49 }
 0x15b   :  { %v3807_v35 = vpop.f32.mrf.mxu1  ;;  %4412 = vmatmul.mubr.bf16.gmra.mxu1 %v6171_v18  ;;  %v3707_v37 = vadd.f32 %v3706_v31, %v7539_v17  ;;  %v7875_v40 = vadd.f32 %v3803_v27, %v3703_v28  ;;  %4463 = vmatpush1.bf16.msra.mxu0 %v6165_v12  ;;  %v6180_v17 = vld [vmem:[%s8596_s0 + $0x360] ss:$100 sps:$4 sm:$0xff]   ;;  %v6203_v18 = vld [vmem:[%s8595_s1 + $0xad4] ss:$8 sps:$4 sm:$0xff]  }
 0x15c   :  { %4564 = vmatpush1.bf16.msra.mxu1 %v6168_v16  ;;  %v3708_v26 = vpop.f32.mrf.mxu0  ;;  %4464 = vmatprep.subr.bf16.mxu0 %v6176_v22  ;;  %v6207_v28 = vld [vmem:[%s8596_s0 + $0x430] ss:$100 sps:$4 sm:$0xff]  }
 0x15d   :  { %v3809_v46 = vpop.f32.mrf.mxu1  ;;  %4565 = vmatprep.subr.bf16.mxu1 %v6179_v11  ;;  %v3709_v48 = vadd.f32 %v3708_v26, %v7551_v25  ;;  %v7890_v51 = vadd.f32 %v3807_v35, %v3707_v37  ;;  %4320 = vmatprep.mubr.bf16.mxu0 %v6182_v1  ;;  %v6206_v11 = vld [vmem:[%s8595_s1 + $0xbd4] ss:$8 sps:$4 sm:$0xff]   ;;  %v6201_v1 = vld [vmem:[%s8595_s1 + $0xad0] ss:$8 sps:$4 sm:$0xff]  }
 0x15e   :  { %4421 = vmatprep.mubr.bf16.mxu1 %v6191_v30  ;;  %v3710_v52 = vpop.f32.mrf.mxu0  ;;  %v179_v35 = vld [vmem:[%s8596_s0 + $0x4f0] sm:$0x11] }
 0x15f   :  { %v3811_v56 = vpop.f32.mrf.mxu1  ;;  %v3711_v25 = vadd.f32 %v3710_v52, %v7563_v34  ;;  %v7902_v61 = vadd.f32 %v3809_v46, %v3709_v48  ;;  %4465 = vmatpush1.bf16.msra.mxu0 %v6174_v36  ;;  %v6200_v34 = vld [vmem:[%s8596_s0 + $0x42c] ss:$100 sps:$4 sm:$0xff]   ;;  %v5017_v48 = vcombine.high %v179_v35, %v179_v35 }
 0x160   :  { %4566 = vmatpush1.bf16.msra.mxu1 %v6177_v9  ;;  %v3712_v63 = vpop.f32.mrf.mxu0  ;;  %4466 = vmatprep.subr.bf16.mxu0 %v6185_v42  ;;  %v6204_v9 = vld [vmem:[%s8595_s1 + $0xbd0] ss:$8 sps:$4 sm:$0xff]   ;;  %v6212_v42 = vld [vmem:[%s8595_s1 + $0xac4] ss:$8 sps:$4 sm:$0xff]  }
 0x161   :  { %v3813_v4 = vpop.f32.mrf.mxu1  ;;  %4567 = vmatprep.subr.bf16.mxu1 %v6188_v47  ;;  %v3713_v39 = vadd.f32 %v3712_v63, %v7575_v44  ;;  %v7914_v49 = vadd.f32 %v3811_v56, %v3711_v25  ;;  %v6195_v44 = vld [vmem:[%s8595_s1 + $0xbe0] ss:$8 sps:$4 sm:$0xff]   ;;  %v6223_v63 = vld [vmem:[%s8595_s1 + $0xbb4] ss:$8 sps:$4 sm:$0xff]  }
 0x162   :  { %v3716_v8 = vpop.f32.mrf.mxu0  ;;  %4321 = vmatmul.mubr.bf16.gmra.mxu0 %v6180_v17  ;;  %v6210_v25 = vld [vmem:[%s8595_s1 + $0xac0] ss:$8 sps:$4 sm:$0xff]  }
 0x163   :  { %v3817_v12 = vpop.f32.mrf.mxu1  ;;  %4422 = vmatmul.mubr.bf16.gmra.mxu1 %v6189_v59  ;;  %v3717_v15 = vadd.f32 %v3716_v8, %v7590_v53  ;;  %v7923_v16 = vadd.f32 %v3813_v4, %v3713_v39  ;;  %4467 = vmatpush2.bf16.msra.mxu0 %v6183_v33  ;;  %v6198_v53 = vld [vmem:[%s8596_s0 + $0x428] ss:$100 sps:$4 sm:$0xff]   ;;  %v6218_v39 = vld [vmem:[%s8595_s1 + $0xab0] ss:$8 sps:$4 sm:$0xff]  }
 0x164   :  { %4568 = vmatpush2.bf16.msra.mxu1 %v6186_v58  ;;  %v3718_v57 = vpop.f32.mrf.mxu0  ;;  %4468 = vmatprep.subr.bf16.mxu0 %v6194_v62 }
 0x165   :  { %v3819_v22 = vpop.f32.mrf.mxu1  ;;  %4569 = vmatprep.subr.bf16.mxu1 %v6197_v41  ;;  %v3719_v24 = vadd.f32 %v3718_v57, %v7605_v0  ;;  %v7938_v27 = vadd.f32 %v3817_v12, %v3717_v15  ;;  %4330 = vmatprep.mubr.bf16.mxu0 %v6200_v34  ;;  %v180_v0 = vld [vmem:[%s8596_s0 + $0x4f8] sm:$0x11]  ;;  %v6231_v57 = vld [vmem:[%s8595_s1 + $0xba4] ss:$8 sps:$4 sm:$0xff]  }
 0x166   :  { %4431 = vmatprep.mubr.bf16.mxu1 %v6209_v7  ;;  %v3720_v30 = vpop.f32.mrf.mxu0  ;;  %v5019_v33 = vcombine.high %v180_v0, %v180_v0  ;;  %v6221_v7 = vld [vmem:[%s8595_s1 + $0xbb0] ss:$8 sps:$4 sm:$0xff]   ;;  %v5018_v15 = vcombine.low %v180_v0, %v180_v0 }
 0x167   :  { %v3821_v31 = vpop.f32.mrf.mxu1  ;;  %v3721_v36 = vadd.f32 %v3720_v30, %v7617_v10  ;;  %v7953_v37 = vadd.f32 %v3819_v22, %v3719_v24  ;;  %4469 = vmatpush2.bf16.msra.mxu0 %v6192_v13  ;;  %v6215_v10 = vld [vmem:[%s8595_s1 + $0xbc4] ss:$8 sps:$4 sm:$0xff]   ;;  %v5016_v13 = vcombine.low %v179_v35, %v179_v35 }
 0x168   :  { %4570 = vmatpush2.bf16.msra.mxu1 %v6195_v44  ;;  %v3722_v26 = vpop.f32.mrf.mxu0  ;;  %4470 = vmatprep.subr.bf16.mxu0 %v6203_v18 }
 0x169   :  { %v3823_v46 = vpop.f32.mrf.mxu1  ;;  %4571 = vmatprep.subr.bf16.mxu1 %v6206_v11  ;;  %v3723_v17 = vadd.f32 %v3722_v26, %v7623_v20  ;;  %v7965_v47 = vadd.f32 %v3821_v31, %v3721_v36  ;;  %v6213_v20 = vld [vmem:[%s8595_s1 + $0xbc0] ss:$8 sps:$4 sm:$0xff]   ;;  %v6246_v11 = vld [vmem:[%s8596_s0 + $0x54] ss:$100 sps:$4 sm:$0xff]  }
 0x16a   :  { %v3726_v52 = vpop.f32.mrf.mxu0  ;;  %4331 = vmatmul.mubr.bf16.gmra.mxu0 %v6198_v53  ;;  %v6226_v31 = vld [vmem:[%s8595_s1 + $0xaa0] ss:$8 sps:$4 sm:$0xff]   ;;  %v6234_v36 = vld [vmem:[%s8595_s1 + $0xa94] ss:$8 sps:$4 sm:$0xff]  }
 0x16b   :  { %v3827_v56 = vpop.f32.mrf.mxu1  ;;  %4432 = vmatmul.mubr.bf16.gmra.mxu1 %v6207_v28  ;;  %v3727_v58 = vadd.f32 %v3726_v52, %v7635_v29  ;;  %v7968_v59 = vadd.f32 %v3823_v46, %v3723_v17  ;;  %4471 = vmatpush2.bf16.msra.mxu0 %v6201_v1  ;;  %v6220_v29 = vld [vmem:[%s8595_s1 + $0xab4] ss:$8 sps:$4 sm:$0xff]   ;;  %v6235_v52 = vld [vmem:[%s8595_s1 + $0xb90] ss:$8 sps:$4 sm:$0xff]  }
 0x16c   :  { %4572 = vmatpush2.bf16.msra.mxu1 %v6204_v9  ;;  %v3728_v62 = vpop.f32.mrf.mxu0  ;;  %4472 = vmatprep.subr.bf16.mxu0 %v6212_v42 }
 0x16d   :  { %v3829_v41 = vpop.f32.mrf.mxu1  ;;  %4573 = vmatprep.subr.bf16.mxu1 %v6215_v10  ;;  %v3729_v4 = vadd.f32 %v3728_v62, %v7641_v38  ;;  %v7983_v34 = vadd.f32 %v3827_v56, %v3727_v58  ;;  %4340 = vmatprep.mubr.bf16.mxu0 %v5017_v48  ;;  %v6228_v38 = vld [vmem:[%s8595_s1 + $0xaa4] ss:$8 sps:$4 sm:$0xff]   ;;  %v6241_v62 = vld [vmem:[%s8595_s1 + $0xb80] ss:$8 sps:$4 sm:$0xff]  }
 0x16e   :  { %4441 = vmatprep.mubr.bf16.mxu1 %v5019_v33  ;;  %v3730_v8 = vpop.f32.mrf.mxu0  ;;  %v6232_v33 = vld [vmem:[%s8595_s1 + $0xa90] ss:$8 sps:$4 sm:$0xff]   ;;  %v6240_v56 = vld [vmem:[%s8595_s1 + $0xa84] ss:$8 sps:$4 sm:$0xff]  }
 0x16f   :  { %v3831_v12 = vpop.f32.mrf.mxu1  ;;  %v3731_v44 = vadd.f32 %v3730_v8, %v7653_v50  ;;  %v7995_v18 = vadd.f32 %v3829_v41, %v3729_v4  ;;  %4473 = vmatpush2.bf16.msra.mxu0 %v6210_v25  ;;  %v6249_v50 = vld [vmem:[%s8596_s0 + $0x5c] ss:$100 sps:$4 sm:$0xff]   ;;  %v6243_v58 = vld [vmem:[%s8595_s1 + $0xb84] ss:$8 sps:$4 sm:$0xff]   ;;  %v6250_v4 = vld [vmem:[%s8595_s1 + $0xc70] ss:$8 sps:$4 sm:$0xff]  }
 0x170   :  { %4574 = vmatpush2.bf16.msra.mxu1 %v6213_v20  ;;  %v3732_v22 = vpop.f32.mrf.mxu0  ;;  %4474 = vmatprep.subr.bf16.mxu0 %v6220_v29  ;;  %v6238_v20 = vld [vmem:[%s8595_s1 + $0xa80] ss:$8 sps:$4 sm:$0xff]   ;;  %v6252_v41 = vld [vmem:[%s8595_s1 + $0xc74] ss:$8 sps:$4 sm:$0xff]   ;;  %v6261_v8 = vld [vmem:[%s8595_s1 + $0xc64] ss:$8 sps:$4 sm:$0xff]  }
 0x171   :  { %v3833_v53 = vpop.f32.mrf.mxu1  ;;  %4575 = vmatprep.subr.bf16.mxu1 %v6223_v63  ;;  %v3733_v24 = vadd.f32 %v3732_v22, %v7665_v60  ;;  %v8004_v1 = vadd.f32 %v3831_v12, %v3731_v44  ;;  %v6229_v60 = vld [vmem:[%s8595_s1 + $0xba0] ss:$8 sps:$4 sm:$0xff]   ;;  %v6244_v29 = vld [vmem:[%s8596_s0 + $0x50] ss:$100 sps:$4 sm:$0xff]   ;;  %v6247_v63 = vld [vmem:[%s8596_s0 + $0x58] ss:$100 sps:$4 sm:$0xff]  }
 0x172   :  { %v3736_v28 = vpop.f32.mrf.mxu0  ;;  %4341 = vmatmul.mubr.bf16.gmra.mxu0 %v5016_v13  ;;  %v6264_v22 = vld [vmem:[%s8595_s1 + $0xc54] ss:$8 sps:$4 sm:$0xff]  }
 0x173   :  { %v3837_v30 = vpop.f32.mrf.mxu1  ;;  %4442 = vmatmul.mubr.bf16.gmra.mxu1 %v5018_v15  ;;  %v3737_v35 = vadd.f32 %v3736_v28, %v7677_v5  ;;  %v8013_v0 = vadd.f32 %v3833_v53, %v3733_v24  ;;  %4475 = vmatpush2.bf16.msra.mxu0 %v6218_v39  ;;  %v6237_v5 = vld [vmem:[%s8595_s1 + $0xb94] ss:$8 sps:$4 sm:$0xff]   ;;  %v6256_v28 = vld [vmem:[%s8596_s0 + $0x120] ss:$100 sps:$4 sm:$0xff]  }
 0x174   :  { %4576 = vmatpush2.bf16.msra.mxu1 %v6221_v7  ;;  %v3738_v9 = vpop.f32.mrf.mxu0  ;;  %4476 = vmatprep.subr.bf16.mxu0 %v6228_v38  ;;  %v6255_v39 = vld [vmem:[%s8596_s0 + $0x11c] ss:$100 sps:$4 sm:$0xff]   ;;  %v6258_v7 = vld [vmem:[%s8596_s0 + $0x124] ss:$100 sps:$4 sm:$0xff]  }
 0x175   :  { %v3839_v42 = vpop.f32.mrf.mxu1  ;;  %4577 = vmatprep.subr.bf16.mxu1 %v6231_v57  ;;  %v3739_v26 = vadd.f32 %v3738_v9, %v7685_v14  ;;  %v8025_v46 = vadd.f32 %v3837_v30, %v3737_v35  ;;  %4482 = vmatprep.mubr.bf16.mxu0 %v6246_v11  ;;  %v6259_v38 = vld [vmem:[%s8595_s1 + $0xc60] ss:$8 sps:$4 sm:$0xff]   ;;  %v6270_v35 = vld [vmem:[%s8596_s0 + $0x1ec] ss:$100 sps:$4 sm:$0xff]  }
 0x176   :  { %4583 = vmatprep.mubr.bf16.mxu1 %v6249_v50  ;;  %v3740_v10 = vpop.f32.mrf.mxu0  ;;  %v6253_v50 = vld [vmem:[%s8596_s0 + $0x118] ss:$100 sps:$4 sm:$0xff]  }
 0x177   :  { %v3841_v17 = vpop.f32.mrf.mxu1  ;;  %v8027_v48 = vadd.f32 %v3839_v42, %v3739_v26  ;;  %4477 = vmatpush2.bf16.msra.mxu0 %v6226_v31  ;;  %v6262_v9 = vld [vmem:[%s8595_s1 + $0xc50] ss:$8 sps:$4 sm:$0xff]  }
 0x178   :  { %4578 = vmatpush2.bf16.msra.mxu1 %v6229_v60  ;;  %4478 = vmatprep.subr.bf16.mxu0 %v6234_v36  ;;  %v3741_v14 = vpop.f32.mrf.mxu0 }
 0x179   :  { %4579 = vmatprep.subr.bf16.mxu1 %v6237_v5  ;;  %v3842_v25 = vpop.f32.mrf.mxu1  ;;  %v6273_v5 = vld [vmem:[%s8595_s1 + $0xc44] ss:$8 sps:$4 sm:$0xff]  }
 0x17b   :  { %4479 = vmatpush2.bf16.msra.mxu0 %v6232_v33 }
 0x17c   :  { %4580 = vmatpush2.bf16.msra.mxu1 %v6235_v52  ;;  %4480 = vmatprep.subr.bf16.mxu0 %v6240_v56 }
 0x17d   :  { %4581 = vmatprep.subr.bf16.mxu1 %v6243_v58 }
 0x17f   :  { %4481 = vmatpush2.bf16.msra.mxu0 %v6238_v20 }
 0x180   :  { %4582 = vmatpush2.bf16.msra.mxu1 %v6241_v62  ;;  %4652 = vmatprep.subr.bf16.mxu0 %v6252_v41  ;;  %v6265_v62 = vld [vmem:[%s8596_s0 + $0x1e0] ss:$100 sps:$4 sm:$0xff]  }
 0x181   :  { %5451 = vmatprep.subr.bf16.mxu1 %v6252_v41  ;;  %v6268_v41 = vld [vmem:[%s8596_s0 + $0x1e8] ss:$100 sps:$4 sm:$0xff]  }
 0x182   :  { %v3878_v12 = vpop.f32.mrf.mxu0  ;;  %4483 = vmatmul.mubr.bf16.vlgmr.msra.gmra.mxu0 %v6244_v29 }
 0x183   :  { %4584 = vmatmul.mubr.bf16.vlgmr.msra.gmra.mxu1 %v6247_v63  ;;  %v3979_v13 = vpop.f32.mrf.mxu1  ;;  %v3879_v15 = vadd.f32 %v3878_v12, %v7743_v55  ;;  %4653 = vmatpush1.bf16.msra.mxu0 %v6250_v4  ;;  %v6276_v63 = vld [vmem:[%s8596_s0 + $0x2ac] ss:$100 sps:$4 sm:$0xff]  }
 0x184   :  { %4492 = vmatprep.mubr.bf16.mxu0 %v6255_v39  ;;  %v3880_v44 = vpop.f32.mrf.mxu0  ;;  %4593 = vmatprep.mubr.bf16.mxu1 %v6258_v7 }
 0x185   :  { %v3981_v57 = vpop.f32.mrf.mxu1  ;;  %4654 = vmatprep.subr.bf16.mxu0 %v6261_v8  ;;  %v3881_v53 = vadd.f32 %v3880_v44, %v7755_v3  ;;  %v8076_v11 = vadd.f32 %v3979_v13, %v3879_v15  ;;  %5459 = vmatpush1.bf16.msra.mxu1 %v6250_v4  ;;  %v6267_v3 = vld [vmem:[%s8596_s0 + $0x1e4] ss:$100 sps:$4 sm:$0xff]   ;;  %v6279_v4 = vld [vmem:[%s8596_s0 + $0x2b4] ss:$100 sps:$4 sm:$0xff]  }
 0x186   :  { %v3882_v55 = vpop.f32.mrf.mxu0  ;;  %5452 = vmatprep.subr.bf16.mxu1 %v6261_v8  ;;  %v6280_v8 = vld [vmem:[%s8595_s1 + $0xc30] ss:$8 sps:$4 sm:$0xff]   ;;  %v6291_v13 = vld [vmem:[%s8595_s1 + $0xc24] ss:$8 sps:$4 sm:$0xff]  }
 0x187   :  { %v3983_v24 = vpop.f32.mrf.mxu1  ;;  %v3883_v30 = vadd.f32 %v3882_v55, %v7770_v43  ;;  %v8085_v31 = vadd.f32 %v3981_v57, %v3881_v53  ;;  %4655 = vmatpush1.bf16.msra.mxu0 %v6259_v38  ;;  %v6289_v53 = vld [vmem:[%s8595_s1 + $0xc20] ss:$8 sps:$4 sm:$0xff]  }
 0x188   :  { %v3884_v60 = vpop.f32.mrf.mxu0  ;;  %4656 = vmatprep.subr.bf16.mxu0 %v6264_v22 }
 0x189   :  { %v3985_v36 = vpop.f32.mrf.mxu1  ;;  %v3885_v43 = vadd.f32 %v3884_v60, %v7779_v23  ;;  %v8097_v42 = vadd.f32 %v3983_v24, %v3883_v30  ;;  %5460 = vmatpush1.bf16.msra.mxu1 %v6259_v38  ;;  %v6271_v23 = vld [vmem:[%s8595_s1 + $0xc40] ss:$8 sps:$4 sm:$0xff]   ;;  %v6285_v60 = vld [vmem:[%s8596_s0 + $0x374] ss:$100 sps:$4 sm:$0xff]  }
 0x18a   :  { %v3888_v26 = vpop.f32.mrf.mxu0  ;;  %4493 = vmatmul.mubr.bf16.gmra.mxu0 %v6253_v50  ;;  %5453 = vmatprep.subr.bf16.mxu1 %v6264_v22  ;;  %v6274_v30 = vld [vmem:[%s8596_s0 + $0x2a8] ss:$100 sps:$4 sm:$0xff]  }
 0x18b   :  { %4594 = vmatmul.mubr.bf16.gmra.mxu1 %v6256_v28  ;;  %v3989_v10 = vpop.f32.mrf.mxu1  ;;  %v3889_v17 = vadd.f32 %v3888_v26, %v7794_v32  ;;  %v8103_v33 = vadd.f32 %v3985_v36, %v3885_v43  ;;  %4502 = vmatprep.mubr.bf16.mxu0 %v6267_v3  ;;  %v6282_v32 = vld [vmem:[%s8595_s1 + $0xc34] ss:$8 sps:$4 sm:$0xff]  }
 0x18c   :  { %4603 = vmatprep.mubr.bf16.mxu1 %v6270_v35  ;;  %v3890_v52 = vpop.f32.mrf.mxu0  ;;  %4657 = vmatpush1.bf16.msra.mxu0 %v6262_v9  ;;  %v6277_v3 = vld [vmem:[%s8596_s0 + $0x2b0] ss:$100 sps:$4 sm:$0xff]   ;;  %v6288_v36 = vld [vmem:[%s8596_s0 + $0x37c] ss:$100 sps:$4 sm:$0xff]  }
 0x18d   :  { %v3991_v14 = vpop.f32.mrf.mxu1  ;;  %v3891_v56 = vadd.f32 %v3890_v52, %v7806_v45  ;;  %v8109_v58 = vadd.f32 %v3989_v10, %v3889_v17  ;;  %4658 = vmatprep.subr.bf16.mxu0 %v6273_v5  ;;  %5461 = vmatpush1.bf16.msra.mxu1 %v6262_v9  ;;  %v6307_v10 = vld [vmem:[%s8595_s1 + $0xc04] ss:$8 sps:$4 sm:$0xff]  }
 0x18e   :  { %v3892_v25 = vpop.f32.mrf.mxu0  ;;  %5454 = vmatprep.subr.bf16.mxu1 %v6273_v5  ;;  %v6298_v5 = vld [vmem:[%s8595_s1 + $0xc10] ss:$8 sps:$4 sm:$0xff]  }
 0x18f   :  { %v3993_v20 = vpop.f32.mrf.mxu1  ;;  %v3893_v45 = vadd.f32 %v3892_v25, %v7818_v54  ;;  %v8121_v29 = vadd.f32 %v3991_v14, %v3891_v56 }
 0x190   :  { %v3894_v39 = vpop.f32.mrf.mxu0  ;;  %4659 = vmatpush1.bf16.msra.mxu0 %v6271_v23 }
 0x191   :  { %v3995_v7 = vpop.f32.mrf.mxu1  ;;  %v3895_v12 = vadd.f32 %v3894_v39, %v7827_v2  ;;  %v8133_v54 = vadd.f32 %v3993_v20, %v3893_v45  ;;  %4660 = vmatprep.subr.bf16.mxu0 %v6282_v32  ;;  %5462 = vmatpush1.bf16.msra.mxu1 %v6271_v23  ;;  %v6286_v45 = vld [vmem:[%s8596_s0 + $0x378] ss:$100 sps:$4 sm:$0xff]   ;;  %v6297_v39 = vld [vmem:[%s8596_s0 + $0x444] ss:$100 sps:$4 sm:$0xff]  }
 0x192   :  { %v3898_v15 = vpop.f32.mrf.mxu0  ;;  %4503 = vmatmul.mubr.bf16.gmra.mxu0 %v6265_v62  ;;  %5455 = vmatprep.subr.bf16.mxu1 %v6282_v32  ;;  %v6305_v32 = vld [vmem:[%s8595_s1 + $0xc00] ss:$8 sps:$4 sm:$0xff]  }
 0x193   :  { %4604 = vmatmul.mubr.bf16.gmra.mxu1 %v6268_v41  ;;  %v3999_v38 = vpop.f32.mrf.mxu1  ;;  %v3899_v44 = vadd.f32 %v3898_v15, %v7842_v6  ;;  %v8139_v57 = vadd.f32 %v3995_v7, %v3895_v12  ;;  %4512 = vmatprep.mubr.bf16.mxu0 %v6276_v63  ;;  %v6300_v6 = vld [vmem:[%s8595_s1 + $0xc14] ss:$8 sps:$4 sm:$0xff]  }
 0x194   :  { %4613 = vmatprep.mubr.bf16.mxu1 %v6279_v4  ;;  %v3900_v22 = vpop.f32.mrf.mxu0  ;;  %4661 = vmatpush1.bf16.msra.mxu0 %v6280_v8  ;;  %v6283_v41 = vld [vmem:[%s8596_s0 + $0x370] ss:$100 sps:$4 sm:$0xff]  }
 0x195   :  { %v4001_v2 = vpop.f32.mrf.mxu1  ;;  %v3901_v55 = vadd.f32 %v3900_v22, %v7854_v21  ;;  %v8145_v24 = vadd.f32 %v3999_v38, %v3899_v44  ;;  %4662 = vmatprep.subr.bf16.mxu0 %v6291_v13  ;;  %5463 = vmatpush1.bf16.msra.mxu1 %v6280_v8 }
 0x196   :  { %v3902_v50 = vpop.f32.mrf.mxu0  ;;  %5456 = vmatprep.subr.bf16.mxu1 %v6291_v13 }
 0x197   :  { %v4003_v28 = vpop.f32.mrf.mxu1  ;;  %v3903_v21 = vadd.f32 %v3902_v50, %v7866_v19  ;;  %v8157_v35 = vadd.f32 %v4001_v2, %v3901_v55 }
 0x198   :  { %v3904_v9 = vpop.f32.mrf.mxu0  ;;  %4663 = vmatpush1.bf16.msra.mxu0 %v6289_v53 }
 0x199   :  { %v4005_v43 = vpop.f32.mrf.mxu1  ;;  %v3905_v26 = vadd.f32 %v3904_v9, %v7875_v40  ;;  %v8169_v19 = vadd.f32 %v4003_v28, %v3903_v21  ;;  %4664 = vmatprep.subr.bf16.mxu0 %v6300_v6  ;;  %5464 = vmatpush1.bf16.msra.mxu1 %v6289_v53  ;;  %v181_v53 = vld [vmem:[%s8596_s0 + $0x500] sm:$0x11]  ;;  %v6292_v28 = vld [vmem:[%s8596_s0 + $0x438] ss:$100 sps:$4 sm:$0xff]  }
 0x19a   :  { %v3908_v17 = vpop.f32.mrf.mxu0  ;;  %4513 = vmatmul.mubr.bf16.gmra.mxu0 %v6274_v30  ;;  %5457 = vmatprep.subr.bf16.mxu1 %v6300_v6  ;;  %v6295_v30 = vld [vmem:[%s8596_s0 + $0x440] ss:$100 sps:$4 sm:$0xff]  }
 0x19b   :  { %4614 = vmatmul.mubr.bf16.gmra.mxu1 %v6277_v3  ;;  %v4009_v52 = vpop.f32.mrf.mxu1  ;;  %v3909_v14 = vadd.f32 %v3908_v17, %v7890_v51  ;;  %v8175_v23 = vadd.f32 %v4005_v43, %v3905_v26  ;;  %4522 = vmatprep.mubr.bf16.mxu0 %v6285_v60  ;;  %v5021_v60 = vcombine.high %v181_v53, %v181_v53 }
 0x19c   :  { %4623 = vmatprep.mubr.bf16.mxu1 %v6288_v36  ;;  %v3910_v56 = vpop.f32.mrf.mxu0  ;;  %4665 = vmatpush1.bf16.msra.mxu0 %v6298_v5 }
 0x19d   :  { %v4011_v40 = vpop.f32.mrf.mxu1  ;;  %v3911_v25 = vadd.f32 %v3910_v56, %v7902_v61  ;;  %v8181_v20 = vadd.f32 %v4009_v52, %v3909_v14  ;;  %5465 = vmatpush1.bf16.msra.mxu1 %v6298_v5  ;;  %4666 = vmatprep.subr.bf16.mxu0 %v6307_v10  ;;  %v6294_v61 = vld [vmem:[%s8596_s0 + $0x43c] ss:$100 sps:$4 sm:$0xff]  }
 0x19e   :  { %v3912_v62 = vpop.f32.mrf.mxu0  ;;  %5458 = vmatprep.subr.bf16.mxu1 %v6307_v10 }
 0x19f   :  { %v4013_v51 = vpop.f32.mrf.mxu1  ;;  %v3913_v63 = vadd.f32 %v3912_v62, %v7914_v49  ;;  %v8190_v4 = vadd.f32 %v4011_v40, %v3911_v25  ;;  %v5020_v25 = vcombine.low %v181_v53, %v181_v53 }
 0x1a0   :  { %v3914_v7 = vpop.f32.mrf.mxu0  ;;  %4667 = vmatpush1.bf16.msra.mxu0 %v6305_v32 }
 0x1a1   :  { %v4015_v8 = vpop.f32.mrf.mxu1  ;;  %v3915_v12 = vadd.f32 %v3914_v7, %v7923_v16  ;;  %v8199_v13 = vadd.f32 %v4013_v51, %v3913_v63  ;;  %5466 = vmatpush1.bf16.msra.mxu1 %v6305_v32  ;;  %v182_v16 = vld [vmem:[%s8596_s0 + $0x508] sm:$0x11] }
 0x1a2   :  { %v3918_v15 = vpop.f32.mrf.mxu0  ;;  %4523 = vmatmul.mubr.bf16.gmra.mxu0 %v6283_v41  ;;  %v5023_v36 = vcombine.high %v182_v16, %v182_v16  ;;  %v5022_v62 = vcombine.low %v182_v16, %v182_v16 }
 0x1a3   :  { %4624 = vmatmul.mubr.bf16.gmra.mxu1 %v6286_v45  ;;  %v4019_v49 = vpop.f32.mrf.mxu1  ;;  %v3919_v38 = vadd.f32 %v3918_v15, %v7938_v27  ;;  %v8202_v44 = vadd.f32 %v4015_v8, %v3915_v12  ;;  %4532 = vmatprep.mubr.bf16.mxu0 %v6294_v61  ;;  %v6315_v12 = vmov 0  }
 0x1a4   :  { %4633 = vmatprep.mubr.bf16.mxu1 %v6297_v39  ;;  %v3920_v22 = vpop.f32.mrf.mxu0 }
 0x1a5   :  { %v4021_v2 = vpop.f32.mrf.mxu1  ;;  %v3921_v55 = vadd.f32 %v3920_v22, %v7953_v37  ;;  %v8211_v6 = vadd.f32 %v4019_v49, %v3919_v38  ;;  %v6308_v22 = vld [vmem:[%s8596_s0 + $0x60] ss:$100 sps:$4 sm:$0xff]  }
 0x1a6   :  { %v3922_v50 = vpop.f32.mrf.mxu0 }
 0x1a7   :  { %v4023_v27 = vpop.f32.mrf.mxu1  ;;  %v3923_v3 = vadd.f32 %v3922_v50, %v7965_v47  ;;  %v8220_v21 = vadd.f32 %v4021_v2, %v3921_v55  ;;  %v6311_v50 = vld [vmem:[%s8596_s0 + $0x448] ss:$100 sps:$4 sm:$0xff]  }
 0x1a8   :  { %v3924_v9 = vpop.f32.mrf.mxu0 }
 0x1a9   :  { %v4025_v37 = vpop.f32.mrf.mxu1  ;;  %v3925_v43 = vadd.f32 %v3924_v9, %v7968_v59  ;;  %v8223_v5 = vadd.f32 %v4023_v27, %v3923_v3 }
 0x1aa   :  { %v3928_v26 = vpop.f32.mrf.mxu0  ;;  %4533 = vmatmul.mubr.bf16.gmra.mxu0 %v6292_v28 }
 0x1ab   :  { %4634 = vmatmul.mubr.bf16.gmra.mxu1 %v6295_v30  ;;  %v4029_v10 = vpop.f32.mrf.mxu1  ;;  %v3929_v17 = vadd.f32 %v3928_v26, %v7983_v34  ;;  %v8226_v52 = vadd.f32 %v4025_v37, %v3925_v43  ;;  %4542 = vmatprep.mubr.bf16.mxu0 %v5021_v60  ;;  %v6312_v26 = vld [vmem:[%s8596_s0 + $0x1f0] ss:$100 sps:$4 sm:$0xff]  }
 0x1ac   :  { %4643 = vmatprep.mubr.bf16.mxu1 %v5023_v36  ;;  %v3930_v47 = vpop.f32.mrf.mxu0 }
 0x1ad   :  { %v4031_v14 = vpop.f32.mrf.mxu1  ;;  %v3931_v56 = vadd.f32 %v3930_v47, %v7995_v18  ;;  %v8229_v40 = vadd.f32 %v4029_v10, %v3929_v17  ;;  %v6313_v10 = vld [vmem:[%s8596_s0 + $0x510] ss:$0 sps:$4 sm:$0x11]  }
 0x1ae   :  { %v3932_v32 = vpop.f32.mrf.mxu0 }
 0x1af   :  { %v4033_v59 = vpop.f32.mrf.mxu1  ;;  %v3933_v51 = vadd.f32 %v3932_v32, %v8004_v1  ;;  %v8232_v41 = vadd.f32 %v4031_v14, %v3931_v56 }
 0x1b0   :  { %v3934_v45 = vpop.f32.mrf.mxu0 }
 0x1b1   :  { %v4035_v34 = vpop.f32.mrf.mxu1  ;;  %v3935_v63 = vadd.f32 %v3934_v45, %v8013_v0  ;;  %v8235_v61 = vadd.f32 %v4033_v59, %v3933_v51 }
 0x1b2   :  { %v3938_v39 = vpop.f32.mrf.mxu0  ;;  %4543 = vmatmul.mubr.bf16.gmra.mxu0 %v5020_v25 }
 0x1b3   :  { %4644 = vmatmul.mubr.bf16.gmra.mxu1 %v5022_v62  ;;  %v4039_v18 = vpop.f32.mrf.mxu1  ;;  %v3939_v7 = vadd.f32 %v3938_v39, %v8025_v46  ;;  %v8238_v8 = vadd.f32 %v4035_v34, %v3935_v63  ;;  %4684 = vmatprep.mubr.bf16.mxu0 %v6315_v12  ;;  %v6309_v46 = vld [vmem:[%s8596_s0 + $0x380] ss:$100 sps:$4 sm:$0xff]  }
 0x1b4   :  { %4724 = vmatprep.mubr.bf16.mxu1 %v6315_v12  ;;  %v3940_v1 = vpop.f32.mrf.mxu0 }
 0x1b5   :  { %v4041_v15 = vpop.f32.mrf.mxu1  ;;  %v3941_v49 = vadd.f32 %v3940_v1, %v8027_v48  ;;  %v8241_v38 = vadd.f32 %v4039_v18, %v3939_v7  ;;  %v6310_v48 = vld [vmem:[%s8596_s0 + $0x128] ss:$100 sps:$4 sm:$0xff]  }
 0x1b6   :  { %v3942_v0 = vpop.f32.mrf.mxu0 }
 0x1b7   :  { %v4043_v2 = vpop.f32.mrf.mxu1  ;;  %v8249_v53 = vadd.f32 %v4041_v15, %v3941_v49 }
 0x1b8   :  { %v3943_v16 = vpop.f32.mrf.mxu0 }
 0x1b9   :  { %v4044_v55 = vpop.f32.mrf.mxu1 }
 0x1ba   :  { %4685 = vmatmul.mubr.bf16.vlgmr.msra.gmra.mxu0 %v6308_v22 }
 0x1bb   :  { %4725 = vmatmul.mubr.bf16.vlgmr.msra.gmra.mxu1 %v6309_v46  ;;  %4694 = vmatprep.mubr.bf16.mxu0 %v6315_v12 }
 0x1bc   :  { %4734 = vmatprep.mubr.bf16.mxu1 %v6315_v12 }
 0x1c2   :  { %v4080_v27 = vpop.f32.mrf.mxu0  ;;  %4695 = vmatmul.mubr.bf16.gmra.mxu0 %v6310_v48 }
 0x1c3   :  { %4735 = vmatmul.mubr.bf16.gmra.mxu1 %v6311_v50  ;;  %v4181_v28 = vpop.f32.mrf.mxu1  ;;  %v4081_v30 = vadd.f32 %v4080_v27, %v8076_v11  ;;  %4704 = vmatprep.mubr.bf16.mxu0 %v6315_v12 }
 0x1c4   :  { %4744 = vmatprep.mubr.bf16.mxu1 %v6315_v12  ;;  %v4082_v3 = vpop.f32.mrf.mxu0 }
 0x1c5   :  { %v4183_v60 = vpop.f32.mrf.mxu1  ;;  %v4083_v36 = vadd.f32 %v4082_v3, %v8085_v31  ;;  %v8259_v9 = vadd.f32 %v4181_v28, %v4081_v30 }
 0x1c6   :  { %v4084_v37 = vpop.f32.mrf.mxu0 }
 0x1c7   :  { %v4185_v43 = vpop.f32.mrf.mxu1  ;;  %v4085_v11 = vadd.f32 %v4084_v37, %v8097_v42  ;;  %v8268_v17 = vadd.f32 %v4183_v60, %v4083_v36 }
 0x1c8   :  { %v4086_v47 = vpop.f32.mrf.mxu0 }
 0x1c9   :  { %v4187_v14 = vpop.f32.mrf.mxu1  ;;  %v4087_v31 = vadd.f32 %v4086_v47, %v8103_v33  ;;  %v8271_v56 = vadd.f32 %v4185_v43, %v4085_v11  ;;  %v6314_v33 = vld [vmem:[%s8596_s0 + $0x2b8] ss:$100 sps:$4 sm:$0xff]  }
 0x1ca   :  { %v4090_v32 = vpop.f32.mrf.mxu0  ;;  %4705 = vmatmul.mubr.bf16.gmra.mxu0 %v6312_v26 }
 0x1cb   :  { %4745 = vmatmul.mubr.bf16.gmra.mxu1 %v6313_v10  ;;  %v4191_v59 = vpop.f32.mrf.mxu1  ;;  %v4091_v25 = vadd.f32 %v4090_v32, %v8109_v58  ;;  %v8274_v62 = vadd.f32 %v4187_v14, %v4087_v31  ;;  %4714 = vmatprep.mubr.bf16.mxu0 %v6315_v12 }
 0x1cc   :  { %v4092_v51 = vpop.f32.mrf.mxu0 }
 0x1cd   :  { %v4193_v45 = vpop.f32.mrf.mxu1  ;;  %v4093_v42 = vadd.f32 %v4092_v51, %v8121_v29  ;;  %v8277_v34 = vadd.f32 %v4191_v59, %v4091_v25 }
 0x1ce   :  { %v4094_v63 = vpop.f32.mrf.mxu0 }
 0x1cf   :  { %v4195_v39 = vpop.f32.mrf.mxu1  ;;  %v4095_v18 = vadd.f32 %v4094_v63, %v8133_v54  ;;  %v8283_v7 = vadd.f32 %v4193_v45, %v4093_v42 }
 0x1d0   :  { %v4096_v58 = vpop.f32.mrf.mxu0 }
 0x1d1   :  { %v4197_v1 = vpop.f32.mrf.mxu1  ;;  %v4097_v12 = vadd.f32 %v4096_v58, %v8139_v57  ;;  %v8286_v15 = vadd.f32 %v4195_v39, %v4095_v18 }
 0x1d2   :  { %v4100_v49 = vpop.f32.mrf.mxu0  ;;  %4715 = vmatmul.mubr.bf16.gmra.mxu0 %v6314_v33 }
 0x1d3   :  { %v4201_v29 = vpop.f32.mrf.mxu1  ;;  %v4101_v0 = vadd.f32 %v4100_v49, %v8145_v24  ;;  %v8289_v22 = vadd.f32 %v4197_v1, %v4097_v12 }
 0x1d4   :  { %v4102_v46 = vpop.f32.mrf.mxu0 }
 0x1d5   :  { %v4203_v2 = vpop.f32.mrf.mxu1  ;;  %v4103_v16 = vadd.f32 %v4102_v46, %v8157_v35  ;;  %v8292_v54 = vadd.f32 %v4201_v29, %v4101_v0 }
 0x1d6   :  { %v4104_v55 = vpop.f32.mrf.mxu0 }
 0x1d7   :  { %v4205_v48 = vpop.f32.mrf.mxu1  ;;  %v4105_v50 = vadd.f32 %v4104_v55, %v8169_v19  ;;  %v8295_v57 = vadd.f32 %v4203_v2, %v4103_v16 }
 0x1d8   :  { %v4106_v27 = vpop.f32.mrf.mxu0 }
 0x1d9   :  { %v4207_v28 = vpop.f32.mrf.mxu1  ;;  %v4107_v30 = vadd.f32 %v4106_v27, %v8175_v23  ;;  %v8298_v3 = vadd.f32 %v4205_v48, %v4105_v50 }
 0x1da   :  { %v4110_v24 = vpop.f32.mrf.mxu0 }
 0x1db   :  { %v4211_v60 = vpop.f32.mrf.mxu1  ;;  %v4111_v36 = vadd.f32 %v4110_v24, %v8181_v20  ;;  %v8301_v37 = vadd.f32 %v4207_v28, %v4107_v30 }
 0x1dc   :  { %v4112_v35 = vpop.f32.mrf.mxu0 }
 0x1dd   :  { %v4213_v43 = vpop.f32.mrf.mxu1  ;;  %v4113_v26 = vadd.f32 %v4112_v35, %v8190_v4  ;;  %v8304_v10 = vadd.f32 %v4211_v60, %v4111_v36 }
 0x1de   :  { %v4114_v19 = vpop.f32.mrf.mxu0 }
 0x1df   :  { %v4215_v11 = vpop.f32.mrf.mxu1  ;;  %v4115_v47 = vadd.f32 %v4114_v19, %v8199_v13  ;;  %v8307_v14 = vadd.f32 %v4213_v43, %v4113_v26 }
 0x1e0   :  { %v4116_v23 = vpop.f32.mrf.mxu0 }
 0x1e1   :  { %v4217_v31 = vpop.f32.mrf.mxu1  ;;  %v4117_v32 = vadd.f32 %v4116_v23, %v8202_v44  ;;  %v8310_v59 = vadd.f32 %v4215_v11, %v4115_v47 }
 0x1e2   :  { %v4120_v20 = vpop.f32.mrf.mxu0 }
 0x1e3   :  { %v4221_v25 = vpop.f32.mrf.mxu1  ;;  %v4121_v51 = vadd.f32 %v4120_v20, %v8211_v6  ;;  %v8313_v45 = vadd.f32 %v4217_v31, %v4117_v32 }
 0x1e4   :  { %v4122_v4 = vpop.f32.mrf.mxu0 }
 0x1e5   :  { %v4223_v42 = vpop.f32.mrf.mxu1  ;;  %v4123_v63 = vadd.f32 %v4122_v4, %v8220_v21  ;;  %v8316_v39 = vadd.f32 %v4221_v25, %v4121_v51 }
 0x1e6   :  { %v4124_v13 = vpop.f32.mrf.mxu0 }
 0x1e7   :  { %v4225_v33 = vpop.f32.mrf.mxu1  ;;  %v4125_v18 = vadd.f32 %v4124_v13, %v8223_v5  ;;  %v8319_v58 = vadd.f32 %v4223_v42, %v4123_v63 }
 0x1e8   :  { %v4126_v44 = vpop.f32.mrf.mxu0 }
 0x1e9   :  { %v4227_v1 = vpop.f32.mrf.mxu1  ;;  %v4127_v12 = vadd.f32 %v4126_v44, %v8226_v52  ;;  %v8322_v49 = vadd.f32 %v4225_v33, %v4125_v18 }
 0x1ea   :  { %v4130_v6 = vpop.f32.mrf.mxu0 }
 0x1eb   :  { %v4231_v29 = vpop.f32.mrf.mxu1  ;;  %v4131_v0 = vadd.f32 %v4130_v6, %v8229_v40  ;;  %v8325_v46 = vadd.f32 %v4227_v1, %v4127_v12 }
 0x1ec   :  { %v4132_v21 = vpop.f32.mrf.mxu0 }
 0x1ed   :  { %v4233_v2 = vpop.f32.mrf.mxu1  ;;  %v4133_v16 = vadd.f32 %v4132_v21, %v8232_v41  ;;  %v8328_v55 = vadd.f32 %v4231_v29, %v4131_v0 }
 0x1ee   :  { %v4134_v5 = vpop.f32.mrf.mxu0 }
 0x1ef   :  { %v4235_v48 = vpop.f32.mrf.mxu1  ;;  %v4135_v50 = vadd.f32 %v4134_v5, %v8235_v61  ;;  %v8331_v27 = vadd.f32 %v4233_v2, %v4133_v16 }
 0x1f0   :  { %v4136_v52 = vpop.f32.mrf.mxu0 }
 0x1f1   :  { %v4237_v28 = vpop.f32.mrf.mxu1  ;;  %v4137_v30 = vadd.f32 %v4136_v52, %v8238_v8  ;;  %v8334_v24 = vadd.f32 %v4235_v48, %v4135_v50 }
 0x1f2   :  { %v4140_v40 = vpop.f32.mrf.mxu0 }
 0x1f3   :  { %v4241_v60 = vpop.f32.mrf.mxu1  ;;  %v4141_v36 = vadd.f32 %v4140_v40, %v8241_v38  ;;  %v8337_v35 = vadd.f32 %v4237_v28, %v4137_v30 }
 0x1f4   :  { %v4142_v41 = vpop.f32.mrf.mxu0 }
 0x1f5   :  { %v4243_v43 = vpop.f32.mrf.mxu1  ;;  %v4143_v26 = vadd.f32 %v4142_v41, %v8249_v53  ;;  %v8340_v19 = vadd.f32 %v4241_v60, %v4141_v36 }
 0x1f6   :  { %v4144_v61 = vpop.f32.mrf.mxu0 }
 0x1f7   :  { %v4245_v11 = vpop.f32.mrf.mxu1  ;;  %v8342_v47 = vadd.f32 %v4243_v43, %v4143_v26 }
 0x1f8   :  { %v4145_v23 = vpop.f32.mrf.mxu0 }
 0x1f9   :  { %v4246_v8 = vpop.f32.mrf.mxu1 }
 0x202   :  { %v4282_v31 = vpop.f32.mrf.mxu0 }
 0x203   :  { %v4383_v32 = vpop.f32.mrf.mxu1  ;;  %v4283_v20 = vadd.f32 %v4282_v31, %v8259_v9 }
 0x204   :  { %v4284_v25 = vpop.f32.mrf.mxu0 }
 0x205   :  { %v4385_v38 = vpop.f32.mrf.mxu1  ;;  %v4285_v51 = vadd.f32 %v4284_v25, %v8268_v17  ;;  %v8346_v4 = vadd.f32 %v4383_v32, %v4283_v20 }
 0x206   :  { %v4286_v42 = vpop.f32.mrf.mxu0 }
 0x207   :  { %v4387_v53 = vpop.f32.mrf.mxu1  ;;  %v4287_v63 = vadd.f32 %v4286_v42, %v8271_v56  ;;  %v8349_v13 = vadd.f32 %v4385_v38, %v4285_v51 }
 0x208   :  { %v4288_v33 = vpop.f32.mrf.mxu0 }
 0x209   :  { %v4389_v18 = vpop.f32.mrf.mxu1  ;;  %v4289_v44 = vadd.f32 %v4288_v33, %v8274_v62  ;;  %v8352_v1 = vadd.f32 %v4387_v53, %v4287_v63 }
 0x20a   :  { %v4292_v12 = vpop.f32.mrf.mxu0 }
 0x20b   :  { %v4393_v9 = vpop.f32.mrf.mxu1  ;;  %v4293_v6 = vadd.f32 %v4292_v12, %v8277_v34  ;;  %v8355_v29 = vadd.f32 %v4389_v18, %v4289_v44 }
 0x20c   :  { %v4294_v17 = vpop.f32.mrf.mxu0 }
 0x20d   :  { %v4395_v0 = vpop.f32.mrf.mxu1  ;;  %v4295_v21 = vadd.f32 %v4294_v17, %v8283_v7  ;;  %v8358_v2 = vadd.f32 %v4393_v9, %v4293_v6 }
 0x20e   :  { %v4296_v56 = vpop.f32.mrf.mxu0 }
 0x20f   :  { %v4397_v16 = vpop.f32.mrf.mxu1  ;;  %v4297_v5 = vadd.f32 %v4296_v56, %v8286_v15  ;;  %v8361_v48 = vadd.f32 %v4395_v0, %v4295_v21 }
 0x210   :  { %v4298_v62 = vpop.f32.mrf.mxu0 }
 0x211   :  { %v4399_v50 = vpop.f32.mrf.mxu1  ;;  %v4299_v52 = vadd.f32 %v4298_v62, %v8289_v22  ;;  %v8364_v28 = vadd.f32 %v4397_v16, %v4297_v5 }
 0x212   :  { %v4302_v34 = vpop.f32.mrf.mxu0 }
 0x213   :  { %v4403_v30 = vpop.f32.mrf.mxu1  ;;  %v4303_v40 = vadd.f32 %v4302_v34, %v8292_v54  ;;  %v8367_v60 = vadd.f32 %v4399_v50, %v4299_v52 }
 0x214   :  { %v4304_v7 = vpop.f32.mrf.mxu0 }
 0x215   :  { %v4405_v36 = vpop.f32.mrf.mxu1  ;;  %v4305_v41 = vadd.f32 %v4304_v7, %v8295_v57  ;;  %v8370_v43 = vadd.f32 %v4403_v30, %v4303_v40 }
 0x216   :  { %v4306_v15 = vpop.f32.mrf.mxu0 }
 0x217   :  { %v4407_v26 = vpop.f32.mrf.mxu1  ;;  %v4307_v61 = vadd.f32 %v4306_v15, %v8298_v3  ;;  %v8373_v11 = vadd.f32 %v4405_v36, %v4305_v41 }
 0x218   :  { %v4308_v22 = vpop.f32.mrf.mxu0 }
 0x219   :  { %v4409_v23 = vpop.f32.mrf.mxu1  ;;  %v4309_v8 = vadd.f32 %v4308_v22, %v8301_v37  ;;  %v8376_v31 = vadd.f32 %v4407_v26, %v4307_v61 }
 0x21a   :  { %v4312_v54 = vpop.f32.mrf.mxu0 }
 0x21b   :  { %8599 = vst [vmem:[#allocation2_spill] sm:$0xff] %v8376_v31  ;;  %v4413_v32 = vpop.f32.mrf.mxu1  ;;  %v4313_v20 = vadd.f32 %v4312_v54, %v8304_v10  ;;  %v8379_v25 = vadd.f32 %v4409_v23, %v4309_v8 }
 0x21c   :  { %v4314_v57 = vpop.f32.mrf.mxu0 }
 0x21d   :  { %8600 = vst [vmem:[#allocation3_spill] sm:$0xff] %v8379_v25  ;;  %v4415_v38 = vpop.f32.mrf.mxu1  ;;  %v4315_v51 = vadd.f32 %v4314_v57, %v8307_v14  ;;  %v8382_v42 = vadd.f32 %v4413_v32, %v4313_v20 }
 0x21e   :  { %v4316_v3 = vpop.f32.mrf.mxu0 }
 0x21f   :  { %8601 = vst [vmem:[#allocation4_spill] sm:$0xff] %v8382_v42  ;;  %v4417_v53 = vpop.f32.mrf.mxu1  ;;  %v4317_v63 = vadd.f32 %v4316_v3, %v8310_v59  ;;  %v8385_v33 = vadd.f32 %v4415_v38, %v4315_v51 }
 0x220   :  { %v4318_v37 = vpop.f32.mrf.mxu0 }
 0x221   :  { %8602 = vst [vmem:[#allocation5_spill] sm:$0xff] %v8385_v33  ;;  %v4419_v18 = vpop.f32.mrf.mxu1  ;;  %v4319_v44 = vadd.f32 %v4318_v37, %v8313_v45  ;;  %v8388_v12 = vadd.f32 %v4417_v53, %v4317_v63 }
 0x222   :  { %v4322_v10 = vpop.f32.mrf.mxu0 }
 0x223   :  { %8603 = vst [vmem:[#allocation6_spill] sm:$0xff] %v8388_v12  ;;  %v4423_v9 = vpop.f32.mrf.mxu1  ;;  %v4323_v6 = vadd.f32 %v4322_v10, %v8316_v39  ;;  %v8391_v17 = vadd.f32 %v4419_v18, %v4319_v44 }
 0x224   :  { %v4324_v14 = vpop.f32.mrf.mxu0 }
 0x225   :  { %8604 = vst [vmem:[#allocation7_spill] sm:$0xff] %v8391_v17  ;;  %v4425_v0 = vpop.f32.mrf.mxu1  ;;  %v4325_v21 = vadd.f32 %v4324_v14, %v8319_v58  ;;  %v8394_v56 = vadd.f32 %v4423_v9, %v4323_v6 }
 0x226   :  { %v4326_v59 = vpop.f32.mrf.mxu0 }
 0x227   :  { %v4427_v16 = vpop.f32.mrf.mxu1  ;;  %v4327_v5 = vadd.f32 %v4326_v59, %v8322_v49  ;;  %v8397_v62 = vadd.f32 %v4425_v0, %v4325_v21 }
 0x228   :  { %v4328_v45 = vpop.f32.mrf.mxu0 }
 0x229   :  { %v4429_v50 = vpop.f32.mrf.mxu1  ;;  %v4329_v52 = vadd.f32 %v4328_v45, %v8325_v46  ;;  %v8400_v34 = vadd.f32 %v4427_v16, %v4327_v5 }
 0x22a   :  { %v4332_v39 = vpop.f32.mrf.mxu0 }
 0x22b   :  { %v4433_v30 = vpop.f32.mrf.mxu1  ;;  %v4333_v40 = vadd.f32 %v4332_v39, %v8328_v55  ;;  %v8403_v7 = vadd.f32 %v4429_v50, %v4329_v52 }
 0x22c   :  { %v4334_v58 = vpop.f32.mrf.mxu0 }
 0x22d   :  { %v4435_v36 = vpop.f32.mrf.mxu1  ;;  %v4335_v41 = vadd.f32 %v4334_v58, %v8331_v27  ;;  %v8406_v15 = vadd.f32 %v4433_v30, %v4333_v40 }
 0x22e   :  { %v4336_v49 = vpop.f32.mrf.mxu0 }
 0x22f   :  { %v4437_v26 = vpop.f32.mrf.mxu1  ;;  %v4337_v61 = vadd.f32 %v4336_v49, %v8334_v24  ;;  %v8409_v22 = vadd.f32 %v4435_v36, %v4335_v41 }
 0x230   :  { %v4338_v46 = vpop.f32.mrf.mxu0 }
 0x231   :  { %v4439_v23 = vpop.f32.mrf.mxu1  ;;  %v4339_v8 = vadd.f32 %v4338_v46, %v8337_v35  ;;  %v8412_v54 = vadd.f32 %v4437_v26, %v4337_v61 }
 0x232   :  { %v4342_v55 = vpop.f32.mrf.mxu0 }
 0x233   :  { %v4443_v32 = vpop.f32.mrf.mxu1  ;;  %v4343_v20 = vadd.f32 %v4342_v55, %v8340_v19  ;;  %v8415_v57 = vadd.f32 %v4439_v23, %v4339_v8 }
 0x234   :  { %v4344_v27 = vpop.f32.mrf.mxu0 }
 0x235   :  { %v4445_v38 = vpop.f32.mrf.mxu1  ;;  %v4345_v51 = vadd.f32 %v4344_v27, %v8342_v47  ;;  %v8418_v3 = vadd.f32 %v4443_v32, %v4343_v20 }
 0x236   :  { %v4346_v24 = vpop.f32.mrf.mxu0 }
 0x237   :  { %8605 = vst [vmem:[#allocation8_spill] sm:$0xff] %v8418_v3  ;;  %v4447_v53 = vpop.f32.mrf.mxu1  ;;  %v8420_v63 = vadd.f32 %v4445_v38, %v4345_v51 }
 0x238   :  { %v4347_v37 = vpop.f32.mrf.mxu0 }
 0x239   :  { %8606 = vst [vmem:[#allocation9_spill] sm:$0xff] %v8420_v63  ;;  %v4448_v35 = vpop.f32.mrf.mxu1 }
 0x242   :  { %v4484_v18 = vpop.f32.mrf.mxu0 }
 0x243   :  { %v8422_v44 = vpop.f32.mrf.mxu1 }
 0x244   :  { %v4486_v10 = vpop.f32.mrf.mxu0 }
 0x245   :  { %v8424_v9 = vpop.f32.mrf.mxu1  ;;  %v4487_v31 = vadd.f32 %v4486_v10, %v8349_v13 }
 0x246   :  { %v4488_v19 = vpop.f32.mrf.mxu0 }
 0x247   :  { %v8426_v6 = vpop.f32.mrf.mxu1  ;;  %v4489_v63 = vadd.f32 %v4488_v19, %v8352_v1  ;;  %v4588_v13 = vadd.f32 %v8424_v9, %v4487_v31 }
 0x248   :  { %v4490_v14 = vpop.f32.mrf.mxu0 }
 0x249   :  { %v8428_v0 = vpop.f32.mrf.mxu1 }
 0x24a   :  { %v8430_v47 = vpop.f32.mrf.mxu0 }
 0x24b   :  { %v8432_v21 = vpop.f32.mrf.mxu1 }
 0x24c   :  { %v8434_v59 = vpop.f32.mrf.mxu0 }
 0x24d   :  { %v8436_v16 = vpop.f32.mrf.mxu1 }
 0x24e   :  { %v8438_v5 = vpop.f32.mrf.mxu0 }
 0x24f   :  { %v8440_v45 = vpop.f32.mrf.mxu1 }
 0x250   :  { %v8442_v50 = vpop.f32.mrf.mxu0 }
 0x251   :  { %v8444_v52 = vpop.f32.mrf.mxu1 }
 0x252   :  { %v8446_v39 = vpop.f32.mrf.mxu0 }
 0x253   :  { %v8448_v30 = vpop.f32.mrf.mxu1 }
 0x254   :  { %8607 = vst [vmem:[#allocation10_spill] sm:$0xff] %v8448_v30  ;;  %v8450_v40 = vpop.f32.mrf.mxu0 }
 0x255   :  { %v8452_v58 = vpop.f32.mrf.mxu1 }
 0x256   :  { %8608 = vst [vmem:[#allocation11_spill] sm:$0xff] %v8452_v58  ;;  %v8454_v36 = vpop.f32.mrf.mxu0 }
 0x257   :  { %8609 = vst [vmem:[#allocation12_spill] sm:$0xff] %v8454_v36  ;;  %v8456_v41 = vpop.f32.mrf.mxu1  ;;  %v4485_v36 = vadd.f32 %v4484_v18, %v8346_v4 }
 0x258   :  { %8610 = vst [vmem:[#allocation13_spill] sm:$0xff] %v8456_v41  ;;  %v8458_v49 = vpop.f32.mrf.mxu0 }
 0x259   :  { %8611 = vst [vmem:[#allocation14_spill] sm:$0xff] %v8458_v49  ;;  %v8460_v26 = vpop.f32.mrf.mxu1  ;;  %v4586_v4 = vadd.f32 %v8422_v44, %v4485_v36  ;;  %v4499_v36 = vadd.f32 %v8438_v5, %v8364_v28 }
 0x25a   :  { %8612 = vst [vmem:[#allocation15_spill] sm:$0xff] %v8460_v26  ;;  %v8462_v61 = vpop.f32.mrf.mxu0 }
 0x25b   :  { %8613 = vst [vmem:[#allocation16_spill] sm:$0xff] %v8462_v61  ;;  %v8464_v46 = vpop.f32.mrf.mxu1 }
 0x25c   :  { %8614 = vst [vmem:[#allocation17_spill] sm:$0xff] %v8464_v46  ;;  %v8466_v23 = vpop.f32.mrf.mxu0 }
 0x25d   :  { %8615 = vst [vmem:[#allocation18_spill] sm:$0xff] %v8466_v23  ;;  %v8468_v8 = vpop.f32.mrf.mxu1 }
 0x25e   :  { %8616 = vst [vmem:[#allocation19_spill] sm:$0xff] %v8468_v8  ;;  %v8470_v55 = vpop.f32.mrf.mxu0 }
 0x25f   :  { %8617 = vst [vmem:[#allocation20_spill] sm:$0xff] %v8470_v55  ;;  %v8472_v32 = vpop.f32.mrf.mxu1 }
 0x260   :  { %8618 = vst [vmem:[#allocation21_spill] sm:$0xff] %v8472_v32  ;;  %v8474_v20 = vpop.f32.mrf.mxu0 }
 0x261   :  { %8619 = vst [vmem:[#allocation22_spill] sm:$0xff] %v8474_v20  ;;  %v8476_v27 = vpop.f32.mrf.mxu1 }
 0x262   :  { %8620 = vst [vmem:[#allocation23_spill] sm:$0xff] %v8476_v27  ;;  %v4524_v38 = vpop.f32.mrf.mxu0 }
 0x263   :  { %v4625_v51 = vpop.f32.mrf.mxu1  ;;  %v4525_v58 = vadd.f32 %v4524_v38, %v8394_v56  ;;  %v4600_v38 = vadd.f32 %v8440_v45, %v4499_v36  ;;  %v4507_v45 = vadd.f32 %v8450_v40, %v8373_v11 }
 0x264   :  { %v4526_v24 = vpop.f32.mrf.mxu0 }
 0x265   :  { %v4627_v53 = vpop.f32.mrf.mxu1  ;;  %v4527_v30 = vadd.f32 %v4526_v24, %v8397_v62  ;;  %v4626_v18 = vadd.f32 %v4625_v51, %v4525_v58  ;;  %v4590_v62 = vadd.f32 %v8426_v6, %v4489_v63 }
 0x266   :  { %v4528_v37 = vpop.f32.mrf.mxu0 }
 0x267   :  { %v4629_v35 = vpop.f32.mrf.mxu1  ;;  %v4628_v56 = vadd.f32 %v4627_v53, %v4527_v30 }
 0x268   :  { %v4530_v17 = vpop.f32.mrf.mxu0 }
 0x269   :  { %v4631_v12 = vpop.f32.mrf.mxu1 }
 0x26a   :  { %v4534_v46 = vpop.f32.mrf.mxu0 }
 0x26b   :  { %v8478_v23 = vpop.f32.mrf.mxu1  ;;  %v4535_v63 = vadd.f32 %v4534_v46, %v8406_v15 }
 0x26c   :  { %v4536_v8 = vpop.f32.mrf.mxu0 }
 0x26d   :  { %v8480_v33 = vpop.f32.mrf.mxu1  ;;  %v4537_v6 = vadd.f32 %v4536_v8, %v8409_v22 }
 0x26e   :  { %v4538_v55 = vpop.f32.mrf.mxu0 }
 0x26f   :  { %v8482_v32 = vpop.f32.mrf.mxu1  ;;  %v4638_v46 = vadd.f32 %v8480_v33, %v4537_v6 }
 0x270   :  { %v4540_v20 = vpop.f32.mrf.mxu0 }
 0x271   :  { %v8484_v26 = vpop.f32.mrf.mxu1 }
 0x272   :  { %v8486_v27 = vpop.f32.mrf.mxu0 }
 0x273   :  { %8621 = vst [vmem:[#allocation24_spill] sm:$0xff] %v8486_v27  ;;  %v8488_v61 = vpop.f32.mrf.mxu1  ;;  %v4491_v27 = vadd.f32 %v4490_v14, %v8355_v29 }
 0x274   :  { %8622 = vst [vmem:[#allocation25_spill] sm:$0xff] %v8488_v61  ;;  %v8490_v42 = vpop.f32.mrf.mxu0 }
 0x275   :  { %8623 = vst [vmem:[#allocation26_spill] sm:$0xff] %v8490_v42  ;;  %v8492_v41 = vpop.f32.mrf.mxu1  ;;  %v4529_v42 = vadd.f32 %v4528_v37, %v8400_v34  ;;  %v4592_v1 = vadd.f32 %v8428_v0, %v4491_v27  ;;  %v8625_v37 = vld [vmem:[#allocation8_spill] sm:$0xff] }
 0x276   :  { %8624 = vst [vmem:[#allocation27_spill] sm:$0xff] %v8492_v41  ;;  %v4548_v49 = vpop.f32.mrf.mxu0  ;;  %v4531_v41 = vadd.f32 %v4530_v17, %v8403_v7  ;;  %v4495_v17 = vadd.f32 %v8430_v47, %v8358_v2  ;;  %v4497_v7 = vadd.f32 %v8434_v59, %v8361_v48  ;;  %v4541_v59 = vadd.f32 %v4540_v20, %v8415_v57 }
 0x277   :  { %v4649_v25 = vpop.f32.mrf.mxu1  ;;  %v4630_v44 = vadd.f32 %v4629_v35, %v4529_v42 }
 0x278   :  { %v4549_v3 = vpop.f32.mrf.mxu0  ;;  %v4632_v31 = vadd.f32 %v4631_v12, %v4531_v41  ;;  %v4596_v22 = vadd.f32 %v8432_v21, %v4495_v17  ;;  %v4598_v28 = vadd.f32 %v8436_v16, %v4497_v7  ;;  %v4636_v41 = vadd.f32 %v8478_v23, %v4535_v63  ;;  %v8634_v17 = vld [vmem:[#allocation14_spill] sm:$0xff] }
 0x279   :  { %v4650_v61 = vpop.f32.mrf.mxu1  ;;  %v4505_v23 = vadd.f32 %v8446_v39, %v8370_v43 }
 0x27a   :  { %v4686_v49 = vpop.f32.mrf.mxu0  ;;  %v4501_v61 = vadd.f32 %v8442_v50, %v8367_v60  ;;  %v4539_v60 = vadd.f32 %v4538_v55, %v8412_v54  ;;  %v4642_v55 = vadd.f32 %v8484_v26, %v4541_v59  ;;  %v8626_v35 = vld [vmem:[#allocation24_spill] sm:$0xff]  ;;  %v8629_v26 = vld [vmem:[#allocation10_spill] sm:$0xff] }
 0x27b   :  { %v4726_v25 = vpop.f32.mrf.mxu1  ;;  %v4687_v3 = vadd.f32 %v4686_v49, %v4586_v4  ;;  %v4545_v49 = vadd.f32 %v8626_v35, %v8625_v37  ;;  %v8647_v37 = vld [vmem:[#allocation7_spill] sm:$0xff]  ;;  %v8648_v35 = vld [vmem:[#allocation22_spill] sm:$0xff] }
 0x27c   :  { %v4688_v10 = vpop.f32.mrf.mxu0  ;;  %v4727_v19 = vadd.f32 %v4726_v25, %v4626_v18  ;;  %v4602_v51 = vadd.f32 %v8444_v52, %v4501_v61  ;;  %v4640_v52 = vadd.f32 %v8482_v32, %v4539_v60  ;;  %v8627_v25 = vld [vmem:[#allocation9_spill] sm:$0xff]  ;;  %v8628_v4 = vld [vmem:[#allocation26_spill] sm:$0xff]  ;;  %v4606_v32 = vadd.f32 %v8629_v26, %v4505_v23 }
 0x27d   :  { %v4728_v29 = vpop.f32.mrf.mxu1  ;;  %v4689_v14 = vadd.f32 %v4688_v10, %v4588_v13  ;;  %v4547_v13 = vadd.f32 %v8628_v4, %v8627_v25  ;;  %v8630_v10 = vld [vmem:[#allocation11_spill] sm:$0xff] }
 0x27e   :  { %v4729_v34 = vadd.f32 %v4728_v29, %v4628_v56  ;;  %v4690_v9 = vpop.f32.mrf.mxu0  ;;  %v4608_v29 = vadd.f32 %v8630_v10, %v4507_v45  ;;  %v8636_v63 = vld [vmem:[#allocation27_spill] sm:$0xff] }
 0x27f   :  { %v4730_v30 = vpop.f32.mrf.mxu1  ;;  %v5438_v0 = vpack.c.bf16 %v4689_v14, %v4687_v3  ;;  %v4691_v48 = vadd.f32 %v4690_v9, %v4590_v62  ;;  %v8631_v3 = vld [vmem:[#allocation2_spill] sm:$0xff]  ;;  %v8635_v9 = vld [vmem:[#allocation25_spill] sm:$0xff]  ;;  %v4648_v6 = vadd.f32 %v8636_v63, %v4547_v13  ;;  %v8644_v45 = vld [vmem:[#allocation19_spill] sm:$0xff] }
 0x280   :  { %v5446_v58 = vpack.c.bf16 %v4729_v34, %v4727_v19  ;;  %v4692_v2 = vpop.f32.mrf.mxu0  ;;  %v4731_v42 = vadd.f32 %v4730_v30, %v4630_v44  ;;  %v8632_v19 = vld [vmem:[#allocation12_spill] sm:$0xff]  ;;  %v8633_v34 = vld [vmem:[#allocation3_spill] sm:$0xff]  ;;  %v4646_v30 = vadd.f32 %v8635_v9, %v4545_v49  ;;  %v4521_v49 = vadd.f32 %v8648_v35, %v8647_v37 }
 0x281   :  { %v4732_v47 = vpop.f32.mrf.mxu1  ;;  %4833 = vst [vmem:[%s8598_s3] sm:$0xff] %v5438_v0  ;;  %v4693_v12 = vadd.f32 %v4692_v2, %v4592_v1  ;;  %v4509_v14 = vadd.f32 %v8632_v19, %v8631_v3  ;;  %v4511_v7 = vadd.f32 %v8634_v17, %v8633_v34 }
 0x282   :  { %4841 = vst [vmem:[%s8598_s3 + $0x40] sm:$0xff] %v5446_v58  ;;  %v4733_v15 = vadd.f32 %v4732_v47, %v4632_v31  ;;  %v4696_v5 = vpop.f32.mrf.mxu0 }
 0x283   :  { %v4736_v50 = vpop.f32.mrf.mxu1  ;;  %v5439_v8 = vpack.c.bf16 %v4693_v12, %v4691_v48  ;;  %v4697_v54 = vadd.f32 %v4696_v5, %v4596_v22  ;;  %v8637_v12 = vld [vmem:[#allocation13_spill] sm:$0xff]  ;;  %v8638_v22 = vld [vmem:[#allocation4_spill] sm:$0xff] }
 0x284   :  { %v5447_v27 = vpack.c.bf16 %v4733_v15, %v4731_v42  ;;  %v4698_v24 = vpop.f32.mrf.mxu0  ;;  %v4737_v57 = vadd.f32 %v4736_v50, %v4636_v41  ;;  %v4610_v15 = vadd.f32 %v8637_v12, %v4509_v14  ;;  %v8640_v50 = vld [vmem:[#allocation15_spill] sm:$0xff] }
 0x285   :  { %v4738_v21 = vpop.f32.mrf.mxu1  ;;  %4834 = vst [vmem:[%s8598_s3 + $0x8] sm:$0xff] %v5439_v8  ;;  %v4699_v16 = vadd.f32 %v4698_v24, %v4598_v28  ;;  %v8639_v28 = vld [vmem:[#allocation16_spill] sm:$0xff]  ;;  %v4612_v41 = vadd.f32 %v8640_v50, %v4511_v7  ;;  %v8642_v8 = vld [vmem:[#allocation18_spill] sm:$0xff] }
 0x286   :  { %4842 = vst [vmem:[%s8598_s3 + $0x48] sm:$0xff] %v5447_v27  ;;  %v4739_v33 = vadd.f32 %v4738_v21, %v4638_v46  ;;  %v4700_v20 = vpop.f32.mrf.mxu0  ;;  %v4515_v60 = vadd.f32 %v8639_v28, %v8638_v22  ;;  %v8641_v46 = vld [vmem:[#allocation5_spill] sm:$0xff] }
 0x287   :  { %v4740_v53 = vpop.f32.mrf.mxu1  ;;  %v5440_v18 = vpack.c.bf16 %v4699_v16, %v4697_v54  ;;  %v4701_v43 = vadd.f32 %v4700_v20, %v4600_v38  ;;  %v4517_v27 = vadd.f32 %v8642_v8, %v8641_v46  ;;  %v8643_v16 = vld [vmem:[#allocation17_spill] sm:$0xff]  ;;  %v8646_v20 = vld [vmem:[#allocation20_spill] sm:$0xff] }
 0x288   :  { %v5448_v56 = vpack.c.bf16 %v4739_v33, %v4737_v57  ;;  %v4702_v62 = vpop.f32.mrf.mxu0  ;;  %v4741_v11 = vadd.f32 %v4740_v53, %v4640_v52  ;;  %v4616_v33 = vadd.f32 %v8643_v16, %v4515_v60 }
 0x289   :  { %v4742_v1 = vpop.f32.mrf.mxu1  ;;  %4835 = vst [vmem:[%s8598_s3 + $0x10] sm:$0xff] %v5440_v18  ;;  %v4703_v39 = vadd.f32 %v4702_v62, %v4602_v51  ;;  %v4618_v52 = vadd.f32 %v8644_v45, %v4517_v27  ;;  %v8649_v62 = vld [vmem:[#allocation21_spill] sm:$0xff] }
 0x28a   :  { %4843 = vst [vmem:[%s8598_s3 + $0x50] sm:$0xff] %v5448_v56  ;;  %v4743_v40 = vadd.f32 %v4742_v1, %v4642_v55  ;;  %v4706_v44 = vpop.f32.mrf.mxu0  ;;  %v8645_v55 = vld [vmem:[#allocation6_spill] sm:$0xff] }
 0x28b   :  { %v4746_v31 = vpop.f32.mrf.mxu1  ;;  %v5441_v0 = vpack.c.bf16 %v4703_v39, %v4701_v43  ;;  %v4707_v2 = vadd.f32 %v4706_v44, %v4606_v32  ;;  %v4519_v53 = vadd.f32 %v8646_v20, %v8645_v55  ;;  %v8650_v43 = vld [vmem:[#allocation23_spill] sm:$0xff] }
 0x28c   :  { %v5449_v58 = vpack.c.bf16 %v4743_v40, %v4741_v11  ;;  %v4708_v36 = vpop.f32.mrf.mxu0  ;;  %v4747_v47 = vadd.f32 %v4746_v31, %v4646_v30  ;;  %v4622_v11 = vadd.f32 %v8650_v43, %v4521_v49 }
 0x28d   :  { %v4748_v61 = vpop.f32.mrf.mxu1  ;;  %4836 = vst [vmem:[%s8598_s3 + $0x18] sm:$0xff] %v5441_v0  ;;  %v4709_v48 = vadd.f32 %v4708_v36, %v4608_v29  ;;  %v4620_v1 = vadd.f32 %v8649_v62, %v4519_v53 }
 0x28e   :  { %4844 = vst [vmem:[%s8598_s3 + $0x58] sm:$0xff] %v5449_v58  ;;  %v4749_v42 = vadd.f32 %v4748_v61, %v4648_v6  ;;  %v4710_v59 = vpop.f32.mrf.mxu0 }
 0x28f   :  { %v4750_v5 = vpop.f32.mrf.mxu1  ;;  %v5442_v38 = vpack.c.bf16 %v4709_v48, %v4707_v2  ;;  %v4711_v54 = vadd.f32 %v4710_v59, %v4610_v15 }
 0x290   :  { %v5450_v51 = vpack.c.bf16 %v4749_v42, %v4747_v47  ;;  %v4712_v24 = vpop.f32.mrf.mxu0 }
 0x291   :  { %v4751_v21 = vpop.f32.mrf.mxu1  ;;  %4837 = vst [vmem:[%s8598_s3 + $0x20] sm:$0xff] %v5442_v38  ;;  %v4713_v57 = vadd.f32 %v4712_v24, %v4612_v41 }
 0x292   :  { %4845 = vst [vmem:[%s8598_s3 + $0x60] sm:$0x11] %v5450_v51  ;;  %v4716_v23 = vpop.f32.mrf.mxu0 }
 0x293   :  { %v5443_v25 = vpack.c.bf16 %v4713_v57, %v4711_v54  ;;  %v4717_v13 = vadd.f32 %v4716_v23, %v4616_v33 }
 0x294   :  { %v4718_v4 = vpop.f32.mrf.mxu0 }
 0x295   :  { %4838 = vst [vmem:[%s8598_s3 + $0x28] sm:$0xff] %v5443_v25  ;;  %v4719_v18 = vadd.f32 %v4718_v4, %v4618_v52 }
 0x296   :  { %v4720_v56 = vpop.f32.mrf.mxu0 }
 0x297   :  { %v5444_v39 = vpack.c.bf16 %v4719_v18, %v4717_v13  ;;  %v4721_v26 = vadd.f32 %v4720_v56, %v4620_v1 }
 0x298   :  { %v4722_v40 = vpop.f32.mrf.mxu0 }
 0x299   :  { %4839 = vst [vmem:[%s8598_s3 + $0x30] sm:$0xff] %v5444_v39  ;;  %v4723_v32 = vadd.f32 %v4722_v40, %v4622_v11 }
 0x29b   :  { %v5445_v10 = vpack.c.bf16 %v4723_v32, %v4721_v26 }
 0x29d   :  { %4840 = vst [vmem:[%s8598_s3 + $0x38] sm:$0xff] %v5445_v10 }

// kernel: neuronal_network_forward.7
= control target key start
LH: loop header
LB: loop body
LE: loop exit
PB: predicated region body
PF: predicated region fallthrough
CT: control target
= control target key end

     0   :  { %v1001_v2 = vmov 0   ;;  %v79_v25 = vlaneseq  ;;  %v1002_v26 = vmov 1966171168   ;;  %s1282_s0 = inlined_call_operand.vmem [shape: bf16[2,384], index: 0, kind: input, shape index: {}]   ;;  %s1283_s1 = inlined_call_operand.vmem [shape: bf16[384,256], index: 1, kind: input, shape index: {}]   ;;  %s1284_s2 = inlined_call_operand.vmem [shape: f32[1,256], index: 2, kind: input, shape index: {}]   ;;  %s1285_s3 = inlined_call_operand.vmem [shape: bf16[256,128], index: 3, kind: input, shape index: {}]   ;;  %s1286_s4 = inlined_call_operand.vmem [shape: f32[1,128], index: 4, kind: input, shape index: {}]   ;;  %s1287_s5 = inlined_call_operand.vmem [shape: bf16[128,2], index: 5, kind: input, shape index: {}]   ;;  %s1288_s6 = inlined_call_operand.vmem [shape: f32[1,2], index: 6, kind: input, shape index: {}]   ;;  %s1289_s7 = inlined_call_operand.hbm [shape: f32[2,2], index: 7, kind: output, shape index: {}]  }
   0x1   :  { %v883_v0 = vld [vmem:[%s1283_s1 + $0x74] ss:$8 sps:$4 sm:$0xff]   ;;  %v885_v1 = vld [vmem:[%s1283_s1 + $0x70] ss:$8 sps:$4 sm:$0xff]   ;;  %429 = vmatprep.mubr.bf16.mxu1 %v1001_v2  ;;  %v886_v3 = vld [vmem:[%s1283_s1 + $0x64] ss:$8 sps:$4 sm:$0xff]   ;;  %v99_v27 = vunpack.c.l.s4 %v1002_v26 }
   0x2   :  { %356 = vmatprep.subr.bf16.mxu0 %v883_v0  ;;  %v888_v4 = vld [vmem:[%s1283_s1 + $0x60] ss:$8 sps:$4 sm:$0xff]   ;;  %v889_v5 = vld [vmem:[%s1283_s1 + $0x54] ss:$8 sps:$4 sm:$0xff]   ;;  %v891_v6 = vld [vmem:[%s1283_s1 + $0x50] ss:$8 sps:$4 sm:$0xff]  }
   0x3   :  { %357 = vmatpush1.bf16.msra.mxu0 %v885_v1  ;;  %v892_v7 = vld [vmem:[%s1283_s1 + $0x44] ss:$8 sps:$4 sm:$0xff]   ;;  %v894_v8 = vld [vmem:[%s1283_s1 + $0x40] ss:$8 sps:$4 sm:$0xff]   ;;  %v906_v9 = vld [vmem:[%s1283_s1 + $0x174] ss:$8 sps:$4 sm:$0xff]   ;;  %v100_v33 = vunpack.c.0.s8 %v99_v27 }
   0x4   :  { %358 = vmatprep.subr.bf16.mxu0 %v886_v3  ;;  %v909_v10 = vld [vmem:[%s1283_s1 + $0x170] ss:$8 sps:$4 sm:$0xff]   ;;  %v895_v11 = vld [vmem:[%s1283_s1 + $0x34] ss:$8 sps:$4 sm:$0xff]   ;;  %397 = vmatprep.subr.bf16.mxu1 %v906_v9  ;;  %v912_v12 = vld [vmem:[%s1283_s1 + $0x164] ss:$8 sps:$4 sm:$0xff]  }
   0x5   :  { %398 = vmatpush1.bf16.msra.mxu1 %v909_v10  ;;  %v915_v13 = vld [vmem:[%s1283_s1 + $0x160] ss:$8 sps:$4 sm:$0xff]   ;;  %v897_v14 = vld [vmem:[%s1283_s1 + $0x30] ss:$8 sps:$4 sm:$0xff]   ;;  %v898_v15 = vld [vmem:[%s1283_s1 + $0x24] ss:$8 sps:$4 sm:$0xff]  }
   0x6   :  { %399 = vmatprep.subr.bf16.mxu1 %v912_v12  ;;  %v918_v16 = vld [vmem:[%s1283_s1 + $0x154] ss:$8 sps:$4 sm:$0xff]   ;;  %v921_v17 = vld [vmem:[%s1283_s1 + $0x150] ss:$8 sps:$4 sm:$0xff]   ;;  %v900_v18 = vld [vmem:[%s1283_s1 + $0x20] ss:$8 sps:$4 sm:$0xff]  }
   0x7   :  { %359 = vmatpush1.bf16.msra.mxu0 %v888_v4  ;;  %v924_v19 = vld [vmem:[%s1283_s1 + $0x144] ss:$8 sps:$4 sm:$0xff]   ;;  %v901_v20 = vld [vmem:[%s1283_s1 + $0x14] ss:$8 sps:$4 sm:$0xff]   ;;  %v903_v21 = vld [vmem:[%s1283_s1 + $0x10] ss:$8 sps:$4 sm:$0xff]  }
   0x8   :  { %360 = vmatprep.subr.bf16.mxu0 %v889_v5  ;;  %v927_v22 = vld [vmem:[%s1283_s1 + $0x140] ss:$8 sps:$4 sm:$0xff]   ;;  %v930_v23 = vld [vmem:[%s1283_s1 + $0x134] ss:$8 sps:$4 sm:$0xff]   ;;  %v904_v24 = vld [vmem:[%s1283_s1 + $0x4] ss:$8 sps:$4 sm:$0xff]  }
   0x9   :  { %400 = vmatpush1.bf16.msra.mxu1 %v915_v13  ;;  %v933_v28 = vld [vmem:[%s1283_s1 + $0x130] ss:$8 sps:$4 sm:$0xff]   ;;  %v908_v29 = vld [vmem:[%s1283_s1] ss:$8 sps:$4 sm:$0xff]   ;;  %v936_v30 = vld [vmem:[%s1283_s1 + $0x124] ss:$8 sps:$4 sm:$0xff]  }
   0xa   :  { %401 = vmatprep.subr.bf16.mxu1 %v918_v16  ;;  %v910_v31 = vld [vmem:[%s1283_s1 + $0xf4] ss:$8 sps:$4 sm:$0xff]   ;;  %v1130_v32 = vshrl.u32 %v79_v25, 7  ;;  %v914_v34 = vld [vmem:[%s1283_s1 + $0xf0] ss:$8 sps:$4 sm:$0xff]   ;;  %v959_v58 = vld [vmem:[%s1285_s3 + $0x68] sm:$0xff]  }
   0xb   :  { %361 = vmatpush1.bf16.msra.mxu0 %v891_v6  ;;  %v939_v35 = vld [vmem:[%s1283_s1 + $0x120] ss:$8 sps:$4 sm:$0xff]   ;;  %v916_v36 = vld [vmem:[%s1283_s1 + $0xe4] ss:$8 sps:$4 sm:$0xff]   ;;  %v942_v37 = vld [vmem:[%s1283_s1 + $0x114] ss:$8 sps:$4 sm:$0xff]  }
   0xc   :  { %362 = vmatprep.subr.bf16.mxu0 %v892_v7  ;;  %v752_v38 = vld.sshfl [vmem:[%s1282_s0] sm:$0x13 pattern:$0x75316420]  ;;  %v103_v40 = vsub.s32 %v100_v33, %v1130_v32  ;;  %v945_v42 = vld [vmem:[%s1283_s1 + $0x110] ss:$8 sps:$4 sm:$0xff]  }
   0xd   :  { %402 = vmatpush1.bf16.msra.mxu1 %v921_v17  ;;  %v920_v39 = vld [vmem:[%s1283_s1 + $0xe0] ss:$8 sps:$4 sm:$0xff]   ;;  %v97_v41 = vcombine.high %v752_v38, %v752_v38  ;;  %v948_v43 = vld [vmem:[%s1283_s1 + $0x104] ss:$8 sps:$4 sm:$0xff]   ;;  %v922_v45 = vld [vmem:[%s1283_s1 + $0xd4] ss:$8 sps:$4 sm:$0xff]  }
   0xe   :  { %403 = vmatprep.subr.bf16.mxu1 %v924_v19  ;;  %v926_v46 = vld [vmem:[%s1283_s1 + $0xd0] ss:$8 sps:$4 sm:$0xff]   ;;  %v104_v47 = vrot.slane %v752_v38, %v103_v40  ;;  %v928_v48 = vld [vmem:[%s1283_s1 + $0xc4] ss:$8 sps:$4 sm:$0xff]   ;;  %v951_v49 = vld [vmem:[%s1283_s1 + $0x100] ss:$8 sps:$4 sm:$0xff]  }
   0xf   :  { %363 = vmatpush1.bf16.msra.mxu0 %v894_v8  ;;  %v111_v44 = vrot.slane %v97_v41, %v103_v40  ;;  %v955_v50 = vld [vmem:[%s1285_s3 + $0x78] sm:$0xff]   ;;  %v932_v52 = vld [vmem:[%s1283_s1 + $0xc0] ss:$8 sps:$4 sm:$0xff]   ;;  %v957_v54 = vld [vmem:[%s1285_s3 + $0x70] sm:$0xff]  }
  0x10   :  { %364 = vmatprep.subr.bf16.mxu0 %v895_v11  ;;  %v956_v51 = vld [vmem:[%s1285_s3 + $0x38] sm:$0xff]   ;;  %v112_v53 = vcombine.high %v104_v47, %v104_v47  ;;  %v958_v56 = vld [vmem:[%s1285_s3 + $0x30] sm:$0xff]   ;;  %v940_v59 = vld [vmem:[%s1283_s1 + $0xa4] ss:$8 sps:$4 sm:$0xff]  }
  0x11   :  { %404 = vmatpush1.bf16.msra.mxu1 %v927_v22  ;;  %388 = vmatprep.mubr.bf16.mxu0 %v111_v44  ;;  %v934_v55 = vld [vmem:[%s1283_s1 + $0xb4] ss:$8 sps:$4 sm:$0xff]   ;;  %v938_v57 = vld [vmem:[%s1283_s1 + $0xb0] ss:$8 sps:$4 sm:$0xff]   ;;  %v960_v60 = vld [vmem:[%s1285_s3 + $0x28] sm:$0xff]  }
  0x12   :  { %405 = vmatprep.subr.bf16.mxu1 %v930_v23  ;;  %v944_v61 = vld [vmem:[%s1283_s1 + $0xa0] ss:$8 sps:$4 sm:$0xff]  }
  0x13   :  { %365 = vmatpush1.bf16.msra.mxu0 %v897_v14  ;;  %v961_v62 = vld [vmem:[%s1285_s3 + $0x60] sm:$0xff]  }
  0x14   :  { %366 = vmatprep.subr.bf16.mxu0 %v898_v15 }
  0x15   :  { %406 = vmatpush1.bf16.msra.mxu1 %v933_v28 }
  0x16   :  { %407 = vmatprep.subr.bf16.mxu1 %v936_v30 }
  0x17   :  { %367 = vmatpush1.bf16.msra.mxu0 %v900_v18 }
  0x18   :  { %368 = vmatprep.subr.bf16.mxu0 %v901_v20 }
  0x19   :  { %408 = vmatpush1.bf16.msra.mxu1 %v939_v35 }
  0x1a   :  { %409 = vmatprep.subr.bf16.mxu1 %v942_v37 }
  0x1b   :  { %369 = vmatpush1.bf16.msra.mxu0 %v903_v21 }
  0x1c   :  { %370 = vmatprep.subr.bf16.mxu0 %v904_v24 }
  0x1d   :  { %410 = vmatpush1.bf16.msra.mxu1 %v945_v42 }
  0x1e   :  { %411 = vmatprep.subr.bf16.mxu1 %v948_v43 }
  0x1f   :  { %371 = vmatpush1.bf16.msra.mxu0 %v908_v29 }
  0x20   :  { %372 = vmatprep.subr.bf16.mxu0 %v910_v31 }
  0x21   :  { %412 = vmatpush1.bf16.msra.mxu1 %v951_v49 }
  0x22   :  { %827 = vmatprep.subr.bf16.mxu1 %v955_v50 }
  0x23   :  { %373 = vmatpush2.bf16.msra.mxu0 %v914_v34 }
  0x24   :  { %374 = vmatprep.subr.bf16.mxu0 %v916_v36  ;;  %430 = vmatmul.mubr.bf16.vlgmr.msra.gmra.mxu1 %v112_v53 }
  0x25   :  { %828 = vmatpush3.bf16.msra.mxu1 %v956_v51 }
  0x26   :  { %829 = vmatprep.subr.bf16.mxu1 %v957_v54 }
  0x27   :  { %375 = vmatpush2.bf16.msra.mxu0 %v920_v39 }
  0x28   :  { %376 = vmatprep.subr.bf16.mxu0 %v922_v45 }
  0x29   :  { %830 = vmatpush3.bf16.msra.mxu1 %v958_v56 }
  0x2a   :  { %831 = vmatprep.subr.bf16.mxu1 %v959_v58 }
  0x2b   :  { %377 = vmatpush2.bf16.msra.mxu0 %v926_v46 }
  0x2c   :  { %378 = vmatprep.subr.bf16.mxu0 %v928_v48 }
  0x2f   :  { %379 = vmatpush2.bf16.msra.mxu0 %v932_v52 }
  0x30   :  { %380 = vmatprep.subr.bf16.mxu0 %v934_v55 }
  0x33   :  { %381 = vmatpush2.bf16.msra.mxu0 %v938_v57 }
  0x34   :  { %12 = vsyncpa [#allocation3], 0  ;;  %382 = vmatprep.subr.bf16.mxu0 %v940_v59  ;;  %v946_v63 = vld [vmem:[%s1283_s1 + $0x94] ss:$8 sps:$4 sm:$0xff]   ;;  %832 = vmatpush3.bf16.msra.mxu1 %v960_v60  ;;  %v962_v0 = vld [vmem:[%s1285_s3 + $0x20] sm:$0xff]   ;;  %v1003_v13 = vmov 0.0  }
  0x35   :  { %v950_v1 = vld [vmem:[%s1283_s1 + $0x90] ss:$8 sps:$4 sm:$0xff]   ;;  %833 = vmatprep.subr.bf16.mxu1 %v961_v62  ;;  %v952_v2 = vld [vmem:[%s1283_s1 + $0x84] ss:$8 sps:$4 sm:$0xff]   ;;  %v954_v3 = vld [vmem:[%s1283_s1 + $0x80] ss:$8 sps:$4 sm:$0xff]  }
  0x36   :  { %v963_v4 = vld [vmem:[%s1285_s3 + $0x58] sm:$0xff]   ;;  %v965_v6 = vld [vmem:[%s1285_s3 + $0x50] sm:$0xff]   ;;  %v967_v8 = vld [vmem:[%s1285_s3 + $0x48] sm:$0xff]   ;;  %v81_v22 = vsub.s32 0, %v1130_v32  ;;  %v85_v24 = vsub.s32 1, %v1130_v32  ;;  %vm1004_vm2 = vmmov 0  }
  0x37   :  { %383 = vmatpush2.bf16.msra.mxu0 %v944_v61  ;;  %v964_v5 = vld [vmem:[%s1285_s3 + $0x18] sm:$0xff]   ;;  %v966_v7 = vld [vmem:[%s1285_s3 + $0x10] sm:$0xff]   ;;  %v968_v9 = vld [vmem:[%s1285_s3 + $0x8] sm:$0xff]   ;;  %s1005_s29 = smov [#allocation2]   ;;  %vm736_vm4 = vcmask 9216  }
  0x38   :  { %384 = vmatprep.subr.bf16.mxu0 %v946_v63  ;;  %834 = vmatpush3.bf16.msra.mxu1 %v962_v0  ;;  %v969_v10 = vld [vmem:[%s1285_s3 + $0x40] sm:$0xff]   ;;  %v971_v12 = vld [vmem:[%s1287_s5 + $0x38] sm:$0xff]   ;;  %v972_v14 = vld [vmem:[%s1287_s5 + $0x30] sm:$0xff]   ;;  %s744_s30 = sshll.u32 %s1005_s29, 4  ;;  %s745_s30 = int_to_ptr.vmem [resolvable:$true] %s744_s30 }
  0x39   :  { %835 = vmatprep.subr.bf16.mxu1 %v963_v4  ;;  %v970_v11 = vld [vmem:[%s1285_s3] sm:$0xff]   ;;  %v973_v15 = vld [vmem:[%s1287_s5 + $0x28] sm:$0xff]   ;;  %v975_v17 = vld [vmem:[%s1287_s5 + $0x18] sm:$0xff]   ;;  %p984_p1 = scmp.lt.s32.totalorder %s745_s30, %s745_s30 }
  0x3a   :  { %v974_v16 = vld [vmem:[%s1287_s5 + $0x20] sm:$0xff]   ;;  %v976_v32 = vld [vmem:[%s1287_s5 + $0x10] sm:$0xff]   ;;  %v977_v42 = vld [vmem:[%s1287_s5 + $0x8] sm:$0xff]  }
  0x3b   :  { %385 = vmatpush2.bf16.msra.mxu0 %v950_v1  ;;  %v77_v23 = vld [vmem:[%s1284_s2] sm:$0x3] }
  0x3c   :  { %386 = vmatprep.subr.bf16.mxu0 %v952_v2  ;;  %836 = vmatpush3.bf16.msra.mxu1 %v964_v5  ;;  %v82_v25 = vrot.slane %v77_v23, %v81_v22  ;;  %v86_v26 = vrot.slane %v77_v23, %v85_v24  ;;  %v978_v43 = vld [vmem:[%s1287_s5] sm:$0xff]  }
  0x3d   :  { %837 = vmatprep.subr.bf16.mxu1 %v965_v6  ;;  %v801_v45 = vld [vmem:[%s1286_s4] ss:$0 sm:$0xff]  ;;  %s979_s4 = scalar_lea.vmem %s745_s30, 32 }
  0x3e   :  { %v818_v54 = vld [vmem:[%s1288_s6] ss:$0 sm:$0xff]  ;;  %p980_p0 = scmp.ne.s32.totalorder %s745_s30, %s979_s4  ;;  %p985_p2 = scmp.lt.s32.totalorder %s979_s4, %s979_s4 }
  0x3f   :  { %387 = vmatpush2.bf16.msra.mxu0 %v954_v3 }
  0x40   :  { %838 = vmatpush3.bf16.msra.mxu1 %v966_v7  ;;  %858 = vmatprep.subr.bf16.mxu0 %v1003_v13  ;;  %p986_p3 = por %p985_p2, %p984_p1 }
  0x41   :  { %839 = vmatprep.subr.bf16.mxu1 %v967_v8 }
  0x42   :  { %389 = vmatmul.mubr.bf16.vlgmr.msra.gmra.mxu0 %v104_v47  ;;  %p987_p4 = pnand %p986_p3, %p980_p0 }
  0x43   :  { %859 = vmatpush3.bf16.msra.mxu0 %v971_v12  ;;  %874 = vmatprep.mubr.msk.bf16.mxu0 %vm1004_vm2, %v1003_v13 }
  0x44   :  { %840 = vmatpush3.bf16.msra.mxu1 %v968_v9  ;;  %860 = vmatprep.subr.bf16.mxu0 %v1003_v13 }
  0x45   :  { %841 = vmatprep.subr.bf16.mxu1 %v969_v10 }
  0x47   :  { %861 = vmatpush3.bf16.msra.mxu0 %v972_v14 }
  0x48   :  { %842 = vmatpush3.bf16.msra.mxu1 %v970_v11  ;;  %862 = vmatprep.subr.bf16.mxu0 %v1003_v13 }
  0x4b   :  { %863 = vmatpush3.bf16.msra.mxu0 %v973_v15 }
  0x4c   :  { %864 = vmatprep.subr.bf16.mxu0 %v1003_v13 }
  0x4f   :  { %865 = vmatpush3.bf16.msra.mxu0 %v974_v16 }
  0x50   :  { %866 = vmatprep.subr.bf16.mxu0 %v1003_v13 }
  0x53   :  { %867 = vmatpush3.bf16.msra.mxu0 %v975_v17 }
  0x54   :  { %868 = vmatprep.subr.bf16.mxu0 %v1003_v13 }
  0x57   :  { %869 = vmatpush3.bf16.msra.mxu0 %v976_v32 }
  0x58   :  { %870 = vmatprep.subr.bf16.mxu0 %v1003_v13 }
  0x5b   :  { %871 = vmatpush3.bf16.msra.mxu0 %v977_v42 }
  0x5c   :  { %872 = vmatprep.subr.bf16.mxu0 %v1003_v13 }
  0x5f   :  { %873 = vmatpush3.bf16.msra.mxu0 %v978_v43 }
  0xe4   :  { %v431_v18 = vpop.f32.mrf.mxu1 }
  0xe6   :  { %v433_v19 = vpop.f32.mrf.mxu1 }
  0xe8   :  { %v435_v20 = vpop.f32.mrf.mxu1 }
  0xea   :  { %v436_v21 = vpop.f32.mrf.mxu1 }
 0x102   :  { %v390_v27 = vpop.f32.mrf.mxu0 }
 0x103   :  { %v391_v28 = vadd.f32 %v390_v27, %v82_v25 }
 0x104   :  { %v392_v29 = vpop.f32.mrf.mxu0 }
 0x105   :  { %v432_v30 = vadd.f32 %v431_v18, %v391_v28  ;;  %v393_v31 = vadd.f32 %v392_v29, %v86_v26 }
 0x106   :  { %v394_v33 = vpop.f32.mrf.mxu0 }
 0x107   :  { %vm438_vm0 = vcmp.ge.f32.partialorder %v432_v30, 0.0  ;;  %v440_v34 = vmul.f32 0.01, %v432_v30  ;;  %v434_v35 = vadd.f32 %v433_v19, %v393_v31 }
 0x108   :  { %v395_v36 = vpop.f32.mrf.mxu0 }
 0x109   :  { %v441_v37 = vmul.f32 0.01, %v434_v35  ;;  %vm439_vm1 = vcmp.ge.f32.partialorder %v434_v35, 0.0  ;;  %v442_v38 = vsel %vm438_vm0, %v432_v30, %v440_v34 }
 0x10a   :  { %v444_v41 = vpack.c.bf16 %v442_v38, %v442_v38 }
 0x10b   :  { %v443_v39 = vsel %vm439_vm1, %v434_v35, %v441_v37 }
 0x10c   :  { %v445_v40 = vpack.c.bf16 %v443_v39, %v443_v39 }
 0x10e   :  { %613 = vmatprep.mubr.bf16.mxu1 %v445_v40 }
 0x10f   :  { %614 = vmatmul.mubr.bf16.vlgmr.msra.gmra.mxu1 %v444_v41 }
 0x1cf   :  { %v843_v44 = vpop.f32.mrf.mxu1 }
 0x1d1   :  { %v844_v46 = vpop.f32.mrf.mxu1 }
 0x1d2   :  { %v845_v47 = vadd.f32 %v844_v46, %v843_v44 }
 0x1d3   :  { %v846_v48 = vpop.f32.mrf.mxu1 }
 0x1d4   :  { %v616_v49 = vadd.f32 %v845_v47, %v801_v45 }
 0x1d5   :  { %v847_v50 = vpop.f32.mrf.mxu1 }
 0x1d6   :  { %vm621_vm3 = vcmp.ge.f32.partialorder %v616_v49, 0.0  ;;  %v622_v51 = vmul.f32 0.01, %v616_v49 }
 0x1d8   :  { %v623_v52 = vsel %vm621_vm3, %v616_v49, %v622_v51 }
 0x1d9   :  { %v624_v53 = vpack.c.bf16 %v623_v52, %v623_v52 }
 0x1db   :  { %875 = vmatmul.mubr.bf16.vlgmr.msra.gmra.mxu0 %v624_v53 }
 0x29b   :  { %v730_v55 = vpop.f32.mrf.mxu0 }
 0x29c   :  { %v731_v56 = vadd.f32 %v818_v54, %v730_v55 }
 0x29d   :  { %v876_v57 = vpop.f32.mrf.mxu0 }
 0x29e   :  { %737 = vst.msk [vmem:[#allocation2] sm:$0x3] %vm736_vm4, %v731_v56 }
 0x29f   :  { %v733_v58 = vpop.f32.mrf.mxu0 }
 0x2a0   :  { %990 = shalt.err (!%p987_p4)
}
 0x2a1   :  { %747 = dma.vmem_to_hbm [thread:$0]  %s745_s30, 32, %s1289_s7, [#allocation3]   ;;  %v877_v59 = vpop.f32.mrf.mxu0 }
 0x2a2   :  { %999 = dma.done.wait [#allocation3], 32  }
 0x2a3   :  { %1000 = vsyncadd [#allocation3], 4294967264 }
 0x2a4   :  { %751 = vsyncpa [#allocation3], 1 }

// kernel: neuronal_network_forward.6
= control target key start
LH: loop header
LB: loop body
LE: loop exit
PB: predicated region body
PF: predicated region fallthrough
CT: control target
= control target key end

     0   :  { %s6475_s1 = inlined_call_operand.vmem [shape: bf16[2304,384], index: 1, kind: input, shape index: {}]   ;;  %s6476_s0 = inlined_call_operand.vmem [shape: bf16[8,2304], index: 0, kind: input, shape index: {}]   ;;  %s6477_s2 = inlined_call_operand.vmem [shape: f32[1,384], index: 2, kind: input, shape index: {}]   ;;  %s6478_s3 = inlined_call_operand.vmem [shape: bf16[8,384], index: 3, kind: output, shape index: {}]  }
   0x1   :  { %v4384_v0 = vld [vmem:[%s6475_s1 + $0xac] ss:$12 sps:$4 sm:$0xff]   ;;  %v4388_v2 = vld [vmem:[%s6475_s1 + $0xa8] ss:$12 sps:$4 sm:$0xff]   ;;  %v4394_v6 = vld [vmem:[%s6475_s1 + $0x90] ss:$12 sps:$4 sm:$0xff]  }
   0x2   :  { %v4386_v1 = vld [vmem:[%s6475_s1 + $0x22c] ss:$12 sps:$4 sm:$0xff]   ;;  %2984 = vmatprep.subr.bf16.mxu0 %v4384_v0  ;;  %v4389_v3 = vld [vmem:[%s6475_s1 + $0x228] ss:$12 sps:$4 sm:$0xff]   ;;  %v4395_v7 = vld [vmem:[%s6475_s1 + $0x210] ss:$12 sps:$4 sm:$0xff]  }
   0x3   :  { %3025 = vmatprep.subr.bf16.mxu1 %v4386_v1  ;;  %v4390_v4 = vld [vmem:[%s6475_s1 + $0x94] ss:$12 sps:$4 sm:$0xff]   ;;  %2985 = vmatpush1.bf16.msra.mxu0 %v4388_v2  ;;  %v4396_v8 = vld [vmem:[%s6475_s1 + $0x7c] ss:$12 sps:$4 sm:$0xff]   ;;  %v4400_v10 = vld [vmem:[%s6475_s1 + $0x78] ss:$12 sps:$4 sm:$0xff]  }
   0x4   :  { %3026 = vmatpush1.bf16.msra.mxu1 %v4389_v3  ;;  %v4392_v5 = vld [vmem:[%s6475_s1 + $0x214] ss:$12 sps:$4 sm:$0xff]   ;;  %2986 = vmatprep.subr.bf16.mxu0 %v4390_v4  ;;  %v4398_v9 = vld [vmem:[%s6475_s1 + $0x1fc] ss:$12 sps:$4 sm:$0xff]   ;;  %v4401_v11 = vld [vmem:[%s6475_s1 + $0x1f8] ss:$12 sps:$4 sm:$0xff]  }
   0x5   :  { %3027 = vmatprep.subr.bf16.mxu1 %v4392_v5  ;;  %v4402_v12 = vld [vmem:[%s6475_s1 + $0x64] ss:$12 sps:$4 sm:$0xff]   ;;  %v4406_v14 = vld [vmem:[%s6475_s1 + $0x60] ss:$12 sps:$4 sm:$0xff]   ;;  %v4412_v18 = vld [vmem:[%s6475_s1 + $0x48] ss:$12 sps:$4 sm:$0xff]  }
   0x6   :  { %v4404_v13 = vld [vmem:[%s6475_s1 + $0x1e4] ss:$12 sps:$4 sm:$0xff]   ;;  %v4407_v15 = vld [vmem:[%s6475_s1 + $0x1e0] ss:$12 sps:$4 sm:$0xff]   ;;  %v4413_v19 = vld [vmem:[%s6475_s1 + $0x1c8] ss:$12 sps:$4 sm:$0xff]  }
   0x7   :  { %2987 = vmatpush1.bf16.msra.mxu0 %v4394_v6  ;;  %v4408_v16 = vld [vmem:[%s6475_s1 + $0x4c] ss:$12 sps:$4 sm:$0xff]   ;;  %v4414_v20 = vld [vmem:[%s6475_s1 + $0x34] ss:$12 sps:$4 sm:$0xff]   ;;  %v4418_v22 = vld [vmem:[%s6475_s1 + $0x30] ss:$12 sps:$4 sm:$0xff]  }
   0x8   :  { %3028 = vmatpush1.bf16.msra.mxu1 %v4395_v7  ;;  %2988 = vmatprep.subr.bf16.mxu0 %v4396_v8  ;;  %v4410_v17 = vld [vmem:[%s6475_s1 + $0x1cc] ss:$12 sps:$4 sm:$0xff]   ;;  %v4416_v21 = vld [vmem:[%s6475_s1 + $0x1b4] ss:$12 sps:$4 sm:$0xff]   ;;  %v4419_v23 = vld [vmem:[%s6475_s1 + $0x1b0] ss:$12 sps:$4 sm:$0xff]  }
   0x9   :  { %3029 = vmatprep.subr.bf16.mxu1 %v4398_v9  ;;  %v4420_v24 = vld [vmem:[%s6475_s1 + $0x1c] ss:$12 sps:$4 sm:$0xff]   ;;  %v4424_v26 = vld [vmem:[%s6475_s1 + $0x18] ss:$12 sps:$4 sm:$0xff]   ;;  %v4430_v30 = vld [vmem:[%s6475_s1] ss:$12 sps:$4 sm:$0xff]  }
   0xa   :  { %v4422_v25 = vld [vmem:[%s6475_s1 + $0x19c] ss:$12 sps:$4 sm:$0xff]   ;;  %v4425_v27 = vld [vmem:[%s6475_s1 + $0x198] ss:$12 sps:$4 sm:$0xff]   ;;  %v4431_v31 = vld [vmem:[%s6475_s1 + $0x180] ss:$12 sps:$4 sm:$0xff]  }
   0xb   :  { %2989 = vmatpush1.bf16.msra.mxu0 %v4400_v10  ;;  %v4426_v28 = vld [vmem:[%s6475_s1 + $0x4] ss:$12 sps:$4 sm:$0xff]   ;;  %v4432_v32 = vld [vmem:[%s6475_s1 + $0x16c] ss:$12 sps:$4 sm:$0xff]   ;;  %v4436_v34 = vld [vmem:[%s6475_s1 + $0x168] ss:$12 sps:$4 sm:$0xff]  }
   0xc   :  { %3030 = vmatpush1.bf16.msra.mxu1 %v4401_v11  ;;  %2990 = vmatprep.subr.bf16.mxu0 %v4402_v12  ;;  %v4428_v29 = vld [vmem:[%s6475_s1 + $0x184] ss:$12 sps:$4 sm:$0xff]   ;;  %v4434_v33 = vld [vmem:[%s6475_s1 + $0x2ec] ss:$12 sps:$4 sm:$0xff]   ;;  %v4437_v35 = vld [vmem:[%s6475_s1 + $0x2e8] ss:$12 sps:$4 sm:$0xff]  }
   0xd   :  { %3031 = vmatprep.subr.bf16.mxu1 %v4404_v13  ;;  %v4438_v36 = vld [vmem:[%s6475_s1 + $0x154] ss:$12 sps:$4 sm:$0xff]   ;;  %v4442_v38 = vld [vmem:[%s6475_s1 + $0x150] ss:$12 sps:$4 sm:$0xff]   ;;  %v4448_v42 = vld [vmem:[%s6475_s1 + $0x138] ss:$12 sps:$4 sm:$0xff]  }
   0xe   :  { %v4440_v37 = vld [vmem:[%s6475_s1 + $0x2d4] ss:$12 sps:$4 sm:$0xff]   ;;  %v4443_v39 = vld [vmem:[%s6475_s1 + $0x2d0] ss:$12 sps:$4 sm:$0xff]   ;;  %v4449_v43 = vld [vmem:[%s6475_s1 + $0x2b8] ss:$12 sps:$4 sm:$0xff]  }
   0xf   :  { %2991 = vmatpush1.bf16.msra.mxu0 %v4406_v14  ;;  %v4444_v40 = vld [vmem:[%s6475_s1 + $0x13c] ss:$12 sps:$4 sm:$0xff]   ;;  %v4450_v44 = vld [vmem:[%s6475_s1 + $0x124] ss:$12 sps:$4 sm:$0xff]   ;;  %v4454_v49 = vld [vmem:[%s6475_s1 + $0x120] ss:$12 sps:$4 sm:$0xff]  }
  0x10   :  { %3032 = vmatpush1.bf16.msra.mxu1 %v4407_v15  ;;  %2992 = vmatprep.subr.bf16.mxu0 %v4408_v16  ;;  %v4446_v41 = vld [vmem:[%s6475_s1 + $0x2bc] ss:$12 sps:$4 sm:$0xff]   ;;  %v4452_v45 = vld [vmem:[%s6475_s1 + $0x2a4] ss:$12 sps:$4 sm:$0xff]   ;;  %v4455_v50 = vld [vmem:[%s6475_s1 + $0x2a0] ss:$12 sps:$4 sm:$0xff]  }
  0x11   :  { %3033 = vmatprep.subr.bf16.mxu1 %v4410_v17  ;;  %v15_v46 = vld [vmem:[%s6476_s0] sm:$0xff]  ;;  %v16_v48 = vld [vmem:[%s6476_s0 + $0x8] sm:$0xff]  ;;  %v4466_v58 = vld [vmem:[%s6475_s1 + $0xf0] ss:$12 sps:$4 sm:$0xff]  }
  0x12   :  { %v5140_v47 = vcombine.high %v15_v46, %v15_v46  ;;  %v5151_v51 = vcombine.high %v16_v48, %v16_v48  ;;  %v4456_v52 = vld [vmem:[%s6475_s1 + $0x10c] ss:$12 sps:$4 sm:$0xff]   ;;  %v4460_v54 = vld [vmem:[%s6475_s1 + $0x108] ss:$12 sps:$4 sm:$0xff]   ;;  %v4467_v59 = vld [vmem:[%s6475_s1 + $0x270] ss:$12 sps:$4 sm:$0xff]   ;;  %v5209_v6 = vcombine.low %v15_v46, %v15_v46  ;;  %v5211_v7 = vcombine.low %v16_v48, %v16_v48 }
  0x13   :  { %2993 = vmatpush1.bf16.msra.mxu0 %v4412_v18  ;;  %v4458_v53 = vld [vmem:[%s6475_s1 + $0x28c] ss:$12 sps:$4 sm:$0xff]   ;;  %v4461_v55 = vld [vmem:[%s6475_s1 + $0x288] ss:$12 sps:$4 sm:$0xff]   ;;  %v4474_v0 = vld [vmem:[%s6475_s1 + $0xc4] ss:$12 sps:$4 sm:$0xff]  }
  0x14   :  { %3034 = vmatpush1.bf16.msra.mxu1 %v4413_v19  ;;  %2994 = vmatprep.subr.bf16.mxu0 %v4414_v20  ;;  %v4462_v56 = vld [vmem:[%s6475_s1 + $0xf4] ss:$12 sps:$4 sm:$0xff]   ;;  %v4468_v60 = vld [vmem:[%s6475_s1 + $0xdc] ss:$12 sps:$4 sm:$0xff]   ;;  %v4472_v62 = vld [vmem:[%s6475_s1 + $0xd8] ss:$12 sps:$4 sm:$0xff]  }
  0x15   :  { %3035 = vmatprep.subr.bf16.mxu1 %v4416_v21  ;;  %3016 = vmatprep.mubr.bf16.mxu0 %v5140_v47  ;;  %v4464_v57 = vld [vmem:[%s6475_s1 + $0x274] ss:$12 sps:$4 sm:$0xff]   ;;  %v4470_v61 = vld [vmem:[%s6475_s1 + $0x25c] ss:$12 sps:$4 sm:$0xff]   ;;  %v4473_v63 = vld [vmem:[%s6475_s1 + $0x258] ss:$12 sps:$4 sm:$0xff]  }
  0x16   :  { %3057 = vmatprep.mubr.bf16.mxu1 %v5151_v51  ;;  %v4476_v1 = vld [vmem:[%s6475_s1 + $0x244] ss:$12 sps:$4 sm:$0xff]   ;;  %v4478_v2 = vld [vmem:[%s6475_s1 + $0xc0] ss:$12 sps:$4 sm:$0xff]   ;;  %v4484_v8 = vld [vmem:[%s6475_s1 + $0x3a8] ss:$12 sps:$4 sm:$0xff]  }
  0x17   :  { %2995 = vmatpush1.bf16.msra.mxu0 %v4418_v22  ;;  %v4479_v3 = vld [vmem:[%s6475_s1 + $0x240] ss:$12 sps:$4 sm:$0xff]   ;;  %v4487_v9 = vld [vmem:[%s6475_s1 + $0x528] ss:$12 sps:$4 sm:$0xff]   ;;  %v4490_v12 = vld [vmem:[%s6475_s1 + $0x390] ss:$12 sps:$4 sm:$0xff]  }
  0x18   :  { %3036 = vmatpush1.bf16.msra.mxu1 %v4419_v23  ;;  %2996 = vmatprep.subr.bf16.mxu0 %v4420_v24  ;;  %v4486_v4 = vld [vmem:[%s6475_s1 + $0x3ac] ss:$12 sps:$4 sm:$0xff]   ;;  %v4492_v10 = vld [vmem:[%s6475_s1 + $0x394] ss:$12 sps:$4 sm:$0xff]   ;;  %v4493_v13 = vld [vmem:[%s6475_s1 + $0x510] ss:$12 sps:$4 sm:$0xff]  }
  0x19   :  { %3037 = vmatprep.subr.bf16.mxu1 %v4422_v25  ;;  %v4489_v5 = vld [vmem:[%s6475_s1 + $0x52c] ss:$12 sps:$4 sm:$0xff]   ;;  %v4495_v11 = vld [vmem:[%s6475_s1 + $0x514] ss:$12 sps:$4 sm:$0xff]   ;;  %v4498_v14 = vld [vmem:[%s6475_s1 + $0x37c] ss:$12 sps:$4 sm:$0xff]  }
  0x1a   :  { %v4501_v15 = vld [vmem:[%s6475_s1 + $0x4fc] ss:$12 sps:$4 sm:$0xff]   ;;  %v4496_v16 = vld [vmem:[%s6475_s1 + $0x378] ss:$12 sps:$4 sm:$0xff]   ;;  %v4502_v20 = vld [vmem:[%s6475_s1 + $0x360] ss:$12 sps:$4 sm:$0xff]  }
  0x1b   :  { %2997 = vmatpush1.bf16.msra.mxu0 %v4424_v26  ;;  %v4499_v17 = vld [vmem:[%s6475_s1 + $0x4f8] ss:$12 sps:$4 sm:$0xff]   ;;  %v4505_v21 = vld [vmem:[%s6475_s1 + $0x4e0] ss:$12 sps:$4 sm:$0xff]   ;;  %v4508_v24 = vld [vmem:[%s6475_s1 + $0x348] ss:$12 sps:$4 sm:$0xff]  }
  0x1c   :  { %3038 = vmatpush1.bf16.msra.mxu1 %v4425_v27  ;;  %2998 = vmatprep.subr.bf16.mxu0 %v4426_v28  ;;  %v4504_v18 = vld [vmem:[%s6475_s1 + $0x364] ss:$12 sps:$4 sm:$0xff]   ;;  %v4510_v22 = vld [vmem:[%s6475_s1 + $0x34c] ss:$12 sps:$4 sm:$0xff]   ;;  %v4511_v25 = vld [vmem:[%s6475_s1 + $0x4c8] ss:$12 sps:$4 sm:$0xff]  }
  0x1d   :  { %3039 = vmatprep.subr.bf16.mxu1 %v4428_v29  ;;  %v4507_v19 = vld [vmem:[%s6475_s1 + $0x4e4] ss:$12 sps:$4 sm:$0xff]   ;;  %v4513_v23 = vld [vmem:[%s6475_s1 + $0x4cc] ss:$12 sps:$4 sm:$0xff]   ;;  %v4516_v26 = vld [vmem:[%s6475_s1 + $0x334] ss:$12 sps:$4 sm:$0xff]  }
  0x1e   :  { %v4519_v27 = vld [vmem:[%s6475_s1 + $0x4b4] ss:$12 sps:$4 sm:$0xff]   ;;  %v4514_v28 = vld [vmem:[%s6475_s1 + $0x330] ss:$12 sps:$4 sm:$0xff]  }
  0x1f   :  { %2999 = vmatpush1.bf16.msra.mxu0 %v4430_v30  ;;  %v4517_v29 = vld [vmem:[%s6475_s1 + $0x4b0] ss:$12 sps:$4 sm:$0xff]   ;;  %v4540_v46 = vld [vmem:[%s6475_s1 + $0x454] ss:$12 sps:$4 sm:$0xff]  }
  0x20   :  { %3040 = vmatpush1.bf16.msra.mxu1 %v4431_v31  ;;  %3000 = vmatprep.subr.bf16.mxu0 %v4432_v32  ;;  %v4522_v30 = vld [vmem:[%s6475_s1 + $0x31c] ss:$12 sps:$4 sm:$0xff]   ;;  %v5290_v32 = vld [vmem:[%s6476_s0 + $0x10] sm:$0xff] }
  0x21   :  { %3041 = vmatprep.subr.bf16.mxu1 %v4434_v33  ;;  %v4525_v31 = vld [vmem:[%s6475_s1 + $0x49c] ss:$12 sps:$4 sm:$0xff]   ;;  %v4543_v48 = vld [vmem:[%s6475_s1 + $0x5d4] ss:$12 sps:$4 sm:$0xff]  }
  0x22   :  { %v5295_v33 = vld [vmem:[%s6476_s0 + $0x18] sm:$0xff] }
  0x23   :  { %3001 = vmatpush2.bf16.msra.mxu0 %v4436_v34  ;;  %v4520_v34 = vld [vmem:[%s6475_s1 + $0x318] ss:$12 sps:$4 sm:$0xff]  }
  0x24   :  { %3042 = vmatpush2.bf16.msra.mxu1 %v4437_v35  ;;  %3002 = vmatprep.subr.bf16.mxu0 %v4438_v36  ;;  %v4523_v35 = vld [vmem:[%s6475_s1 + $0x498] ss:$12 sps:$4 sm:$0xff]   ;;  %v5305_v36 = vcombine.high %v5290_v32, %v5290_v32 }
  0x25   :  { %3043 = vmatprep.subr.bf16.mxu1 %v4440_v37  ;;  %v5309_v37 = vcombine.high %v5295_v33, %v5295_v33 }
  0x27   :  { %3003 = vmatpush2.bf16.msra.mxu0 %v4442_v38  ;;  %v4528_v38 = vld [vmem:[%s6475_s1 + $0x304] ss:$12 sps:$4 sm:$0xff]  }
  0x28   :  { %3044 = vmatpush2.bf16.msra.mxu1 %v4443_v39  ;;  %3004 = vmatprep.subr.bf16.mxu0 %v4444_v40  ;;  %v4531_v39 = vld [vmem:[%s6475_s1 + $0x484] ss:$12 sps:$4 sm:$0xff]   ;;  %v4526_v40 = vld [vmem:[%s6475_s1 + $0x300] ss:$12 sps:$4 sm:$0xff]  }
  0x29   :  { %3045 = vmatprep.subr.bf16.mxu1 %v4446_v41  ;;  %v4529_v41 = vld [vmem:[%s6475_s1 + $0x480] ss:$12 sps:$4 sm:$0xff]  }
  0x2b   :  { %3005 = vmatpush2.bf16.msra.mxu0 %v4448_v42  ;;  %v4534_v42 = vld [vmem:[%s6475_s1 + $0x46c] ss:$12 sps:$4 sm:$0xff]  }
  0x2c   :  { %3046 = vmatpush2.bf16.msra.mxu1 %v4449_v43  ;;  %3006 = vmatprep.subr.bf16.mxu0 %v4450_v44  ;;  %v4537_v43 = vld [vmem:[%s6475_s1 + $0x5ec] ss:$12 sps:$4 sm:$0xff]   ;;  %v4532_v44 = vld [vmem:[%s6475_s1 + $0x468] ss:$12 sps:$4 sm:$0xff]  }
  0x2d   :  { %3047 = vmatprep.subr.bf16.mxu1 %v4452_v45  ;;  %v4535_v45 = vld [vmem:[%s6475_s1 + $0x5e8] ss:$12 sps:$4 sm:$0xff]  }
  0x2f   :  { %3007 = vmatpush2.bf16.msra.mxu0 %v4454_v49  ;;  %v4538_v49 = vld [vmem:[%s6475_s1 + $0x450] ss:$12 sps:$4 sm:$0xff]  }
  0x30   :  { %3048 = vmatpush2.bf16.msra.mxu1 %v4455_v50  ;;  %3008 = vmatprep.subr.bf16.mxu0 %v4456_v52  ;;  %v4541_v50 = vld [vmem:[%s6475_s1 + $0x5d0] ss:$12 sps:$4 sm:$0xff]  }
  0x31   :  { %3049 = vmatprep.subr.bf16.mxu1 %v4458_v53  ;;  %v4546_v52 = vld [vmem:[%s6475_s1 + $0x43c] ss:$12 sps:$4 sm:$0xff]  }
  0x32   :  { %v4549_v53 = vld [vmem:[%s6475_s1 + $0x5bc] ss:$12 sps:$4 sm:$0xff]  }
  0x33   :  { %3009 = vmatpush2.bf16.msra.mxu0 %v4460_v54  ;;  %v4544_v54 = vld [vmem:[%s6475_s1 + $0x438] ss:$12 sps:$4 sm:$0xff]  }
  0x34   :  { %3050 = vmatpush2.bf16.msra.mxu1 %v4461_v55  ;;  %3010 = vmatprep.subr.bf16.mxu0 %v4462_v56  ;;  %v4547_v55 = vld [vmem:[%s6475_s1 + $0x5b8] ss:$12 sps:$4 sm:$0xff]  }
  0x35   :  { %3051 = vmatprep.subr.bf16.mxu1 %v4464_v57  ;;  %v4552_v56 = vld [vmem:[%s6475_s1 + $0x424] ss:$12 sps:$4 sm:$0xff]  }
  0x36   :  { %v4555_v57 = vld [vmem:[%s6475_s1 + $0x5a4] ss:$12 sps:$4 sm:$0xff]  }
  0x37   :  { %3011 = vmatpush2.bf16.msra.mxu0 %v4466_v58  ;;  %v4550_v58 = vld [vmem:[%s6475_s1 + $0x420] ss:$12 sps:$4 sm:$0xff]  }
  0x38   :  { %3052 = vmatpush2.bf16.msra.mxu1 %v4467_v59  ;;  %3012 = vmatprep.subr.bf16.mxu0 %v4468_v60  ;;  %v4553_v59 = vld [vmem:[%s6475_s1 + $0x5a0] ss:$12 sps:$4 sm:$0xff]  }
  0x39   :  { %3053 = vmatprep.subr.bf16.mxu1 %v4470_v61  ;;  %v4558_v60 = vld [vmem:[%s6475_s1 + $0x40c] ss:$12 sps:$4 sm:$0xff]  }
  0x3a   :  { %v4561_v61 = vld [vmem:[%s6475_s1 + $0x58c] ss:$12 sps:$4 sm:$0xff]  }
  0x3b   :  { %3013 = vmatpush2.bf16.msra.mxu0 %v4472_v62  ;;  %v4556_v62 = vld [vmem:[%s6475_s1 + $0x408] ss:$12 sps:$4 sm:$0xff]  }
  0x3c   :  { %3054 = vmatpush2.bf16.msra.mxu1 %v4473_v63  ;;  %3014 = vmatprep.subr.bf16.mxu0 %v4474_v0  ;;  %v4559_v63 = vld [vmem:[%s6475_s1 + $0x588] ss:$12 sps:$4 sm:$0xff]  }
  0x3d   :  { %3055 = vmatprep.subr.bf16.mxu1 %v4476_v1  ;;  %v4564_v0 = vld [vmem:[%s6475_s1 + $0x3f4] ss:$12 sps:$4 sm:$0xff]  }
  0x3e   :  { %v4567_v1 = vld [vmem:[%s6475_s1 + $0x574] ss:$12 sps:$4 sm:$0xff]  }
  0x3f   :  { %3015 = vmatpush2.bf16.msra.mxu0 %v4478_v2  ;;  %v4562_v2 = vld [vmem:[%s6475_s1 + $0x3f0] ss:$12 sps:$4 sm:$0xff]  }
  0x40   :  { %3056 = vmatpush2.bf16.msra.mxu1 %v4479_v3  ;;  %3066 = vmatprep.subr.bf16.mxu0 %v4486_v4  ;;  %v4565_v3 = vld [vmem:[%s6475_s1 + $0x570] ss:$12 sps:$4 sm:$0xff]  }
  0x41   :  { %3107 = vmatprep.subr.bf16.mxu1 %v4489_v5  ;;  %v4570_v4 = vld [vmem:[%s6475_s1 + $0x3dc] ss:$12 sps:$4 sm:$0xff]  }
  0x42   :  { %3017 = vmatmul.mubr.bf16.vlgmr.msra.gmra.mxu0 %v5209_v6  ;;  %v4573_v5 = vld [vmem:[%s6475_s1 + $0x55c] ss:$12 sps:$4 sm:$0xff]  }
  0x43   :  { %3058 = vmatmul.mubr.bf16.vlgmr.msra.gmra.mxu1 %v5211_v7  ;;  %3067 = vmatpush1.bf16.msra.mxu0 %v4484_v8  ;;  %v4568_v8 = vld [vmem:[%s6475_s1 + $0x3d8] ss:$12 sps:$4 sm:$0xff]  }
  0x44   :  { %3108 = vmatpush1.bf16.msra.mxu1 %v4487_v9  ;;  %3068 = vmatprep.subr.bf16.mxu0 %v4492_v10  ;;  %v4571_v9 = vld [vmem:[%s6475_s1 + $0x558] ss:$12 sps:$4 sm:$0xff]  }
  0x45   :  { %3109 = vmatprep.subr.bf16.mxu1 %v4495_v11  ;;  %3098 = vmatprep.mubr.bf16.mxu0 %v5305_v36  ;;  %v4576_v10 = vld [vmem:[%s6475_s1 + $0x3c4] ss:$12 sps:$4 sm:$0xff]  }
  0x46   :  { %3139 = vmatprep.mubr.bf16.mxu1 %v5309_v37  ;;  %v4579_v11 = vld [vmem:[%s6475_s1 + $0x544] ss:$12 sps:$4 sm:$0xff]  }
  0x47   :  { %3069 = vmatpush1.bf16.msra.mxu0 %v4490_v12  ;;  %v4574_v12 = vld [vmem:[%s6475_s1 + $0x3c0] ss:$12 sps:$4 sm:$0xff]  }
  0x48   :  { %3110 = vmatpush1.bf16.msra.mxu1 %v4493_v13  ;;  %3070 = vmatprep.subr.bf16.mxu0 %v4498_v14  ;;  %v4577_v13 = vld [vmem:[%s6475_s1 + $0x540] ss:$12 sps:$4 sm:$0xff]  }
  0x49   :  { %3111 = vmatprep.subr.bf16.mxu1 %v4501_v15  ;;  %v4586_v14 = vld [vmem:[%s6475_s1 + $0x6ac] ss:$12 sps:$4 sm:$0xff]  }
  0x4a   :  { %v4589_v15 = vld [vmem:[%s6475_s1 + $0x82c] ss:$12 sps:$4 sm:$0xff]  }
  0x4b   :  { %3071 = vmatpush1.bf16.msra.mxu0 %v4496_v16  ;;  %v5429_v16 = vcombine.low %v5290_v32, %v5290_v32  ;;  %v4604_v32 = vld [vmem:[%s6475_s1 + $0x664] ss:$12 sps:$4 sm:$0xff]  }
  0x4c   :  { %3112 = vmatpush1.bf16.msra.mxu1 %v4499_v17  ;;  %3072 = vmatprep.subr.bf16.mxu0 %v4504_v18  ;;  %v5433_v17 = vcombine.low %v5295_v33, %v5295_v33  ;;  %v4584_v18 = vld [vmem:[%s6475_s1 + $0x6a8] ss:$12 sps:$4 sm:$0xff]   ;;  %v4607_v33 = vld [vmem:[%s6475_s1 + $0x7e4] ss:$12 sps:$4 sm:$0xff]  }
  0x4d   :  { %3113 = vmatprep.subr.bf16.mxu1 %v4507_v19  ;;  %v4587_v19 = vld [vmem:[%s6475_s1 + $0x828] ss:$12 sps:$4 sm:$0xff]  }
  0x4f   :  { %3073 = vmatpush1.bf16.msra.mxu0 %v4502_v20  ;;  %v4592_v20 = vld [vmem:[%s6475_s1 + $0x694] ss:$12 sps:$4 sm:$0xff]  }
  0x50   :  { %3114 = vmatpush1.bf16.msra.mxu1 %v4505_v21  ;;  %3074 = vmatprep.subr.bf16.mxu0 %v4510_v22  ;;  %v4595_v21 = vld [vmem:[%s6475_s1 + $0x814] ss:$12 sps:$4 sm:$0xff]  }
  0x51   :  { %3115 = vmatprep.subr.bf16.mxu1 %v4513_v23  ;;  %v5450_v22 = vld [vmem:[%s6476_s0 + $0x20] sm:$0xff]  ;;  %v5455_v23 = vld [vmem:[%s6476_s0 + $0x28] sm:$0xff] }
  0x53   :  { %3075 = vmatpush1.bf16.msra.mxu0 %v4508_v24  ;;  %v5459_v24 = vcombine.high %v5450_v22, %v5450_v22 }
  0x54   :  { %3116 = vmatpush1.bf16.msra.mxu1 %v4511_v25  ;;  %3076 = vmatprep.subr.bf16.mxu0 %v4516_v26  ;;  %v5463_v25 = vcombine.high %v5455_v23, %v5455_v23  ;;  %v4590_v26 = vld [vmem:[%s6475_s1 + $0x690] ss:$12 sps:$4 sm:$0xff]  }
  0x55   :  { %3117 = vmatprep.subr.bf16.mxu1 %v4519_v27  ;;  %v4593_v27 = vld [vmem:[%s6475_s1 + $0x810] ss:$12 sps:$4 sm:$0xff]  }
  0x57   :  { %3077 = vmatpush1.bf16.msra.mxu0 %v4514_v28  ;;  %v4598_v28 = vld [vmem:[%s6475_s1 + $0x67c] ss:$12 sps:$4 sm:$0xff]  }
  0x58   :  { %3118 = vmatpush1.bf16.msra.mxu1 %v4517_v29  ;;  %3078 = vmatprep.subr.bf16.mxu0 %v4522_v30  ;;  %v4601_v29 = vld [vmem:[%s6475_s1 + $0x7fc] ss:$12 sps:$4 sm:$0xff]   ;;  %v4596_v30 = vld [vmem:[%s6475_s1 + $0x678] ss:$12 sps:$4 sm:$0xff]  }
  0x59   :  { %3119 = vmatprep.subr.bf16.mxu1 %v4525_v31  ;;  %v4599_v31 = vld [vmem:[%s6475_s1 + $0x7f8] ss:$12 sps:$4 sm:$0xff]  }
  0x5b   :  { %3079 = vmatpush1.bf16.msra.mxu0 %v4520_v34  ;;  %v4602_v34 = vld [vmem:[%s6475_s1 + $0x660] ss:$12 sps:$4 sm:$0xff]  }
  0x5c   :  { %3120 = vmatpush1.bf16.msra.mxu1 %v4523_v35  ;;  %3080 = vmatprep.subr.bf16.mxu0 %v4528_v38  ;;  %v4605_v35 = vld [vmem:[%s6475_s1 + $0x7e0] ss:$12 sps:$4 sm:$0xff]  }
  0x5d   :  { %3121 = vmatprep.subr.bf16.mxu1 %v4531_v39  ;;  %v4610_v38 = vld [vmem:[%s6475_s1 + $0x64c] ss:$12 sps:$4 sm:$0xff]  }
  0x5e   :  { %v4613_v39 = vld [vmem:[%s6475_s1 + $0x7cc] ss:$12 sps:$4 sm:$0xff]  }
  0x5f   :  { %3081 = vmatpush1.bf16.msra.mxu0 %v4526_v40  ;;  %v4608_v40 = vld [vmem:[%s6475_s1 + $0x648] ss:$12 sps:$4 sm:$0xff]  }
  0x60   :  { %3122 = vmatpush1.bf16.msra.mxu1 %v4529_v41  ;;  %3082 = vmatprep.subr.bf16.mxu0 %v4534_v42  ;;  %v4611_v41 = vld [vmem:[%s6475_s1 + $0x7c8] ss:$12 sps:$4 sm:$0xff]  }
  0x61   :  { %3123 = vmatprep.subr.bf16.mxu1 %v4537_v43  ;;  %v4616_v42 = vld [vmem:[%s6475_s1 + $0x634] ss:$12 sps:$4 sm:$0xff]  }
  0x62   :  { %v4619_v43 = vld [vmem:[%s6475_s1 + $0x7b4] ss:$12 sps:$4 sm:$0xff]  }
  0x63   :  { %3083 = vmatpush2.bf16.msra.mxu0 %v4532_v44  ;;  %v4614_v44 = vld [vmem:[%s6475_s1 + $0x630] ss:$12 sps:$4 sm:$0xff]  }
  0x64   :  { %3124 = vmatpush2.bf16.msra.mxu1 %v4535_v45  ;;  %3084 = vmatprep.subr.bf16.mxu0 %v4540_v46  ;;  %v4617_v45 = vld [vmem:[%s6475_s1 + $0x7b0] ss:$12 sps:$4 sm:$0xff]  }
  0x65   :  { %3125 = vmatprep.subr.bf16.mxu1 %v4543_v48  ;;  %v4622_v46 = vld [vmem:[%s6475_s1 + $0x61c] ss:$12 sps:$4 sm:$0xff]  }
  0x66   :  { %v4625_v48 = vld [vmem:[%s6475_s1 + $0x79c] ss:$12 sps:$4 sm:$0xff]  }
  0x67   :  { %3085 = vmatpush2.bf16.msra.mxu0 %v4538_v49  ;;  %v4620_v49 = vld [vmem:[%s6475_s1 + $0x618] ss:$12 sps:$4 sm:$0xff]  }
  0x68   :  { %3126 = vmatpush2.bf16.msra.mxu1 %v4541_v50  ;;  %3086 = vmatprep.subr.bf16.mxu0 %v4546_v52  ;;  %v4623_v50 = vld [vmem:[%s6475_s1 + $0x798] ss:$12 sps:$4 sm:$0xff]  }
  0x69   :  { %3127 = vmatprep.subr.bf16.mxu1 %v4549_v53  ;;  %v4628_v52 = vld [vmem:[%s6475_s1 + $0x604] ss:$12 sps:$4 sm:$0xff]  }
  0x6a   :  { %v4631_v53 = vld [vmem:[%s6475_s1 + $0x784] ss:$12 sps:$4 sm:$0xff]  }
  0x6b   :  { %3087 = vmatpush2.bf16.msra.mxu0 %v4544_v54  ;;  %v4626_v54 = vld [vmem:[%s6475_s1 + $0x600] ss:$12 sps:$4 sm:$0xff]  }
  0x6c   :  { %3128 = vmatpush2.bf16.msra.mxu1 %v4547_v55  ;;  %3088 = vmatprep.subr.bf16.mxu0 %v4552_v56  ;;  %v4629_v55 = vld [vmem:[%s6475_s1 + $0x780] ss:$12 sps:$4 sm:$0xff]  }
  0x6d   :  { %3129 = vmatprep.subr.bf16.mxu1 %v4555_v57  ;;  %v4634_v56 = vld [vmem:[%s6475_s1 + $0x76c] ss:$12 sps:$4 sm:$0xff]  }
  0x6e   :  { %v4637_v57 = vld [vmem:[%s6475_s1 + $0x8ec] ss:$12 sps:$4 sm:$0xff]  }
  0x6f   :  { %3089 = vmatpush2.bf16.msra.mxu0 %v4550_v58  ;;  %v4632_v58 = vld [vmem:[%s6475_s1 + $0x768] ss:$12 sps:$4 sm:$0xff]  }
  0x70   :  { %3130 = vmatpush2.bf16.msra.mxu1 %v4553_v59  ;;  %3090 = vmatprep.subr.bf16.mxu0 %v4558_v60  ;;  %v4635_v59 = vld [vmem:[%s6475_s1 + $0x8e8] ss:$12 sps:$4 sm:$0xff]  }
  0x71   :  { %3131 = vmatprep.subr.bf16.mxu1 %v4561_v61  ;;  %v4640_v60 = vld [vmem:[%s6475_s1 + $0x754] ss:$12 sps:$4 sm:$0xff]  }
  0x72   :  { %v4643_v61 = vld [vmem:[%s6475_s1 + $0x8d4] ss:$12 sps:$4 sm:$0xff]  }
  0x73   :  { %3091 = vmatpush2.bf16.msra.mxu0 %v4556_v62  ;;  %v4638_v62 = vld [vmem:[%s6475_s1 + $0x750] ss:$12 sps:$4 sm:$0xff]  }
  0x74   :  { %3132 = vmatpush2.bf16.msra.mxu1 %v4559_v63  ;;  %3092 = vmatprep.subr.bf16.mxu0 %v4564_v0  ;;  %v4641_v63 = vld [vmem:[%s6475_s1 + $0x8d0] ss:$12 sps:$4 sm:$0xff]  }
  0x75   :  { %3133 = vmatprep.subr.bf16.mxu1 %v4567_v1  ;;  %v4646_v0 = vld [vmem:[%s6475_s1 + $0x73c] ss:$12 sps:$4 sm:$0xff]  }
  0x76   :  { %v4649_v1 = vld [vmem:[%s6475_s1 + $0x8bc] ss:$12 sps:$4 sm:$0xff]  }
  0x77   :  { %3093 = vmatpush2.bf16.msra.mxu0 %v4562_v2  ;;  %v4644_v2 = vld [vmem:[%s6475_s1 + $0x738] ss:$12 sps:$4 sm:$0xff]  }
  0x78   :  { %3134 = vmatpush2.bf16.msra.mxu1 %v4565_v3  ;;  %3094 = vmatprep.subr.bf16.mxu0 %v4570_v4  ;;  %v4647_v3 = vld [vmem:[%s6475_s1 + $0x8b8] ss:$12 sps:$4 sm:$0xff]  }
  0x79   :  { %3135 = vmatprep.subr.bf16.mxu1 %v4573_v5  ;;  %v4652_v4 = vld [vmem:[%s6475_s1 + $0x724] ss:$12 sps:$4 sm:$0xff]  }
  0x7a   :  { %v4655_v5 = vld [vmem:[%s6475_s1 + $0x8a4] ss:$12 sps:$4 sm:$0xff]  }
  0x7b   :  { %3095 = vmatpush2.bf16.msra.mxu0 %v4568_v8  ;;  %v4650_v8 = vld [vmem:[%s6475_s1 + $0x720] ss:$12 sps:$4 sm:$0xff]  }
  0x7c   :  { %3136 = vmatpush2.bf16.msra.mxu1 %v4571_v9  ;;  %3096 = vmatprep.subr.bf16.mxu0 %v4576_v10  ;;  %v4653_v9 = vld [vmem:[%s6475_s1 + $0x8a0] ss:$12 sps:$4 sm:$0xff]  }
  0x7d   :  { %3137 = vmatprep.subr.bf16.mxu1 %v4579_v11  ;;  %v4658_v10 = vld [vmem:[%s6475_s1 + $0x70c] ss:$12 sps:$4 sm:$0xff]  }
  0x7e   :  { %v4661_v11 = vld [vmem:[%s6475_s1 + $0x88c] ss:$12 sps:$4 sm:$0xff]  }
  0x7f   :  { %3097 = vmatpush2.bf16.msra.mxu0 %v4574_v12  ;;  %v4656_v12 = vld [vmem:[%s6475_s1 + $0x708] ss:$12 sps:$4 sm:$0xff]  }
  0x80   :  { %3138 = vmatpush2.bf16.msra.mxu1 %v4577_v13  ;;  %3148 = vmatprep.subr.bf16.mxu0 %v4586_v14  ;;  %v4659_v13 = vld [vmem:[%s6475_s1 + $0x888] ss:$12 sps:$4 sm:$0xff]  }
  0x81   :  { %3189 = vmatprep.subr.bf16.mxu1 %v4589_v15  ;;  %v4664_v14 = vld [vmem:[%s6475_s1 + $0x6f4] ss:$12 sps:$4 sm:$0xff]  }
  0x82   :  { %3099 = vmatmul.mubr.bf16.vlgmr.msra.gmra.mxu0 %v5429_v16  ;;  %v4667_v15 = vld [vmem:[%s6475_s1 + $0x874] ss:$12 sps:$4 sm:$0xff]  }
  0x83   :  { %3140 = vmatmul.mubr.bf16.vlgmr.msra.gmra.mxu1 %v5433_v17  ;;  %3149 = vmatpush1.bf16.msra.mxu0 %v4584_v18  ;;  %v4662_v18 = vld [vmem:[%s6475_s1 + $0x6f0] ss:$12 sps:$4 sm:$0xff]  }
  0x84   :  { %3190 = vmatpush1.bf16.msra.mxu1 %v4587_v19  ;;  %3150 = vmatprep.subr.bf16.mxu0 %v4592_v20  ;;  %v4665_v19 = vld [vmem:[%s6475_s1 + $0x870] ss:$12 sps:$4 sm:$0xff]  }
  0x85   :  { %3191 = vmatprep.subr.bf16.mxu1 %v4595_v21  ;;  %3180 = vmatprep.mubr.bf16.mxu0 %v5459_v24  ;;  %v4670_v20 = vld [vmem:[%s6475_s1 + $0x6dc] ss:$12 sps:$4 sm:$0xff]  }
  0x86   :  { %3221 = vmatprep.mubr.bf16.mxu1 %v5463_v25  ;;  %v4673_v21 = vld [vmem:[%s6475_s1 + $0x85c] ss:$12 sps:$4 sm:$0xff]  }
  0x87   :  { %3151 = vmatpush1.bf16.msra.mxu0 %v4590_v26  ;;  %v4668_v26 = vld [vmem:[%s6475_s1 + $0x6d8] ss:$12 sps:$4 sm:$0xff]  }
  0x88   :  { %3192 = vmatpush1.bf16.msra.mxu1 %v4593_v27  ;;  %3152 = vmatprep.subr.bf16.mxu0 %v4598_v28  ;;  %v4671_v27 = vld [vmem:[%s6475_s1 + $0x858] ss:$12 sps:$4 sm:$0xff]  }
  0x89   :  { %3193 = vmatprep.subr.bf16.mxu1 %v4601_v29  ;;  %v4676_v28 = vld [vmem:[%s6475_s1 + $0x6c4] ss:$12 sps:$4 sm:$0xff]  }
  0x8a   :  { %v4679_v29 = vld [vmem:[%s6475_s1 + $0x844] ss:$12 sps:$4 sm:$0xff]  }
  0x8b   :  { %3153 = vmatpush1.bf16.msra.mxu0 %v4596_v30  ;;  %v4674_v30 = vld [vmem:[%s6475_s1 + $0x6c0] ss:$12 sps:$4 sm:$0xff]  }
  0x8c   :  { %3194 = vmatpush1.bf16.msra.mxu1 %v4599_v31  ;;  %3154 = vmatprep.subr.bf16.mxu0 %v4604_v32  ;;  %v4677_v31 = vld [vmem:[%s6475_s1 + $0x840] ss:$12 sps:$4 sm:$0xff]  }
  0x8d   :  { %3195 = vmatprep.subr.bf16.mxu1 %v4607_v33  ;;  %v4686_v32 = vld [vmem:[%s6475_s1 + $0x9ac] ss:$12 sps:$4 sm:$0xff]  }
  0x8e   :  { %v4689_v33 = vld [vmem:[%s6475_s1 + $0xb2c] ss:$12 sps:$4 sm:$0xff]  }
  0x8f   :  { %3155 = vmatpush1.bf16.msra.mxu0 %v4602_v34  ;;  %v4684_v34 = vld [vmem:[%s6475_s1 + $0x9a8] ss:$12 sps:$4 sm:$0xff]  }
  0x90   :  { %3196 = vmatpush1.bf16.msra.mxu1 %v4605_v35  ;;  %3156 = vmatprep.subr.bf16.mxu0 %v4610_v38  ;;  %v4687_v35 = vld [vmem:[%s6475_s1 + $0xb28] ss:$12 sps:$4 sm:$0xff]   ;;  %v5657_v38 = vcombine.low %v5450_v22, %v5450_v22 }
  0x91   :  { %3197 = vmatprep.subr.bf16.mxu1 %v4613_v39  ;;  %v5661_v39 = vcombine.low %v5455_v23, %v5455_v23  ;;  %v4692_v22 = vld [vmem:[%s6475_s1 + $0x994] ss:$12 sps:$4 sm:$0xff]  }
  0x92   :  { %v4695_v23 = vld [vmem:[%s6475_s1 + $0xb14] ss:$12 sps:$4 sm:$0xff]  }
  0x93   :  { %3157 = vmatpush1.bf16.msra.mxu0 %v4608_v40  ;;  %v5666_v40 = vld [vmem:[%s6476_s0 + $0x30] sm:$0xff] }
  0x94   :  { %3198 = vmatpush1.bf16.msra.mxu1 %v4611_v41  ;;  %3158 = vmatprep.subr.bf16.mxu0 %v4616_v42  ;;  %v5671_v41 = vld [vmem:[%s6476_s0 + $0x38] sm:$0xff] }
  0x95   :  { %3199 = vmatprep.subr.bf16.mxu1 %v4619_v43  ;;  %v4690_v42 = vld [vmem:[%s6475_s1 + $0x990] ss:$12 sps:$4 sm:$0xff]   ;;  %v5684_v43 = vcombine.high %v5666_v40, %v5666_v40 }
  0x97   :  { %3159 = vmatpush1.bf16.msra.mxu0 %v4614_v44  ;;  %v5688_v44 = vcombine.high %v5671_v41, %v5671_v41 }
  0x98   :  { %3200 = vmatpush1.bf16.msra.mxu1 %v4617_v45  ;;  %3160 = vmatprep.subr.bf16.mxu0 %v4622_v46  ;;  %v4693_v45 = vld [vmem:[%s6475_s1 + $0xb10] ss:$12 sps:$4 sm:$0xff]  }
  0x99   :  { %3201 = vmatprep.subr.bf16.mxu1 %v4625_v48  ;;  %v4698_v46 = vld [vmem:[%s6475_s1 + $0x97c] ss:$12 sps:$4 sm:$0xff]  }
  0x9a   :  { %v4701_v48 = vld [vmem:[%s6475_s1 + $0xafc] ss:$12 sps:$4 sm:$0xff]  }
  0x9b   :  { %3161 = vmatpush1.bf16.msra.mxu0 %v4620_v49  ;;  %v4696_v49 = vld [vmem:[%s6475_s1 + $0x978] ss:$12 sps:$4 sm:$0xff]  }
  0x9c   :  { %3202 = vmatpush1.bf16.msra.mxu1 %v4623_v50  ;;  %3162 = vmatprep.subr.bf16.mxu0 %v4628_v52  ;;  %v4699_v50 = vld [vmem:[%s6475_s1 + $0xaf8] ss:$12 sps:$4 sm:$0xff]  }
  0x9d   :  { %3203 = vmatprep.subr.bf16.mxu1 %v4631_v53  ;;  %v4704_v52 = vld [vmem:[%s6475_s1 + $0x964] ss:$12 sps:$4 sm:$0xff]  }
  0x9e   :  { %v4707_v53 = vld [vmem:[%s6475_s1 + $0xae4] ss:$12 sps:$4 sm:$0xff]  }
  0x9f   :  { %3163 = vmatpush1.bf16.msra.mxu0 %v4626_v54  ;;  %v4702_v54 = vld [vmem:[%s6475_s1 + $0x960] ss:$12 sps:$4 sm:$0xff]  }
  0xa0   :  { %3204 = vmatpush1.bf16.msra.mxu1 %v4629_v55  ;;  %3164 = vmatprep.subr.bf16.mxu0 %v4634_v56  ;;  %v4705_v55 = vld [vmem:[%s6475_s1 + $0xae0] ss:$12 sps:$4 sm:$0xff]  }
  0xa1   :  { %3205 = vmatprep.subr.bf16.mxu1 %v4637_v57  ;;  %v4710_v56 = vld [vmem:[%s6475_s1 + $0x94c] ss:$12 sps:$4 sm:$0xff]  }
  0xa2   :  { %v4713_v57 = vld [vmem:[%s6475_s1 + $0xacc] ss:$12 sps:$4 sm:$0xff]  }
  0xa3   :  { %3165 = vmatpush2.bf16.msra.mxu0 %v4632_v58  ;;  %v4708_v58 = vld [vmem:[%s6475_s1 + $0x948] ss:$12 sps:$4 sm:$0xff]  }
  0xa4   :  { %3206 = vmatpush2.bf16.msra.mxu1 %v4635_v59  ;;  %3166 = vmatprep.subr.bf16.mxu0 %v4640_v60  ;;  %v4711_v59 = vld [vmem:[%s6475_s1 + $0xac8] ss:$12 sps:$4 sm:$0xff]  }
  0xa5   :  { %3207 = vmatprep.subr.bf16.mxu1 %v4643_v61  ;;  %v4716_v60 = vld [vmem:[%s6475_s1 + $0x934] ss:$12 sps:$4 sm:$0xff]  }
  0xa6   :  { %v4719_v61 = vld [vmem:[%s6475_s1 + $0xab4] ss:$12 sps:$4 sm:$0xff]  }
  0xa7   :  { %3167 = vmatpush2.bf16.msra.mxu0 %v4638_v62  ;;  %v4714_v62 = vld [vmem:[%s6475_s1 + $0x930] ss:$12 sps:$4 sm:$0xff]  }
  0xa8   :  { %3208 = vmatpush2.bf16.msra.mxu1 %v4641_v63  ;;  %3168 = vmatprep.subr.bf16.mxu0 %v4646_v0  ;;  %v4717_v63 = vld [vmem:[%s6475_s1 + $0xab0] ss:$12 sps:$4 sm:$0xff]  }
  0xa9   :  { %3209 = vmatprep.subr.bf16.mxu1 %v4649_v1  ;;  %v4722_v0 = vld [vmem:[%s6475_s1 + $0x91c] ss:$12 sps:$4 sm:$0xff]  }
  0xaa   :  { %v4725_v1 = vld [vmem:[%s6475_s1 + $0xa9c] ss:$12 sps:$4 sm:$0xff]  }
  0xab   :  { %3169 = vmatpush2.bf16.msra.mxu0 %v4644_v2  ;;  %v4720_v2 = vld [vmem:[%s6475_s1 + $0x918] ss:$12 sps:$4 sm:$0xff]  }
  0xac   :  { %3210 = vmatpush2.bf16.msra.mxu1 %v4647_v3  ;;  %3170 = vmatprep.subr.bf16.mxu0 %v4652_v4  ;;  %v602_v3 = vlaneseq  ;;  %v4723_v4 = vld [vmem:[%s6475_s1 + $0xa98] ss:$12 sps:$4 sm:$0xff]  }
  0xad   :  { %3211 = vmatprep.subr.bf16.mxu1 %v4655_v5  ;;  %v4728_v5 = vld [vmem:[%s6475_s1 + $0x904] ss:$12 sps:$4 sm:$0xff]  }
  0xaf   :  { %3171 = vmatpush2.bf16.msra.mxu0 %v4650_v8  ;;  %v4731_v8 = vld [vmem:[%s6475_s1 + $0xa84] ss:$12 sps:$4 sm:$0xff]  }
  0xb0   :  { %3212 = vmatpush2.bf16.msra.mxu1 %v4653_v9  ;;  %3172 = vmatprep.subr.bf16.mxu0 %v4658_v10  ;;  %v5763_v9 = vshrl.u32 %v602_v3, 7  ;;  %v4726_v10 = vld [vmem:[%s6475_s1 + $0x900] ss:$12 sps:$4 sm:$0xff]  }
  0xb1   :  { %3213 = vmatprep.subr.bf16.mxu1 %v4661_v11  ;;  %v4729_v11 = vld [vmem:[%s6475_s1 + $0xa80] ss:$12 sps:$4 sm:$0xff]  }
  0xb2   :  { %v5895_v3 = vld [vmem:[%s6476_s0 + $0x40] sm:$0xff] }
  0xb3   :  { %3173 = vmatpush2.bf16.msra.mxu0 %v4656_v12  ;;  %v4734_v12 = vld [vmem:[%s6475_s1 + $0xa6c] ss:$12 sps:$4 sm:$0xff]  }
  0xb4   :  { %3214 = vmatpush2.bf16.msra.mxu1 %v4659_v13  ;;  %3174 = vmatprep.subr.bf16.mxu0 %v4664_v14  ;;  %v4737_v13 = vld [vmem:[%s6475_s1 + $0xbec] ss:$12 sps:$4 sm:$0xff]   ;;  %v4732_v14 = vld [vmem:[%s6475_s1 + $0xa68] ss:$12 sps:$4 sm:$0xff]  }
  0xb5   :  { %3215 = vmatprep.subr.bf16.mxu1 %v4667_v15  ;;  %v604_v15 = vsub.s32 0, %v5763_v9 }
  0xb7   :  { %3175 = vmatpush2.bf16.msra.mxu0 %v4662_v18  ;;  %v4735_v18 = vld [vmem:[%s6475_s1 + $0xbe8] ss:$12 sps:$4 sm:$0xff]  }
  0xb8   :  { %3216 = vmatpush2.bf16.msra.mxu1 %v4665_v19  ;;  %3176 = vmatprep.subr.bf16.mxu0 %v4670_v20  ;;  %v4740_v19 = vld [vmem:[%s6475_s1 + $0xa54] ss:$12 sps:$4 sm:$0xff]   ;;  %v608_v20 = vsub.s32 1, %v5763_v9 }
  0xb9   :  { %3217 = vmatprep.subr.bf16.mxu1 %v4673_v21  ;;  %v4743_v21 = vld [vmem:[%s6475_s1 + $0xbd4] ss:$12 sps:$4 sm:$0xff]  }
  0xbb   :  { %3177 = vmatpush2.bf16.msra.mxu0 %v4668_v26  ;;  %v4738_v26 = vld [vmem:[%s6475_s1 + $0xa50] ss:$12 sps:$4 sm:$0xff]  }
  0xbc   :  { %3218 = vmatpush2.bf16.msra.mxu1 %v4671_v27  ;;  %3178 = vmatprep.subr.bf16.mxu0 %v4676_v28  ;;  %v4741_v27 = vld [vmem:[%s6475_s1 + $0xbd0] ss:$12 sps:$4 sm:$0xff]  }
  0xbd   :  { %3219 = vmatprep.subr.bf16.mxu1 %v4679_v29  ;;  %v4746_v28 = vld [vmem:[%s6475_s1 + $0xa3c] ss:$12 sps:$4 sm:$0xff]  }
  0xbe   :  { %v4749_v29 = vld [vmem:[%s6475_s1 + $0xbbc] ss:$12 sps:$4 sm:$0xff]  }
  0xbf   :  { %3179 = vmatpush2.bf16.msra.mxu0 %v4674_v30  ;;  %v4744_v30 = vld [vmem:[%s6475_s1 + $0xa38] ss:$12 sps:$4 sm:$0xff]  }
  0xc0   :  { %3220 = vmatpush2.bf16.msra.mxu1 %v4677_v31  ;;  %3230 = vmatprep.subr.bf16.mxu0 %v4686_v32  ;;  %v4747_v31 = vld [vmem:[%s6475_s1 + $0xbb8] ss:$12 sps:$4 sm:$0xff]  }
  0xc1   :  { %3271 = vmatprep.subr.bf16.mxu1 %v4689_v33  ;;  %v4752_v32 = vld [vmem:[%s6475_s1 + $0xa24] ss:$12 sps:$4 sm:$0xff]  }
  0xc2   :  { %3181 = vmatmul.mubr.bf16.vlgmr.msra.gmra.mxu0 %v5657_v38  ;;  %v4755_v33 = vld [vmem:[%s6475_s1 + $0xba4] ss:$12 sps:$4 sm:$0xff]  }
  0xc3   :  { %3222 = vmatmul.mubr.bf16.vlgmr.msra.gmra.mxu1 %v5661_v39  ;;  %3231 = vmatpush1.bf16.msra.mxu0 %v4684_v34  ;;  %v4750_v34 = vld [vmem:[%s6475_s1 + $0xa20] ss:$12 sps:$4 sm:$0xff]  }
  0xc4   :  { %3272 = vmatpush1.bf16.msra.mxu1 %v4687_v35  ;;  %3232 = vmatprep.subr.bf16.mxu0 %v4692_v22  ;;  %v4753_v35 = vld [vmem:[%s6475_s1 + $0xba0] ss:$12 sps:$4 sm:$0xff]  }
  0xc5   :  { %3273 = vmatprep.subr.bf16.mxu1 %v4695_v23  ;;  %3262 = vmatprep.mubr.bf16.mxu0 %v5684_v43  ;;  %v4758_v22 = vld [vmem:[%s6475_s1 + $0xa0c] ss:$12 sps:$4 sm:$0xff]  }
  0xc6   :  { %3303 = vmatprep.mubr.bf16.mxu1 %v5688_v44  ;;  %v4761_v23 = vld [vmem:[%s6475_s1 + $0xb8c] ss:$12 sps:$4 sm:$0xff]  }
  0xc7   :  { %3233 = vmatpush1.bf16.msra.mxu0 %v4690_v42  ;;  %v4756_v42 = vld [vmem:[%s6475_s1 + $0xa08] ss:$12 sps:$4 sm:$0xff]  }
  0xc8   :  { %3274 = vmatpush1.bf16.msra.mxu1 %v4693_v45  ;;  %3234 = vmatprep.subr.bf16.mxu0 %v4698_v46  ;;  %v4759_v45 = vld [vmem:[%s6475_s1 + $0xb88] ss:$12 sps:$4 sm:$0xff]  }
  0xc9   :  { %3275 = vmatprep.subr.bf16.mxu1 %v4701_v48  ;;  %v4764_v46 = vld [vmem:[%s6475_s1 + $0x9f4] ss:$12 sps:$4 sm:$0xff]  }
  0xca   :  { %v4767_v48 = vld [vmem:[%s6475_s1 + $0xb74] ss:$12 sps:$4 sm:$0xff]  }
  0xcb   :  { %3235 = vmatpush1.bf16.msra.mxu0 %v4696_v49  ;;  %v4762_v49 = vld [vmem:[%s6475_s1 + $0x9f0] ss:$12 sps:$4 sm:$0xff]  }
  0xcc   :  { %3276 = vmatpush1.bf16.msra.mxu1 %v4699_v50  ;;  %3236 = vmatprep.subr.bf16.mxu0 %v4704_v52  ;;  %v4765_v50 = vld [vmem:[%s6475_s1 + $0xb70] ss:$12 sps:$4 sm:$0xff]  }
  0xcd   :  { %3277 = vmatprep.subr.bf16.mxu1 %v4707_v53  ;;  %v4770_v52 = vld [vmem:[%s6475_s1 + $0x9dc] ss:$12 sps:$4 sm:$0xff]  }
  0xce   :  { %v4773_v53 = vld [vmem:[%s6475_s1 + $0xb5c] ss:$12 sps:$4 sm:$0xff]  }
  0xcf   :  { %3237 = vmatpush1.bf16.msra.mxu0 %v4702_v54  ;;  %v4768_v54 = vld [vmem:[%s6475_s1 + $0x9d8] ss:$12 sps:$4 sm:$0xff]  }
  0xd0   :  { %3278 = vmatpush1.bf16.msra.mxu1 %v4705_v55  ;;  %3238 = vmatprep.subr.bf16.mxu0 %v4710_v56  ;;  %v4771_v55 = vld [vmem:[%s6475_s1 + $0xb58] ss:$12 sps:$4 sm:$0xff]  }
  0xd1   :  { %3279 = vmatprep.subr.bf16.mxu1 %v4713_v57  ;;  %v4776_v56 = vld [vmem:[%s6475_s1 + $0x9c4] ss:$12 sps:$4 sm:$0xff]  }
  0xd2   :  { %v4779_v57 = vld [vmem:[%s6475_s1 + $0xb44] ss:$12 sps:$4 sm:$0xff]  }
  0xd3   :  { %3239 = vmatpush1.bf16.msra.mxu0 %v4708_v58  ;;  %v4774_v58 = vld [vmem:[%s6475_s1 + $0x9c0] ss:$12 sps:$4 sm:$0xff]  }
  0xd4   :  { %3280 = vmatpush1.bf16.msra.mxu1 %v4711_v59  ;;  %3240 = vmatprep.subr.bf16.mxu0 %v4716_v60  ;;  %v4777_v59 = vld [vmem:[%s6475_s1 + $0xb40] ss:$12 sps:$4 sm:$0xff]  }
  0xd5   :  { %3281 = vmatprep.subr.bf16.mxu1 %v4719_v61  ;;  %v600_v60 = vld [vmem:[%s6477_s2] sm:$0x7]  ;;  %v4786_v61 = vld [vmem:[%s6475_s1 + $0xcac] ss:$12 sps:$4 sm:$0xff]  }
  0xd7   :  { %3241 = vmatpush1.bf16.msra.mxu0 %v4714_v62  ;;  %v4787_v62 = vld [vmem:[%s6475_s1 + $0x170] ss:$12 sps:$4 sm:$0xff]  }
  0xd8   :  { %3282 = vmatpush1.bf16.msra.mxu1 %v4717_v63  ;;  %3242 = vmatprep.subr.bf16.mxu0 %v4722_v0  ;;  %v4784_v63 = vld [vmem:[%s6475_s1 + $0xca8] ss:$12 sps:$4 sm:$0xff]   ;;  %v4788_v0 = vld [vmem:[%s6475_s1 + $0xb0] ss:$12 sps:$4 sm:$0xff]  }
  0xd9   :  { %3283 = vmatprep.subr.bf16.mxu1 %v4725_v1  ;;  %v5886_v1 = vcombine.low %v5666_v40, %v5666_v40  ;;  %v4792_v40 = vld [vmem:[%s6475_s1 + $0x158] ss:$12 sps:$4 sm:$0xff]  }
  0xdb   :  { %3243 = vmatpush1.bf16.msra.mxu0 %v4720_v2  ;;  %v5890_v2 = vcombine.low %v5671_v41, %v5671_v41  ;;  %v609_v41 = vrot.slane %v600_v60, %v608_v20  ;;  %v4797_v20 = vld [vmem:[%s6475_s1 + $0x140] ss:$12 sps:$4 sm:$0xff]  }
  0xdc   :  { %3284 = vmatpush1.bf16.msra.mxu1 %v4723_v4  ;;  %3244 = vmatprep.subr.bf16.mxu0 %v4728_v5  ;;  %v605_v4 = vrot.slane %v600_v60, %v604_v15  ;;  %v4791_v5 = vld [vmem:[%s6475_s1 + $0xc94] ss:$12 sps:$4 sm:$0xff]   ;;  %v4796_v15 = vld [vmem:[%s6475_s1 + $0xc7c] ss:$12 sps:$4 sm:$0xff]  }
  0xdd   :  { %3285 = vmatprep.subr.bf16.mxu1 %v4731_v8  ;;  %v4789_v8 = vld [vmem:[%s6475_s1 + $0xc90] ss:$12 sps:$4 sm:$0xff]   ;;  %v4823_v60 = vld [vmem:[%s6475_s1 + $0x8] ss:$12 sps:$4 sm:$0xff]  }
  0xdf   :  { %3245 = vmatpush1.bf16.msra.mxu0 %v4726_v10  ;;  %v5912_v10 = vcombine.high %v5895_v3, %v5895_v3 }
  0xe0   :  { %3286 = vmatpush1.bf16.msra.mxu1 %v4729_v11  ;;  %3246 = vmatprep.subr.bf16.mxu0 %v4734_v12 }
  0xe1   :  { %3287 = vmatprep.subr.bf16.mxu1 %v4737_v13  ;;  %v4793_v13 = vld [vmem:[%s6475_s1 + $0x98] ss:$12 sps:$4 sm:$0xff]  }
  0xe3   :  { %3247 = vmatpush2.bf16.msra.mxu0 %v4732_v14 }
  0xe4   :  { %3288 = vmatpush2.bf16.msra.mxu1 %v4735_v18  ;;  %3248 = vmatprep.subr.bf16.mxu0 %v4740_v19 }
  0xe5   :  { %3289 = vmatprep.subr.bf16.mxu1 %v4743_v21 }
  0xe7   :  { %3249 = vmatpush2.bf16.msra.mxu0 %v4738_v26 }
  0xe8   :  { %3290 = vmatpush2.bf16.msra.mxu1 %v4741_v27  ;;  %3250 = vmatprep.subr.bf16.mxu0 %v4746_v28  ;;  %v4794_v27 = vld [vmem:[%s6475_s1 + $0xc78] ss:$12 sps:$4 sm:$0xff]  }
  0xe9   :  { %3291 = vmatprep.subr.bf16.mxu1 %v4749_v29  ;;  %v4798_v29 = vld [vmem:[%s6475_s1 + $0x80] ss:$12 sps:$4 sm:$0xff]  }
  0xeb   :  { %3251 = vmatpush2.bf16.msra.mxu0 %v4744_v30 }
  0xec   :  { %3292 = vmatpush2.bf16.msra.mxu1 %v4747_v31  ;;  %3252 = vmatprep.subr.bf16.mxu0 %v4752_v32  ;;  %v4801_v32 = vld [vmem:[%s6475_s1 + $0xc64] ss:$12 sps:$4 sm:$0xff]  }
  0xed   :  { %3293 = vmatprep.subr.bf16.mxu1 %v4755_v33 }
  0xef   :  { %3253 = vmatpush2.bf16.msra.mxu0 %v4750_v34 }
  0xf0   :  { %3294 = vmatpush2.bf16.msra.mxu1 %v4753_v35  ;;  %3254 = vmatprep.subr.bf16.mxu0 %v4758_v22  ;;  %v4799_v35 = vld [vmem:[%s6475_s1 + $0xc60] ss:$12 sps:$4 sm:$0xff]   ;;  %v4803_v22 = vld [vmem:[%s6475_s1 + $0x68] ss:$12 sps:$4 sm:$0xff]  }
  0xf1   :  { %3295 = vmatprep.subr.bf16.mxu1 %v4761_v23  ;;  %v4806_v23 = vld [vmem:[%s6475_s1 + $0xc4c] ss:$12 sps:$4 sm:$0xff]  }
  0xf3   :  { %3255 = vmatpush2.bf16.msra.mxu0 %v4756_v42  ;;  %v4807_v42 = vld [vmem:[%s6475_s1 + $0x110] ss:$12 sps:$4 sm:$0xff]  }
  0xf4   :  { %3296 = vmatpush2.bf16.msra.mxu1 %v4759_v45  ;;  %3256 = vmatprep.subr.bf16.mxu0 %v4764_v46  ;;  %v4804_v45 = vld [vmem:[%s6475_s1 + $0xc48] ss:$12 sps:$4 sm:$0xff]   ;;  %v4808_v46 = vld [vmem:[%s6475_s1 + $0x50] ss:$12 sps:$4 sm:$0xff]  }
  0xf5   :  { %3297 = vmatprep.subr.bf16.mxu1 %v4767_v48  ;;  %v4811_v48 = vld [vmem:[%s6475_s1 + $0xc34] ss:$12 sps:$4 sm:$0xff]  }
  0xf7   :  { %3257 = vmatpush2.bf16.msra.mxu0 %v4762_v49  ;;  %v4812_v49 = vld [vmem:[%s6475_s1 + $0xf8] ss:$12 sps:$4 sm:$0xff]  }
  0xf8   :  { %3298 = vmatpush2.bf16.msra.mxu1 %v4765_v50  ;;  %3258 = vmatprep.subr.bf16.mxu0 %v4770_v52  ;;  %v4809_v50 = vld [vmem:[%s6475_s1 + $0xc30] ss:$12 sps:$4 sm:$0xff]   ;;  %v4813_v52 = vld [vmem:[%s6475_s1 + $0x38] ss:$12 sps:$4 sm:$0xff]  }
  0xf9   :  { %3299 = vmatprep.subr.bf16.mxu1 %v4773_v53  ;;  %v4816_v53 = vld [vmem:[%s6475_s1 + $0xc1c] ss:$12 sps:$4 sm:$0xff]  }
  0xfb   :  { %3259 = vmatpush2.bf16.msra.mxu0 %v4768_v54  ;;  %v4817_v54 = vld [vmem:[%s6475_s1 + $0xe0] ss:$12 sps:$4 sm:$0xff]  }
  0xfc   :  { %3300 = vmatpush2.bf16.msra.mxu1 %v4771_v55  ;;  %3260 = vmatprep.subr.bf16.mxu0 %v4776_v56  ;;  %v4814_v55 = vld [vmem:[%s6475_s1 + $0xc18] ss:$12 sps:$4 sm:$0xff]   ;;  %v4818_v56 = vld [vmem:[%s6475_s1 + $0x20] ss:$12 sps:$4 sm:$0xff]  }
  0xfd   :  { %3301 = vmatprep.subr.bf16.mxu1 %v4779_v57  ;;  %v4821_v57 = vld [vmem:[%s6475_s1 + $0xc04] ss:$12 sps:$4 sm:$0xff]  }
  0xff   :  { %3261 = vmatpush2.bf16.msra.mxu0 %v4774_v58  ;;  %v4822_v58 = vld [vmem:[%s6475_s1 + $0xc8] ss:$12 sps:$4 sm:$0xff]  }
 0x100   :  { %3302 = vmatpush2.bf16.msra.mxu1 %v4777_v59  ;;  %3312 = vmatprep.subr.bf16.mxu0 %v4786_v61  ;;  %v4819_v59 = vld [vmem:[%s6475_s1 + $0xc00] ss:$12 sps:$4 sm:$0xff]  }
 0x101   :  { %4186 = vmatprep.subr.bf16.mxu1 %v4787_v62  ;;  %v4826_v61 = vld [vmem:[%s6475_s1 + $0xd6c] ss:$12 sps:$4 sm:$0xff]   ;;  %v4827_v62 = vld [vmem:[%s6475_s1 + $0x2f0] ss:$12 sps:$4 sm:$0xff]  }
 0x102   :  { %v3018_v11 = vpop.f32.mrf.mxu0  ;;  %3263 = vmatmul.mubr.bf16.vlgmr.msra.gmra.mxu0 %v5886_v1 }
 0x103   :  { %3304 = vmatmul.mubr.bf16.vlgmr.msra.gmra.mxu1 %v5890_v2  ;;  %v3059_v12 = vpop.f32.mrf.mxu1  ;;  %v3019_v14 = vadd.f32 %v3018_v11, %v605_v4  ;;  %3313 = vmatpush1.bf16.msra.mxu0 %v4784_v63  ;;  %v4824_v63 = vld [vmem:[%s6475_s1 + $0xd68] ss:$12 sps:$4 sm:$0xff]   ;;  %v4837_v11 = vld [vmem:[%s6475_s1 + $0x2c0] ss:$12 sps:$4 sm:$0xff]  }
 0x104   :  { %4187 = vmatpush3.bf16.msra.mxu1 %v4788_v0  ;;  %v3020_v18 = vpop.f32.mrf.mxu0  ;;  %3314 = vmatprep.subr.bf16.mxu0 %v4791_v5  ;;  %v4828_v0 = vld [vmem:[%s6475_s1 + $0x230] ss:$12 sps:$4 sm:$0xff]   ;;  %v4831_v4 = vld [vmem:[%s6475_s1 + $0xd54] ss:$12 sps:$4 sm:$0xff]   ;;  %v4832_v5 = vld [vmem:[%s6475_s1 + $0x2d8] ss:$12 sps:$4 sm:$0xff]  }
 0x105   :  { %v3061_v19 = vpop.f32.mrf.mxu1  ;;  %4188 = vmatprep.subr.bf16.mxu1 %v4792_v40  ;;  %v3021_v21 = vadd.f32 %v3020_v18, %v609_v41  ;;  %v5925_v26 = vadd.f32 %v3059_v12, %v3019_v14  ;;  %3385 = vmatprep.mubr.bf16.mxu1 %v5140_v47  ;;  %v4802_v47 = vld [vmem:[%s6475_s1 + $0x128] ss:$12 sps:$4 sm:$0xff]   ;;  %v4829_v40 = vld [vmem:[%s6475_s1 + $0xd50] ss:$12 sps:$4 sm:$0xff]   ;;  %v4833_v41 = vld [vmem:[%s6475_s1 + $0x218] ss:$12 sps:$4 sm:$0xff]  }
 0x106   :  { %3344 = vmatprep.mubr.bf16.mxu0 %v5912_v10  ;;  %v3022_v28 = vpop.f32.mrf.mxu0  ;;  %v4838_v12 = vld [vmem:[%s6475_s1 + $0x200] ss:$12 sps:$4 sm:$0xff]   ;;  %v4842_v14 = vld [vmem:[%s6475_s1 + $0x2a8] ss:$12 sps:$4 sm:$0xff]  }
 0x107   :  { %v3063_v30 = vpop.f32.mrf.mxu1  ;;  %v5935_v31 = vadd.f32 %v3061_v19, %v3021_v21  ;;  %3315 = vmatpush1.bf16.msra.mxu0 %v4789_v8  ;;  %v4836_v8 = vld [vmem:[%s6475_s1 + $0xd3c] ss:$12 sps:$4 sm:$0xff]   ;;  %v4846_v18 = vld [vmem:[%s6475_s1 + $0xd0c] ss:$12 sps:$4 sm:$0xff]  }
 0x108   :  { %4189 = vmatpush3.bf16.msra.mxu1 %v4793_v13  ;;  %v3023_v33 = vpop.f32.mrf.mxu0  ;;  %3316 = vmatprep.subr.bf16.mxu0 %v4796_v15  ;;  %v4841_v13 = vld [vmem:[%s6475_s1 + $0xd24] ss:$12 sps:$4 sm:$0xff]   ;;  %v4843_v15 = vld [vmem:[%s6475_s1 + $0x1e8] ss:$12 sps:$4 sm:$0xff]  }
 0x109   :  { %4190 = vmatprep.subr.bf16.mxu1 %v4797_v20  ;;  %v3064_v34 = vpop.f32.mrf.mxu1  ;;  %v4847_v19 = vld [vmem:[%s6475_s1 + $0x290] ss:$12 sps:$4 sm:$0xff]   ;;  %v4844_v20 = vld [vmem:[%s6475_s1 + $0xd08] ss:$12 sps:$4 sm:$0xff]   ;;  %v4852_v28 = vld [vmem:[%s6475_s1 + $0x278] ss:$12 sps:$4 sm:$0xff]  }
 0x10a   :  { %v4848_v21 = vld [vmem:[%s6475_s1 + $0x1d0] ss:$12 sps:$4 sm:$0xff]   ;;  %v4853_v30 = vld [vmem:[%s6475_s1 + $0x1b8] ss:$12 sps:$4 sm:$0xff]   ;;  %v4857_v33 = vld [vmem:[%s6475_s1 + $0x260] ss:$12 sps:$4 sm:$0xff]  }
 0x10b   :  { %3317 = vmatpush1.bf16.msra.mxu0 %v4794_v27  ;;  %v4851_v27 = vld [vmem:[%s6475_s1 + $0xcf4] ss:$12 sps:$4 sm:$0xff]  }
 0x10c   :  { %4191 = vmatpush3.bf16.msra.mxu1 %v4798_v29  ;;  %3318 = vmatprep.subr.bf16.mxu0 %v4801_v32  ;;  %v4849_v29 = vld [vmem:[%s6475_s1 + $0xcf0] ss:$12 sps:$4 sm:$0xff]   ;;  %v4858_v34 = vld [vmem:[%s6475_s1 + $0x1a0] ss:$12 sps:$4 sm:$0xff]  }
 0x10d   :  { %4192 = vmatprep.subr.bf16.mxu1 %v4802_v47  ;;  %v4856_v32 = vld [vmem:[%s6475_s1 + $0xcdc] ss:$12 sps:$4 sm:$0xff]   ;;  %v4854_v47 = vld [vmem:[%s6475_s1 + $0xcd8] ss:$12 sps:$4 sm:$0xff]  }
 0x10f   :  { %3319 = vmatpush1.bf16.msra.mxu0 %v4799_v35  ;;  %v4861_v35 = vld [vmem:[%s6475_s1 + $0xcc4] ss:$12 sps:$4 sm:$0xff]  }
 0x110   :  { %4193 = vmatpush3.bf16.msra.mxu1 %v4803_v22  ;;  %3320 = vmatprep.subr.bf16.mxu0 %v4806_v23  ;;  %v4862_v22 = vld [vmem:[%s6475_s1 + $0x248] ss:$12 sps:$4 sm:$0xff]   ;;  %v4859_v23 = vld [vmem:[%s6475_s1 + $0xcc0] ss:$12 sps:$4 sm:$0xff]  }
 0x111   :  { %4194 = vmatprep.subr.bf16.mxu1 %v4807_v42  ;;  %v4863_v42 = vld [vmem:[%s6475_s1 + $0x188] ss:$12 sps:$4 sm:$0xff]  }
 0x113   :  { %3321 = vmatpush1.bf16.msra.mxu0 %v4804_v45  ;;  %v4866_v45 = vld [vmem:[%s6475_s1 + $0x470] ss:$12 sps:$4 sm:$0xff]  }
 0x114   :  { %4195 = vmatpush3.bf16.msra.mxu1 %v4808_v46  ;;  %3322 = vmatprep.subr.bf16.mxu0 %v4811_v48  ;;  %v4868_v46 = vld [vmem:[%s6475_s1 + $0x5f0] ss:$12 sps:$4 sm:$0xff]  }
 0x115   :  { %4196 = vmatprep.subr.bf16.mxu1 %v4812_v49  ;;  %v4867_v48 = vld [vmem:[%s6475_s1 + $0x3b0] ss:$12 sps:$4 sm:$0xff]   ;;  %v6106_v49 = vcombine.low %v5895_v3, %v5895_v3  ;;  %v4871_v3 = vld [vmem:[%s6475_s1 + $0x398] ss:$12 sps:$4 sm:$0xff]  }
 0x117   :  { %3323 = vmatpush1.bf16.msra.mxu0 %v4809_v50  ;;  %v4869_v50 = vld [vmem:[%s6475_s1 + $0x530] ss:$12 sps:$4 sm:$0xff]  }
 0x118   :  { %4197 = vmatpush3.bf16.msra.mxu1 %v4813_v52  ;;  %3324 = vmatprep.subr.bf16.mxu0 %v4816_v53  ;;  %v4870_v52 = vld [vmem:[%s6475_s1 + $0x458] ss:$12 sps:$4 sm:$0xff]  }
 0x119   :  { %4198 = vmatprep.subr.bf16.mxu1 %v4817_v54  ;;  %v4872_v53 = vld [vmem:[%s6475_s1 + $0x5d8] ss:$12 sps:$4 sm:$0xff]  }
 0x11b   :  { %3325 = vmatpush1.bf16.msra.mxu0 %v4814_v55 }
 0x11c   :  { %4199 = vmatpush3.bf16.msra.mxu1 %v4818_v56  ;;  %3326 = vmatprep.subr.bf16.mxu0 %v4821_v57  ;;  %v4873_v56 = vld [vmem:[%s6475_s1 + $0x518] ss:$12 sps:$4 sm:$0xff]  }
 0x11d   :  { %4200 = vmatprep.subr.bf16.mxu1 %v4822_v58  ;;  %v4874_v58 = vld [vmem:[%s6475_s1 + $0x440] ss:$12 sps:$4 sm:$0xff]  }
 0x11f   :  { %3327 = vmatpush1.bf16.msra.mxu0 %v4819_v59 }
 0x120   :  { %4201 = vmatpush3.bf16.msra.mxu1 %v4823_v60  ;;  %3328 = vmatprep.subr.bf16.mxu0 %v4826_v61 }
 0x121   :  { %4208 = vmatprep.subr.bf16.mxu1 %v4827_v62 }
 0x123   :  { %3386 = vmatmul.mubr.bf16.vlgmr.msra.gmra.mxu1 %v5209_v6  ;;  %3329 = vmatpush2.bf16.msra.mxu0 %v4824_v63  ;;  %v4834_v6 = vld [vmem:[%s6475_s1 + $0xd38] ss:$12 sps:$4 sm:$0xff]  }
 0x124   :  { %4209 = vmatpush3.bf16.msra.mxu1 %v4828_v0  ;;  %3330 = vmatprep.subr.bf16.mxu0 %v4831_v4  ;;  %v4877_v0 = vld [vmem:[%s6475_s1 + $0x500] ss:$12 sps:$4 sm:$0xff]  }
 0x125   :  { %4210 = vmatprep.subr.bf16.mxu1 %v4832_v5  ;;  %3425 = vmatprep.mubr.bf16.mxu1 %v5151_v51  ;;  %v4839_v51 = vld [vmem:[%s6475_s1 + $0xd20] ss:$12 sps:$4 sm:$0xff]  }
 0x127   :  { %3331 = vmatpush2.bf16.msra.mxu0 %v4829_v40 }
 0x128   :  { %4211 = vmatpush3.bf16.msra.mxu1 %v4833_v41  ;;  %3332 = vmatprep.subr.bf16.mxu0 %v4836_v8  ;;  %v4879_v41 = vld [vmem:[%s6475_s1 + $0x368] ss:$12 sps:$4 sm:$0xff]  }
 0x129   :  { %4212 = vmatprep.subr.bf16.mxu1 %v4837_v11  ;;  %v4881_v8 = vld [vmem:[%s6475_s1 + $0x4e8] ss:$12 sps:$4 sm:$0xff]   ;;  %v4882_v11 = vld [vmem:[%s6475_s1 + $0x410] ss:$12 sps:$4 sm:$0xff]  }
 0x12b   :  { %3333 = vmatpush2.bf16.msra.mxu0 %v4834_v6  ;;  %v4884_v6 = vld [vmem:[%s6475_s1 + $0x590] ss:$12 sps:$4 sm:$0xff]  }
 0x12c   :  { %4213 = vmatpush3.bf16.msra.mxu1 %v4838_v12  ;;  %3334 = vmatprep.subr.bf16.mxu0 %v4841_v13  ;;  %v4883_v12 = vld [vmem:[%s6475_s1 + $0x350] ss:$12 sps:$4 sm:$0xff]  }
 0x12d   :  { %4214 = vmatprep.subr.bf16.mxu1 %v4842_v14  ;;  %v4885_v13 = vld [vmem:[%s6475_s1 + $0x4d0] ss:$12 sps:$4 sm:$0xff]   ;;  %v4886_v14 = vld [vmem:[%s6475_s1 + $0x3f8] ss:$12 sps:$4 sm:$0xff]  }
 0x12f   :  { %3335 = vmatpush2.bf16.msra.mxu0 %v4839_v51  ;;  %v4888_v51 = vld [vmem:[%s6475_s1 + $0x578] ss:$12 sps:$4 sm:$0xff]  }
 0x130   :  { %4215 = vmatpush3.bf16.msra.mxu1 %v4843_v15  ;;  %3336 = vmatprep.subr.bf16.mxu0 %v4846_v18  ;;  %v4887_v15 = vld [vmem:[%s6475_s1 + $0x338] ss:$12 sps:$4 sm:$0xff]  }
 0x131   :  { %4216 = vmatprep.subr.bf16.mxu1 %v4847_v19  ;;  %v4889_v18 = vld [vmem:[%s6475_s1 + $0x4b8] ss:$12 sps:$4 sm:$0xff]   ;;  %v4890_v19 = vld [vmem:[%s6475_s1 + $0x3e0] ss:$12 sps:$4 sm:$0xff]  }
 0x133   :  { %3337 = vmatpush2.bf16.msra.mxu0 %v4844_v20  ;;  %v4892_v20 = vld [vmem:[%s6475_s1 + $0x560] ss:$12 sps:$4 sm:$0xff]  }
 0x134   :  { %4217 = vmatpush3.bf16.msra.mxu1 %v4848_v21  ;;  %3338 = vmatprep.subr.bf16.mxu0 %v4851_v27  ;;  %v4891_v21 = vld [vmem:[%s6475_s1 + $0x320] ss:$12 sps:$4 sm:$0xff]  }
 0x135   :  { %4218 = vmatprep.subr.bf16.mxu1 %v4852_v28  ;;  %v4893_v27 = vld [vmem:[%s6475_s1 + $0x4a0] ss:$12 sps:$4 sm:$0xff]   ;;  %v4894_v28 = vld [vmem:[%s6475_s1 + $0x3c8] ss:$12 sps:$4 sm:$0xff]  }
 0x137   :  { %3339 = vmatpush2.bf16.msra.mxu0 %v4849_v29  ;;  %v4896_v29 = vld [vmem:[%s6475_s1 + $0x548] ss:$12 sps:$4 sm:$0xff]  }
 0x138   :  { %4219 = vmatpush3.bf16.msra.mxu1 %v4853_v30  ;;  %3340 = vmatprep.subr.bf16.mxu0 %v4856_v32  ;;  %v4895_v30 = vld [vmem:[%s6475_s1 + $0x308] ss:$12 sps:$4 sm:$0xff]  }
 0x139   :  { %4220 = vmatprep.subr.bf16.mxu1 %v4857_v33  ;;  %v4897_v32 = vld [vmem:[%s6475_s1 + $0x488] ss:$12 sps:$4 sm:$0xff]   ;;  %v4898_v33 = vld [vmem:[%s6475_s1 + $0x770] ss:$12 sps:$4 sm:$0xff]  }
 0x13b   :  { %3341 = vmatpush2.bf16.msra.mxu0 %v4854_v47  ;;  %v4900_v47 = vld [vmem:[%s6475_s1 + $0x8f0] ss:$12 sps:$4 sm:$0xff]  }
 0x13c   :  { %4221 = vmatpush3.bf16.msra.mxu1 %v4858_v34  ;;  %3342 = vmatprep.subr.bf16.mxu0 %v4861_v35  ;;  %v4899_v34 = vld [vmem:[%s6475_s1 + $0x6b0] ss:$12 sps:$4 sm:$0xff]  }
 0x13d   :  { %4222 = vmatprep.subr.bf16.mxu1 %v4862_v22  ;;  %v4901_v35 = vld [vmem:[%s6475_s1 + $0x830] ss:$12 sps:$4 sm:$0xff]   ;;  %v4902_v22 = vld [vmem:[%s6475_s1 + $0x758] ss:$12 sps:$4 sm:$0xff]  }
 0x13f   :  { %3343 = vmatpush2.bf16.msra.mxu0 %v4859_v23  ;;  %v4904_v23 = vld [vmem:[%s6475_s1 + $0x8d8] ss:$12 sps:$4 sm:$0xff]  }
 0x140   :  { %4223 = vmatpush3.bf16.msra.mxu1 %v4863_v42  ;;  %4230 = vmatprep.subr.bf16.mxu0 %v4866_v45  ;;  %v4903_v42 = vld [vmem:[%s6475_s1 + $0x698] ss:$12 sps:$4 sm:$0xff]  }
 0x141   :  { %4252 = vmatprep.subr.bf16.mxu1 %v4868_v46  ;;  %v4905_v45 = vld [vmem:[%s6475_s1 + $0x818] ss:$12 sps:$4 sm:$0xff]   ;;  %v4906_v46 = vld [vmem:[%s6475_s1 + $0x740] ss:$12 sps:$4 sm:$0xff]  }
 0x142   :  { %v3100_v54 = vpop.f32.mrf.mxu0  ;;  %3345 = vmatmul.mubr.bf16.vlgmr.msra.gmra.mxu0 %v6106_v49 }
 0x143   :  { %3426 = vmatmul.mubr.bf16.vlgmr.msra.gmra.mxu1 %v5211_v7  ;;  %v3141_v55 = vpop.f32.mrf.mxu1  ;;  %v3101_v57 = vadd.f32 %v3100_v54, %v5925_v26  ;;  %4231 = vmatpush3.bf16.msra.mxu0 %v4867_v48  ;;  %v4876_v7 = vld [vmem:[%s6475_s1 + $0x5c0] ss:$12 sps:$4 sm:$0xff]   ;;  %v4915_v54 = vld [vmem:[%s6475_s1 + $0x650] ss:$12 sps:$4 sm:$0xff]  }
 0x144   :  { %4253 = vmatpush3.bf16.msra.mxu1 %v4869_v50  ;;  %v3102_v59 = vpop.f32.mrf.mxu0  ;;  %4232 = vmatprep.subr.bf16.mxu0 %v4870_v52  ;;  %v4875_v26 = vld [vmem:[%s6475_s1 + $0x380] ss:$12 sps:$4 sm:$0xff]   ;;  %v4910_v50 = vld [vmem:[%s6475_s1 + $0x728] ss:$12 sps:$4 sm:$0xff]  }
 0x145   :  { %v3143_v60 = vpop.f32.mrf.mxu1  ;;  %4254 = vmatprep.subr.bf16.mxu1 %v4872_v53  ;;  %v3103_v61 = vadd.f32 %v3102_v59, %v5935_v31  ;;  %v6133_v62 = vadd.f32 %v3141_v55, %v3101_v57  ;;  %3465 = vmatprep.mubr.bf16.mxu0 %v5305_v36  ;;  %v4878_v31 = vld [vmem:[%s6475_s1 + $0x428] ss:$12 sps:$4 sm:$0xff]   ;;  %v4909_v48 = vld [vmem:[%s6475_s1 + $0x800] ss:$12 sps:$4 sm:$0xff]   ;;  %v4914_v53 = vld [vmem:[%s6475_s1 + $0x710] ss:$12 sps:$4 sm:$0xff]  }
 0x146   :  { %3505 = vmatprep.mubr.bf16.mxu1 %v5309_v37  ;;  %v3104_v63 = vpop.f32.mrf.mxu0  ;;  %v4880_v36 = vld [vmem:[%s6475_s1 + $0x5a8] ss:$12 sps:$4 sm:$0xff]   ;;  %v4917_v55 = vld [vmem:[%s6475_s1 + $0x7d0] ss:$12 sps:$4 sm:$0xff]   ;;  %v4920_v57 = vld [vmem:[%s6475_s1 + $0x878] ss:$12 sps:$4 sm:$0xff]  }
 0x147   :  { %v3145_v4 = vpop.f32.mrf.mxu1  ;;  %v6143_v5 = vadd.f32 %v3143_v60, %v3103_v61  ;;  %4233 = vmatpush3.bf16.msra.mxu0 %v4871_v3  ;;  %v4913_v52 = vld [vmem:[%s6475_s1 + $0x7e8] ss:$12 sps:$4 sm:$0xff]   ;;  %v4916_v3 = vld [vmem:[%s6475_s1 + $0x890] ss:$12 sps:$4 sm:$0xff]   ;;  %v4921_v59 = vld [vmem:[%s6475_s1 + $0x7b8] ss:$12 sps:$4 sm:$0xff]  }
 0x148   :  { %4255 = vmatpush3.bf16.msra.mxu1 %v4873_v56  ;;  %v3105_v40 = vpop.f32.mrf.mxu0  ;;  %4234 = vmatprep.subr.bf16.mxu0 %v4874_v58  ;;  %v4918_v56 = vld [vmem:[%s6475_s1 + $0x6f8] ss:$12 sps:$4 sm:$0xff]   ;;  %v4922_v60 = vld [vmem:[%s6475_s1 + $0x6e0] ss:$12 sps:$4 sm:$0xff]   ;;  %v4926_v63 = vld [vmem:[%s6475_s1 + $0x6c8] ss:$12 sps:$4 sm:$0xff]  }
 0x149   :  { %4256 = vmatprep.subr.bf16.mxu1 %v4876_v7  ;;  %v3146_v37 = vpop.f32.mrf.mxu1  ;;  %v4919_v58 = vld [vmem:[%s6475_s1 + $0x638] ss:$12 sps:$4 sm:$0xff]   ;;  %v4924_v7 = vld [vmem:[%s6475_s1 + $0x860] ss:$12 sps:$4 sm:$0xff]   ;;  %v4927_v4 = vld [vmem:[%s6475_s1 + $0x608] ss:$12 sps:$4 sm:$0xff]  }
 0x14a   :  { %v4923_v61 = vld [vmem:[%s6475_s1 + $0x620] ss:$12 sps:$4 sm:$0xff]   ;;  %v4930_v40 = vld [vmem:[%s6475_s1 + $0xa70] ss:$12 sps:$4 sm:$0xff]  }
 0x14b   :  { %4235 = vmatpush3.bf16.msra.mxu0 %v4875_v26  ;;  %v4925_v26 = vld [vmem:[%s6475_s1 + $0x7a0] ss:$12 sps:$4 sm:$0xff]   ;;  %v4931_v37 = vld [vmem:[%s6475_s1 + $0x9b0] ss:$12 sps:$4 sm:$0xff]  }
 0x14c   :  { %4257 = vmatpush3.bf16.msra.mxu1 %v4877_v0  ;;  %4236 = vmatprep.subr.bf16.mxu0 %v4878_v31  ;;  %v4928_v0 = vld [vmem:[%s6475_s1 + $0x848] ss:$12 sps:$4 sm:$0xff]  }
 0x14d   :  { %4258 = vmatprep.subr.bf16.mxu1 %v4880_v36  ;;  %v4929_v31 = vld [vmem:[%s6475_s1 + $0x788] ss:$12 sps:$4 sm:$0xff]   ;;  %v4932_v36 = vld [vmem:[%s6475_s1 + $0xbf0] ss:$12 sps:$4 sm:$0xff]  }
 0x14f   :  { %4237 = vmatpush3.bf16.msra.mxu0 %v4879_v41  ;;  %v4933_v41 = vld [vmem:[%s6475_s1 + $0xb30] ss:$12 sps:$4 sm:$0xff]  }
 0x150   :  { %4259 = vmatpush3.bf16.msra.mxu1 %v4881_v8  ;;  %4238 = vmatprep.subr.bf16.mxu0 %v4882_v11  ;;  %v4934_v8 = vld [vmem:[%s6475_s1 + $0xa58] ss:$12 sps:$4 sm:$0xff]  }
 0x151   :  { %4260 = vmatprep.subr.bf16.mxu1 %v4884_v6  ;;  %v4936_v11 = vld [vmem:[%s6475_s1 + $0xbd8] ss:$12 sps:$4 sm:$0xff]  }
 0x153   :  { %4239 = vmatpush3.bf16.msra.mxu0 %v4883_v12 }
 0x154   :  { %4261 = vmatpush3.bf16.msra.mxu1 %v4885_v13  ;;  %4240 = vmatprep.subr.bf16.mxu0 %v4886_v14  ;;  %v4935_v14 = vld [vmem:[%s6475_s1 + $0x998] ss:$12 sps:$4 sm:$0xff]  }
 0x155   :  { %4262 = vmatprep.subr.bf16.mxu1 %v4888_v51  ;;  %v4937_v51 = vld [vmem:[%s6475_s1 + $0xb18] ss:$12 sps:$4 sm:$0xff]  }
 0x157   :  { %4241 = vmatpush3.bf16.msra.mxu0 %v4887_v15 }
 0x158   :  { %4263 = vmatpush3.bf16.msra.mxu1 %v4889_v18  ;;  %4242 = vmatprep.subr.bf16.mxu0 %v4890_v19 }
 0x159   :  { %4264 = vmatprep.subr.bf16.mxu1 %v4892_v20 }
 0x15b   :  { %4243 = vmatpush3.bf16.msra.mxu0 %v4891_v21 }
 0x15c   :  { %4265 = vmatpush3.bf16.msra.mxu1 %v4893_v27  ;;  %4244 = vmatprep.subr.bf16.mxu0 %v4894_v28  ;;  %v4939_v28 = vld [vmem:[%s6475_s1 + $0x980] ss:$12 sps:$4 sm:$0xff]  }
 0x15d   :  { %4266 = vmatprep.subr.bf16.mxu1 %v4896_v29 }
 0x15f   :  { %4245 = vmatpush3.bf16.msra.mxu0 %v4895_v30 }
 0x160   :  { %4267 = vmatpush3.bf16.msra.mxu1 %v4897_v32  ;;  %4274 = vmatprep.subr.bf16.mxu0 %v4898_v33  ;;  %v4943_v32 = vld [vmem:[%s6475_s1 + $0x968] ss:$12 sps:$4 sm:$0xff]  }
 0x161   :  { %4296 = vmatprep.subr.bf16.mxu1 %v4900_v47  ;;  %v4945_v33 = vld [vmem:[%s6475_s1 + $0xae8] ss:$12 sps:$4 sm:$0xff]   ;;  %v4946_v47 = vld [vmem:[%s6475_s1 + $0xa10] ss:$12 sps:$4 sm:$0xff]  }
 0x162   :  { %3466 = vmatmul.mubr.bf16.vlgmr.msra.gmra.mxu0 %v5429_v16  ;;  %v4908_v16 = vld [vmem:[%s6475_s1 + $0x8c0] ss:$12 sps:$4 sm:$0xff]  }
 0x163   :  { %3506 = vmatmul.mubr.bf16.vlgmr.msra.gmra.mxu1 %v5433_v17  ;;  %4275 = vmatpush3.bf16.msra.mxu0 %v4899_v34  ;;  %v4907_v17 = vld [vmem:[%s6475_s1 + $0x680] ss:$12 sps:$4 sm:$0xff]   ;;  %v4948_v34 = vld [vmem:[%s6475_s1 + $0xb90] ss:$12 sps:$4 sm:$0xff]  }
 0x164   :  { %4297 = vmatpush3.bf16.msra.mxu1 %v4901_v35  ;;  %4276 = vmatprep.subr.bf16.mxu0 %v4902_v22  ;;  %v4947_v35 = vld [vmem:[%s6475_s1 + $0x950] ss:$12 sps:$4 sm:$0xff]  }
 0x165   :  { %4298 = vmatprep.subr.bf16.mxu1 %v4904_v23  ;;  %3545 = vmatprep.mubr.bf16.mxu0 %v5459_v24  ;;  %v4912_v24 = vld [vmem:[%s6475_s1 + $0x8a8] ss:$12 sps:$4 sm:$0xff]   ;;  %v4949_v22 = vld [vmem:[%s6475_s1 + $0xad0] ss:$12 sps:$4 sm:$0xff]   ;;  %v4950_v23 = vld [vmem:[%s6475_s1 + $0x9f8] ss:$12 sps:$4 sm:$0xff]  }
 0x166   :  { %3585 = vmatprep.mubr.bf16.mxu1 %v5463_v25  ;;  %v4911_v25 = vld [vmem:[%s6475_s1 + $0x668] ss:$12 sps:$4 sm:$0xff]  }
 0x167   :  { %4277 = vmatpush3.bf16.msra.mxu0 %v4903_v42  ;;  %v4952_v42 = vld [vmem:[%s6475_s1 + $0xb78] ss:$12 sps:$4 sm:$0xff]  }
 0x168   :  { %4299 = vmatpush3.bf16.msra.mxu1 %v4905_v45  ;;  %4278 = vmatprep.subr.bf16.mxu0 %v4906_v46  ;;  %v4951_v45 = vld [vmem:[%s6475_s1 + $0x938] ss:$12 sps:$4 sm:$0xff]  }
 0x169   :  { %4300 = vmatprep.subr.bf16.mxu1 %v4908_v16  ;;  %v4953_v46 = vld [vmem:[%s6475_s1 + $0xab8] ss:$12 sps:$4 sm:$0xff]   ;;  %v4954_v16 = vld [vmem:[%s6475_s1 + $0x9e0] ss:$12 sps:$4 sm:$0xff]  }
 0x16b   :  { %4279 = vmatpush3.bf16.msra.mxu0 %v4907_v17  ;;  %v4956_v17 = vld [vmem:[%s6475_s1 + $0xb60] ss:$12 sps:$4 sm:$0xff]  }
 0x16c   :  { %4301 = vmatpush3.bf16.msra.mxu1 %v4909_v48  ;;  %4280 = vmatprep.subr.bf16.mxu0 %v4910_v50  ;;  %v4955_v48 = vld [vmem:[%s6475_s1 + $0x920] ss:$12 sps:$4 sm:$0xff]  }
 0x16d   :  { %4302 = vmatprep.subr.bf16.mxu1 %v4912_v24  ;;  %v4957_v50 = vld [vmem:[%s6475_s1 + $0xaa0] ss:$12 sps:$4 sm:$0xff]   ;;  %v4958_v24 = vld [vmem:[%s6475_s1 + $0x9c8] ss:$12 sps:$4 sm:$0xff]  }
 0x16f   :  { %4281 = vmatpush3.bf16.msra.mxu0 %v4911_v25  ;;  %v4960_v25 = vld [vmem:[%s6475_s1 + $0xb48] ss:$12 sps:$4 sm:$0xff]  }
 0x170   :  { %4303 = vmatpush3.bf16.msra.mxu1 %v4913_v52  ;;  %4282 = vmatprep.subr.bf16.mxu0 %v4914_v53  ;;  %v4959_v52 = vld [vmem:[%s6475_s1 + $0x908] ss:$12 sps:$4 sm:$0xff]  }
 0x171   :  { %4304 = vmatprep.subr.bf16.mxu1 %v4916_v3  ;;  %v4961_v53 = vld [vmem:[%s6475_s1 + $0xa88] ss:$12 sps:$4 sm:$0xff]   ;;  %v4962_v3 = vld [vmem:[%s6475_s1 + $0xd70] ss:$12 sps:$4 sm:$0xff]  }
 0x173   :  { %4283 = vmatpush3.bf16.msra.mxu0 %v4915_v54  ;;  %v4963_v54 = vld [vmem:[%s6475_s1 + $0xcb0] ss:$12 sps:$4 sm:$0xff]  }
 0x174   :  { %4305 = vmatpush3.bf16.msra.mxu1 %v4917_v55  ;;  %4284 = vmatprep.subr.bf16.mxu0 %v4918_v56  ;;  %v4964_v55 = vld [vmem:[%s6475_s1 + $0xd58] ss:$12 sps:$4 sm:$0xff]  }
 0x175   :  { %4306 = vmatprep.subr.bf16.mxu1 %v4920_v57  ;;  %v4965_v56 = vld [vmem:[%s6475_s1 + $0xc98] ss:$12 sps:$4 sm:$0xff]   ;;  %v4966_v57 = vld [vmem:[%s6475_s1 + $0xd40] ss:$12 sps:$4 sm:$0xff]  }
 0x177   :  { %4285 = vmatpush3.bf16.msra.mxu0 %v4919_v58  ;;  %v4967_v58 = vld [vmem:[%s6475_s1 + $0xc80] ss:$12 sps:$4 sm:$0xff]  }
 0x178   :  { %4307 = vmatpush3.bf16.msra.mxu1 %v4921_v59  ;;  %4286 = vmatprep.subr.bf16.mxu0 %v4922_v60  ;;  %v4971_v59 = vld [vmem:[%s6475_s1 + $0xc50] ss:$12 sps:$4 sm:$0xff]   ;;  %v4972_v60 = vld [vmem:[%s6475_s1 + $0xcf8] ss:$12 sps:$4 sm:$0xff]  }
 0x179   :  { %4308 = vmatprep.subr.bf16.mxu1 %v4924_v7  ;;  %v4973_v7 = vld [vmem:[%s6475_s1 + $0xc38] ss:$12 sps:$4 sm:$0xff]  }
 0x17b   :  { %4287 = vmatpush3.bf16.msra.mxu0 %v4923_v61  ;;  %v4974_v61 = vld [vmem:[%s6475_s1 + $0xce0] ss:$12 sps:$4 sm:$0xff]  }
 0x17c   :  { %4309 = vmatpush3.bf16.msra.mxu1 %v4925_v26  ;;  %4288 = vmatprep.subr.bf16.mxu0 %v4926_v63  ;;  %v4975_v26 = vld [vmem:[%s6475_s1 + $0xc20] ss:$12 sps:$4 sm:$0xff]   ;;  %v4976_v63 = vld [vmem:[%s6475_s1 + $0xcc8] ss:$12 sps:$4 sm:$0xff]  }
 0x17d   :  { %4310 = vmatprep.subr.bf16.mxu1 %v4928_v0  ;;  %v4977_v0 = vld [vmem:[%s6475_s1 + $0xc08] ss:$12 sps:$4 sm:$0xff]  }
 0x17f   :  { %4289 = vmatpush3.bf16.msra.mxu0 %v4927_v4 }
 0x180   :  { %4311 = vmatpush3.bf16.msra.mxu1 %v4929_v31  ;;  %4318 = vmatprep.subr.bf16.mxu0 %v4930_v40 }
 0x181   :  { %4340 = vmatprep.subr.bf16.mxu1 %v4932_v36 }
 0x182   :  { %v3182_v6 = vpop.f32.mrf.mxu0  ;;  %3546 = vmatmul.mubr.bf16.vlgmr.msra.gmra.mxu0 %v5657_v38  ;;  %v4938_v38 = vld [vmem:[%s6475_s1 + $0xa40] ss:$12 sps:$4 sm:$0xff]  }
 0x183   :  { %v3223_v12 = vpop.f32.mrf.mxu1  ;;  %3586 = vmatmul.mubr.bf16.vlgmr.msra.gmra.mxu1 %v5661_v39  ;;  %v3183_v13 = vadd.f32 %v3182_v6, %v6133_v62  ;;  %4319 = vmatpush3.bf16.msra.mxu0 %v4931_v37  ;;  %v4940_v39 = vld [vmem:[%s6475_s1 + $0xbc0] ss:$12 sps:$4 sm:$0xff]  }
 0x184   :  { %4341 = vmatpush3.bf16.msra.mxu1 %v4933_v41  ;;  %v3184_v15 = vpop.f32.mrf.mxu0  ;;  %4320 = vmatprep.subr.bf16.mxu0 %v4934_v8 }
 0x185   :  { %v3225_v18 = vpop.f32.mrf.mxu1  ;;  %4342 = vmatprep.subr.bf16.mxu1 %v4936_v11  ;;  %v3185_v62 = vadd.f32 %v3184_v15, %v6143_v5  ;;  %v6339_v19 = vadd.f32 %v3223_v12, %v3183_v13  ;;  %3625 = vmatprep.mubr.bf16.mxu0 %v5684_v43  ;;  %v4941_v5 = vld [vmem:[%s6475_s1 + $0xb00] ss:$12 sps:$4 sm:$0xff]   ;;  %v4942_v43 = vld [vmem:[%s6475_s1 + $0xa28] ss:$12 sps:$4 sm:$0xff]  }
 0x186   :  { %3665 = vmatprep.mubr.bf16.mxu1 %v5688_v44  ;;  %v3186_v20 = vpop.f32.mrf.mxu0  ;;  %v4944_v44 = vld [vmem:[%s6475_s1 + $0xba8] ss:$12 sps:$4 sm:$0xff]  }
 0x187   :  { %v3227_v21 = vpop.f32.mrf.mxu1  ;;  %v6343_v27 = vadd.f32 %v3225_v18, %v3185_v62  ;;  %4321 = vmatpush3.bf16.msra.mxu0 %v4935_v14 }
 0x188   :  { %4343 = vmatpush3.bf16.msra.mxu1 %v4937_v51  ;;  %v3187_v29 = vpop.f32.mrf.mxu0  ;;  %4322 = vmatprep.subr.bf16.mxu0 %v4938_v38  ;;  %v612_v38 = vsub.s32 2, %v5763_v9 }
 0x189   :  { %4344 = vmatprep.subr.bf16.mxu1 %v4940_v39  ;;  %v3228_v30 = vpop.f32.mrf.mxu1 }
 0x18b   :  { %4323 = vmatpush3.bf16.msra.mxu0 %v4939_v28 }
 0x18c   :  { %4345 = vmatpush3.bf16.msra.mxu1 %v4941_v5  ;;  %4324 = vmatprep.subr.bf16.mxu0 %v4942_v43 }
 0x18d   :  { %4346 = vmatprep.subr.bf16.mxu1 %v4944_v44 }
 0x18f   :  { %4325 = vmatpush3.bf16.msra.mxu0 %v4943_v32 }
 0x190   :  { %4347 = vmatpush3.bf16.msra.mxu1 %v4945_v33  ;;  %4326 = vmatprep.subr.bf16.mxu0 %v4946_v47 }
 0x191   :  { %4348 = vmatprep.subr.bf16.mxu1 %v4948_v34 }
 0x193   :  { %4327 = vmatpush3.bf16.msra.mxu0 %v4947_v35 }
 0x194   :  { %4349 = vmatpush3.bf16.msra.mxu1 %v4949_v22  ;;  %4328 = vmatprep.subr.bf16.mxu0 %v4950_v23 }
 0x195   :  { %4350 = vmatprep.subr.bf16.mxu1 %v4952_v42 }
 0x197   :  { %4329 = vmatpush3.bf16.msra.mxu0 %v4951_v45 }
 0x198   :  { %4351 = vmatpush3.bf16.msra.mxu1 %v4953_v46  ;;  %4330 = vmatprep.subr.bf16.mxu0 %v4954_v16 }
 0x199   :  { %4352 = vmatprep.subr.bf16.mxu1 %v4956_v17 }
 0x19b   :  { %4331 = vmatpush3.bf16.msra.mxu0 %v4955_v48 }
 0x19c   :  { %4353 = vmatpush3.bf16.msra.mxu1 %v4957_v50  ;;  %4332 = vmatprep.subr.bf16.mxu0 %v4958_v24 }
 0x19d   :  { %4354 = vmatprep.subr.bf16.mxu1 %v4960_v25 }
 0x19f   :  { %4333 = vmatpush3.bf16.msra.mxu0 %v4959_v52 }
 0x1a0   :  { %4355 = vmatpush3.bf16.msra.mxu1 %v4961_v53  ;;  %4362 = vmatprep.subr.bf16.mxu0 %v4962_v3 }
 0x1a2   :  { %3626 = vmatmul.mubr.bf16.vlgmr.msra.gmra.mxu0 %v5886_v1  ;;  %v4968_v1 = vld [vmem:[%s6475_s1 + $0xd28] ss:$12 sps:$4 sm:$0xff]  }
 0x1a3   :  { %3666 = vmatmul.mubr.bf16.vlgmr.msra.gmra.mxu1 %v5890_v2  ;;  %4363 = vmatpush3.bf16.msra.mxu0 %v4963_v54  ;;  %v4969_v2 = vld [vmem:[%s6475_s1 + $0xc68] ss:$12 sps:$4 sm:$0xff]  }
 0x1a4   :  { %3705 = vmatprep.mubr.bf16.mxu0 %v5912_v10  ;;  %4364 = vmatprep.subr.bf16.mxu0 %v4964_v55  ;;  %v4970_v10 = vld [vmem:[%s6475_s1 + $0xd10] ss:$12 sps:$4 sm:$0xff]  }
 0x1a7   :  { %4365 = vmatpush3.bf16.msra.mxu0 %v4965_v56 }
 0x1a8   :  { %4366 = vmatprep.subr.bf16.mxu0 %v4966_v57 }
 0x1ab   :  { %4367 = vmatpush3.bf16.msra.mxu0 %v4967_v58 }
 0x1ac   :  { %4368 = vmatprep.subr.bf16.mxu0 %v4968_v1 }
 0x1af   :  { %4369 = vmatpush3.bf16.msra.mxu0 %v4969_v2 }
 0x1b0   :  { %4370 = vmatprep.subr.bf16.mxu0 %v4970_v10 }
 0x1b3   :  { %4371 = vmatpush3.bf16.msra.mxu0 %v4971_v59 }
 0x1b4   :  { %4372 = vmatprep.subr.bf16.mxu0 %v4972_v60 }
 0x1b7   :  { %4373 = vmatpush3.bf16.msra.mxu0 %v4973_v7 }
 0x1b8   :  { %4374 = vmatprep.subr.bf16.mxu0 %v4974_v61 }
 0x1bb   :  { %4375 = vmatpush3.bf16.msra.mxu0 %v4975_v26 }
 0x1bc   :  { %4376 = vmatprep.subr.bf16.mxu0 %v4976_v63 }
 0x1bf   :  { %4377 = vmatpush3.bf16.msra.mxu0 %v4977_v0 }
 0x1c2   :  { %v3264_v4 = vpop.f32.mrf.mxu0  ;;  %3706 = vmatmul.mubr.bf16.vlgmr.msra.gmra.mxu0 %v6106_v49  ;;  %v4978_v49 = vld [vmem:[%s6477_s2] sm:$0x7] }
 0x1c3   :  { %v3305_v31 = vpop.f32.mrf.mxu1  ;;  %v3265_v40 = vadd.f32 %v3264_v4, %v6339_v19  ;;  %v613_v62 = vrot.slane %v4978_v49, %v612_v38 }
 0x1c4   :  { %v3266_v36 = vpop.f32.mrf.mxu0 }
 0x1c5   :  { %v3307_v37 = vpop.f32.mrf.mxu1  ;;  %v3306_v41 = vadd.f32 %v3305_v31, %v3265_v40  ;;  %v3267_v39 = vadd.f32 %v3266_v36, %v6343_v27 }
 0x1c6   :  { %v3268_v8 = vpop.f32.mrf.mxu0 }
 0x1c7   :  { %v3309_v11 = vpop.f32.mrf.mxu1  ;;  %v3308_v21 = vadd.f32 %v3307_v37, %v3267_v39 }
 0x1c8   :  { %v3269_v6 = vpop.f32.mrf.mxu0 }
 0x1c9   :  { %v3310_v12 = vpop.f32.mrf.mxu1 }
 0x1e3   :  { %v4202_v13 = vpop.f32.mrf.mxu1 }
 0x1e5   :  { %v4203_v14 = vpop.f32.mrf.mxu1 }
 0x1e6   :  { %v4204_v51 = vadd.f32 %v4203_v14, %v4202_v13 }
 0x1e7   :  { %v4205_v15 = vpop.f32.mrf.mxu1 }
 0x1e8   :  { %v3388_v28 = vadd.f32 %v4204_v51, %v613_v62 }
 0x1e9   :  { %v4206_v18 = vpop.f32.mrf.mxu1 }
 0x202   :  { %v3346_v19 = vpop.f32.mrf.mxu0 }
 0x203   :  { %v4224_v20 = vpop.f32.mrf.mxu1  ;;  %v3347_v43 = vadd.f32 %v3346_v19, %v3306_v41 }
 0x204   :  { %v3348_v5 = vpop.f32.mrf.mxu0 }
 0x205   :  { %v4225_v29 = vpop.f32.mrf.mxu1  ;;  %v3349_v44 = vadd.f32 %v3348_v5, %v3308_v21 }
 0x206   :  { %v4226_v30 = vadd.f32 %v4225_v29, %v4224_v20  ;;  %v3350_v32 = vpop.f32.mrf.mxu0 }
 0x207   :  { %v4227_v33 = vpop.f32.mrf.mxu1  ;;  %v4184_v47 = vpack.c.bf16 %v3349_v44, %v3347_v43 }
 0x208   :  { %v3428_v9 = vadd.f32 %v4226_v30, %v3388_v28  ;;  %v3351_v34 = vpop.f32.mrf.mxu0 }
 0x209   :  { %v4228_v27 = vpop.f32.mrf.mxu1  ;;  %3726 = vst [vmem:[%s6478_s3] sm:$0xff] %v4184_v47 }
 0x222   :  { %v4246_v35 = vpop.f32.mrf.mxu0 }
 0x223   :  { %v4268_v22 = vpop.f32.mrf.mxu1 }
 0x224   :  { %v4247_v23 = vpop.f32.mrf.mxu0 }
 0x225   :  { %v4269_v42 = vpop.f32.mrf.mxu1  ;;  %v4248_v45 = vadd.f32 %v4247_v23, %v4246_v35 }
 0x226   :  { %v4270_v46 = vadd.f32 %v4269_v42, %v4268_v22  ;;  %v4249_v16 = vpop.f32.mrf.mxu0 }
 0x227   :  { %v4271_v17 = vpop.f32.mrf.mxu1  ;;  %v3468_v48 = vadd.f32 %v4248_v45, %v3428_v9 }
 0x228   :  { %v4250_v50 = vpop.f32.mrf.mxu0 }
 0x229   :  { %v4272_v24 = vpop.f32.mrf.mxu1  ;;  %v3508_v25 = vadd.f32 %v4270_v46, %v3468_v48 }
 0x242   :  { %v4290_v52 = vpop.f32.mrf.mxu0 }
 0x243   :  { %v4312_v53 = vpop.f32.mrf.mxu1 }
 0x244   :  { %v4291_v3 = vpop.f32.mrf.mxu0 }
 0x245   :  { %v4313_v54 = vpop.f32.mrf.mxu1  ;;  %v4292_v63 = vadd.f32 %v4291_v3, %v4290_v52 }
 0x246   :  { %v4293_v55 = vpop.f32.mrf.mxu0  ;;  %v4314_v4 = vadd.f32 %v4313_v54, %v4312_v53 }
 0x247   :  { %v4315_v56 = vpop.f32.mrf.mxu1  ;;  %v3548_v0 = vadd.f32 %v4292_v63, %v3508_v25 }
 0x248   :  { %v4294_v57 = vpop.f32.mrf.mxu0 }
 0x249   :  { %v4316_v58 = vpop.f32.mrf.mxu1  ;;  %v3588_v40 = vadd.f32 %v4314_v4, %v3548_v0 }
 0x262   :  { %v4334_v1 = vpop.f32.mrf.mxu0 }
 0x263   :  { %v4356_v2 = vpop.f32.mrf.mxu1 }
 0x264   :  { %v4335_v10 = vpop.f32.mrf.mxu0 }
 0x265   :  { %v4357_v59 = vpop.f32.mrf.mxu1  ;;  %v4336_v31 = vadd.f32 %v4335_v10, %v4334_v1 }
 0x266   :  { %v4337_v60 = vpop.f32.mrf.mxu0  ;;  %v4358_v37 = vadd.f32 %v4357_v59, %v4356_v2 }
 0x267   :  { %v4359_v7 = vpop.f32.mrf.mxu1  ;;  %v3628_v36 = vadd.f32 %v4336_v31, %v3588_v40 }
 0x268   :  { %v4338_v61 = vpop.f32.mrf.mxu0 }
 0x269   :  { %v4360_v26 = vpop.f32.mrf.mxu1  ;;  %v3668_v11 = vadd.f32 %v4358_v37, %v3628_v36 }
 0x282   :  { %v4378_v41 = vpop.f32.mrf.mxu0 }
 0x284   :  { %v4379_v8 = vpop.f32.mrf.mxu0 }
 0x285   :  { %v4380_v6 = vadd.f32 %v4379_v8, %v4378_v41 }
 0x286   :  { %v4381_v12 = vpop.f32.mrf.mxu0 }
 0x287   :  { %v3708_v13 = vadd.f32 %v4380_v6, %v3668_v11 }
 0x288   :  { %v4382_v14 = vpop.f32.mrf.mxu0 }
 0x289   :  { %v4185_v51 = vpack.c.bf16 %v3708_v13, %v3708_v13 }
 0x28b   :  { %3727 = vst [vmem:[%s6478_s3 + $0x8] sm:$0xf] %v4185_v51 }

</bundles_post_ra>
